<compile_context>
chip_gen: v5e
topology: v5e:2x2
jax: 0.10.0
libtpu: 0.0.40
codegen_flags: <defaults>
</compile_context>

<pallas_src>
import jax
import jax.numpy as jnp
from jax import lax
from jax.experimental import pallas as pl
from jax.experimental.pallas import tpu as pltpu

NUM_HIDDENS = 256
NUM_HEADS = 4
HEAD_DIM = NUM_HIDDENS // NUM_HEADS   # 64
FFN_HIDDEN = 1024
VOCAB = 29
MAX_POS = 12
LN_EPS = 1e-5
NEG_INF = -1e30   # finite mask sentinel (avoids -inf -> NaN in softmax)

# batched-matmul dimension numbers (batch dim 0 on both operands)
_DN_PROJ = (((2,), (1,)), ((0,), (0,)))   # (G,M,K) x (G,K,N) -> (G,M,N)
_DN_QK   = (((2,), (2,)), ((0,), (0,)))   # (G,S,D) x (G,T,D) -> (G,S,T)


def _layer_norm(x, gamma, beta):
    mu = jnp.mean(x, axis=-1, keepdims=True)
    var = jnp.mean(jnp.square(x - mu), axis=-1, keepdims=True)
    return (x - mu) * lax.rsqrt(var + LN_EPS) * gamma + beta


def _mm(a, b):
    """2-D matmul: bf16 inputs, f32 accumulation (MXU-native)."""
    return jnp.dot(a.astype(jnp.bfloat16), b.astype(jnp.bfloat16),
                   preferred_element_type=jnp.float32)


def _bmm(a, b, dn):
    """Head-batched matmul: bf16 inputs, f32 accumulation."""
    return lax.dot_general(a.astype(jnp.bfloat16), b.astype(jnp.bfloat16),
                           dimension_numbers=dn,
                           preferred_element_type=jnp.float32)


def _encoder_block_math(x, bias, params):
    """One Encoder_block on the folded (B*S, H) residual slab.

    Shared verbatim by the Pallas kernel body and the pure-JAX reference so
    the two are op-for-op identical."""
    wq, wk, wv, wo, g1, b1, w1, w2, g2, b2 = params
    BS = x.shape[0]
    scale = 1.0 / (HEAD_DIM ** 0.5)

    # ---- multi-head self-attention (heads batched on leading dim) ----
    xg = jnp.broadcast_to(x.astype(jnp.bfloat16)[None, :, :],
                          (NUM_HEADS, BS, NUM_HIDDENS))
    q = _bmm(xg, wq, _DN_PROJ)            # (NH, BS, HD) f32
    k = _bmm(xg, wk, _DN_PROJ)
    v = _bmm(xg, wv, _DN_PROJ)

    s = _bmm(q, k, _DN_QK) * scale + bias[None, :, :]   # (NH, BS, BS)
    s = s - jnp.max(s, axis=-1, keepdims=True)
    e = jnp.exp(s)
    p = e / jnp.sum(e, axis=-1, keepdims=True)           # exact softmax

    o = _bmm(p, v, _DN_PROJ)              # (NH, BS, HD)
    x1h = _bmm(o, wo, _DN_PROJ)           # (NH, BS, H); sum over heads == concat @ Wo
    x1 = x1h[0]
    for h in range(1, NUM_HEADS):
        x1 = x1 + x1h[h]

    # ---- AddNorm 1: X = X + LayerNorm(X1)   (dropout == identity) ----
    x = x + _layer_norm(x1, g1, b1)

    # ---- Pos_FFN: relu(relu(X @ W1) @ W2) ----
    h1 = jnp.maximum(_mm(x, w1), 0.0)          # (BS, FFN)
    x2 = jnp.maximum(_mm(h1, w2), 0.0)         # (BS, H)

    # ---- AddNorm 2 ----
    x = x + _layer_norm(x2, g2, b2)
    return x


# --------------------------------------------------------------------------
# Fused kernel: embedding-added activations -> 2 x Encoder_block
# --------------------------------------------------------------------------
def fused_encoder_kernel(*refs):
    """refs = (x, mask_bias, <10 weights block 1>, <10 weights block 2>, out)."""
    x_ref, bias_ref = refs[0], refs[1]
    o_ref = refs[-1]

    x = x_ref[...]                             # (BS, H) f32 residual stream
    bias = bias_ref[...]                       # (BS, BS) block-diag additive mask

    for blk in (refs[2:12], refs[12:22]):
        params = tuple(r[...] for r in blk)
        x = _encoder_block_math(x, bias, params)

    o_ref[...] = x.astype(o_ref.dtype)


# --------------------------------------------------------------------------
# Wrapper
# --------------------------------------------------------------------------
def _embed_and_bias(token_ids, i_m, word_emb, pos_emb):
    """EBD + folded block-diagonal key-mask bias (plain JAX glue)."""
    B, S = token_ids.shape
    BS = B * S

    x = word_emb[token_ids] + pos_emb[:S][None, :, :]        # (B, S, H) f32
    xf = x.reshape(BS, NUM_HIDDENS).astype(jnp.float32)

    # bias[i, j] = 0 if (i, j) in same batch element and key j is valid,
    # else -1e30 (cross-batch / padded keys get exactly zero probability).
    row_batch = jnp.repeat(jnp.arange(B), S)                  # (BS,)
    key_valid = (i_m.reshape(BS) != 0.0)                      # (BS,)
    same_batch = row_batch[:, None] == row_batch[None, :]     # (BS, BS)
    bias = jnp.where(same_batch & key_valid[None, :], 0.0, NEG_INF)
    return xf, bias.astype(jnp.float32)


def encoder_forward(token_ids, i_m, word_emb, pos_emb, kernel_blocks):
    """token_ids: (B, S) int32; i_m: (B, S) key-validity mask."""
    B, S = token_ids.shape
    BS = B * S

    xf, bias = _embed_and_bias(token_ids, i_m, word_emb, pos_emb)

    flat_w = [w for blk in kernel_blocks for w in blk]
    n_in = 2 + len(flat_w)

    # Advisory cost estimate (kernel is weight-DMA / latency bound here).
    flops_blk = (2 * 3 * NUM_HEADS * BS * NUM_HIDDENS * HEAD_DIM    # QKV proj
                 + 2 * 2 * NUM_HEADS * BS * BS * HEAD_DIM           # QK^T, PV
                 + 2 * NUM_HEADS * BS * HEAD_DIM * NUM_HIDDENS      # out proj
                 + 2 * 2 * BS * NUM_HIDDENS * FFN_HIDDEN)           # FFN
    flops = 2 * flops_blk
    transcendentals = 2 * (NUM_HEADS * BS * BS + 4 * BS)
    weight_bytes = 2 * 2 * (4 * NUM_HIDDENS * NUM_HIDDENS
                            + 2 * NUM_HIDDENS * FFN_HIDDEN)         # bf16
    bytes_accessed = weight_bytes + 2 * BS * NUM_HIDDENS * 4 + BS * BS * 4

    out = pl.pallas_call(
        fused_encoder_kernel,
        out_shape=jax.ShapeDtypeStruct((BS, NUM_HIDDENS), jnp.float32),
        in_specs=[pl.BlockSpec(memory_space=pltpu.MemorySpace.VMEM)] * n_in,
        out_specs=pl.BlockSpec(memory_space=pltpu.MemorySpace.VMEM),
        cost_estimate=pl.CostEstimate(flops=flops,
                                      transcendentals=transcendentals,
                                      bytes_accessed=bytes_accessed),
    )(xf, bias, *flat_w)

    return out.reshape(B, S, NUM_HIDDENS)


# --------------------------------------------------------------------------
# Parameters
# --------------------------------------------------------------------------
def init_params(key):
    """f32 master parameters; Linear weights in (in_features, out_features)."""
    keys = jax.random.split(key, 16)
    it = iter(keys)

    def nrm(shape, scale):
        return (scale * jax.random.normal(next(it), shape)).astype(jnp.float32)

    word_emb = nrm((VOCAB, NUM_HIDDENS), 1.0)
    pos_emb = nrm((MAX_POS, NUM_HIDDENS), 1.0)

    def lin(fan_in, fan_out):
        return nrm((fan_in, fan_out), fan_in ** -0.5)

    def block_params():
        return (
            lin(NUM_HIDDENS, NUM_HIDDENS),               # Wq
            lin(NUM_HIDDENS, NUM_HIDDENS),               # Wk
            lin(NUM_HIDDENS, NUM_HIDDENS),               # Wv
            lin(NUM_HIDDENS, NUM_HIDDENS),               # Wo
            jnp.ones((1, NUM_HIDDENS), jnp.float32),     # LN1 gamma
            jnp.zeros((1, NUM_HIDDENS), jnp.float32),    # LN1 beta
            lin(NUM_HIDDENS, FFN_HIDDEN),                # FFN lin1
            lin(FFN_HIDDEN, NUM_HIDDENS),                # FFN lin2
            jnp.ones((1, NUM_HIDDENS), jnp.float32),     # LN2 gamma
            jnp.zeros((1, NUM_HIDDENS), jnp.float32),    # LN2 beta
        )

    return word_emb, pos_emb, (block_params(), block_params())


def block_to_kernel_layout(p):
    """Pre-split per head + cast weights to bf16 (done once, outside kernel)."""
    wq, wk, wv, wo, g1, b1, w1, w2, g2, b2 = p
    bf = jnp.bfloat16

    def split_out(w):   # (H, H) -> (NH, H, HD): head h uses output cols h*HD:(h+1)*HD
        return jnp.transpose(
            w.reshape(NUM_HIDDENS, NUM_HEADS, HEAD_DIM), (1, 0, 2)).astype(bf)

    wo_h = wo.reshape(NUM_HEADS, HEAD_DIM, NUM_HIDDENS).astype(bf)   # per-head rows
    return (split_out(wq), split_out(wk), split_out(wv), wo_h,
            g1, b1, w1.astype(bf), w2.astype(bf), g2, b2)


# --------------------------------------------------------------------------
# Pure-JAX reference: identical math, identical weight layout
# --------------------------------------------------------------------------
def ref_encoder_folded(xf, bias, kernel_blocks):
    x = xf
    for blk in kernel_blocks:
        x = _encoder_block_math(x, bias, blk)
    return x


# --------------------------------------------------------------------------
if __name__ == "__main__":
    key = jax.random.PRNGKey(0)
    k_tok, k_par = jax.random.split(key)

    B, S = 2, 8
    token_ids = jax.random.randint(k_tok, (B, S), 0, VOCAB, dtype=jnp.int32)
    # valid-length style key mask (>=1 valid key per row)
    i_m = jnp.array([[1, 1, 1, 1, 1, 1, 1, 1],
                     [1, 1, 1, 1, 1, 0, 0, 0]], dtype=jnp.float32)

    word_emb, pos_emb, blocks_f32 = init_params(k_par)
    kernel_blocks = tuple(block_to_kernel_layout(p) for p in blocks_f32)

    fwd = jax.jit(encoder_forward)
    out = fwd(token_ids, i_m, word_emb, pos_emb, kernel_blocks)
    out = jax.block_until_ready(out)

    assert out.shape == (B, S, NUM_HIDDENS)
    assert bool(jnp.all(jnp.isfinite(out)))

    xf, bias = _embed_and_bias(token_ids, i_m, word_emb, pos_emb)
    ref = ref_encoder_folded(xf, bias, kernel_blocks).reshape(B, S, NUM_HIDDENS)
    max_err = float(jnp.max(jnp.abs(out - ref)))
    assert bool(jnp.allclose(out, ref, rtol=2e-2, atol=2e-2)), max_err

    print("KERNEL_OK")
</pallas_src>

<mosaic_0001>
module attributes {stable_mosaic.version = 11 : i64} {
  func.func @fused_encoder_kernel(%arg0: memref<16x256xf32, #tpu.memory_space<vmem>>, %arg1: memref<16x16xf32, #tpu.memory_space<vmem>>, %arg2: memref<4x256x64xbf16, #tpu.memory_space<vmem>>, %arg3: memref<4x256x64xbf16, #tpu.memory_space<vmem>>, %arg4: memref<4x256x64xbf16, #tpu.memory_space<vmem>>, %arg5: memref<4x64x256xbf16, #tpu.memory_space<vmem>>, %arg6: memref<1x256xf32, #tpu.memory_space<vmem>>, %arg7: memref<1x256xf32, #tpu.memory_space<vmem>>, %arg8: memref<256x1024xbf16, #tpu.memory_space<vmem>>, %arg9: memref<1024x256xbf16, #tpu.memory_space<vmem>>, %arg10: memref<1x256xf32, #tpu.memory_space<vmem>>, %arg11: memref<1x256xf32, #tpu.memory_space<vmem>>, %arg12: memref<4x256x64xbf16, #tpu.memory_space<vmem>>, %arg13: memref<4x256x64xbf16, #tpu.memory_space<vmem>>, %arg14: memref<4x256x64xbf16, #tpu.memory_space<vmem>>, %arg15: memref<4x64x256xbf16, #tpu.memory_space<vmem>>, %arg16: memref<1x256xf32, #tpu.memory_space<vmem>>, %arg17: memref<1x256xf32, #tpu.memory_space<vmem>>, %arg18: memref<256x1024xbf16, #tpu.memory_space<vmem>>, %arg19: memref<1024x256xbf16, #tpu.memory_space<vmem>>, %arg20: memref<1x256xf32, #tpu.memory_space<vmem>>, %arg21: memref<1x256xf32, #tpu.memory_space<vmem>>, %arg22: memref<16x256xf32, #tpu.memory_space<vmem>>) attributes {dimension_semantics = [], scalar_prefetch = 0 : i64, scratch_operands = 0 : i64, tpu.core_type = #tpu.core_type<tc>} {
    %c0 = arith.constant 0 : index
    %c0_0 = arith.constant 0 : index
    %0 = vector.load %arg0[%c0, %c0_0] : memref<16x256xf32, #tpu.memory_space<vmem>>, vector<16x256xf32>
    %c0_1 = arith.constant 0 : index
    %c0_2 = arith.constant 0 : index
    %1 = vector.load %arg1[%c0_1, %c0_2] : memref<16x16xf32, #tpu.memory_space<vmem>>, vector<16x16xf32>
    %c0_3 = arith.constant 0 : index
    %c0_4 = arith.constant 0 : index
    %c0_5 = arith.constant 0 : index
    %2 = vector.load %arg2[%c0_3, %c0_4, %c0_5] : memref<4x256x64xbf16, #tpu.memory_space<vmem>>, vector<4x256x64xbf16>
    %c0_6 = arith.constant 0 : index
    %c0_7 = arith.constant 0 : index
    %c0_8 = arith.constant 0 : index
    %3 = vector.load %arg3[%c0_6, %c0_7, %c0_8] : memref<4x256x64xbf16, #tpu.memory_space<vmem>>, vector<4x256x64xbf16>
    %c0_9 = arith.constant 0 : index
    %c0_10 = arith.constant 0 : index
    %c0_11 = arith.constant 0 : index
    %4 = vector.load %arg4[%c0_9, %c0_10, %c0_11] : memref<4x256x64xbf16, #tpu.memory_space<vmem>>, vector<4x256x64xbf16>
    %c0_12 = arith.constant 0 : index
    %c0_13 = arith.constant 0 : index
    %c0_14 = arith.constant 0 : index
    %5 = vector.load %arg5[%c0_12, %c0_13, %c0_14] : memref<4x64x256xbf16, #tpu.memory_space<vmem>>, vector<4x64x256xbf16>
    %c0_15 = arith.constant 0 : index
    %c0_16 = arith.constant 0 : index
    %6 = vector.load %arg6[%c0_15, %c0_16] : memref<1x256xf32, #tpu.memory_space<vmem>>, vector<1x256xf32>
    %c0_17 = arith.constant 0 : index
    %c0_18 = arith.constant 0 : index
    %7 = vector.load %arg7[%c0_17, %c0_18] : memref<1x256xf32, #tpu.memory_space<vmem>>, vector<1x256xf32>
    %c0_19 = arith.constant 0 : index
    %c0_20 = arith.constant 0 : index
    %8 = vector.load %arg8[%c0_19, %c0_20] : memref<256x1024xbf16, #tpu.memory_space<vmem>>, vector<256x1024xbf16>
    %c0_21 = arith.constant 0 : index
    %c0_22 = arith.constant 0 : index
    %9 = vector.load %arg9[%c0_21, %c0_22] : memref<1024x256xbf16, #tpu.memory_space<vmem>>, vector<1024x256xbf16>
    %c0_23 = arith.constant 0 : index
    %c0_24 = arith.constant 0 : index
    %10 = vector.load %arg10[%c0_23, %c0_24] : memref<1x256xf32, #tpu.memory_space<vmem>>, vector<1x256xf32>
    %c0_25 = arith.constant 0 : index
    %c0_26 = arith.constant 0 : index
    %11 = vector.load %arg11[%c0_25, %c0_26] : memref<1x256xf32, #tpu.memory_space<vmem>>, vector<1x256xf32>
    %12 = arith.truncf %0 : vector<16x256xf32> to vector<16x256xbf16>
    %13 = vector.shape_cast %12 : vector<16x256xbf16> to vector<1x16x256xbf16>
    %14 = vector.shape_cast %13 : vector<1x16x256xbf16> to vector<1x16x256xbf16>
    %15 = vector.broadcast %14 : vector<1x16x256xbf16> to vector<4x16x256xbf16>
    %cst = arith.constant dense<0.000000e+00> : vector<4x16x64xf32>
    %16 = tpu.matmul %15, %2, %cst {dimension_numbers = #tpu.dot_dimension_numbers<[2], [1], [1], [2], [0, 0, 0, 1, 1, 2], [0], [0]>} : vector<4x16x256xbf16>, vector<4x256x64xbf16>, vector<4x16x64xf32> -> vector<4x16x64xf32>
    %cst_27 = arith.constant dense<0.000000e+00> : vector<4x16x64xf32>
    %17 = tpu.matmul %15, %3, %cst_27 {dimension_numbers = #tpu.dot_dimension_numbers<[2], [1], [1], [2], [0, 0, 0, 1, 1, 2], [0], [0]>} : vector<4x16x256xbf16>, vector<4x256x64xbf16>, vector<4x16x64xf32> -> vector<4x16x64xf32>
    %cst_28 = arith.constant dense<0.000000e+00> : vector<4x16x64xf32>
    %18 = tpu.matmul %15, %4, %cst_28 {dimension_numbers = #tpu.dot_dimension_numbers<[2], [1], [1], [2], [0, 0, 0, 1, 1, 2], [0], [0]>} : vector<4x16x256xbf16>, vector<4x256x64xbf16>, vector<4x16x64xf32> -> vector<4x16x64xf32>
    %19 = arith.truncf %16 : vector<4x16x64xf32> to vector<4x16x64xbf16>
    %20 = arith.truncf %17 : vector<4x16x64xf32> to vector<4x16x64xbf16>
    %cst_29 = arith.constant dense<0.000000e+00> : vector<4x16x16xf32>
    %21 = tpu.matmul %19, %20, %cst_29 {dimension_numbers = #tpu.dot_dimension_numbers<[2], [2], [1], [1], [0, 0, 0, 1, 1, 1], [0], [0]>} : vector<4x16x64xbf16>, vector<4x16x64xbf16>, vector<4x16x16xf32> -> vector<4x16x16xf32>
    %cst_30 = arith.constant 1.250000e-01 : f32
    %22 = vector.broadcast %cst_30 : f32 to vector<4x16x16xf32>
    %23 = arith.mulf %21, %22 : vector<4x16x16xf32>
    %24 = vector.shape_cast %1 : vector<16x16xf32> to vector<1x16x16xf32>
    %25 = vector.broadcast %24 : vector<1x16x16xf32> to vector<4x16x16xf32>
    %26 = arith.addf %23, %25 : vector<4x16x16xf32>
    %cst_31 = arith.constant dense<0xFF800000> : vector<4x16xf32>
    %27 = vector.multi_reduction <maximumf>, %26, %cst_31 [2] : vector<4x16x16xf32> to vector<4x16xf32>
    %28 = vector.shape_cast %27 : vector<4x16xf32> to vector<4x16x1xf32>
    %29 = vector.broadcast %28 : vector<4x16x1xf32> to vector<4x16x16xf32>
    %30 = arith.subf %26, %29 : vector<4x16x16xf32>
    %31 = math.exp %30 : vector<4x16x16xf32>
    %cst_32 = arith.constant dense<0.000000e+00> : vector<4x16xf32>
    %32 = vector.multi_reduction <add>, %31, %cst_32 [2] : vector<4x16x16xf32> to vector<4x16xf32>
    %33 = vector.shape_cast %32 : vector<4x16xf32> to vector<4x16x1xf32>
    %34 = vector.broadcast %33 : vector<4x16x1xf32> to vector<4x16x16xf32>
    %35 = arith.divf %31, %34 : vector<4x16x16xf32>
    %36 = arith.truncf %35 : vector<4x16x16xf32> to vector<4x16x16xbf16>
    %37 = arith.truncf %18 : vector<4x16x64xf32> to vector<4x16x64xbf16>
    %cst_33 = arith.constant dense<0.000000e+00> : vector<4x16x64xf32>
    %38 = tpu.matmul %36, %37, %cst_33 {dimension_numbers = #tpu.dot_dimension_numbers<[2], [1], [1], [2], [0, 0, 0, 1, 1, 2], [0], [0]>} : vector<4x16x16xbf16>, vector<4x16x64xbf16>, vector<4x16x64xf32> -> vector<4x16x64xf32>
    %39 = arith.truncf %38 : vector<4x16x64xf32> to vector<4x16x64xbf16>
    %cst_34 = arith.constant dense<0.000000e+00> : vector<4x16x256xf32>
    %40 = tpu.matmul %39, %5, %cst_34 {dimension_numbers = #tpu.dot_dimension_numbers<[2], [1], [1], [2], [0, 0, 0, 1, 1, 2], [0], [0]>} : vector<4x16x64xbf16>, vector<4x64x256xbf16>, vector<4x16x256xf32> -> vector<4x16x256xf32>
    %41 = vector.extract_strided_slice %40 {offsets = [0, 0, 0], sizes = [1, 16, 256], strides = [1, 1, 1]} : vector<4x16x256xf32> to vector<1x16x256xf32>
    %42 = vector.shape_cast %41 : vector<1x16x256xf32> to vector<16x256xf32>
    %43 = vector.extract_strided_slice %40 {offsets = [1, 0, 0], sizes = [1, 16, 256], strides = [1, 1, 1]} : vector<4x16x256xf32> to vector<1x16x256xf32>
    %44 = vector.shape_cast %43 : vector<1x16x256xf32> to vector<16x256xf32>
    %45 = arith.addf %42, %44 : vector<16x256xf32>
    %46 = vector.extract_strided_slice %40 {offsets = [2, 0, 0], sizes = [1, 16, 256], strides = [1, 1, 1]} : vector<4x16x256xf32> to vector<1x16x256xf32>
    %47 = vector.shape_cast %46 : vector<1x16x256xf32> to vector<16x256xf32>
    %48 = arith.addf %45, %47 : vector<16x256xf32>
    %49 = vector.extract_strided_slice %40 {offsets = [3, 0, 0], sizes = [1, 16, 256], strides = [1, 1, 1]} : vector<4x16x256xf32> to vector<1x16x256xf32>
    %50 = vector.shape_cast %49 : vector<1x16x256xf32> to vector<16x256xf32>
    %51 = arith.addf %48, %50 : vector<16x256xf32>
    %cst_35 = arith.constant dense<0.000000e+00> : vector<16xf32>
    %52 = vector.multi_reduction <add>, %51, %cst_35 [1] : vector<16x256xf32> to vector<16xf32>
    %53 = vector.shape_cast %52 : vector<16xf32> to vector<16x1xf32>
    %cst_36 = arith.constant 2.560000e+02 : f32
    %54 = vector.broadcast %cst_36 : f32 to vector<16x1xf32>
    %55 = arith.divf %53, %54 : vector<16x1xf32>
    %56 = vector.broadcast %55 : vector<16x1xf32> to vector<16x256xf32>
    %57 = arith.subf %51, %56 : vector<16x256xf32>
    %58 = arith.mulf %57, %57 : vector<16x256xf32>
    %cst_37 = arith.constant dense<0.000000e+00> : vector<16xf32>
    %59 = vector.multi_reduction <add>, %58, %cst_37 [1] : vector<16x256xf32> to vector<16xf32>
    %60 = vector.shape_cast %59 : vector<16xf32> to vector<16x1xf32>
    %cst_38 = arith.constant 2.560000e+02 : f32
    %61 = vector.broadcast %cst_38 : f32 to vector<16x1xf32>
    %62 = arith.divf %60, %61 : vector<16x1xf32>
    %63 = vector.broadcast %55 : vector<16x1xf32> to vector<16x256xf32>
    %64 = arith.subf %51, %63 : vector<16x256xf32>
    %cst_39 = arith.constant 9.99999974E-6 : f32
    %65 = vector.broadcast %cst_39 : f32 to vector<16x1xf32>
    %66 = arith.addf %62, %65 : vector<16x1xf32>
    %67 = math.rsqrt %66 : vector<16x1xf32>
    %68 = vector.broadcast %67 : vector<16x1xf32> to vector<16x256xf32>
    %69 = arith.mulf %64, %68 : vector<16x256xf32>
    %70 = vector.broadcast %6 : vector<1x256xf32> to vector<16x256xf32>
    %71 = arith.mulf %69, %70 : vector<16x256xf32>
    %72 = vector.broadcast %7 : vector<1x256xf32> to vector<16x256xf32>
    %73 = arith.addf %71, %72 : vector<16x256xf32>
    %74 = arith.addf %0, %73 : vector<16x256xf32>
    %75 = arith.truncf %74 : vector<16x256xf32> to vector<16x256xbf16>
    %cst_40 = arith.constant dense<0.000000e+00> : vector<16x1024xf32>
    %76 = tpu.matmul %75, %8, %cst_40 {dimension_numbers = #tpu.dot_dimension_numbers<[1], [0], [0], [1], [0, 0, 1, 1], [], []>} : vector<16x256xbf16>, vector<256x1024xbf16>, vector<16x1024xf32> -> vector<16x1024xf32>
    %cst_41 = arith.constant 0.000000e+00 : f32
    %77 = vector.broadcast %cst_41 : f32 to vector<16x1024xf32>
    %78 = arith.maximumf %76, %77 : vector<16x1024xf32>
    %79 = arith.truncf %78 : vector<16x1024xf32> to vector<16x1024xbf16>
    %cst_42 = arith.constant dense<0.000000e+00> : vector<16x256xf32>
    %80 = tpu.matmul %79, %9, %cst_42 {dimension_numbers = #tpu.dot_dimension_numbers<[1], [0], [0], [1], [0, 0, 1, 1], [], []>} : vector<16x1024xbf16>, vector<1024x256xbf16>, vector<16x256xf32> -> vector<16x256xf32>
    %cst_43 = arith.constant 0.000000e+00 : f32
    %81 = vector.broadcast %cst_43 : f32 to vector<16x256xf32>
    %82 = arith.maximumf %80, %81 : vector<16x256xf32>
    %cst_44 = arith.constant dense<0.000000e+00> : vector<16xf32>
    %83 = vector.multi_reduction <add>, %82, %cst_44 [1] : vector<16x256xf32> to vector<16xf32>
    %84 = vector.shape_cast %83 : vector<16xf32> to vector<16x1xf32>
    %cst_45 = arith.constant 2.560000e+02 : f32
    %85 = vector.broadcast %cst_45 : f32 to vector<16x1xf32>
    %86 = arith.divf %84, %85 : vector<16x1xf32>
    %87 = vector.broadcast %86 : vector<16x1xf32> to vector<16x256xf32>
    %88 = arith.subf %82, %87 : vector<16x256xf32>
    %89 = arith.mulf %88, %88 : vector<16x256xf32>
    %cst_46 = arith.constant dense<0.000000e+00> : vector<16xf32>
    %90 = vector.multi_reduction <add>, %89, %cst_46 [1] : vector<16x256xf32> to vector<16xf32>
    %91 = vector.shape_cast %90 : vector<16xf32> to vector<16x1xf32>
    %cst_47 = arith.constant 2.560000e+02 : f32
    %92 = vector.broadcast %cst_47 : f32 to vector<16x1xf32>
    %93 = arith.divf %91, %92 : vector<16x1xf32>
    %94 = vector.broadcast %86 : vector<16x1xf32> to vector<16x256xf32>
    %95 = arith.subf %82, %94 : vector<16x256xf32>
    %cst_48 = arith.constant 9.99999974E-6 : f32
    %96 = vector.broadcast %cst_48 : f32 to vector<16x1xf32>
    %97 = arith.addf %93, %96 : vector<16x1xf32>
    %98 = math.rsqrt %97 : vector<16x1xf32>
    %99 = vector.broadcast %98 : vector<16x1xf32> to vector<16x256xf32>
    %100 = arith.mulf %95, %99 : vector<16x256xf32>
    %101 = vector.broadcast %10 : vector<1x256xf32> to vector<16x256xf32>
    %102 = arith.mulf %100, %101 : vector<16x256xf32>
    %103 = vector.broadcast %11 : vector<1x256xf32> to vector<16x256xf32>
    %104 = arith.addf %102, %103 : vector<16x256xf32>
    %105 = arith.addf %74, %104 : vector<16x256xf32>
    %c0_49 = arith.constant 0 : index
    %c0_50 = arith.constant 0 : index
    %c0_51 = arith.constant 0 : index
    %106 = vector.load %arg12[%c0_49, %c0_50, %c0_51] : memref<4x256x64xbf16, #tpu.memory_space<vmem>>, vector<4x256x64xbf16>
    %c0_52 = arith.constant 0 : index
    %c0_53 = arith.constant 0 : index
    %c0_54 = arith.constant 0 : index
    %107 = vector.load %arg13[%c0_52, %c0_53, %c0_54] : memref<4x256x64xbf16, #tpu.memory_space<vmem>>, vector<4x256x64xbf16>
    %c0_55 = arith.constant 0 : index
    %c0_56 = arith.constant 0 : index
    %c0_57 = arith.constant 0 : index
    %108 = vector.load %arg14[%c0_55, %c0_56, %c0_57] : memref<4x256x64xbf16, #tpu.memory_space<vmem>>, vector<4x256x64xbf16>
    %c0_58 = arith.constant 0 : index
    %c0_59 = arith.constant 0 : index
    %c0_60 = arith.constant 0 : index
    %109 = vector.load %arg15[%c0_58, %c0_59, %c0_60] : memref<4x64x256xbf16, #tpu.memory_space<vmem>>, vector<4x64x256xbf16>
    %c0_61 = arith.constant 0 : index
    %c0_62 = arith.constant 0 : index
    %110 = vector.load %arg16[%c0_61, %c0_62] : memref<1x256xf32, #tpu.memory_space<vmem>>, vector<1x256xf32>
    %c0_63 = arith.constant 0 : index
    %c0_64 = arith.constant 0 : index
    %111 = vector.load %arg17[%c0_63, %c0_64] : memref<1x256xf32, #tpu.memory_space<vmem>>, vector<1x256xf32>
    %c0_65 = arith.constant 0 : index
    %c0_66 = arith.constant 0 : index
    %112 = vector.load %arg18[%c0_65, %c0_66] : memref<256x1024xbf16, #tpu.memory_space<vmem>>, vector<256x1024xbf16>
    %c0_67 = arith.constant 0 : index
    %c0_68 = arith.constant 0 : index
    %113 = vector.load %arg19[%c0_67, %c0_68] : memref<1024x256xbf16, #tpu.memory_space<vmem>>, vector<1024x256xbf16>
    %c0_69 = arith.constant 0 : index
    %c0_70 = arith.constant 0 : index
    %114 = vector.load %arg20[%c0_69, %c0_70] : memref<1x256xf32, #tpu.memory_space<vmem>>, vector<1x256xf32>
    %c0_71 = arith.constant 0 : index
    %c0_72 = arith.constant 0 : index
    %115 = vector.load %arg21[%c0_71, %c0_72] : memref<1x256xf32, #tpu.memory_space<vmem>>, vector<1x256xf32>
    %116 = arith.truncf %105 : vector<16x256xf32> to vector<16x256xbf16>
    %117 = vector.shape_cast %116 : vector<16x256xbf16> to vector<1x16x256xbf16>
    %118 = vector.shape_cast %117 : vector<1x16x256xbf16> to vector<1x16x256xbf16>
    %119 = vector.broadcast %118 : vector<1x16x256xbf16> to vector<4x16x256xbf16>
    %cst_73 = arith.constant dense<0.000000e+00> : vector<4x16x64xf32>
    %120 = tpu.matmul %119, %106, %cst_73 {dimension_numbers = #tpu.dot_dimension_numbers<[2], [1], [1], [2], [0, 0, 0, 1, 1, 2], [0], [0]>} : vector<4x16x256xbf16>, vector<4x256x64xbf16>, vector<4x16x64xf32> -> vector<4x16x64xf32>
    %cst_74 = arith.constant dense<0.000000e+00> : vector<4x16x64xf32>
    %121 = tpu.matmul %119, %107, %cst_74 {dimension_numbers = #tpu.dot_dimension_numbers<[2], [1], [1], [2], [0, 0, 0, 1, 1, 2], [0], [0]>} : vector<4x16x256xbf16>, vector<4x256x64xbf16>, vector<4x16x64xf32> -> vector<4x16x64xf32>
    %cst_75 = arith.constant dense<0.000000e+00> : vector<4x16x64xf32>
    %122 = tpu.matmul %119, %108, %cst_75 {dimension_numbers = #tpu.dot_dimension_numbers<[2], [1], [1], [2], [0, 0, 0, 1, 1, 2], [0], [0]>} : vector<4x16x256xbf16>, vector<4x256x64xbf16>, vector<4x16x64xf32> -> vector<4x16x64xf32>
    %123 = arith.truncf %120 : vector<4x16x64xf32> to vector<4x16x64xbf16>
    %124 = arith.truncf %121 : vector<4x16x64xf32> to vector<4x16x64xbf16>
    %cst_76 = arith.constant dense<0.000000e+00> : vector<4x16x16xf32>
    %125 = tpu.matmul %123, %124, %cst_76 {dimension_numbers = #tpu.dot_dimension_numbers<[2], [2], [1], [1], [0, 0, 0, 1, 1, 1], [0], [0]>} : vector<4x16x64xbf16>, vector<4x16x64xbf16>, vector<4x16x16xf32> -> vector<4x16x16xf32>
    %cst_77 = arith.constant 1.250000e-01 : f32
    %126 = vector.broadcast %cst_77 : f32 to vector<4x16x16xf32>
    %127 = arith.mulf %125, %126 : vector<4x16x16xf32>
    %128 = vector.shape_cast %1 : vector<16x16xf32> to vector<1x16x16xf32>
    %129 = vector.broadcast %128 : vector<1x16x16xf32> to vector<4x16x16xf32>
    %130 = arith.addf %127, %129 : vector<4x16x16xf32>
    %cst_78 = arith.constant dense<0xFF800000> : vector<4x16xf32>
    %131 = vector.multi_reduction <maximumf>, %130, %cst_78 [2] : vector<4x16x16xf32> to vector<4x16xf32>
    %132 = vector.shape_cast %131 : vector<4x16xf32> to vector<4x16x1xf32>
    %133 = vector.broadcast %132 : vector<4x16x1xf32> to vector<4x16x16xf32>
    %134 = arith.subf %130, %133 : vector<4x16x16xf32>
    %135 = math.exp %134 : vector<4x16x16xf32>
    %cst_79 = arith.constant dense<0.000000e+00> : vector<4x16xf32>
    %136 = vector.multi_reduction <add>, %135, %cst_79 [2] : vector<4x16x16xf32> to vector<4x16xf32>
    %137 = vector.shape_cast %136 : vector<4x16xf32> to vector<4x16x1xf32>
    %138 = vector.broadcast %137 : vector<4x16x1xf32> to vector<4x16x16xf32>
    %139 = arith.divf %135, %138 : vector<4x16x16xf32>
    %140 = arith.truncf %139 : vector<4x16x16xf32> to vector<4x16x16xbf16>
    %141 = arith.truncf %122 : vector<4x16x64xf32> to vector<4x16x64xbf16>
    %cst_80 = arith.constant dense<0.000000e+00> : vector<4x16x64xf32>
    %142 = tpu.matmul %140, %141, %cst_80 {dimension_numbers = #tpu.dot_dimension_numbers<[2], [1], [1], [2], [0, 0, 0, 1, 1, 2], [0], [0]>} : vector<4x16x16xbf16>, vector<4x16x64xbf16>, vector<4x16x64xf32> -> vector<4x16x64xf32>
    %143 = arith.truncf %142 : vector<4x16x64xf32> to vector<4x16x64xbf16>
    %cst_81 = arith.constant dense<0.000000e+00> : vector<4x16x256xf32>
    %144 = tpu.matmul %143, %109, %cst_81 {dimension_numbers = #tpu.dot_dimension_numbers<[2], [1], [1], [2], [0, 0, 0, 1, 1, 2], [0], [0]>} : vector<4x16x64xbf16>, vector<4x64x256xbf16>, vector<4x16x256xf32> -> vector<4x16x256xf32>
    %145 = vector.extract_strided_slice %144 {offsets = [0, 0, 0], sizes = [1, 16, 256], strides = [1, 1, 1]} : vector<4x16x256xf32> to vector<1x16x256xf32>
    %146 = vector.shape_cast %145 : vector<1x16x256xf32> to vector<16x256xf32>
    %147 = vector.extract_strided_slice %144 {offsets = [1, 0, 0], sizes = [1, 16, 256], strides = [1, 1, 1]} : vector<4x16x256xf32> to vector<1x16x256xf32>
    %148 = vector.shape_cast %147 : vector<1x16x256xf32> to vector<16x256xf32>
    %149 = arith.addf %146, %148 : vector<16x256xf32>
    %150 = vector.extract_strided_slice %144 {offsets = [2, 0, 0], sizes = [1, 16, 256], strides = [1, 1, 1]} : vector<4x16x256xf32> to vector<1x16x256xf32>
    %151 = vector.shape_cast %150 : vector<1x16x256xf32> to vector<16x256xf32>
    %152 = arith.addf %149, %151 : vector<16x256xf32>
    %153 = vector.extract_strided_slice %144 {offsets = [3, 0, 0], sizes = [1, 16, 256], strides = [1, 1, 1]} : vector<4x16x256xf32> to vector<1x16x256xf32>
    %154 = vector.shape_cast %153 : vector<1x16x256xf32> to vector<16x256xf32>
    %155 = arith.addf %152, %154 : vector<16x256xf32>
    %cst_82 = arith.constant dense<0.000000e+00> : vector<16xf32>
    %156 = vector.multi_reduction <add>, %155, %cst_82 [1] : vector<16x256xf32> to vector<16xf32>
    %157 = vector.shape_cast %156 : vector<16xf32> to vector<16x1xf32>
    %cst_83 = arith.constant 2.560000e+02 : f32
    %158 = vector.broadcast %cst_83 : f32 to vector<16x1xf32>
    %159 = arith.divf %157, %158 : vector<16x1xf32>
    %160 = vector.broadcast %159 : vector<16x1xf32> to vector<16x256xf32>
    %161 = arith.subf %155, %160 : vector<16x256xf32>
    %162 = arith.mulf %161, %161 : vector<16x256xf32>
    %cst_84 = arith.constant dense<0.000000e+00> : vector<16xf32>
    %163 = vector.multi_reduction <add>, %162, %cst_84 [1] : vector<16x256xf32> to vector<16xf32>
    %164 = vector.shape_cast %163 : vector<16xf32> to vector<16x1xf32>
    %cst_85 = arith.constant 2.560000e+02 : f32
    %165 = vector.broadcast %cst_85 : f32 to vector<16x1xf32>
    %166 = arith.divf %164, %165 : vector<16x1xf32>
    %167 = vector.broadcast %159 : vector<16x1xf32> to vector<16x256xf32>
    %168 = arith.subf %155, %167 : vector<16x256xf32>
    %cst_86 = arith.constant 9.99999974E-6 : f32
    %169 = vector.broadcast %cst_86 : f32 to vector<16x1xf32>
    %170 = arith.addf %166, %169 : vector<16x1xf32>
    %171 = math.rsqrt %170 : vector<16x1xf32>
    %172 = vector.broadcast %171 : vector<16x1xf32> to vector<16x256xf32>
    %173 = arith.mulf %168, %172 : vector<16x256xf32>
    %174 = vector.broadcast %110 : vector<1x256xf32> to vector<16x256xf32>
    %175 = arith.mulf %173, %174 : vector<16x256xf32>
    %176 = vector.broadcast %111 : vector<1x256xf32> to vector<16x256xf32>
    %177 = arith.addf %175, %176 : vector<16x256xf32>
    %178 = arith.addf %105, %177 : vector<16x256xf32>
    %179 = arith.truncf %178 : vector<16x256xf32> to vector<16x256xbf16>
    %cst_87 = arith.constant dense<0.000000e+00> : vector<16x1024xf32>
    %180 = tpu.matmul %179, %112, %cst_87 {dimension_numbers = #tpu.dot_dimension_numbers<[1], [0], [0], [1], [0, 0, 1, 1], [], []>} : vector<16x256xbf16>, vector<256x1024xbf16>, vector<16x1024xf32> -> vector<16x1024xf32>
    %cst_88 = arith.constant 0.000000e+00 : f32
    %181 = vector.broadcast %cst_88 : f32 to vector<16x1024xf32>
    %182 = arith.maximumf %180, %181 : vector<16x1024xf32>
    %183 = arith.truncf %182 : vector<16x1024xf32> to vector<16x1024xbf16>
    %cst_89 = arith.constant dense<0.000000e+00> : vector<16x256xf32>
    %184 = tpu.matmul %183, %113, %cst_89 {dimension_numbers = #tpu.dot_dimension_numbers<[1], [0], [0], [1], [0, 0, 1, 1], [], []>} : vector<16x1024xbf16>, vector<1024x256xbf16>, vector<16x256xf32> -> vector<16x256xf32>
    %cst_90 = arith.constant 0.000000e+00 : f32
    %185 = vector.broadcast %cst_90 : f32 to vector<16x256xf32>
    %186 = arith.maximumf %184, %185 : vector<16x256xf32>
    %cst_91 = arith.constant dense<0.000000e+00> : vector<16xf32>
    %187 = vector.multi_reduction <add>, %186, %cst_91 [1] : vector<16x256xf32> to vector<16xf32>
    %188 = vector.shape_cast %187 : vector<16xf32> to vector<16x1xf32>
    %cst_92 = arith.constant 2.560000e+02 : f32
    %189 = vector.broadcast %cst_92 : f32 to vector<16x1xf32>
    %190 = arith.divf %188, %189 : vector<16x1xf32>
    %191 = vector.broadcast %190 : vector<16x1xf32> to vector<16x256xf32>
    %192 = arith.subf %186, %191 : vector<16x256xf32>
    %193 = arith.mulf %192, %192 : vector<16x256xf32>
    %cst_93 = arith.constant dense<0.000000e+00> : vector<16xf32>
    %194 = vector.multi_reduction <add>, %193, %cst_93 [1] : vector<16x256xf32> to vector<16xf32>
    %195 = vector.shape_cast %194 : vector<16xf32> to vector<16x1xf32>
    %cst_94 = arith.constant 2.560000e+02 : f32
    %196 = vector.broadcast %cst_94 : f32 to vector<16x1xf32>
    %197 = arith.divf %195, %196 : vector<16x1xf32>
    %198 = vector.broadcast %190 : vector<16x1xf32> to vector<16x256xf32>
    %199 = arith.subf %186, %198 : vector<16x256xf32>
    %cst_95 = arith.constant 9.99999974E-6 : f32
    %200 = vector.broadcast %cst_95 : f32 to vector<16x1xf32>
    %201 = arith.addf %197, %200 : vector<16x1xf32>
    %202 = math.rsqrt %201 : vector<16x1xf32>
    %203 = vector.broadcast %202 : vector<16x1xf32> to vector<16x256xf32>
    %204 = arith.mulf %199, %203 : vector<16x256xf32>
    %205 = vector.broadcast %114 : vector<1x256xf32> to vector<16x256xf32>
    %206 = arith.mulf %204, %205 : vector<16x256xf32>
    %207 = vector.broadcast %115 : vector<1x256xf32> to vector<16x256xf32>
    %208 = arith.addf %206, %207 : vector<16x256xf32>
    %209 = arith.addf %178, %208 : vector<16x256xf32>
    %c0_96 = arith.constant 0 : index
    %c0_97 = arith.constant 0 : index
    %210 = vector.load %arg22[%c0_96, %c0_97] : memref<16x256xf32, #tpu.memory_space<vmem>>, vector<16x256xf32>
    tpu.vector_store %arg22[%c0_96, %c0_97], %209 {strides = array<i32>} : memref<16x256xf32, #tpu.memory_space<vmem>>, vector<16x256xf32>,
    return
  }
}

</mosaic_0001>

<bundles_post_ra>
// kernel: encoder_forward.1
= control target key start
LH: loop header
LB: loop body
LE: loop exit
PB: predicated region body
PF: predicated region fallthrough
CT: control target
= control target key end

     0   :  { %s19827_s0 = inlined_call_operand.vmem [shape: f32[16,256], index: 0, kind: input, shape index: {}]   ;;  %s19828_s1 = inlined_call_operand.vmem [shape: f32[16,16], index: 1, kind: input, shape index: {}]   ;;  %s19829_s2 = inlined_call_operand.vmem [shape: bf16[4,256,64], index: 2, kind: input, shape index: {}]   ;;  %s19830_s3 = inlined_call_operand.vmem [shape: bf16[4,256,64], index: 3, kind: input, shape index: {}]   ;;  %s19831_s4 = inlined_call_operand.vmem [shape: bf16[4,256,64], index: 4, kind: input, shape index: {}]   ;;  %s19832_s5 = inlined_call_operand.hbm [shape: bf16[4,64,256], index: 5, kind: input, shape index: {}]   ;;  %s19833_s6 = inlined_call_operand.vmem [shape: f32[1,256], index: 6, kind: input, shape index: {}]   ;;  %s19834_s7 = inlined_call_operand.vmem [shape: f32[1,256], index: 7, kind: input, shape index: {}]   ;;  %s19835_s8 = inlined_call_operand.vmem [shape: bf16[256,1024], index: 8, kind: input, shape index: {}]   ;;  %s19836_s9 = inlined_call_operand.vmem [shape: bf16[1024,256], index: 9, kind: input, shape index: {}]   ;;  %s19837_s10 = inlined_call_operand.vmem [shape: f32[1,256], index: 10, kind: input, shape index: {}]   ;;  %s19838_s11 = inlined_call_operand.vmem [shape: f32[1,256], index: 11, kind: input, shape index: {}]   ;;  %s19839_s12 = inlined_call_operand.vmem [shape: bf16[4,256,64], index: 12, kind: input, shape index: {}]   ;;  %s19840_s13 = inlined_call_operand.vmem [shape: bf16[4,256,64], index: 13, kind: input, shape index: {}]   ;;  %s19841_s14 = inlined_call_operand.vmem [shape: bf16[4,256,64], index: 14, kind: input, shape index: {}]   ;;  %s19842_s15 = inlined_call_operand.hbm [shape: bf16[4,64,256], index: 15, kind: input, shape index: {}]   ;;  %s19843_s16 = inlined_call_operand.vmem [shape: f32[1,256], index: 16, kind: input, shape index: {}]   ;;  %s19844_s17 = inlined_call_operand.vmem [shape: f32[1,256], index: 17, kind: input, shape index: {}]   ;;  %s19845_s18 = inlined_call_operand.vmem [shape: bf16[256,1024], index: 18, kind: input, shape index: {}]   ;;  %s19846_s19 = inlined_call_operand.vmem [shape: bf16[1024,256], index: 19, kind: input, shape index: {}]   ;;  %s19847_s20 = inlined_call_operand.vmem [shape: f32[1,256], index: 20, kind: input, shape index: {}]   ;;  %s19848_s21 = inlined_call_operand.vmem [shape: f32[1,256], index: 21, kind: input, shape index: {}]   ;;  %s19849_s22 = inlined_call_operand.hbm [shape: f32[16,256], index: 22, kind: output, shape index: {}]  }
   0x1   :  { %19855 = sst [smem:[#allocation11_spill]] %s19827_s0 }
   0x2   :  { %19856 = sst [smem:[#allocation12_spill]] %s19828_s1 }
   0x3   :  { %19857 = sst [smem:[#allocation13_spill]] %s19829_s2 }
   0x4   :  { %19858 = sst [smem:[#allocation14_spill]] %s19830_s3 }
   0x5   :  { %19859 = sst [smem:[#allocation15_spill]] %s19831_s4 }
   0x6   :  { %19860 = sst [smem:[#allocation16_spill]] %s19832_s5 }
   0x7   :  { %19861 = sst [smem:[#allocation17_spill]] %s19833_s6 }
   0x8   :  { %27 = vsyncpa [#allocation3], 0 }
   0x9   :  { %28 = vsyncpa [#allocation6], 0 }
   0xa   :  { %29 = vsyncpa [#allocation4], 0  ;;  %s19862_s29 = sld [smem:[#allocation16_spill]]  ;;  %s14898_s4 = smov [#allocation2]  }
   0xb   :  { %s46_s0 = sshll.u32 %s14898_s4, 4  ;;  %s75_s5 = sshll.u32 %s19842_s15, 4  ;;  %s47_s0 = int_to_ptr.vmem [resolvable:$true] %s46_s0  ;;  %s76_s5 = int_to_ptr.hbm [resolvable:$true] %s75_s5 }
   0xc   :  { %s14899_s24 = smov 128   ;;  %s14900_s6 = smov 8  }
   0xd   :  { %s14901_s25 = smov [#allocation5]  }
   0xe   :  { %s77_s26 = sshll.u32 %s14901_s25, 4  ;;  %s78_s26 = int_to_ptr.vmem [resolvable:$true] %s77_s26 }
   0xf   :  { %83 = dma.hbm_to_vmem [thread:$0]  %s76_s5, 4096, %s78_s26, [#allocation6], %s14899_s24, %s14899_s24, %s14900_s6  }
  0x10   :  { %s44_s30 = sshll.u32 %s19862_s29, 4  ;;  %s45_s30 = int_to_ptr.hbm [resolvable:$true] %s44_s30 }
  0x11   :  { %52 = dma.hbm_to_vmem [thread:$0]  %s45_s30, 4096, %s47_s0, [#allocation3], %s14899_s24, %s14899_s24, %s14900_s6  }
  0x12   :  { %14892 = dma.done.wait [#allocation3], 4096  }
  0x13   :  { %14893 = vsyncadd [#allocation3], 4294963200 }
  0x14   :  { %14894 = dma.done.wait [#allocation6], 4096  }
  0x15   :  { %14895 = vsyncadd [#allocation6], 4294963200  ;;  %s19863_s3 = sld [smem:[#allocation13_spill]]  ;;  %vm2313_vm0 = vcmask 523264   ;;  %vm2440_vm1 = vcmask 130048  }
  0x16   :  { %s19864_s4 = sld [smem:[#allocation11_spill]] }
  0x17   :  { %s19865_s5 = sld [smem:[#allocation14_spill]] }
  0x18   :  { %s19866_s25 = sld [smem:[#allocation15_spill]] }
  0x19   :  { %s19867_s2 = sld [smem:[#allocation12_spill]] }
  0x1a   :  { %s19868_s23 = sld [smem:[#allocation17_spill]] }
  0x1b   :  { %v13771_v0 = vld [vmem:[%s19863_s3 + $0x38] sm:$0xff]  ;;  %v13770_v4 = vld [vmem:[%s19863_s3 + $0x30] sm:$0xff]  ;;  %v13769_v8 = vld [vmem:[%s19863_s3 + $0x28] sm:$0xff] }
  0x1c   :  { %v13779_v1 = vld [vmem:[%s19863_s3 + $0x78] sm:$0xff]  ;;  %895 = vmatpush.bf16.msra.mxu0 %v13771_v0  ;;  %v13778_v5 = vld [vmem:[%s19863_s3 + $0x70] sm:$0xff]  ;;  %v13777_v9 = vld [vmem:[%s19863_s3 + $0x68] sm:$0xff] }
  0x1d   :  { %v13787_v2 = vld [vmem:[%s19863_s3 + $0xb8] sm:$0xff]  ;;  %909 = vmatpush.bf16.msra.mxu1 %v13779_v1  ;;  %v13786_v6 = vld [vmem:[%s19863_s3 + $0xb0] sm:$0xff]  ;;  %v13785_v10 = vld [vmem:[%s19863_s3 + $0xa8] sm:$0xff] }
  0x1e   :  { %v13795_v3 = vld [vmem:[%s19863_s3 + $0xf8] sm:$0xff]  ;;  %1019 = vmatpush.bf16.msra.mxu2 %v13787_v2  ;;  %v13794_v7 = vld [vmem:[%s19863_s3 + $0xf0] sm:$0xff]  ;;  %v13793_v11 = vld [vmem:[%s19863_s3 + $0xe8] sm:$0xff] }
  0x1f   :  { %1033 = vmatpush.bf16.msra.mxu3 %v13795_v3  ;;  %v13768_v12 = vld [vmem:[%s19863_s3 + $0x20] sm:$0xff]  ;;  %v13767_v16 = vld [vmem:[%s19863_s3 + $0x18] sm:$0xff]  ;;  %v13766_v20 = vld [vmem:[%s19863_s3 + $0x10] sm:$0xff] }
  0x20   :  { %896 = vmatpush.bf16.msra.mxu0 %v13770_v4  ;;  %v13776_v13 = vld [vmem:[%s19863_s3 + $0x60] sm:$0xff]  ;;  %v13775_v17 = vld [vmem:[%s19863_s3 + $0x58] sm:$0xff]  ;;  %v13774_v21 = vld [vmem:[%s19863_s3 + $0x50] sm:$0xff] }
  0x21   :  { %910 = vmatpush.bf16.msra.mxu1 %v13778_v5  ;;  %v13784_v14 = vld [vmem:[%s19863_s3 + $0xa0] sm:$0xff]  ;;  %v13783_v18 = vld [vmem:[%s19863_s3 + $0x98] sm:$0xff]  ;;  %v13782_v22 = vld [vmem:[%s19863_s3 + $0x90] sm:$0xff] }
  0x22   :  { %1020 = vmatpush.bf16.msra.mxu2 %v13786_v6  ;;  %v13792_v15 = vld [vmem:[%s19863_s3 + $0xe0] sm:$0xff]  ;;  %v13791_v19 = vld [vmem:[%s19863_s3 + $0xd8] sm:$0xff]  ;;  %v13790_v23 = vld [vmem:[%s19863_s3 + $0xd0] sm:$0xff] }
  0x23   :  { %1034 = vmatpush.bf16.msra.mxu3 %v13794_v7  ;;  %v105_v24 = vld [vmem:[%s19864_s4] sm:$0xff]  ;;  %v106_v25 = vld [vmem:[%s19864_s4 + $0x8] sm:$0xff]  ;;  %v107_v26 = vld [vmem:[%s19864_s4 + $0x10] sm:$0xff] }
  0x24   :  { %897 = vmatpush.bf16.msra.mxu0 %v13769_v8  ;;  %v108_v27 = vld [vmem:[%s19864_s4 + $0x18] sm:$0xff]  ;;  %v13765_v28 = vld [vmem:[%s19863_s3 + $0x8] sm:$0xff]  ;;  %v787_v30 = vpack.c.bf16 %v106_v25, %v105_v24  ;;  %v13764_v34 = vld [vmem:[%s19863_s3] sm:$0xff] }
  0x25   :  { %911 = vmatpush.bf16.msra.mxu1 %v13777_v9  ;;  %v13773_v29 = vld [vmem:[%s19863_s3 + $0x48] sm:$0xff]  ;;  %v788_v31 = vpack.c.bf16 %v108_v27, %v107_v26  ;;  %v13772_v35 = vld [vmem:[%s19863_s3 + $0x40] sm:$0xff]  ;;  %v13803_v42 = vld [vmem:[%s19863_s3 + $0x138] sm:$0xff] }
  0x26   :  { %1021 = vmatpush.bf16.msra.mxu2 %v13785_v10  ;;  %v13781_v32 = vld [vmem:[%s19863_s3 + $0x88] sm:$0xff]  ;;  %v791_v36 = vunpack.c.l.b16 %v787_v30  ;;  %v792_v38 = vunpack.c.h.b16 %v787_v30  ;;  %v13780_v40 = vld [vmem:[%s19863_s3 + $0x80] sm:$0xff]  ;;  %v13811_v43 = vld [vmem:[%s19863_s3 + $0x178] sm:$0xff] }
  0x27   :  { %1035 = vmatpush.bf16.msra.mxu3 %v13793_v11  ;;  %v13789_v33 = vld [vmem:[%s19863_s3 + $0xc8] sm:$0xff]  ;;  %v793_v37 = vunpack.c.l.b16 %v788_v31  ;;  %v794_v39 = vunpack.c.h.b16 %v788_v31  ;;  %v13788_v41 = vld [vmem:[%s19863_s3 + $0xc0] sm:$0xff]  ;;  %v13819_v44 = vld [vmem:[%s19863_s3 + $0x1b8] sm:$0xff] }
  0x28   :  { %898 = vmatpush.bf16.msra.mxu0 %v13768_v12  ;;  %v13827_v45 = vld [vmem:[%s19863_s3 + $0x1f8] sm:$0xff]  ;;  %v13802_v48 = vld [vmem:[%s19863_s3 + $0x130] sm:$0xff]  ;;  %v13801_v52 = vld [vmem:[%s19863_s3 + $0x128] sm:$0xff] }
  0x29   :  { %912 = vmatpush.bf16.msra.mxu1 %v13776_v13  ;;  %v15147_v46 = vpack.c.b16 %v793_v37, %v791_v36  ;;  %v15149_v47 = vpack.c.b16 %v794_v39, %v792_v38  ;;  %v13810_v49 = vld [vmem:[%s19863_s3 + $0x170] sm:$0xff]  ;;  %v13809_v53 = vld [vmem:[%s19863_s3 + $0x168] sm:$0xff]  ;;  %v13800_v56 = vld [vmem:[%s19863_s3 + $0x120] sm:$0xff] }
  0x2a   :  { %1022 = vmatpush.bf16.msra.mxu2 %v13784_v14  ;;  %v13818_v50 = vld [vmem:[%s19863_s3 + $0x1b0] sm:$0xff]  ;;  %v13817_v54 = vld [vmem:[%s19863_s3 + $0x1a8] sm:$0xff]  ;;  %v13808_v57 = vld [vmem:[%s19863_s3 + $0x160] sm:$0xff] }
  0x2b   :  { %1036 = vmatpush.bf16.msra.mxu3 %v13792_v15  ;;  %v13826_v51 = vld [vmem:[%s19863_s3 + $0x1f0] sm:$0xff]  ;;  %v13825_v55 = vld [vmem:[%s19863_s3 + $0x1e8] sm:$0xff]  ;;  %v13816_v58 = vld [vmem:[%s19863_s3 + $0x1a0] sm:$0xff] }
  0x2c   :  { %899 = vmatpush.bf16.msra.mxu0 %v13767_v16  ;;  %v13824_v59 = vld [vmem:[%s19863_s3 + $0x1e0] sm:$0xff]  ;;  %v13799_v60 = vld [vmem:[%s19863_s3 + $0x118] sm:$0xff]  ;;  %v13798_v0 = vld [vmem:[%s19863_s3 + $0x110] sm:$0xff] }
  0x2d   :  { %913 = vmatpush.bf16.msra.mxu1 %v13775_v17  ;;  %v13807_v61 = vld [vmem:[%s19863_s3 + $0x158] sm:$0xff]  ;;  %v13806_v1 = vld [vmem:[%s19863_s3 + $0x150] sm:$0xff]  ;;  %v13797_v4 = vld [vmem:[%s19863_s3 + $0x108] sm:$0xff] }
  0x2e   :  { %1023 = vmatpush.bf16.msra.mxu2 %v13783_v18  ;;  %v13815_v62 = vld [vmem:[%s19863_s3 + $0x198] sm:$0xff]  ;;  %v13814_v2 = vld [vmem:[%s19863_s3 + $0x190] sm:$0xff]  ;;  %v13805_v5 = vld [vmem:[%s19863_s3 + $0x148] sm:$0xff] }
  0x2f   :  { %1037 = vmatpush.bf16.msra.mxu3 %v13791_v19  ;;  %v13823_v63 = vld [vmem:[%s19863_s3 + $0x1d8] sm:$0xff]  ;;  %v13822_v3 = vld [vmem:[%s19863_s3 + $0x1d0] sm:$0xff]  ;;  %v13813_v6 = vld [vmem:[%s19863_s3 + $0x188] sm:$0xff] }
  0x30   :  { %900 = vmatpush.bf16.msra.mxu0 %v13766_v20  ;;  %v13821_v7 = vld [vmem:[%s19863_s3 + $0x1c8] sm:$0xff]  ;;  %v13796_v8 = vld [vmem:[%s19863_s3 + $0x100] sm:$0xff]  ;;  %v13835_v12 = vld [vmem:[%s19865_s5 + $0x38] sm:$0xff] }
  0x31   :  { %914 = vmatpush.bf16.msra.mxu1 %v13774_v21  ;;  %v13804_v9 = vld [vmem:[%s19863_s3 + $0x140] sm:$0xff]  ;;  %v13843_v13 = vld [vmem:[%s19865_s5 + $0x78] sm:$0xff]  ;;  %v13834_v16 = vld [vmem:[%s19865_s5 + $0x30] sm:$0xff] }
  0x32   :  { %1024 = vmatpush.bf16.msra.mxu2 %v13782_v22  ;;  %v13812_v10 = vld [vmem:[%s19863_s3 + $0x180] sm:$0xff]  ;;  %v13851_v14 = vld [vmem:[%s19865_s5 + $0xb8] sm:$0xff]  ;;  %v13842_v17 = vld [vmem:[%s19865_s5 + $0x70] sm:$0xff] }
  0x33   :  { %1038 = vmatpush.bf16.msra.mxu3 %v13790_v23  ;;  %v13820_v11 = vld [vmem:[%s19863_s3 + $0x1c0] sm:$0xff]  ;;  %v13859_v15 = vld [vmem:[%s19865_s5 + $0xf8] sm:$0xff]  ;;  %v13850_v18 = vld [vmem:[%s19865_s5 + $0xb0] sm:$0xff] }
  0x34   :  { %901 = vmatpush.bf16.msra.mxu0 %v13765_v28  ;;  %v13858_v19 = vld [vmem:[%s19865_s5 + $0xf0] sm:$0xff]  ;;  %v13833_v20 = vld [vmem:[%s19865_s5 + $0x28] sm:$0xff]  ;;  %v13832_v24 = vld [vmem:[%s19865_s5 + $0x20] sm:$0xff] }
  0x35   :  { %915 = vmatpush.bf16.msra.mxu1 %v13773_v29  ;;  %v13841_v21 = vld [vmem:[%s19865_s5 + $0x68] sm:$0xff]  ;;  %v13840_v25 = vld [vmem:[%s19865_s5 + $0x60] sm:$0xff]  ;;  %v13831_v28 = vld [vmem:[%s19865_s5 + $0x18] sm:$0xff] }
  0x36   :  { %1025 = vmatpush.bf16.msra.mxu2 %v13781_v32  ;;  %v13849_v22 = vld [vmem:[%s19865_s5 + $0xa8] sm:$0xff]  ;;  %v13848_v26 = vld [vmem:[%s19865_s5 + $0xa0] sm:$0xff]  ;;  %v13839_v29 = vld [vmem:[%s19865_s5 + $0x58] sm:$0xff] }
  0x37   :  { %1039 = vmatpush.bf16.msra.mxu3 %v13789_v33  ;;  %v13857_v23 = vld [vmem:[%s19865_s5 + $0xe8] sm:$0xff]  ;;  %v13856_v27 = vld [vmem:[%s19865_s5 + $0xe0] sm:$0xff]  ;;  %v13847_v30 = vld [vmem:[%s19865_s5 + $0x98] sm:$0xff] }
  0x38   :  { %902 = vmatpush.bf16.msra.mxu0 %v13764_v34  ;;  %v13855_v31 = vld [vmem:[%s19865_s5 + $0xd8] sm:$0xff]  ;;  %v13830_v32 = vld [vmem:[%s19865_s5 + $0x10] sm:$0xff]  ;;  %v13829_v36 = vld [vmem:[%s19865_s5 + $0x8] sm:$0xff] }
  0x39   :  { %916 = vmatpush.bf16.msra.mxu1 %v13772_v35  ;;  %v13838_v33 = vld [vmem:[%s19865_s5 + $0x50] sm:$0xff]  ;;  %v13837_v37 = vld [vmem:[%s19865_s5 + $0x48] sm:$0xff] }
  0x3a   :  { %1026 = vmatpush.bf16.msra.mxu2 %v13780_v40  ;;  %v13846_v34 = vld [vmem:[%s19865_s5 + $0x90] sm:$0xff]  ;;  %v13845_v38 = vld [vmem:[%s19865_s5 + $0x88] sm:$0xff]  ;;  %v13828_v40 = vld [vmem:[%s19865_s5] sm:$0xff] }
  0x3b   :  { %1040 = vmatpush.bf16.msra.mxu3 %v13788_v41  ;;  %903 = vmatmul.bf16.vlgmr.msra.gmra.mxu0 %v15147_v46  ;;  %v13854_v35 = vld [vmem:[%s19865_s5 + $0xd0] sm:$0xff]  ;;  %v13853_v39 = vld [vmem:[%s19865_s5 + $0xc8] sm:$0xff]  ;;  %v13836_v41 = vld [vmem:[%s19865_s5 + $0x40] sm:$0xff] }
  0x3c   :  { %1143 = vmatpush.bf16.msrb.mxu0 %v13803_v42  ;;  %917 = vmatmul.bf16.vlgmr.msra.gmra.mxu1 %v15149_v47  ;;  %v13844_v42 = vld [vmem:[%s19865_s5 + $0x80] sm:$0xff] }
  0x3d   :  { %1157 = vmatpush.bf16.msrb.mxu1 %v13811_v43  ;;  %1027 = vmatmul.bf16.vlgmr.msra.gmra.mxu2 %v15147_v46  ;;  %v13852_v43 = vld [vmem:[%s19865_s5 + $0xc0] sm:$0xff] }
  0x3e   :  { %1267 = vmatpush.bf16.msrb.mxu2 %v13819_v44  ;;  %1041 = vmatmul.bf16.vlgmr.msra.gmra.mxu3 %v15149_v47  ;;  %v13867_v44 = vld [vmem:[%s19865_s5 + $0x138] sm:$0xff] }
  0x3f   :  { %1281 = vmatpush.bf16.msrb.mxu3 %v13827_v45  ;;  %v13875_v45 = vld [vmem:[%s19865_s5 + $0x178] sm:$0xff] }
  0x40   :  { %1144 = vmatpush.bf16.msrb.mxu0 %v13802_v48  ;;  %v13883_v48 = vld [vmem:[%s19865_s5 + $0x1b8] sm:$0xff] }
  0x41   :  { %1158 = vmatpush.bf16.msrb.mxu1 %v13810_v49  ;;  %v13891_v49 = vld [vmem:[%s19865_s5 + $0x1f8] sm:$0xff] }
  0x42   :  { %1268 = vmatpush.bf16.msrb.mxu2 %v13818_v50  ;;  %v13866_v50 = vld [vmem:[%s19865_s5 + $0x130] sm:$0xff] }
  0x43   :  { %1282 = vmatpush.bf16.msrb.mxu3 %v13826_v51  ;;  %v13874_v51 = vld [vmem:[%s19865_s5 + $0x170] sm:$0xff] }
  0x44   :  { %1145 = vmatpush.bf16.msrb.mxu0 %v13801_v52  ;;  %v13882_v52 = vld [vmem:[%s19865_s5 + $0x1b0] sm:$0xff] }
  0x45   :  { %1159 = vmatpush.bf16.msrb.mxu1 %v13809_v53  ;;  %v13890_v53 = vld [vmem:[%s19865_s5 + $0x1f0] sm:$0xff] }
  0x46   :  { %1269 = vmatpush.bf16.msrb.mxu2 %v13817_v54  ;;  %v13865_v54 = vld [vmem:[%s19865_s5 + $0x128] sm:$0xff] }
  0x47   :  { %1283 = vmatpush.bf16.msrb.mxu3 %v13825_v55  ;;  %v13873_v55 = vld [vmem:[%s19865_s5 + $0x168] sm:$0xff] }
  0x48   :  { %1146 = vmatpush.bf16.msrb.mxu0 %v13800_v56  ;;  %v13881_v56 = vld [vmem:[%s19865_s5 + $0x1a8] sm:$0xff] }
  0x49   :  { %1160 = vmatpush.bf16.msrb.mxu1 %v13808_v57  ;;  %v13889_v57 = vld [vmem:[%s19865_s5 + $0x1e8] sm:$0xff] }
  0x4a   :  { %1270 = vmatpush.bf16.msrb.mxu2 %v13816_v58  ;;  %v13864_v58 = vld [vmem:[%s19865_s5 + $0x120] sm:$0xff] }
  0x4b   :  { %1284 = vmatpush.bf16.msrb.mxu3 %v13824_v59  ;;  %v13872_v59 = vld [vmem:[%s19865_s5 + $0x160] sm:$0xff] }
  0x4c   :  { %1147 = vmatpush.bf16.msrb.mxu0 %v13799_v60  ;;  %v13880_v60 = vld [vmem:[%s19865_s5 + $0x1a0] sm:$0xff] }
  0x4d   :  { %1161 = vmatpush.bf16.msrb.mxu1 %v13807_v61  ;;  %v13888_v61 = vld [vmem:[%s19865_s5 + $0x1e0] sm:$0xff] }
  0x4e   :  { %1271 = vmatpush.bf16.msrb.mxu2 %v13815_v62  ;;  %v13863_v62 = vld [vmem:[%s19865_s5 + $0x118] sm:$0xff] }
  0x4f   :  { %1285 = vmatpush.bf16.msrb.mxu3 %v13823_v63  ;;  %v13871_v63 = vld [vmem:[%s19865_s5 + $0x158] sm:$0xff] }
  0x50   :  { %1148 = vmatpush.bf16.msrb.mxu0 %v13798_v0  ;;  %v13879_v0 = vld [vmem:[%s19865_s5 + $0x198] sm:$0xff] }
  0x51   :  { %1162 = vmatpush.bf16.msrb.mxu1 %v13806_v1  ;;  %v13887_v1 = vld [vmem:[%s19865_s5 + $0x1d8] sm:$0xff] }
  0x52   :  { %1272 = vmatpush.bf16.msrb.mxu2 %v13814_v2  ;;  %v13862_v2 = vld [vmem:[%s19865_s5 + $0x110] sm:$0xff] }
  0x53   :  { %1286 = vmatpush.bf16.msrb.mxu3 %v13822_v3  ;;  %v13870_v3 = vld [vmem:[%s19865_s5 + $0x150] sm:$0xff] }
  0x54   :  { %1149 = vmatpush.bf16.msrb.mxu0 %v13797_v4  ;;  %v13878_v4 = vld [vmem:[%s19865_s5 + $0x190] sm:$0xff] }
  0x55   :  { %1163 = vmatpush.bf16.msrb.mxu1 %v13805_v5  ;;  %v13886_v5 = vld [vmem:[%s19865_s5 + $0x1d0] sm:$0xff] }
  0x56   :  { %1273 = vmatpush.bf16.msrb.mxu2 %v13813_v6  ;;  %v13861_v6 = vld [vmem:[%s19865_s5 + $0x108] sm:$0xff] }
  0x57   :  { %1287 = vmatpush.bf16.msrb.mxu3 %v13821_v7  ;;  %v13869_v7 = vld [vmem:[%s19865_s5 + $0x148] sm:$0xff] }
  0x58   :  { %1150 = vmatpush.bf16.msrb.mxu0 %v13796_v8  ;;  %v13877_v8 = vld [vmem:[%s19865_s5 + $0x188] sm:$0xff] }
  0x59   :  { %1164 = vmatpush.bf16.msrb.mxu1 %v13804_v9  ;;  %v13885_v9 = vld [vmem:[%s19865_s5 + $0x1c8] sm:$0xff] }
  0x5a   :  { %1274 = vmatpush.bf16.msrb.mxu2 %v13812_v10  ;;  %v13860_v10 = vld [vmem:[%s19865_s5 + $0x100] sm:$0xff] }
  0x5b   :  { %1288 = vmatpush.bf16.msrb.mxu3 %v13820_v11  ;;  %1151 = vmatmul.bf16.vlgmr.msrb.gmra.mxu0 %v15147_v46  ;;  %v13868_v11 = vld [vmem:[%s19865_s5 + $0x140] sm:$0xff] }
  0x5c   :  { %1391 = vmatpush.bf16.msra.mxu0 %v13835_v12  ;;  %1165 = vmatmul.bf16.vlgmr.msrb.gmra.mxu1 %v15149_v47  ;;  %v13876_v12 = vld [vmem:[%s19865_s5 + $0x180] sm:$0xff] }
  0x5d   :  { %1405 = vmatpush.bf16.msra.mxu1 %v13843_v13  ;;  %1275 = vmatmul.bf16.vlgmr.msrb.gmra.mxu2 %v15147_v46  ;;  %v13884_v13 = vld [vmem:[%s19865_s5 + $0x1c0] sm:$0xff] }
  0x5e   :  { %1515 = vmatpush.bf16.msra.mxu2 %v13851_v14  ;;  %1289 = vmatmul.bf16.vlgmr.msrb.gmra.mxu3 %v15149_v47  ;;  %v13899_v14 = vld [vmem:[%s19866_s25 + $0x38] sm:$0xff] }
  0x5f   :  { %1529 = vmatpush.bf16.msra.mxu3 %v13859_v15  ;;  %v13907_v15 = vld [vmem:[%s19866_s25 + $0x78] sm:$0xff] }
  0x60   :  { %1392 = vmatpush.bf16.msra.mxu0 %v13834_v16  ;;  %v13898_v16 = vld [vmem:[%s19866_s25 + $0x30] sm:$0xff] }
  0x61   :  { %1406 = vmatpush.bf16.msra.mxu1 %v13842_v17  ;;  %v13906_v17 = vld [vmem:[%s19866_s25 + $0x70] sm:$0xff] }
  0x62   :  { %1516 = vmatpush.bf16.msra.mxu2 %v13850_v18  ;;  %v13897_v18 = vld [vmem:[%s19866_s25 + $0x28] sm:$0xff] }
  0x63   :  { %1530 = vmatpush.bf16.msra.mxu3 %v13858_v19  ;;  %v13905_v19 = vld [vmem:[%s19866_s25 + $0x68] sm:$0xff] }
  0x64   :  { %1393 = vmatpush.bf16.msra.mxu0 %v13833_v20  ;;  %v13896_v20 = vld [vmem:[%s19866_s25 + $0x20] sm:$0xff] }
  0x65   :  { %1407 = vmatpush.bf16.msra.mxu1 %v13841_v21  ;;  %v13895_v21 = vld [vmem:[%s19866_s25 + $0x18] sm:$0xff] }
  0x66   :  { %1517 = vmatpush.bf16.msra.mxu2 %v13849_v22  ;;  %v13904_v22 = vld [vmem:[%s19866_s25 + $0x60] sm:$0xff] }
  0x67   :  { %1531 = vmatpush.bf16.msra.mxu3 %v13857_v23  ;;  %v13894_v23 = vld [vmem:[%s19866_s25 + $0x10] sm:$0xff] }
  0x68   :  { %1394 = vmatpush.bf16.msra.mxu0 %v13832_v24  ;;  %v13903_v24 = vld [vmem:[%s19866_s25 + $0x58] sm:$0xff] }
  0x69   :  { %1408 = vmatpush.bf16.msra.mxu1 %v13840_v25  ;;  %v13893_v25 = vld [vmem:[%s19866_s25 + $0x8] sm:$0xff] }
  0x6a   :  { %1518 = vmatpush.bf16.msra.mxu2 %v13848_v26  ;;  %v13902_v26 = vld [vmem:[%s19866_s25 + $0x50] sm:$0xff] }
  0x6b   :  { %1532 = vmatpush.bf16.msra.mxu3 %v13856_v27  ;;  %v13915_v27 = vld [vmem:[%s19866_s25 + $0xb8] sm:$0xff] }
  0x6c   :  { %1395 = vmatpush.bf16.msra.mxu0 %v13831_v28  ;;  %v13923_v28 = vld [vmem:[%s19866_s25 + $0xf8] sm:$0xff] }
  0x6d   :  { %1409 = vmatpush.bf16.msra.mxu1 %v13839_v29  ;;  %v13892_v29 = vld [vmem:[%s19866_s25] sm:$0xff] }
  0x6e   :  { %1519 = vmatpush.bf16.msra.mxu2 %v13847_v30  ;;  %v13931_v30 = vld [vmem:[%s19866_s25 + $0x138] sm:$0xff] }
  0x6f   :  { %1533 = vmatpush.bf16.msra.mxu3 %v13855_v31  ;;  %v13901_v31 = vld [vmem:[%s19866_s25 + $0x48] sm:$0xff] }
  0x70   :  { %1396 = vmatpush.bf16.msra.mxu0 %v13830_v32  ;;  %v13914_v32 = vld [vmem:[%s19866_s25 + $0xb0] sm:$0xff] }
  0x71   :  { %1410 = vmatpush.bf16.msra.mxu1 %v13838_v33  ;;  %v13922_v33 = vld [vmem:[%s19866_s25 + $0xf0] sm:$0xff] }
  0x72   :  { %1520 = vmatpush.bf16.msra.mxu2 %v13846_v34  ;;  %v13930_v34 = vld [vmem:[%s19866_s25 + $0x130] sm:$0xff] }
  0x73   :  { %1534 = vmatpush.bf16.msra.mxu3 %v13854_v35  ;;  %v13900_v35 = vld [vmem:[%s19866_s25 + $0x40] sm:$0xff] }
  0x74   :  { %1397 = vmatpush.bf16.msra.mxu0 %v13829_v36  ;;  %v13913_v36 = vld [vmem:[%s19866_s25 + $0xa8] sm:$0xff] }
  0x75   :  { %1411 = vmatpush.bf16.msra.mxu1 %v13837_v37  ;;  %v13921_v37 = vld [vmem:[%s19866_s25 + $0xe8] sm:$0xff] }
  0x76   :  { %1521 = vmatpush.bf16.msra.mxu2 %v13845_v38  ;;  %v13939_v38 = vld [vmem:[%s19866_s25 + $0x178] sm:$0xff] }
  0x77   :  { %1535 = vmatpush.bf16.msra.mxu3 %v13853_v39  ;;  %v13929_v39 = vld [vmem:[%s19866_s25 + $0x128] sm:$0xff] }
  0x78   :  { %1398 = vmatpush.bf16.msra.mxu0 %v13828_v40  ;;  %v13912_v40 = vld [vmem:[%s19866_s25 + $0xa0] sm:$0xff] }
  0x79   :  { %1412 = vmatpush.bf16.msra.mxu1 %v13836_v41  ;;  %v13920_v41 = vld [vmem:[%s19866_s25 + $0xe0] sm:$0xff] }
  0x7a   :  { %1522 = vmatpush.bf16.msra.mxu2 %v13844_v42  ;;  %v13938_v42 = vld [vmem:[%s19866_s25 + $0x170] sm:$0xff] }
  0x7b   :  { %1536 = vmatpush.bf16.msra.mxu3 %v13852_v43  ;;  %1399 = vmatmul.bf16.vlgmr.msra.gmra.mxu0 %v15147_v46  ;;  %v13928_v43 = vld [vmem:[%s19866_s25 + $0x120] sm:$0xff] }
  0x7c   :  { %1639 = vmatpush.bf16.msrb.mxu0 %v13867_v44  ;;  %1413 = vmatmul.bf16.vlgmr.msra.gmra.mxu1 %v15149_v47  ;;  %v13911_v44 = vld [vmem:[%s19866_s25 + $0x98] sm:$0xff] }
  0x7d   :  { %1653 = vmatpush.bf16.msrb.mxu1 %v13875_v45  ;;  %1523 = vmatmul.bf16.vlgmr.msra.gmra.mxu2 %v15147_v46  ;;  %v13919_v45 = vld [vmem:[%s19866_s25 + $0xd8] sm:$0xff] }
  0x7e   :  { %1763 = vmatpush.bf16.msrb.mxu2 %v13883_v48  ;;  %1537 = vmatmul.bf16.vlgmr.msra.gmra.mxu3 %v15149_v47  ;;  %v13937_v48 = vld [vmem:[%s19866_s25 + $0x168] sm:$0xff] }
  0x7f   :  { %1777 = vmatpush.bf16.msrb.mxu3 %v13891_v49  ;;  %v13927_v49 = vld [vmem:[%s19866_s25 + $0x118] sm:$0xff] }
  0x80   :  { %1640 = vmatpush.bf16.msrb.mxu0 %v13866_v50  ;;  %v13910_v50 = vld [vmem:[%s19866_s25 + $0x90] sm:$0xff] }
  0x81   :  { %1654 = vmatpush.bf16.msrb.mxu1 %v13874_v51  ;;  %v13918_v51 = vld [vmem:[%s19866_s25 + $0xd0] sm:$0xff] }
  0x82   :  { %1764 = vmatpush.bf16.msrb.mxu2 %v13882_v52  ;;  %v13936_v52 = vld [vmem:[%s19866_s25 + $0x160] sm:$0xff] }
  0x83   :  { %1778 = vmatpush.bf16.msrb.mxu3 %v13890_v53 }
  0x84   :  { %1641 = vmatpush.bf16.msrb.mxu0 %v13865_v54 }
  0x85   :  { %1655 = vmatpush.bf16.msrb.mxu1 %v13873_v55  ;;  %v13926_v55 = vld [vmem:[%s19866_s25 + $0x110] sm:$0xff] }
  0x86   :  { %1765 = vmatpush.bf16.msrb.mxu2 %v13881_v56  ;;  %v13909_v56 = vld [vmem:[%s19866_s25 + $0x88] sm:$0xff] }
  0x87   :  { %1779 = vmatpush.bf16.msrb.mxu3 %v13889_v57  ;;  %v13917_v57 = vld [vmem:[%s19866_s25 + $0xc8] sm:$0xff] }
  0x88   :  { %1642 = vmatpush.bf16.msrb.mxu0 %v13864_v58  ;;  %v13935_v58 = vld [vmem:[%s19866_s25 + $0x158] sm:$0xff] }
  0x89   :  { %1656 = vmatpush.bf16.msrb.mxu1 %v13872_v59 }
  0x8a   :  { %1766 = vmatpush.bf16.msrb.mxu2 %v13880_v60 }
  0x8b   :  { %1780 = vmatpush.bf16.msrb.mxu3 %v13888_v61  ;;  %v13925_v61 = vld [vmem:[%s19866_s25 + $0x108] sm:$0xff] }
  0x8c   :  { %1643 = vmatpush.bf16.msrb.mxu0 %v13863_v62 }
  0x8d   :  { %1657 = vmatpush.bf16.msrb.mxu1 %v13871_v63 }
  0x8e   :  { %1767 = vmatpush.bf16.msrb.mxu2 %v13879_v0  ;;  %v13908_v0 = vld [vmem:[%s19866_s25 + $0x80] sm:$0xff] }
  0x8f   :  { %1781 = vmatpush.bf16.msrb.mxu3 %v13887_v1  ;;  %v13916_v1 = vld [vmem:[%s19866_s25 + $0xc0] sm:$0xff] }
  0x90   :  { %1644 = vmatpush.bf16.msrb.mxu0 %v13862_v2  ;;  %v13934_v2 = vld [vmem:[%s19866_s25 + $0x150] sm:$0xff] }
  0x91   :  { %1658 = vmatpush.bf16.msrb.mxu1 %v13870_v3  ;;  %v13947_v3 = vld [vmem:[%s19866_s25 + $0x1b8] sm:$0xff] }
  0x92   :  { %1768 = vmatpush.bf16.msrb.mxu2 %v13878_v4  ;;  %v13955_v4 = vld [vmem:[%s19866_s25 + $0x1f8] sm:$0xff] }
  0x93   :  { %1782 = vmatpush.bf16.msrb.mxu3 %v13886_v5  ;;  %v13924_v5 = vld [vmem:[%s19866_s25 + $0x100] sm:$0xff] }
  0x94   :  { %1645 = vmatpush.bf16.msrb.mxu0 %v13861_v6  ;;  %v13933_v6 = vld [vmem:[%s19866_s25 + $0x148] sm:$0xff] }
  0x95   :  { %1659 = vmatpush.bf16.msrb.mxu1 %v13869_v7  ;;  %v13946_v7 = vld [vmem:[%s19866_s25 + $0x1b0] sm:$0xff] }
  0x96   :  { %1769 = vmatpush.bf16.msrb.mxu2 %v13877_v8  ;;  %v13954_v8 = vld [vmem:[%s19866_s25 + $0x1f0] sm:$0xff] }
  0x97   :  { %1783 = vmatpush.bf16.msrb.mxu3 %v13885_v9 }
  0x98   :  { %1646 = vmatpush.bf16.msrb.mxu0 %v13860_v10 }
  0x99   :  { %1660 = vmatpush.bf16.msrb.mxu1 %v13868_v11  ;;  %v13932_v11 = vld [vmem:[%s19866_s25 + $0x140] sm:$0xff] }
  0x9a   :  { %1770 = vmatpush.bf16.msrb.mxu2 %v13876_v12 }
  0x9b   :  { %1784 = vmatpush.bf16.msrb.mxu3 %v13884_v13  ;;  %1647 = vmatmul.bf16.vlgmr.msrb.gmra.mxu0 %v15147_v46 }
  0x9c   :  { %1887 = vmatpush.bf16.msra.mxu0 %v13899_v14  ;;  %1661 = vmatmul.bf16.vlgmr.msrb.gmra.mxu1 %v15149_v47  ;;  %v13945_v14 = vld [vmem:[%s19866_s25 + $0x1a8] sm:$0xff] }
  0x9d   :  { %1901 = vmatpush.bf16.msra.mxu1 %v13907_v15  ;;  %1771 = vmatmul.bf16.vlgmr.msrb.gmra.mxu2 %v15147_v46  ;;  %v13953_v15 = vld [vmem:[%s19866_s25 + $0x1e8] sm:$0xff] }
  0x9e   :  { %1785 = vmatmul.bf16.vlgmr.msrb.gmra.mxu3 %v15149_v47  ;;  %2011 = vmatpush.bf16.msra.mxu2 %v13915_v27  ;;  %v13949_v27 = vld [vmem:[%s19866_s25 + $0x1c8] sm:$0xff] }
  0x9f   :  { %2025 = vmatpush.bf16.msra.mxu3 %v13923_v28 }
  0xa0   :  { %1888 = vmatpush.bf16.msra.mxu0 %v13898_v16  ;;  %v13944_v16 = vld [vmem:[%s19866_s25 + $0x1a0] sm:$0xff] }
  0xa1   :  { %1902 = vmatpush.bf16.msra.mxu1 %v13906_v17  ;;  %v13952_v17 = vld [vmem:[%s19866_s25 + $0x1e0] sm:$0xff] }
  0xa2   :  { %2012 = vmatpush.bf16.msra.mxu2 %v13914_v32  ;;  %v13940_v32 = vld [vmem:[%s19866_s25 + $0x180] sm:$0xff] }
  0xa3   :  { %2026 = vmatpush.bf16.msra.mxu3 %v13922_v33  ;;  %v13948_v33 = vld [vmem:[%s19866_s25 + $0x1c0] sm:$0xff] }
  0xa4   :  { %1889 = vmatpush.bf16.msra.mxu0 %v13897_v18 }
  0xa5   :  { %1903 = vmatpush.bf16.msra.mxu1 %v13905_v19 }
  0xa6   :  { %2013 = vmatpush.bf16.msra.mxu2 %v13913_v36 }
  0xa7   :  { %2027 = vmatpush.bf16.msra.mxu3 %v13921_v37 }
  0xa8   :  { %1890 = vmatpush.bf16.msra.mxu0 %v13896_v20  ;;  %v13943_v20 = vld [vmem:[%s19866_s25 + $0x198] sm:$0xff] }
  0xa9   :  { %1904 = vmatpush.bf16.msra.mxu1 %v13904_v22 }
  0xaa   :  { %2014 = vmatpush.bf16.msra.mxu2 %v13912_v40 }
  0xab   :  { %2028 = vmatpush.bf16.msra.mxu3 %v13920_v41 }
  0xac   :  { %1891 = vmatpush.bf16.msra.mxu0 %v13895_v21  ;;  %v13951_v21 = vld [vmem:[%s19866_s25 + $0x1d8] sm:$0xff] }
  0xad   :  { %1905 = vmatpush.bf16.msra.mxu1 %v13903_v24  ;;  %v13942_v24 = vld [vmem:[%s19866_s25 + $0x190] sm:$0xff] }
  0xae   :  { %2015 = vmatpush.bf16.msra.mxu2 %v13911_v44 }
  0xaf   :  { %2029 = vmatpush.bf16.msra.mxu3 %v13919_v45 }
  0xb0   :  { %1892 = vmatpush.bf16.msra.mxu0 %v13894_v23 }
  0xb1   :  { %1906 = vmatpush.bf16.msra.mxu1 %v13902_v26  ;;  %v13941_v26 = vld [vmem:[%s19866_s25 + $0x188] sm:$0xff] }
  0xb2   :  { %2016 = vmatpush.bf16.msra.mxu2 %v13910_v50 }
  0xb3   :  { %2030 = vmatpush.bf16.msra.mxu3 %v13918_v51 }
  0xb4   :  { %1893 = vmatpush.bf16.msra.mxu0 %v13893_v25  ;;  %v13950_v25 = vld [vmem:[%s19866_s25 + $0x1d0] sm:$0xff] }
  0xb5   :  { %1907 = vmatpush.bf16.msra.mxu1 %v13901_v31 }
  0xb6   :  { %2017 = vmatpush.bf16.msra.mxu2 %v13909_v56 }
  0xb7   :  { %2031 = vmatpush.bf16.msra.mxu3 %v13917_v57 }
  0xb8   :  { %1894 = vmatpush.bf16.msra.mxu0 %v13892_v29  ;;  %v15556_v53 = vpop.f32.mrf.mxu0 }
  0xb9   :  { %1908 = vmatpush.bf16.msra.mxu1 %v13900_v35  ;;  %v15558_v54 = vpop.f32.mrf.mxu1 }
  0xba   :  { %2018 = vmatpush.bf16.msra.mxu2 %v13908_v0 }
  0xbb   :  { %1895 = vmatmul.bf16.vlgmr.msra.gmra.mxu0 %v15147_v46  ;;  %2032 = vmatpush.bf16.msra.mxu3 %v13916_v1 }
  0xbc   :  { %2135 = vmatpush.bf16.msrb.mxu0 %v13931_v30  ;;  %1909 = vmatmul.bf16.vlgmr.msra.gmra.mxu1 %v15149_v47 }
  0xbd   :  { %2149 = vmatpush.bf16.msrb.mxu1 %v13939_v38  ;;  %2019 = vmatmul.bf16.vlgmr.msra.gmra.mxu2 %v15147_v46 }
  0xbe   :  { %2259 = vmatpush.bf16.msrb.mxu2 %v13947_v3  ;;  %2033 = vmatmul.bf16.vlgmr.msra.gmra.mxu3 %v15149_v47 }
  0xbf   :  { %2273 = vmatpush.bf16.msrb.mxu3 %v13955_v4 }
  0xc0   :  { %2136 = vmatpush.bf16.msrb.mxu0 %v13930_v34  ;;  %v15572_v59 = vpop.f32.mrf.mxu2  ;;  %v15579_v62 = vpop.f32.mrf.mxu0 }
  0xc1   :  { %2150 = vmatpush.bf16.msrb.mxu1 %v13938_v42  ;;  %v15574_v60 = vpop.f32.mrf.mxu3  ;;  %v15581_v63 = vpop.f32.mrf.mxu1  ;;  %v919_v42 = vadd.f32 %v15558_v54, %v15556_v53 }
  0xc2   :  { %2260 = vmatpush.bf16.msrb.mxu2 %v13946_v7  ;;  %v1043_v57 = vadd.f32 %v15574_v60, %v15572_v59 }
  0xc3   :  { %2274 = vmatpush.bf16.msrb.mxu3 %v13954_v8 }
  0xc4   :  { %2137 = vmatpush.bf16.msrb.mxu0 %v13929_v39  ;;  %v2289_v0 = vpack.c.bf16 %v1043_v57, %v1043_v57 }
  0xc5   :  { %2151 = vmatpush.bf16.msrb.mxu1 %v13937_v48 }
  0xc6   :  { %2261 = vmatpush.bf16.msrb.mxu2 %v13945_v14 }
  0xc7   :  { %2275 = vmatpush.bf16.msrb.mxu3 %v13953_v15 }
  0xc8   :  { %2138 = vmatpush.bf16.msrb.mxu0 %v13928_v43  ;;  %v15613_v9 = vpop.f32.mrf.mxu2  ;;  %v921_v43 = vadd.f32 %v15581_v63, %v15579_v62 }
  0xc9   :  { %2152 = vmatpush.bf16.msrb.mxu1 %v13936_v52  ;;  %v15615_v10 = vpop.f32.mrf.mxu3 }
  0xca   :  { %2262 = vmatpush.bf16.msrb.mxu2 %v13944_v16  ;;  %v1045_v53 = vadd.f32 %v15615_v10, %v15613_v9 }
  0xcb   :  { %2276 = vmatpush.bf16.msrb.mxu3 %v13952_v17 }
  0xcc   :  { %2139 = vmatpush.bf16.msrb.mxu0 %v13927_v49  ;;  %v2290_v1 = vpack.c.bf16 %v1045_v53, %v1045_v53 }
  0xcd   :  { %2153 = vmatpush.bf16.msrb.mxu1 %v13935_v58 }
  0xce   :  { %2263 = vmatpush.bf16.msrb.mxu2 %v13943_v20  ;;  %v2337_v59 = vunpack.c.l.b16 %v2290_v1 }
  0xcf   :  { %2277 = vmatpush.bf16.msrb.mxu3 %v13951_v21 }
  0xd0   :  { %2140 = vmatpush.bf16.msrb.mxu0 %v13926_v55 }
  0xd1   :  { %2154 = vmatpush.bf16.msrb.mxu1 %v13934_v2 }
  0xd2   :  { %2264 = vmatpush.bf16.msrb.mxu2 %v13942_v24 }
  0xd3   :  { %2278 = vmatpush.bf16.msrb.mxu3 %v13950_v25 }
  0xd4   :  { %2141 = vmatpush.bf16.msrb.mxu0 %v13925_v61 }
  0xd5   :  { %2155 = vmatpush.bf16.msrb.mxu1 %v13933_v6 }
  0xd6   :  { %2265 = vmatpush.bf16.msrb.mxu2 %v13941_v26 }
  0xd7   :  { %2279 = vmatpush.bf16.msrb.mxu3 %v13949_v27 }
  0xd8   :  { %2142 = vmatpush.bf16.msrb.mxu0 %v13924_v5  ;;  %v15620_v12 = vpop.f32.mrf.mxu0  ;;  %v2336_v5 = vunpack.c.l.b16 %v2289_v0 }
  0xd9   :  { %v15622_v13 = vpop.f32.mrf.mxu1  ;;  %2156 = vmatpush.bf16.msrb.mxu1 %v13932_v11 }
  0xda   :  { %2266 = vmatpush.bf16.msrb.mxu2 %v13940_v32  ;;  %v2338_v7 = vpack.c.b16 %v2337_v59, %v2336_v5  ;;  %v1167_v17 = vadd.f32 %v15622_v13, %v15620_v12 }
  0xdb   :  { %2143 = vmatmul.bf16.vlgmr.msrb.gmra.mxu0 %v15147_v46  ;;  %2280 = vmatpush.bf16.msrb.mxu3 %v13948_v33 }
  0xdc   :  { %2157 = vmatmul.bf16.vlgmr.msrb.gmra.mxu1 %v15149_v47  ;;  %v2291_v27 = vpack.c.bf16 %v1167_v17, %v1167_v17 }
  0xdd   :  { %2267 = vmatmul.bf16.vlgmr.msrb.gmra.mxu2 %v15147_v46  ;;  %v2287_v46 = vpack.c.bf16 %v919_v42, %v919_v42 }
  0xde   :  { %2281 = vmatmul.bf16.vlgmr.msrb.gmra.mxu3 %v15149_v47  ;;  %v2288_v47 = vpack.c.bf16 %v921_v43, %v921_v43 }
  0xdf   :  { %v2305_v61 = vunpack.c.l.b16 %v2287_v46 }
  0xe0   :  { %v15637_v18 = vpop.f32.mrf.mxu2  ;;  %v15647_v22 = vpop.f32.mrf.mxu0  ;;  %v2306_v62 = vunpack.c.l.b16 %v2288_v47 }
  0xe1   :  { %v15639_v19 = vpop.f32.mrf.mxu3  ;;  %v15649_v23 = vpop.f32.mrf.mxu1 }
  0xe2   :  { %v2307_v3 = vpack.c.b16 %v2306_v62, %v2305_v61  ;;  %v1169_v20 = vadd.f32 %v15649_v23, %v15647_v22  ;;  %v2366_v22 = vunpack.c.l.b16 %v2291_v27 }
  0xe8   :  { %v15663_v28 = vpop.f32.mrf.mxu2 }
  0xe9   :  { %v15665_v29 = vpop.f32.mrf.mxu3 }
  0xea   :  { %v1293_v12 = vadd.f32 %v15665_v29, %v15663_v28 }
  0xf8   :  { %v1400_v30 = vpop.f32.mrf.mxu0 }
  0xf9   :  { %v1414_v31 = vpop.f32.mrf.mxu1 }
  0xfa   :  { %v1415_v34 = vadd.f32 %v1414_v31, %v1400_v30  ;;  %v2292_v30 = vpack.c.bf16 %v1169_v20, %v1169_v20 }
  0xfc   :  { %v2295_v35 = vpack.c.bf16 %v1415_v34, %v1415_v34  ;;  %v2367_v23 = vunpack.c.l.b16 %v2292_v30 }
  0xfe   :  { %v2310_v44 = vunpack.c.l.b16 %v2295_v35  ;;  %v2368_v43 = vpack.c.b16 %v2367_v23, %v2366_v22  ;;  %v110_v22 = vld [vmem:[%s19867_s2 + $0x8] sm:$0xff] }
 0x100   :  { %v1524_v36 = vpop.f32.mrf.mxu2  ;;  %v1402_v38 = vpop.f32.mrf.mxu0 }
 0x101   :  { %v1538_v37 = vpop.f32.mrf.mxu3  ;;  %v1416_v39 = vpop.f32.mrf.mxu1 }
 0x102   :  { %v1417_v40 = vadd.f32 %v1416_v39, %v1402_v38  ;;  %v1539_v41 = vadd.f32 %v1538_v37, %v1524_v36  ;;  %v1291_v37 = vadd.f32 %v15639_v19, %v15637_v18 }
 0x104   :  { %v2296_v45 = vpack.c.bf16 %v1417_v40, %v1417_v40  ;;  %v2297_v49 = vpack.c.bf16 %v1539_v41, %v1539_v41  ;;  %v2293_v40 = vpack.c.bf16 %v1291_v37, %v1291_v37  ;;  %v2294_v41 = vpack.c.bf16 %v1293_v12, %v1293_v12 }
 0x106   :  { %v2311_v48 = vunpack.c.l.b16 %v2296_v45  ;;  %v2341_v54 = vunpack.c.l.b16 %v2297_v49  ;;  %v2396_v45 = vunpack.c.l.b16 %v2293_v40  ;;  %v2397_v18 = vunpack.c.l.b16 %v2294_v41 }
 0x108   :  { %v2312_v50 = vpack.c.b16 %v2311_v48, %v2310_v44  ;;  %v1526_v51 = vpop.f32.mrf.mxu2  ;;  %v2398_v19 = vpack.c.b16 %v2397_v18, %v2396_v45 }
 0x109   :  { %v1540_v52 = vpop.f32.mrf.mxu3 }
 0x10a   :  { %v1541_v55 = vadd.f32 %v1540_v52, %v1526_v51  ;;  %v2318_v56 = vsel %vm2313_vm0, %v2312_v50, 0 }
 0x10b   :  { %2327 = vmatpush.bf16.xpose.msra.mxu0 %v2318_v56 }
 0x10c   :  { %v2298_v58 = vpack.c.bf16 %v1541_v55, %v1541_v55 }
 0x10e   :  { %v2342_v63 = vunpack.c.l.b16 %v2298_v58 }
 0x110   :  { %v2343_v2 = vpack.c.b16 %v2342_v63, %v2341_v54 }
 0x112   :  { %v2348_v4 = vsel %vm2313_vm0, %v2343_v2, 0  ;;  %10660 = vmatmul.msk.bf16.vlgmr.msra.gmra.mxu0 %vm2313_vm0, %v2307_v3 }
 0x113   :  { %2357 = vmatpush.bf16.xpose.msra.mxu1 %v2348_v4 }
 0x118   :  { %v1648_v60 = vpop.f32.mrf.mxu0 }
 0x119   :  { %v1662_v6 = vpop.f32.mrf.mxu1 }
 0x11a   :  { %v1663_v8 = vadd.f32 %v1662_v6, %v1648_v60  ;;  %10661 = vmatmul.msk.bf16.vlgmr.msra.gmra.mxu1 %vm2313_vm0, %v2338_v7 }
 0x11c   :  { %v2299_v9 = vpack.c.bf16 %v1663_v8, %v1663_v8 }
 0x11e   :  { %v2371_v21 = vunpack.c.l.b16 %v2299_v9 }
 0x120   :  { %v1772_v10 = vpop.f32.mrf.mxu2  ;;  %v1650_v14 = vpop.f32.mrf.mxu0 }
 0x121   :  { %v1786_v11 = vpop.f32.mrf.mxu3  ;;  %v1664_v15 = vpop.f32.mrf.mxu1 }
 0x122   :  { %v1665_v16 = vadd.f32 %v1664_v15, %v1650_v14  ;;  %v1787_v25 = vadd.f32 %v1786_v11, %v1772_v10 }
 0x124   :  { %v2300_v24 = vpack.c.bf16 %v1665_v16, %v1665_v16  ;;  %v2301_v34 = vpack.c.bf16 %v1787_v25, %v1787_v25 }
 0x126   :  { %v2372_v26 = vunpack.c.l.b16 %v2300_v24  ;;  %v2401_v38 = vunpack.c.l.b16 %v2301_v34 }
 0x128   :  { %v2373_v31 = vpack.c.b16 %v2372_v26, %v2371_v21  ;;  %v1774_v32 = vpop.f32.mrf.mxu2 }
 0x129   :  { %v1788_v33 = vpop.f32.mrf.mxu3 }
 0x12a   :  { %v1789_v35 = vadd.f32 %v1788_v33, %v1774_v32  ;;  %v2378_v36 = vsel %vm2313_vm0, %v2373_v31, 0  ;;  %v109_v31 = vld [vmem:[%s19867_s2] sm:$0xff] }
 0x12b   :  { %2387 = vmatpush.bf16.xpose.msra.mxu2 %v2378_v36 }
 0x12c   :  { %v2302_v13 = vpack.c.bf16 %v1789_v35, %v1789_v35 }
 0x12e   :  { %v2402_v39 = vunpack.c.l.b16 %v2302_v13 }
 0x130   :  { %v2403_v42 = vpack.c.b16 %v2402_v39, %v2401_v38 }
 0x132   :  { %v2408_v44 = vsel %vm2313_vm0, %v2403_v42, 0  ;;  %10662 = vmatmul.msk.bf16.vlgmr.msra.gmra.mxu2 %vm2313_vm0, %v2368_v43 }
 0x133   :  { %2417 = vmatpush.bf16.xpose.msra.mxu3 %v2408_v44 }
 0x138   :  { %v1896_v28 = vpop.f32.mrf.mxu0 }
 0x139   :  { %v1910_v29 = vpop.f32.mrf.mxu1 }
 0x13a   :  { %10663 = vmatmul.msk.bf16.vlgmr.msra.gmra.mxu3 %vm2313_vm0, %v2398_v19  ;;  %v1911_v48 = vadd.f32 %v1910_v29, %v1896_v28 }
 0x13c   :  { %v2641_v49 = vpack.c.bf16 %v1911_v48, %v1911_v48 }
 0x13e   :  { %v2656_v51 = vunpack.c.l.b16 %v2641_v49 }
 0x140   :  { %v1898_v46 = vpop.f32.mrf.mxu0  ;;  %v2020_v0 = vpop.f32.mrf.mxu2 }
 0x141   :  { %v1912_v47 = vpop.f32.mrf.mxu1  ;;  %v2034_v1 = vpop.f32.mrf.mxu3 }
 0x142   :  { %v1913_v50 = vadd.f32 %v1912_v47, %v1898_v46  ;;  %v2035_v4 = vadd.f32 %v2034_v1, %v2020_v0 }
 0x144   :  { %v2642_v52 = vpack.c.bf16 %v1913_v50, %v1913_v50  ;;  %v2643_v60 = vpack.c.bf16 %v2035_v4, %v2035_v4 }
 0x146   :  { %v2657_v55 = vunpack.c.l.b16 %v2642_v52  ;;  %v2684_v9 = vunpack.c.l.b16 %v2643_v60 }
 0x148   :  { %v2658_v56 = vpack.c.b16 %v2657_v55, %v2656_v51  ;;  %v2022_v6 = vpop.f32.mrf.mxu2 }
 0x149   :  { %v2036_v7 = vpop.f32.mrf.mxu3 }
 0x14a   :  { %2670 = vmatpush.bf16.msrb.mxu0 %v2658_v56  ;;  %v2037_v8 = vadd.f32 %v2036_v7, %v2022_v6 }
 0x14c   :  { %v2644_v10 = vpack.c.bf16 %v2037_v8, %v2037_v8 }
 0x14e   :  { %v2685_v11 = vunpack.c.l.b16 %v2644_v10 }
 0x150   :  { %v2686_v14 = vpack.c.b16 %v2685_v11, %v2684_v9 }
 0x152   :  { %2698 = vmatpush.bf16.msrb.mxu1 %v2686_v14 }
 0x158   :  { %v2144_v57 = vpop.f32.mrf.mxu0 }
 0x159   :  { %v2158_v53 = vpop.f32.mrf.mxu1 }
 0x15a   :  { %v2159_v54 = vadd.f32 %v2158_v53, %v2144_v57 }
 0x15c   :  { %v2645_v58 = vpack.c.bf16 %v2159_v54, %v2159_v54 }
 0x15e   :  { %v2712_v2 = vunpack.c.l.b16 %v2645_v58 }
 0x160   :  { %v2146_v61 = vpop.f32.mrf.mxu0  ;;  %v2268_v15 = vpop.f32.mrf.mxu2 }
 0x161   :  { %v2160_v62 = vpop.f32.mrf.mxu1  ;;  %v2282_v16 = vpop.f32.mrf.mxu3 }
 0x162   :  { %v2161_v63 = vadd.f32 %v2160_v62, %v2146_v61  ;;  %v2283_v17 = vadd.f32 %v2282_v16, %v2268_v15 }
 0x164   :  { %v2646_v3 = vpack.c.bf16 %v2161_v63, %v2161_v63  ;;  %v2647_v20 = vpack.c.bf16 %v2283_v17, %v2283_v17 }
 0x166   :  { %v2713_v5 = vunpack.c.l.b16 %v2646_v3  ;;  %v2740_v26 = vunpack.c.l.b16 %v2647_v20 }
 0x168   :  { %v2714_v59 = vpack.c.b16 %v2713_v5, %v2712_v2  ;;  %v2270_v21 = vpop.f32.mrf.mxu2 }
 0x169   :  { %v2284_v24 = vpop.f32.mrf.mxu3 }
 0x16a   :  { %2726 = vmatpush.bf16.msrb.mxu2 %v2714_v59  ;;  %v2285_v25 = vadd.f32 %v2284_v24, %v2270_v21 }
 0x16c   :  { %v2648_v27 = vpack.c.bf16 %v2285_v25, %v2285_v25 }
 0x16e   :  { %v2741_v32 = vunpack.c.l.b16 %v2648_v27 }
 0x170   :  { %v2742_v34 = vpack.c.b16 %v2741_v32, %v2740_v26 }
 0x172   :  { %2754 = vmatpush.bf16.msrb.mxu3 %v2742_v34 }
 0x18f   :  { %v2329_v30 = vpop.f32.mrf.mxu0 }
 0x190   :  { %v2424_v33 = vmul.f32 0.125, %v2329_v30 }
 0x192   :  { %v2432_v35 = vadd.f32 %v2424_v33, %v109_v31 }
 0x194   :  { %v2441_v36 = vsel %vm2440_vm1, %v2432_v35, -inf }
 0x195   :  { %2442 = vmax.xlane.f32.xlu1 %v2441_v36 }
 0x197   :  { %v2359_v37 = vpop.f32.mrf.mxu1  ;;  %v2331_v13 = vpop.f32.mrf.mxu0 }
 0x198   :  { %v2426_v12 = vmul.f32 0.125, %v2359_v37  ;;  %v2425_v23 = vmul.f32 0.125, %v2331_v13 }
 0x19a   :  { %v2434_v38 = vadd.f32 %v2426_v12, %v109_v31  ;;  %v2433_v39 = vadd.f32 %v2425_v23, %v110_v22 }
 0x19c   :  { %v2447_v40 = vsel %vm2440_vm1, %v2434_v38, -inf  ;;  %v2444_v41 = vsel %vm2440_vm1, %v2433_v39, -inf }
 0x19d   :  { %2448 = vmax.xlane.f32.xlu0 %v2447_v40  ;;  %2445 = vmax.xlane.f32.xlu1 %v2444_v41 }
 0x19f   :  { %v2361_v42 = vpop.f32.mrf.mxu1 }
 0x1a0   :  { %v2427_v43 = vmul.f32 0.125, %v2361_v42 }
 0x1a2   :  { %v2435_v44 = vadd.f32 %v2427_v43, %v110_v22 }
 0x1a4   :  { %v2450_v45 = vsel %vm2440_vm1, %v2435_v44, -inf }
 0x1a5   :  { %2451 = vmax.xlane.f32.xlu0 %v2450_v45 }
 0x1b5   :  { %v2389_v18 = vpop.f32.mrf.mxu2 }
 0x1b6   :  { %v2428_v19 = vmul.f32 0.125, %v2389_v18 }
 0x1b8   :  { %v2436_v28 = vadd.f32 %v2428_v19, %v109_v31 }
 0x1ba   :  { %v2453_v29 = vsel %vm2440_vm1, %v2436_v28, -inf }
 0x1bb   :  { %2454 = vmax.xlane.f32.xlu0 %v2453_v29 }
 0x1bd   :  { %v2419_v48 = vpop.f32.mrf.mxu3  ;;  %v2391_v46 = vpop.f32.mrf.mxu2 }
 0x1be   :  { %v2430_v49 = vmul.f32 0.125, %v2419_v48  ;;  %v2429_v47 = vmul.f32 0.125, %v2391_v46 }
 0x1c0   :  { %v2438_v50 = vadd.f32 %v2430_v49, %v109_v31  ;;  %v2437_v51 = vadd.f32 %v2429_v47, %v110_v22 }
 0x1c2   :  { %v2459_v52 = vsel %vm2440_vm1, %v2438_v50, -inf  ;;  %v2456_v55 = vsel %vm2440_vm1, %v2437_v51, -inf }
 0x1c3   :  { %2460 = vmax.xlane.f32.xlu2 %v2459_v52  ;;  %2457 = vmax.xlane.f32.xlu1 %v2456_v55 }
 0x1c5   :  { %v2421_v56 = vpop.f32.mrf.mxu3 }
 0x1c6   :  { %v2431_v57 = vmul.f32 0.125, %v2421_v56 }
 0x1c8   :  { %v2439_v53 = vadd.f32 %v2431_v57, %v110_v22 }
 0x1ca   :  { %v2462_v54 = vsel %vm2440_vm1, %v2439_v53, -inf }
 0x1cb   :  { %2463 = vmax.xlane.f32.xlu2 %v2462_v54 }
 0x208   :  { %v2443_v58 = vpop.xlane.xlu1 %2442 }
 0x209   :  { %v2465_v61 = vsub.f32 %v2432_v35, %v2443_v58 }
 0x20b   :  { %v2473_v62 = vmul.f32 1.442695, %v2465_v61 }
 0x20d   :  { %14732 = vpow2.f32 %v2473_v62 }
 0x210   :  { %v2449_v63 = vpop.xlane.xlu0 %2448  ;;  %v2446_v1 = vpop.xlane.xlu1 %2445 }
 0x211   :  { %v2467_v0 = vsub.f32 %v2434_v38, %v2449_v63  ;;  %v2466_v3 = vsub.f32 %v2433_v39, %v2446_v1 }
 0x213   :  { %v2477_v2 = vmul.f32 1.442695, %v2467_v0  ;;  %v15713_v4 = vpop.eup %14732  ;;  %v2475_v59 = vmul.f32 1.442695, %v2466_v3 }
 0x214   :  { %v2489_v5 = vsel %vm2440_vm1, %v15713_v4, 0.0 }
 0x215   :  { %14734 = vpow2.f32 %v2477_v2  ;;  %2490 = vadd.xlane.f32.xlu1 %v2489_v5 }
 0x216   :  { %14736 = vpow2.f32 %v2475_v59 }
 0x218   :  { %v2452_v60 = vpop.xlane.xlu0 %2451 }
 0x219   :  { %v2468_v6 = vsub.f32 %v2435_v44, %v2452_v60 }
 0x21b   :  { %v15717_v7 = vpop.eup %14734  ;;  %v2479_v8 = vmul.f32 1.442695, %v2468_v6 }
 0x21c   :  { %v2495_v9 = vsel %vm2440_vm1, %v15717_v7, 0.0  ;;  %v15721_v10 = vpop.eup %14736 }
 0x21d   :  { %14738 = vpow2.f32 %v2479_v8  ;;  %2496 = vadd.xlane.f32.xlu2 %v2495_v9  ;;  %v2492_v15 = vsel %vm2440_vm1, %v15721_v10, 0.0 }
 0x223   :  { %v15723_v11 = vpop.eup %14738 }
 0x224   :  { %v2498_v14 = vsel %vm2440_vm1, %v15723_v11, 0.0 }
 0x225   :  { %2499 = vadd.xlane.f32.xlu0 %v2498_v14  ;;  %2493 = vadd.xlane.f32.xlu2 %v2492_v15 }
 0x22e   :  { %v2455_v16 = vpop.xlane.xlu0 %2454 }
 0x22f   :  { %v2469_v17 = vsub.f32 %v2436_v28, %v2455_v16 }
 0x231   :  { %v2481_v20 = vmul.f32 1.442695, %v2469_v17 }
 0x233   :  { %14740 = vpow2.f32 %v2481_v20 }
 0x236   :  { %v2461_v21 = vpop.xlane.xlu2 %2460  ;;  %v2458_v25 = vpop.xlane.xlu1 %2457 }
 0x237   :  { %v2471_v24 = vsub.f32 %v2438_v50, %v2461_v21  ;;  %v2470_v27 = vsub.f32 %v2437_v51, %v2458_v25 }
 0x239   :  { %v2485_v26 = vmul.f32 1.442695, %v2471_v24  ;;  %v15729_v30 = vpop.eup %14740  ;;  %v2483_v32 = vmul.f32 1.442695, %v2470_v27 }
 0x23a   :  { %v2501_v31 = vsel %vm2440_vm1, %v15729_v30, 0.0 }
 0x23b   :  { %14742 = vpow2.f32 %v2485_v26  ;;  %2502 = vadd.xlane.f32.xlu2 %v2501_v31 }
 0x23c   :  { %14744 = vpow2.f32 %v2483_v32 }
 0x23e   :  { %v2464_v33 = vpop.xlane.xlu2 %2463 }
 0x23f   :  { %v2472_v34 = vsub.f32 %v2439_v53, %v2464_v33 }
 0x241   :  { %v15733_v35 = vpop.eup %14742  ;;  %v2487_v36 = vmul.f32 1.442695, %v2472_v34 }
 0x242   :  { %v2507_v37 = vsel %vm2440_vm1, %v15733_v35, 0.0  ;;  %v15737_v12 = vpop.eup %14744 }
 0x243   :  { %14746 = vpow2.f32 %v2487_v36  ;;  %2508 = vadd.xlane.f32.xlu0 %v2507_v37  ;;  %v2504_v23 = vsel %vm2440_vm1, %v15737_v12, 0.0 }
 0x249   :  { %v15739_v13 = vpop.eup %14746 }
 0x24a   :  { %v2510_v22 = vsel %vm2440_vm1, %v15739_v13, 0.0 }
 0x24b   :  { %2511 = vadd.xlane.f32.xlu1 %v2510_v22  ;;  %2505 = vadd.xlane.f32.xlu0 %v2504_v23 }
 0x288   :  { %v2491_v38 = vpop.xlane.xlu1 %2490 }
 0x289   :  { %14748 = vrcp.f32 %v2491_v38  ;;  %v2522_v49 = vand.u32 2147483647, %v2491_v38  ;;  %v2524_v47 = vand.u32 2147483648, %v2491_v38  ;;  %vm2518_vm5 = vweird.f32 %v2491_v38 }
 0x28b   :  { %vm2523_vm8 = vcmp.eq.f32.partialorder %v2522_v49, 8.507059e+37  ;;  %v2525_v61 = vor.u32 1.1754944e-38, %v2524_v47 }
 0x28f   :  { %v14749_v39 = vpop.eup %14748 }
 0x290   :  { %v2497_v40 = vpop.xlane.xlu2 %2496  ;;  %v2514_v41 = vmul.f32 %v14749_v39, %v2491_v38  ;;  %vm2519_vm3 = vweird.f32 %v14749_v39 }
 0x291   :  { %14750 = vrcp.f32 %v2497_v40  ;;  %v2554_v46 = vand.u32 2147483648, %v2497_v40  ;;  %vm2548_vm4 = vweird.f32 %v2497_v40  ;;  %v2552_v51 = vand.u32 2147483647, %v2497_v40  ;;  %vm2520_vm7 = vmor %vm2518_vm5, %vm2519_vm3 }
 0x292   :  { %v2515_v42 = vsub.f32 1.0, %v2514_v41 }
 0x293   :  { %v2555_v54 = vor.u32 1.1754944e-38, %v2554_v46  ;;  %vm2553_vm9 = vcmp.eq.f32.partialorder %v2552_v51, 8.507059e+37 }
 0x294   :  { %v2516_v19 = vmul.f32 %v14749_v39, %v2515_v42 }
 0x296   :  { %v2517_v48 = vadd.f32 %v14749_v39, %v2516_v19 }
 0x297   :  { %v14751_v43 = vpop.eup %14750 }
 0x298   :  { %v2544_v44 = vmul.f32 %v14751_v43, %v2497_v40  ;;  %v2500_v45 = vpop.xlane.xlu0 %2499  ;;  %v2494_v18 = vpop.xlane.xlu2 %2493  ;;  %vm2549_vm2 = vweird.f32 %v14751_v43  ;;  %v2521_v53 = vsel %vm2520_vm7, %v14749_v39, %v2517_v48 }
 0x299   :  { %14752 = vrcp.f32 %v2500_v45  ;;  %vm2550_vm6 = vmor %vm2548_vm4, %vm2549_vm2  ;;  %v2567_v0 = vand.u32 2147483647, %v2500_v45  ;;  %v2569_v1 = vand.u32 2147483648, %v2500_v45  ;;  %v2526_v3 = vsel %vm2523_vm8, %v2525_v61, %v2521_v53 }
 0x29a   :  { %v2545_v28 = vsub.f32 1.0, %v2544_v44  ;;  %14754 = vrcp.f32 %v2494_v18  ;;  %v2539_v59 = vand.u32 2147483648, %v2494_v18  ;;  %v2537_v6 = vand.u32 2147483647, %v2494_v18 }
 0x29b   :  { %vm2563_vm12 = vweird.f32 %v2500_v45  ;;  %v2527_v14 = vmul.f32 %v15713_v4, %v2526_v3  ;;  %v2570_v15 = vor.u32 1.1754944e-38, %v2569_v1  ;;  %vm2533_vm14 = vweird.f32 %v2494_v18 }
 0x29c   :  { %v2546_v29 = vmul.f32 %v14751_v43, %v2545_v28  ;;  %vm2568_vm15 = vcmp.eq.f32.partialorder %v2567_v0, 8.507059e+37  ;;  %v2540_v20 = vor.u32 1.1754944e-38, %v2539_v59  ;;  %vm2538_vm3 = vcmp.eq.f32.partialorder %v2537_v6, 8.507059e+37 }
 0x29e   :  { %v2547_v50 = vadd.f32 %v14751_v43, %v2546_v29 }
 0x29f   :  { %v14753_v52 = vpop.eup %14752 }
 0x2a0   :  { %v14755_v55 = vpop.eup %14754  ;;  %v2551_v56 = vsel %vm2550_vm6, %v14751_v43, %v2547_v50  ;;  %v2559_v57 = vmul.f32 %v14753_v52, %v2500_v45  ;;  %vm2564_vm10 = vweird.f32 %v14753_v52 }
 0x2a1   :  { %v2529_v58 = vmul.f32 %v14755_v55, %v2494_v18  ;;  %v2556_v63 = vsel %vm2553_vm9, %v2555_v54, %v2551_v56  ;;  %vm2534_vm11 = vweird.f32 %v14755_v55  ;;  %vm2565_vm13 = vmor %vm2563_vm12, %vm2564_vm10 }
 0x2a2   :  { %v2560_v62 = vsub.f32 1.0, %v2559_v57  ;;  %v2557_v8 = vmul.f32 %v15717_v7, %v2556_v63  ;;  %vm2535_vm2 = vmor %vm2533_vm14, %vm2534_vm11  ;;  %v2633_v7 = vpack.c.bf16 %v2527_v14, %v2527_v14 }
 0x2a3   :  { %v2530_v2 = vsub.f32 1.0, %v2529_v58 }
 0x2a4   :  { %v2561_v5 = vmul.f32 %v14753_v52, %v2560_v62  ;;  %v2635_v25 = vpack.c.bf16 %v2557_v8, %v2557_v8  ;;  %v2651_v37 = vunpack.c.l.b16 %v2633_v7 }
 0x2a5   :  { %v2531_v60 = vmul.f32 %v14755_v55, %v2530_v2 }
 0x2a6   :  { %v2562_v9 = vadd.f32 %v14753_v52, %v2561_v5  ;;  %v2679_v34 = vunpack.c.l.b16 %v2635_v25 }
 0x2a7   :  { %v2532_v16 = vadd.f32 %v14755_v55, %v2531_v60 }
 0x2a8   :  { %v2566_v17 = vsel %vm2565_vm13, %v14753_v52, %v2562_v9 }
 0x2a9   :  { %v2571_v21 = vsel %vm2568_vm15, %v2570_v15, %v2566_v17  ;;  %v2536_v24 = vsel %vm2535_vm2, %v14755_v55, %v2532_v16 }
 0x2aa   :  { %v2572_v26 = vmul.f32 %v15723_v11, %v2571_v21  ;;  %v2541_v27 = vsel %vm2538_vm3, %v2540_v20, %v2536_v24 }
 0x2ab   :  { %v2542_v31 = vmul.f32 %v15721_v10, %v2541_v27 }
 0x2ac   :  { %v2636_v32 = vpack.c.bf16 %v2572_v26, %v2572_v26 }
 0x2ad   :  { %v2634_v33 = vpack.c.bf16 %v2542_v31, %v2542_v31 }
 0x2ae   :  { %v2503_v4 = vpop.xlane.xlu2 %2502  ;;  %v2680_v36 = vunpack.c.l.b16 %v2636_v32 }
 0x2af   :  { %14756 = vrcp.f32 %v2503_v4  ;;  %v2652_v22 = vunpack.c.l.b16 %v2634_v33  ;;  %vm2578_vm5 = vweird.f32 %v2503_v4  ;;  %v2584_v29 = vand.u32 2147483648, %v2503_v4 }
 0x2b0   :  { %v2681_v23 = vpack.c.b16 %v2680_v36, %v2679_v34  ;;  %v2582_v48 = vand.u32 2147483647, %v2503_v4  ;;  %v10694_v36 = vld [vmem:[#allocation2 + $0x30] sm:$0xf] }
 0x2b1   :  { %v2653_v38 = vpack.c.b16 %v2652_v22, %v2651_v37  ;;  %v2585_v56 = vor.u32 1.1754944e-38, %v2584_v29  ;;  %v13963_v37 = vld [vmem:[#allocation2 + $0x34] sm:$0xf0]  ;;  %v13962_v22 = vld [vmem:[#allocation2 + $0x34] sm:$0xf] }
 0x2b2   :  { %10665 = vmatmul.msk.bf16.vlgmr.msrb.gmra.mxu1 %vm2440_vm1, %v2681_v23  ;;  %vm2583_vm10 = vcmp.eq.f32.partialorder %v2582_v48, 8.507059e+37  ;;  %v10696_v23 = vld [vmem:[#allocation2 + $0x38] sm:$0xf0] }
 0x2b3   :  { %10664 = vmatmul.msk.bf16.vlgmr.msrb.gmra.mxu0 %vm2440_vm1, %v2653_v38  ;;  %v10728_v38 = vld [vmem:[#allocation2 + $0x70] sm:$0xf] }
 0x2b5   :  { %v14757_v39 = vpop.eup %14756 }
 0x2b6   :  { %v2509_v11 = vpop.xlane.xlu0 %2508  ;;  %v2574_v40 = vmul.f32 %v14757_v39, %v2503_v4  ;;  %vm2579_vm4 = vweird.f32 %v14757_v39 }
 0x2b7   :  { %14758 = vrcp.f32 %v2509_v11  ;;  %v2612_v46 = vand.u32 2147483647, %v2509_v11  ;;  %v2614_v47 = vand.u32 2147483648, %v2509_v11  ;;  %vm2580_vm7 = vmor %vm2578_vm5, %vm2579_vm4  ;;  %vm2608_vm8 = vweird.f32 %v2509_v11 }
 0x2b8   :  { %v2575_v41 = vsub.f32 1.0, %v2574_v40  ;;  %v13970_v40 = vld [vmem:[#allocation2 + $0x74] sm:$0xf] }
 0x2b9   :  { %vm2613_vm11 = vcmp.eq.f32.partialorder %v2612_v46, 8.507059e+37  ;;  %v2615_v54 = vor.u32 1.1754944e-38, %v2614_v47  ;;  %v10722_v46 = vld [vmem:[#allocation2 + $0x68] sm:$0xf0] }
 0x2ba   :  { %v2576_v42 = vmul.f32 %v14757_v39, %v2575_v41  ;;  %v10730_v41 = vld [vmem:[#allocation2 + $0x78] sm:$0xf0] }
 0x2bc   :  { %v2577_v19 = vadd.f32 %v14757_v39, %v2576_v42  ;;  %v10686_v42 = vld [vmem:[#allocation2 + $0x20] sm:$0xf] }
 0x2bd   :  { %v14759_v10 = vpop.eup %14758 }
 0x2be   :  { %v2604_v43 = vmul.f32 %v14759_v10, %v2509_v11  ;;  %v2506_v44 = vpop.xlane.xlu0 %2505  ;;  %v2512_v45 = vpop.xlane.xlu1 %2511  ;;  %vm2609_vm6 = vweird.f32 %v14759_v10  ;;  %v2581_v52 = vsel %vm2580_vm7, %v14757_v39, %v2577_v19  ;;  %v13971_v39 = vld [vmem:[#allocation2 + $0x74] sm:$0xf0]  ;;  %v10720_v19 = vld [vmem:[#allocation2 + $0x60] sm:$0xf] }
 0x2bf   :  { %14760 = vrcp.f32 %v2506_v44  ;;  %vm2610_vm9 = vmor %vm2608_vm8, %vm2609_vm6  ;;  %v2586_v61 = vsel %vm2583_vm10, %v2585_v56, %v2581_v52  ;;  %v2597_v62 = vand.u32 2147483647, %v2506_v44  ;;  %v2599_v63 = vand.u32 2147483648, %v2506_v44  ;;  %v13958_v52 = vld [vmem:[#allocation2 + $0x14] sm:$0xf] }
 0x2c0   :  { %v2605_v18 = vsub.f32 1.0, %v2604_v43  ;;  %14762 = vrcp.f32 %v2512_v45  ;;  %v2629_v3 = vand.u32 2147483648, %v2512_v45  ;;  %v2627_v59 = vand.u32 2147483647, %v2512_v45  ;;  %v13961_v43 = vld [vmem:[#allocation2 + $0x24] sm:$0xf0] }
 0x2c1   :  { %v2587_v60 = vmul.f32 %v15729_v30, %v2586_v61  ;;  %vm2593_vm14 = vweird.f32 %v2506_v44  ;;  %v2600_v9 = vor.u32 1.1754944e-38, %v2599_v63  ;;  %vm2623_vm2 = vweird.f32 %v2512_v45  ;;  %v10680_v56 = vld [vmem:[#allocation2 + $0x18] sm:$0xf0]  ;;  %v13966_v61 = vld [vmem:[#allocation2 + $0x54] sm:$0xf] }
 0x2c2   :  { %v2606_v28 = vmul.f32 %v14759_v10, %v2605_v18  ;;  %vm2598_vm3 = vcmp.eq.f32.partialorder %v2597_v62, 8.507059e+37  ;;  %v2630_v16 = vor.u32 1.1754944e-38, %v2629_v3  ;;  %vm2628_vm5 = vcmp.eq.f32.partialorder %v2627_v59, 8.507059e+37  ;;  %v10688_v18 = vld [vmem:[#allocation2 + $0x28] sm:$0xf0] }
 0x2c3   :  { %v2637_v21 = vpack.c.bf16 %v2587_v60, %v2587_v60  ;;  %v10729_v11 = vor.u32 %v13971_v39, %v10728_v38  ;;  %v10714_v62 = vld [vmem:[#allocation2 + $0x58] sm:$0xf0]  ;;  %v10704_v59 = vld [vmem:[#allocation2 + $0x40] sm:$0xf]  ;;  %v13965_v60 = vld [vmem:[#allocation2 + $0x44] sm:$0xf0] }
 0x2c4   :  { %v2607_v49 = vadd.f32 %v14759_v10, %v2606_v28  ;;  %v13969_v28 = vld [vmem:[#allocation2 + $0x64] sm:$0xf0]  ;;  %v10717_v63 = vor.u32 %v13966_v61, %v10714_v62  ;;  %v10738_v62 = vld [vmem:[#allocation2 + $0x80] sm:$0xf] }
 0x2c5   :  { %v14761_v50 = vpop.eup %14760  ;;  %v2707_v7 = vunpack.c.l.b16 %v2637_v21  ;;  %2897 = vmatpush.bf16.msra.mxu2 %v10729_v11  ;;  %v10721_v48 = vor.u32 %v13969_v28, %v10720_v19 }
 0x2c6   :  { %v14763_v51 = vpop.eup %14762  ;;  %v2589_v55 = vmul.f32 %v14761_v50, %v2506_v44  ;;  %v2611_v57 = vsel %vm2610_vm9, %v14759_v10, %v2607_v49  ;;  %vm2594_vm12 = vweird.f32 %v14761_v50  ;;  %v10733_v10 = vor.u32 %v13970_v40, %v10730_v41  ;;  %v13960_v44 = vld [vmem:[#allocation2 + $0x24] sm:$0xf]  ;;  %v10754_v40 = vld [vmem:[#allocation2 + $0xa0] sm:$0xf]  ;;  %v13977_v41 = vld [vmem:[#allocation2 + $0xa4] sm:$0xf0] }
 0x2c7   :  { %v2619_v53 = vmul.f32 %v14763_v51, %v2512_v45  ;;  %v2616_v1 = vsel %vm2613_vm11, %v2615_v54, %v2611_v57  ;;  %vm2624_vm13 = vweird.f32 %v14763_v51  ;;  %vm2595_vm15 = vmor %vm2593_vm14, %vm2594_vm12  ;;  %v10687_v45 = vor.u32 %v13961_v43, %v10686_v42  ;;  %v13968_v49 = vld [vmem:[#allocation2 + $0x64] sm:$0xf]  ;;  %v10712_v57 = vld [vmem:[#allocation2 + $0x50] sm:$0xf] }
 0x2c8   :  { %v2590_v58 = vsub.f32 1.0, %v2589_v55  ;;  %v2617_v8 = vmul.f32 %v15733_v35, %v2616_v1  ;;  %vm2625_vm4 = vmor %vm2623_vm2, %vm2624_vm13  ;;  %2911 = vmatpush.bf16.msra.mxu3 %v10733_v10  ;;  %v10691_v29 = vor.u32 %v13960_v44, %v10688_v18  ;;  %v10725_v47 = vor.u32 %v13968_v49, %v10722_v46  ;;  %v13957_v1 = vld [vmem:[#allocation2 + $0x4] sm:$0xf0]  ;;  %v13976_v10 = vld [vmem:[#allocation2 + $0xa4] sm:$0xf] }
 0x2c9   :  { %v2620_v0 = vsub.f32 1.0, %v2619_v53  ;;  %2898 = vmatpush.bf16.msra.mxu2 %v10721_v48  ;;  %v13967_v53 = vld [vmem:[#allocation2 + $0x54] sm:$0xf0]  ;;  %v10683_v54 = vor.u32 %v13958_v52, %v10680_v56  ;;  %v10755_v43 = vor.u32 %v13977_v41, %v10754_v40  ;;  %v10756_v44 = vld [vmem:[#allocation2 + $0xa8] sm:$0xf0] }
 0x2ca   :  { %v2591_v2 = vmul.f32 %v14761_v50, %v2590_v58  ;;  %v2639_v30 = vpack.c.bf16 %v2617_v8, %v2617_v8  ;;  %v10713_v58 = vor.u32 %v13967_v53, %v10712_v57  ;;  %v10705_v8 = vor.u32 %v13965_v60, %v10704_v59  ;;  %v13985_v18 = vld [vmem:[#allocation2 + $0xe4] sm:$0xf0]  ;;  %v10790_v48 = vld [vmem:[#allocation2 + $0xe8] sm:$0xf0]  ;;  %v10746_v46 = vld [vmem:[#allocation2 + $0x90] sm:$0xf] }
 0x2cb   :  { %v2621_v5 = vmul.f32 %v14763_v51, %v2620_v0  ;;  %v10670_v0 = vld [vmem:[#allocation2] sm:$0xf]  ;;  %v10759_v19 = vor.u32 %v13976_v10, %v10756_v44  ;;  %v10748_v52 = vld [vmem:[#allocation2 + $0x98] sm:$0xf0]  ;;  %v13983_v56 = vld [vmem:[#allocation2 + $0xd4] sm:$0xf0] }
 0x2cc   :  { %v2592_v6 = vadd.f32 %v14761_v50, %v2591_v2  ;;  %v2735_v32 = vunpack.c.l.b16 %v2639_v30  ;;  %2912 = vmatpush.bf16.msra.mxu3 %v10725_v47  ;;  %v13956_v2 = vld [vmem:[#allocation2 + $0x4] sm:$0xf]  ;;  %v10671_v3 = vor.u32 %v13957_v1, %v10670_v0  ;;  %v13975_v47 = vld [vmem:[#allocation2 + $0x94] sm:$0xf0] }
 0x2cd   :  { %v2622_v14 = vadd.f32 %v14763_v51, %v2621_v5  ;;  %2899 = vmatpush.bf16.msra.mxu2 %v10713_v58  ;;  %v10672_v5 = vld [vmem:[#allocation2 + $0x8] sm:$0xf0]  ;;  %v10782_v58 = vld [vmem:[#allocation2 + $0xd8] sm:$0xf0]  ;;  %v13972_v0 = vld [vmem:[#allocation2 + $0x84] sm:$0xf] }
 0x2ce   :  { %v2596_v15 = vsel %vm2595_vm15, %v14761_v50, %v2592_v6  ;;  %v10678_v50 = vld [vmem:[#allocation2 + $0x10] sm:$0xf]  ;;  %v10675_v6 = vor.u32 %v13956_v2, %v10672_v5  ;;  %v10740_v2 = vld [vmem:[#allocation2 + $0x88] sm:$0xf0]  ;;  %v13981_v5 = vld [vmem:[#allocation2 + $0xc4] sm:$0xf0] }
 0x2cf   :  { %v2601_v17 = vsel %vm2598_vm3, %v2600_v9, %v2596_v15  ;;  %v2626_v20 = vsel %vm2625_vm4, %v14763_v51, %v2622_v14  ;;  %v13959_v51 = vld [vmem:[#allocation2 + $0x14] sm:$0xf0]  ;;  %v13964_v9 = vld [vmem:[#allocation2 + $0x44] sm:$0xf]  ;;  %v10706_v14 = vld [vmem:[#allocation2 + $0x48] sm:$0xf0]  ;;  %v10743_v59 = vor.u32 %v13972_v0, %v10740_v2 }
 0x2d0   :  { %v2602_v24 = vmul.f32 %v15737_v12, %v2601_v17  ;;  %v2631_v25 = vsel %vm2628_vm5, %v2630_v16, %v2626_v20  ;;  %v10695_v12 = vor.u32 %v13963_v37, %v10694_v36  ;;  %v10679_v55 = vor.u32 %v13959_v51, %v10678_v50  ;;  %2913 = vmatpush.bf16.msra.mxu3 %v10717_v63  ;;  %v13974_v50 = vld [vmem:[#allocation2 + $0x94] sm:$0xf]  ;;  %v13973_v63 = vld [vmem:[#allocation2 + $0x84] sm:$0xf0]  ;;  %v11032_v0 = vld [vmem:[%s19835_s8 + $0x1e0] sm:$0xf0] }
 0x2d1   :  { %v2632_v26 = vmul.f32 %v15739_v13, %v2631_v25  ;;  %v10699_v13 = vor.u32 %v13962_v22, %v10696_v23  ;;  %v10709_v15 = vor.u32 %v13964_v9, %v10706_v14  ;;  %2900 = vmatpush.bf16.msra.mxu2 %v10705_v8  ;;  %v10798_v23 = vld [vmem:[#allocation2 + $0xf8] sm:$0xf0]  ;;  %v10747_v51 = vor.u32 %v13975_v47, %v10746_v46  ;;  %v10774_v8 = vld [vmem:[#allocation2 + $0xc8] sm:$0xf0] }
 0x2d2   :  { %v2638_v27 = vpack.c.bf16 %v2602_v24, %v2602_v24  ;;  %2821 = vmatpush.bf16.msra.mxu0 %v10695_v12  ;;  %v13986_v12 = vld [vmem:[#allocation2 + $0xf4] sm:$0xf]  ;;  %v10751_v57 = vor.u32 %v13974_v50, %v10748_v52  ;;  %v10739_v1 = vor.u32 %v13973_v63, %v10738_v62  ;;  %v14902_v52 = vmov 256.0   ;;  %v14112_v62 = vld [vmem:[%s19835_s8 + $0x3dc] sm:$0xf0] }
 0x2d3   :  { %v2640_v35 = vpack.c.bf16 %v2632_v26, %v2632_v26  ;;  %2835 = vmatpush.bf16.msra.mxu1 %v10699_v13  ;;  %v10762_v26 = vld [vmem:[#allocation2 + $0xb0] sm:$0xf]  ;;  %v10801_v13 = vor.u32 %v13986_v12, %v10798_v23  ;;  %14764 = vrcp.f32 %v14902_v52  ;;  %v14044_v63 = vld [vmem:[%s19835_s8 + $0x1c4] sm:$0xf] }
 0x2d4   :  { %v2708_v31 = vunpack.c.l.b16 %v2638_v27  ;;  %2914 = vmatpush.bf16.msra.mxu3 %v10709_v15  ;;  %v13979_v27 = vld [vmem:[#allocation2 + $0xb4] sm:$0xf0]  ;;  %v11035_v2 = vor.u32 %v14044_v63, %v11032_v0  ;;  %v10904_v52 = vld [vmem:[%s19835_s8 + $0xe0] sm:$0xf0] }
 0x2d5   :  { %v2736_v4 = vunpack.c.l.b16 %v2640_v35  ;;  %v13978_v35 = vld [vmem:[#allocation2 + $0xb4] sm:$0xf] }
 0x2d6   :  { %v2709_v33 = vpack.c.b16 %v2708_v31, %v2707_v7  ;;  %2822 = vmatpush.bf16.msra.mxu0 %v10687_v45  ;;  %v10763_v31 = vor.u32 %v13979_v27, %v10762_v26  ;;  %v10788_v45 = vld [vmem:[#allocation2 + $0xe0] sm:$0xf] }
 0x2d7   :  { %v2737_v34 = vpack.c.b16 %v2736_v4, %v2735_v32  ;;  %2836 = vmatpush.bf16.msra.mxu1 %v10691_v29  ;;  %v10764_v32 = vld [vmem:[#allocation2 + $0xb8] sm:$0xf0]  ;;  %v10796_v4 = vld [vmem:[#allocation2 + $0xf0] sm:$0xf]  ;;  %v10789_v28 = vor.u32 %v13985_v18, %v10788_v45  ;;  %v13984_v29 = vld [vmem:[#allocation2 + $0xe4] sm:$0xf] }
 0x2d8   :  { %10666 = vmatmul.msk.bf16.vlgmr.msrb.gmra.mxu2 %vm2440_vm1, %v2709_v33  ;;  %v13987_v33 = vld [vmem:[#allocation2 + $0xf4] sm:$0xf0]  ;;  %v10767_v37 = vor.u32 %v13978_v35, %v10764_v32  ;;  %v10793_v49 = vor.u32 %v13984_v29, %v10790_v48 }
 0x2d9   :  { %10667 = vmatmul.msk.bf16.vlgmr.msrb.gmra.mxu3 %vm2440_vm1, %v2737_v34  ;;  %v10797_v22 = vor.u32 %v13987_v33, %v10796_v4 }
 0x2da   :  { %2823 = vmatpush.bf16.msra.mxu0 %v10679_v55  ;;  %3063 = vmatpush.bf16.msrb.mxu3 %v10801_v13  ;;  %v10780_v55 = vld [vmem:[#allocation2 + $0xd0] sm:$0xf] }
 0x2db   :  { %2837 = vmatpush.bf16.msra.mxu1 %v10683_v54  ;;  %3049 = vmatpush.bf16.msrb.mxu2 %v10797_v22  ;;  %v10781_v53 = vor.u32 %v13983_v56, %v10780_v55  ;;  %v13982_v54 = vld [vmem:[#allocation2 + $0xd4] sm:$0xf]  ;;  %v15777_v55 = vpop.eup %14764 }
 0x2dc   :  { %v10785_v61 = vor.u32 %v13982_v54, %v10782_v58  ;;  %v3092_v56 = vmul.f32 256.0, %v15777_v55  ;;  %v14048_v54 = vld [vmem:[%s19835_s8 + $0x1dc] sm:$0xf0]  ;;  %vm3096_vm6 = vweird.f32 %v15777_v55 }
 0x2dd   :  { %v11286_v58 = vld [vmem:[%s19835_s8 + $0x3c0] sm:$0xf] }
 0x2de   :  { %2824 = vmatpush.bf16.msra.mxu0 %v10671_v3  ;;  %3064 = vmatpush.bf16.msrb.mxu3 %v10793_v49  ;;  %v10772_v3 = vld [vmem:[#allocation2 + $0xc0] sm:$0xf] }
 0x2df   :  { %2838 = vmatpush.bf16.msra.mxu1 %v10675_v6  ;;  %3050 = vmatpush.bf16.msrb.mxu2 %v10789_v28  ;;  %v10773_v60 = vor.u32 %v13981_v5, %v10772_v3  ;;  %v13980_v6 = vld [vmem:[#allocation2 + $0xc4] sm:$0xf] }
 0x2e0   :  { %v10777_v9 = vor.u32 %v13980_v6, %v10774_v8  ;;  %v14108_v3 = vld [vmem:[%s19835_s8 + $0x3c4] sm:$0xf]  ;;  %v14040_v6 = vld [vmem:[%s19835_s8 + $0x19c] sm:$0xf0] }
 0x2e1   :  { %v11288_v5 = vld [vmem:[%s19835_s8 + $0x3e0] sm:$0xf0]  ;;  %v11254_v8 = vld [vmem:[%s19835_s8 + $0x380] sm:$0xf] }
 0x2e2   :  { %2973 = vmatpush.bf16.msrb.mxu0 %v10763_v31  ;;  %3065 = vmatpush.bf16.msrb.mxu3 %v10785_v61 }
 0x2e3   :  { %2987 = vmatpush.bf16.msrb.mxu1 %v10767_v37  ;;  %3051 = vmatpush.bf16.msrb.mxu2 %v10781_v53  ;;  %v11030_v53 = vld [vmem:[%s19835_s8 + $0x1c0] sm:$0xf] }
 0x2e4   :  { %v11031_v61 = vor.u32 %v14048_v54, %v11030_v53 }
 0x2e6   :  { %2974 = vmatpush.bf16.msrb.mxu0 %v10755_v43  ;;  %3066 = vmatpush.bf16.msrb.mxu3 %v10777_v9  ;;  %v14104_v9 = vld [vmem:[%s19835_s8 + $0x39c] sm:$0xf0] }
 0x2e7   :  { %2988 = vmatpush.bf16.msrb.mxu1 %v10759_v19  ;;  %3052 = vmatpush.bf16.msrb.mxu2 %v10773_v60  ;;  %v11291_v60 = vor.u32 %v14108_v3, %v11288_v5 }
 0x2ea   :  { %2975 = vmatpush.bf16.msrb.mxu0 %v10747_v51 }
 0x2eb   :  { %2989 = vmatpush.bf16.msrb.mxu1 %v10751_v57  ;;  %v3093_v57 = vsub.f32 1.0, %v3092_v56  ;;  %v14076_v56 = vld [vmem:[%s19835_s8 + $0x2c4] sm:$0xf] }
 0x2ee   :  { %2976 = vmatpush.bf16.msrb.mxu0 %v10739_v1  ;;  %v11287_v1 = vor.u32 %v14112_v62, %v11286_v58 }
 0x2ef   :  { %2990 = vmatpush.bf16.msrb.mxu1 %v10743_v59  ;;  %v10998_v59 = vld [vmem:[%s19835_s8 + $0x180] sm:$0xf] }
 0x32f   :  { %v2700_v16 = vpop.f32.mrf.mxu1 }
 0x330   :  { %v2672_v17 = vpop.f32.mrf.mxu0  ;;  %v2763_v20 = vpack.c.bf16 %v2700_v16, %v2700_v16 }
 0x331   :  { %v2761_v21 = vpack.c.bf16 %v2672_v17, %v2672_v17 }
 0x332   :  { %v2847_v34 = vunpack.c.l.b16 %v2763_v20 }
 0x333   :  { %v2771_v38 = vunpack.c.l.b16 %v2761_v21 }
 0x337   :  { %v2702_v24 = vpop.f32.mrf.mxu1 }
 0x338   :  { %v2674_v25 = vpop.f32.mrf.mxu0  ;;  %v2764_v30 = vpack.c.bf16 %v2702_v24, %v2702_v24 }
 0x339   :  { %v2762_v7 = vpack.c.bf16 %v2674_v25, %v2674_v25 }
 0x33a   :  { %v2848_v36 = vunpack.c.l.b16 %v2764_v30 }
 0x33b   :  { %v2772_v39 = vunpack.c.l.b16 %v2762_v7 }
 0x33c   :  { %v2849_v11 = vpack.c.b16 %v2848_v36, %v2847_v34 }
 0x33d   :  { %v2773_v42 = vpack.c.b16 %v2772_v39, %v2771_v38 }
 0x33e   :  { %10734 = vmatmul.msk.bf16.vlgmr.msra.gmra.mxu2 %vm2313_vm0, %v2849_v11  ;;  %10735 = vmatmul.msk.bf16.vlgmr.msra.gmra.mxu3 %vm2313_vm0, %v2849_v11 }
 0x33f   :  { %10700 = vmatmul.msk.bf16.vlgmr.msra.gmra.mxu0 %vm2313_vm0, %v2773_v42  ;;  %10701 = vmatmul.msk.bf16.vlgmr.msra.gmra.mxu1 %vm2313_vm0, %v2773_v42 }
 0x340   :  { %3806 = vmatpush.bf16.msra.mxu0 %v11031_v61  ;;  %3820 = vmatpush.bf16.msra.mxu1 %v11287_v1 }
 0x341   :  { %3834 = vmatpush.bf16.msra.mxu2 %v11035_v2  ;;  %3848 = vmatpush.bf16.msra.mxu3 %v11291_v60 }
 0x35b   :  { %v2728_v14 = vpop.f32.mrf.mxu2 }
 0x35c   :  { %v2756_v15 = vpop.f32.mrf.mxu3  ;;  %v2765_v16 = vpack.c.bf16 %v2728_v14, %v2728_v14  ;;  %v10999_v14 = vor.u32 %v14040_v6, %v10998_v59 }
 0x35d   :  { %v2767_v17 = vpack.c.bf16 %v2756_v15, %v2756_v15  ;;  %v11255_v15 = vor.u32 %v14104_v9, %v11254_v8  ;;  %v10870_v9 = vld [vmem:[%s19835_s8 + $0x80] sm:$0xf] }
 0x35e   :  { %v2923_v30 = vunpack.c.l.b16 %v2765_v16  ;;  %v14036_v16 = vld [vmem:[%s19835_s8 + $0x184] sm:$0xf]  ;;  %3807 = vmatpush.bf16.msra.mxu0 %v10999_v14 }
 0x35f   :  { %v2999_v27 = vunpack.c.l.b16 %v2767_v17  ;;  %v11000_v17 = vld [vmem:[%s19835_s8 + $0x1a0] sm:$0xf0]  ;;  %3821 = vmatpush.bf16.msra.mxu1 %v11255_v15  ;;  %v14072_v15 = vld [vmem:[%s19835_s8 + $0x29c] sm:$0xf0] }
 0x363   :  { %v2730_v20 = vpop.f32.mrf.mxu2 }
 0x364   :  { %v2766_v21 = vpack.c.bf16 %v2730_v20, %v2730_v20  ;;  %v2758_v24 = vpop.f32.mrf.mxu3  ;;  %v14100_v20 = vld [vmem:[%s19835_s8 + $0x384] sm:$0xf] }
 0x365   :  { %v2768_v25 = vpack.c.bf16 %v2758_v24, %v2758_v24  ;;  %v11003_v24 = vor.u32 %v14036_v16, %v11000_v17  ;;  %v14004_v16 = vld [vmem:[%s19835_s8 + $0x84] sm:$0xf] }
 0x366   :  { %v2924_v26 = vunpack.c.l.b16 %v2766_v21  ;;  %v3094_v21 = vmul.f32 %v15777_v55, %v3093_v57  ;;  %v10872_v17 = vld [vmem:[%s19835_s8 + $0xa0] sm:$0xf0] }
 0x367   :  { %v3000_v35 = vunpack.c.l.b16 %v2768_v25  ;;  %v11256_v25 = vld [vmem:[%s19835_s8 + $0x3a0] sm:$0xf0]  ;;  %3835 = vmatpush.bf16.msra.mxu2 %v11003_v24 }
 0x368   :  { %v2925_v7 = vpack.c.b16 %v2924_v26, %v2923_v30  ;;  %v10966_v30 = vld [vmem:[%s19835_s8 + $0x140] sm:$0xf]  ;;  %v14068_v24 = vld [vmem:[%s19835_s8 + $0x284] sm:$0xf] }
 0x369   :  { %v3001_v31 = vpack.c.b16 %v3000_v35, %v2999_v27  ;;  %v14032_v26 = vld [vmem:[%s19835_s8 + $0x15c] sm:$0xf0]  ;;  %v11259_v27 = vor.u32 %v14100_v20, %v11256_v25  ;;  %v11128_v25 = vld [vmem:[%s19835_s8 + $0x2a0] sm:$0xf0] }
 0x36a   :  { %10768 = vmatmul.msk.bf16.vlgmr.msrb.gmra.mxu0 %vm2313_vm0, %v2925_v7  ;;  %10769 = vmatmul.msk.bf16.vlgmr.msrb.gmra.mxu1 %vm2313_vm0, %v2925_v7  ;;  %v11222_v35 = vld [vmem:[%s19835_s8 + $0x340] sm:$0xf] }
 0x36b   :  { %10802 = vmatmul.msk.bf16.vlgmr.msrb.gmra.mxu2 %vm2313_vm0, %v3001_v31  ;;  %10803 = vmatmul.msk.bf16.vlgmr.msrb.gmra.mxu3 %vm2313_vm0, %v3001_v31  ;;  %v14096_v7 = vld [vmem:[%s19835_s8 + $0x35c] sm:$0xf0]  ;;  %v14028_v31 = vld [vmem:[%s19835_s8 + $0x144] sm:$0xf] }
 0x36c   :  { %3849 = vmatpush.bf16.msra.mxu3 %v11259_v27  ;;  %v14000_v27 = vld [vmem:[%s19835_s8 + $0x5c] sm:$0xf0] }
 0x3bc   :  { %v2826_v32 = vpop.f32.mrf.mxu0  ;;  %v2840_v4 = vpop.f32.mrf.mxu1 }
 0x3c1   :  { %v2902_v33 = vpop.f32.mrf.mxu2  ;;  %v2916_v34 = vpop.f32.mrf.mxu3 }
 0x3c2   :  { %v3073_v39 = vadd.f32 %v2902_v33, %v2826_v32  ;;  %v3074_v13 = vadd.f32 %v2916_v34, %v2840_v4  ;;  %v10967_v32 = vor.u32 %v14032_v26, %v10966_v30  ;;  %v10968_v4 = vld [vmem:[%s19835_s8 + $0x160] sm:$0xf0]  ;;  %v11131_v30 = vor.u32 %v14068_v24, %v11128_v25  ;;  %v10838_v26 = vld [vmem:[%s19835_s8 + $0x40] sm:$0xf]  ;;  %v14093_v25 = vld [vmem:[%s19835_s8 + $0x34c] sm:$0xf] }
 0x3c3   :  { %v14092_v33 = vld [vmem:[%s19835_s8 + $0x344] sm:$0xf] }
 0x3c4   :  { %v2828_v36 = vpop.f32.mrf.mxu0  ;;  %v2842_v37 = vpop.f32.mrf.mxu1  ;;  %v11224_v34 = vld [vmem:[%s19835_s8 + $0x360] sm:$0xf0]  ;;  %3808 = vmatpush.bf16.msra.mxu0 %v10967_v32 }
 0x3c5   :  { %v13996_v32 = vld [vmem:[%s19835_s8 + $0x44] sm:$0xf] }
 0x3c9   :  { %v2904_v22 = vpop.f32.mrf.mxu2  ;;  %v2918_v12 = vpop.f32.mrf.mxu3 }
 0x3ca   :  { %v3075_v19 = vadd.f32 %v2904_v22, %v2828_v36  ;;  %v3076_v28 = vadd.f32 %v2918_v12, %v2842_v37  ;;  %v11223_v36 = vor.u32 %v14096_v7, %v11222_v35  ;;  %v10971_v37 = vor.u32 %v14028_v31, %v10968_v4  ;;  %v10934_v22 = vld [vmem:[%s19835_s8 + $0x100] sm:$0xf]  ;;  %v10840_v4 = vld [vmem:[%s19835_s8 + $0x60] sm:$0xf0] }
 0x3cb   :  { %v14024_v12 = vld [vmem:[%s19835_s8 + $0x11c] sm:$0xf0]  ;;  %v10839_v7 = vor.u32 %v14000_v27, %v10838_v26  ;;  %v10942_v27 = vld [vmem:[%s19835_s8 + $0x108] sm:$0xf] }
 0x3cc   :  { %3822 = vmatpush.bf16.msra.mxu1 %v11223_v36  ;;  %3836 = vmatpush.bf16.msra.mxu2 %v10971_v37  ;;  %v11094_v35 = vld [vmem:[%s19835_s8 + $0x240] sm:$0xf]  ;;  %v14060_v36 = vld [vmem:[%s19835_s8 + $0x244] sm:$0xf] }
 0x3cd   :  { %v14064_v31 = vld [vmem:[%s19835_s8 + $0x25c] sm:$0xf0]  ;;  %v11096_v37 = vld [vmem:[%s19835_s8 + $0x260] sm:$0xf0] }
 0x3e7   :  { %v2978_v23 = vpop.f32.mrf.mxu0  ;;  %v2992_v38 = vpop.f32.mrf.mxu1 }
 0x3e8   :  { %v3077_v11 = vadd.f32 %v3073_v39, %v2978_v23  ;;  %v3078_v40 = vadd.f32 %v3074_v13, %v2992_v38  ;;  %v11190_v23 = vld [vmem:[%s19835_s8 + $0x300] sm:$0xf]  ;;  %v3095_v38 = vadd.f32 %v15777_v55, %v3094_v21  ;;  %v11227_v39 = vor.u32 %v14092_v33, %v11224_v34 }
 0x3e9   :  { %v14088_v13 = vld [vmem:[%s19835_s8 + $0x31c] sm:$0xf0]  ;;  %v10875_v21 = vor.u32 %v14004_v16, %v10872_v17  ;;  %v11095_v33 = vor.u32 %v14064_v31, %v11094_v35  ;;  %v10843_v34 = vor.u32 %v13996_v32, %v10840_v4  ;;  %v14097_v16 = vld [vmem:[%s19835_s8 + $0x364] sm:$0xf0]  ;;  %v14029_v17 = vld [vmem:[%s19835_s8 + $0x14c] sm:$0xf] }
 0x3ea   :  { %3850 = vmatpush.bf16.msra.mxu3 %v11227_v39  ;;  %v14025_v35 = vld [vmem:[%s19835_s8 + $0x124] sm:$0xf0]  ;;  %v14021_v4 = vld [vmem:[%s19835_s8 + $0x10c] sm:$0xf] }
 0x3eb   :  { %v10943_v31 = vor.u32 %v14025_v35, %v10942_v27  ;;  %v14089_v32 = vld [vmem:[%s19835_s8 + $0x324] sm:$0xf0] }
 0x3ee   :  { %v3054_v41 = vpop.f32.mrf.mxu2  ;;  %v3068_v10 = vpop.f32.mrf.mxu3 }
 0x3ef   :  { %v15765_v42 = vadd.f32 %v3077_v11, %v3054_v41  ;;  %v15767_v43 = vadd.f32 %v3078_v40, %v3068_v10  ;;  %v2980_v45 = vpop.f32.mrf.mxu0  ;;  %v2994_v18 = vpop.f32.mrf.mxu1  ;;  %v14020_v11 = vld [vmem:[%s19835_s8 + $0x104] sm:$0xf] }
 0x3f0   :  { %v3079_v29 = vadd.f32 %v3075_v19, %v2980_v45  ;;  %v3080_v48 = vadd.f32 %v3076_v28, %v2994_v18  ;;  %v10936_v40 = vld [vmem:[%s19835_s8 + $0x120] sm:$0xf0]  ;;  %v11191_v45 = vor.u32 %v14088_v13, %v11190_v23  ;;  %v10902_v19 = vld [vmem:[%s19835_s8 + $0xc0] sm:$0xf] }
 0x3f1   :  { %v3085_v44 = vadd.f32 %v15767_v43, %v15765_v42  ;;  %v14084_v41 = vld [vmem:[%s19835_s8 + $0x304] sm:$0xf]  ;;  %v10939_v18 = vor.u32 %v14020_v11, %v10936_v40  ;;  %v14016_v28 = vld [vmem:[%s19835_s8 + $0xdc] sm:$0xf0] }
 0x3f2   :  { %v11192_v10 = vld [vmem:[%s19835_s8 + $0x320] sm:$0xf0]  ;;  %v10903_v53 = vor.u32 %v14016_v28, %v10902_v19  ;;  %3823 = vmatpush.bf16.msra.mxu1 %v11191_v45  ;;  %v13992_v23 = vld [vmem:[%s19835_s8 + $0x1c] sm:$0xf0]  ;;  %v14049_v28 = vld [vmem:[%s19835_s8 + $0x1e4] sm:$0xf0] }
 0x3f3   :  { %3086 = vadd.xlane.f32.xlu1 %v3085_v44  ;;  %v10935_v44 = vor.u32 %v14024_v12, %v10934_v22  ;;  %3837 = vmatpush.bf16.msra.mxu2 %v10939_v18  ;;  %v11099_v22 = vor.u32 %v14060_v36, %v11096_v37  ;;  %v10806_v12 = vld [vmem:[%s19835_s8] sm:$0xf]  ;;  %v13988_v11 = vld [vmem:[%s19835_s8 + $0x4] sm:$0xf]  ;;  %v11038_v18 = vld [vmem:[%s19835_s8 + $0x1c8] sm:$0xf] }
 0x3f4   :  { %v10807_v39 = vor.u32 %v13992_v23, %v10806_v12  ;;  %v14056_v13 = vld [vmem:[%s19835_s8 + $0x21c] sm:$0xf0]  ;;  %v10808_v40 = vld [vmem:[%s19835_s8 + $0x20] sm:$0xf0]  ;;  %v14085_v37 = vld [vmem:[%s19835_s8 + $0x30c] sm:$0xf] }
 0x3f5   :  { %3809 = vmatpush.bf16.msra.mxu0 %v10935_v44  ;;  %v14052_v44 = vld [vmem:[%s19835_s8 + $0x204] sm:$0xf]  ;;  %v10910_v23 = vld [vmem:[%s19835_s8 + $0xc8] sm:$0xf] }
 0x3f6   :  { %v3056_v49 = vpop.f32.mrf.mxu2  ;;  %v3070_v46 = vpop.f32.mrf.mxu3  ;;  %v11064_v45 = vld [vmem:[%s19835_s8 + $0x220] sm:$0xf0] }
 0x3f7   :  { %v15771_v47 = vadd.f32 %v3079_v29, %v3056_v49  ;;  %v15773_v50 = vadd.f32 %v3080_v48, %v3070_v46  ;;  %v11158_v29 = vld [vmem:[%s19835_s8 + $0x2c0] sm:$0xf]  ;;  %v15889_v48 = vsel %vm3096_vm6, %v15777_v55, %v3095_v38  ;;  %v11195_v49 = vor.u32 %v14084_v41, %v11192_v10  ;;  %v11160_v55 = vld [vmem:[%s19835_s8 + $0x2e0] sm:$0xf0] }
 0x3f8   :  { %v14080_v46 = vld [vmem:[%s19835_s8 + $0x2dc] sm:$0xf0]  ;;  %v11163_v62 = vor.u32 %v14076_v56, %v11160_v55  ;;  %v10811_v10 = vor.u32 %v13988_v11, %v10808_v40  ;;  %v11067_v19 = vor.u32 %v14052_v44, %v11064_v45  ;;  %v11040_v56 = vld [vmem:[%s19835_s8 + $0x1e8] sm:$0xf0]  ;;  %v14081_v11 = vld [vmem:[%s19835_s8 + $0x2e4] sm:$0xf0] }
 0x3f9   :  { %v3088_v51 = vadd.f32 %v15773_v50, %v15771_v47  ;;  %v11159_v58 = vor.u32 %v14080_v46, %v11158_v29  ;;  %3851 = vmatpush.bf16.msra.mxu3 %v11195_v49  ;;  %3810 = vmatpush.bf16.msra.mxu0 %v10903_v53  ;;  %v11062_v38 = vld [vmem:[%s19835_s8 + $0x200] sm:$0xf]  ;;  %v11294_v29 = vld [vmem:[%s19835_s8 + $0x3c8] sm:$0xf]  ;;  %v11039_v46 = vor.u32 %v14049_v28, %v11038_v18  ;;  %v14109_v55 = vld [vmem:[%s19835_s8 + $0x3cc] sm:$0xf] }
 0x3fa   :  { %v11063_v41 = vor.u32 %v14056_v13, %v11062_v38  ;;  %v14113_v49 = vld [vmem:[%s19835_s8 + $0x3e4] sm:$0xf0]  ;;  %v11296_v53 = vld [vmem:[%s19835_s8 + $0x3e8] sm:$0xf0] }
 0x3fb   :  { %3089 = vadd.xlane.f32.xlu2 %v3088_v51  ;;  %v14012_v51 = vld [vmem:[%s19835_s8 + $0xc4] sm:$0xf]  ;;  %3824 = vmatpush.bf16.msra.mxu1 %v11159_v58  ;;  %v14041_v58 = vld [vmem:[%s19835_s8 + $0x1a4] sm:$0xf0]  ;;  %v14013_v40 = vld [vmem:[%s19835_s8 + $0xcc] sm:$0xf] }
 0x3fc   :  { %v10907_v61 = vor.u32 %v14012_v51, %v10904_v52  ;;  %v11295_v51 = vor.u32 %v14113_v49, %v11294_v29  ;;  %v14045_v52 = vld [vmem:[%s19835_s8 + $0x1cc] sm:$0xf]  ;;  %v14017_v38 = vld [vmem:[%s19835_s8 + $0xe4] sm:$0xf0] }
 0x3fd   :  { %3852 = vmatpush.bf16.msra.mxu3 %v11163_v62  ;;  %v10911_v13 = vor.u32 %v14017_v38, %v10910_v23  ;;  %v14077_v45 = vld [vmem:[%s19835_s8 + $0x2cc] sm:$0xf]  ;;  %v10878_v28 = vld [vmem:[%s19835_s8 + $0x88] sm:$0xf] }
 0x3fe   :  { %3838 = vmatpush.bf16.msra.mxu2 %v10907_v61  ;;  %v11299_v61 = vor.u32 %v14109_v55, %v11296_v53  ;;  %v11168_v18 = vld [vmem:[%s19835_s8 + $0x2e8] sm:$0xf0]  ;;  %v14009_v29 = vld [vmem:[%s19835_s8 + $0xa4] sm:$0xf0] }
 0x3ff   :  { %v11134_v49 = vld [vmem:[%s19835_s8 + $0x288] sm:$0xf]  ;;  %v10880_v55 = vld [vmem:[%s19835_s8 + $0xa8] sm:$0xf0] }
 0x401   :  { %3853 = vmatpush.bf16.msra.mxu3 %v11131_v30  ;;  %v11232_v30 = vld [vmem:[%s19835_s8 + $0x368] sm:$0xf0] }
 0x402   :  { %3839 = vmatpush.bf16.msra.mxu2 %v10875_v21  ;;  %v11235_v26 = vor.u32 %v14093_v25, %v11232_v30  ;;  %v14057_v25 = vld [vmem:[%s19835_s8 + $0x224] sm:$0xf0]  ;;  %v13989_v30 = vld [vmem:[%s19835_s8 + $0xc] sm:$0xf] }
 0x405   :  { %3854 = vmatpush.bf16.msra.mxu3 %v11099_v22  ;;  %v11200_v22 = vld [vmem:[%s19835_s8 + $0x328] sm:$0xf0] }
 0x406   :  { %3840 = vmatpush.bf16.msra.mxu2 %v10843_v34  ;;  %v11203_v12 = vor.u32 %v14085_v37, %v11200_v22 }
 0x409   :  { %3855 = vmatpush.bf16.msra.mxu3 %v11067_v19  ;;  %v11171_v19 = vor.u32 %v14077_v45, %v11168_v18 }
 0x40a   :  { %3841 = vmatpush.bf16.msra.mxu2 %v10811_v10 }
 0x40d   :  { %3904 = vmatpush.bf16.msrb.mxu3 %v11299_v61  ;;  %v11136_v61 = vld [vmem:[%s19835_s8 + $0x2a8] sm:$0xf0] }
 0x466   :  { %v3087_v57 = vpop.xlane.xlu1 %3086 }
 0x467   :  { %v3098_v54 = vmul.f32 %v15889_v48, %v3087_v57  ;;  %v11043_v57 = vor.u32 %v14045_v52, %v11040_v56  ;;  %v14073_v52 = vld [vmem:[%s19835_s8 + $0x2a4] sm:$0xf0]  ;;  %v14005_v56 = vld [vmem:[%s19835_s8 + $0x8c] sm:$0xf] }
 0x468   :  { %v11135_v53 = vor.u32 %v14073_v52, %v11134_v49 }
 0x469   :  { %v15908_v63 = vsub.f32 %v15765_v42, %v3098_v54  ;;  %v15911_v0 = vsub.f32 %v15767_v43, %v3098_v54  ;;  %v11006_v54 = vld [vmem:[%s19835_s8 + $0x188] sm:$0xf]  ;;  %3890 = vmatpush.bf16.msrb.mxu2 %v11043_v57 }
 0x46a   :  { %v11007_v62 = vor.u32 %v14041_v58, %v11006_v54  ;;  %v10883_v54 = vor.u32 %v14005_v56, %v10880_v55  ;;  %v14069_v58 = vld [vmem:[%s19835_s8 + $0x28c] sm:$0xf] }
 0x46b   :  { %v3104_v1 = vmul.f32 %v15908_v63, %v15908_v63  ;;  %v3105_v2 = vmul.f32 %v15911_v0, %v15911_v0 }
 0x46d   :  { %v3108_v3 = vadd.f32 %v3105_v2, %v3104_v1  ;;  %v11262_v1 = vld [vmem:[%s19835_s8 + $0x388] sm:$0xf] }
 0x46e   :  { %v3090_v5 = vpop.xlane.xlu2 %3089  ;;  %v14105_v2 = vld [vmem:[%s19835_s8 + $0x3a4] sm:$0xf0] }
 0x46f   :  { %v3099_v59 = vmul.f32 %v15889_v48, %v3090_v5  ;;  %3109 = vadd.xlane.f32.xlu0 %v3108_v3  ;;  %v14037_v3 = vld [vmem:[%s19835_s8 + $0x18c] sm:$0xf]  ;;  %v11263_v5 = vor.u32 %v14105_v2, %v11262_v1  ;;  %v10846_v2 = vld [vmem:[%s19835_s8 + $0x48] sm:$0xf] }
 0x471   :  { %v15919_v42 = vsub.f32 %v15771_v47, %v3099_v59  ;;  %v15922_v43 = vsub.f32 %v15773_v50, %v3099_v59  ;;  %v14008_v47 = vld [vmem:[%s19835_s8 + $0x9c] sm:$0xf0]  ;;  %v11008_v59 = vld [vmem:[%s19835_s8 + $0x1a8] sm:$0xf0] }
 0x472   :  { %v11126_v50 = vld [vmem:[%s19835_s8 + $0x280] sm:$0xf]  ;;  %v10871_v14 = vor.u32 %v14008_v47, %v10870_v9  ;;  %v10974_v47 = vld [vmem:[%s19835_s8 + $0x148] sm:$0xf] }
 0x473   :  { %v3106_v60 = vmul.f32 %v15919_v42, %v15919_v42  ;;  %v3107_v6 = vmul.f32 %v15922_v43, %v15922_v43  ;;  %v11127_v20 = vor.u32 %v14072_v15, %v11126_v50  ;;  %v14033_v50 = vld [vmem:[%s19835_s8 + $0x164] sm:$0xf0] }
 0x474   :  { %3811 = vmatpush.bf16.msra.mxu0 %v10871_v14  ;;  %v11230_v14 = vld [vmem:[%s19835_s8 + $0x348] sm:$0xf]  ;;  %v10975_v15 = vor.u32 %v14033_v50, %v10974_v47  ;;  %v14061_v47 = vld [vmem:[%s19835_s8 + $0x24c] sm:$0xf] }
 0x475   :  { %v3111_v8 = vadd.f32 %v3107_v6, %v3106_v60  ;;  %3825 = vmatpush.bf16.msra.mxu1 %v11127_v20  ;;  %v14101_v60 = vld [vmem:[%s19835_s8 + $0x38c] sm:$0xf]  ;;  %v11231_v21 = vor.u32 %v14097_v16, %v11230_v14  ;;  %v10814_v16 = vld [vmem:[%s19835_s8 + $0x8] sm:$0xf] }
 0x476   :  { %v11264_v6 = vld [vmem:[%s19835_s8 + $0x3a8] sm:$0xf0] }
 0x477   :  { %3112 = vadd.xlane.f32.xlu1 %v3111_v8  ;;  %v11011_v8 = vor.u32 %v14037_v3, %v11008_v59  ;;  %v11267_v9 = vor.u32 %v14101_v60, %v11264_v6  ;;  %v10976_v20 = vld [vmem:[%s19835_s8 + $0x168] sm:$0xf0]  ;;  %v14001_v3 = vld [vmem:[%s19835_s8 + $0x64] sm:$0xf0] }
 0x478   :  { %3812 = vmatpush.bf16.msra.mxu0 %v10839_v7  ;;  %v10979_v24 = vor.u32 %v14029_v17, %v10976_v20  ;;  %v11198_v7 = vld [vmem:[%s19835_s8 + $0x308] sm:$0xf]  ;;  %v13997_v6 = vld [vmem:[%s19835_s8 + $0x4c] sm:$0xf] }
 0x479   :  { %3826 = vmatpush.bf16.msra.mxu1 %v11095_v33  ;;  %3891 = vmatpush.bf16.msrb.mxu2 %v11011_v8  ;;  %v10944_v33 = vld [vmem:[%s19835_s8 + $0x128] sm:$0xf0]  ;;  %v11199_v34 = vor.u32 %v14089_v32, %v11198_v7  ;;  %v11102_v59 = vld [vmem:[%s19835_s8 + $0x248] sm:$0xf] }
 0x47a   :  { %3905 = vmatpush.bf16.msrb.mxu3 %v11267_v9  ;;  %v10947_v36 = vor.u32 %v14021_v4, %v10944_v33  ;;  %v14065_v60 = vld [vmem:[%s19835_s8 + $0x264] sm:$0xf0]  ;;  %v10848_v9 = vld [vmem:[%s19835_s8 + $0x68] sm:$0xf0] }
 0x47b   :  { %v11103_v8 = vor.u32 %v14065_v60, %v11102_v59  ;;  %v11104_v50 = vld [vmem:[%s19835_s8 + $0x268] sm:$0xf0]  ;;  %v10851_v14 = vor.u32 %v13997_v6, %v10848_v9  ;;  %v13993_v17 = vld [vmem:[%s19835_s8 + $0x24] sm:$0xf0]  ;;  %v14816_v6 = vld [vmem:[%s19864_s4 + $0x10] sm:$0xff] }
 0x47c   :  { %3813 = vmatpush.bf16.msra.mxu0 %v10807_v39  ;;  %v11166_v39 = vld [vmem:[%s19835_s8 + $0x2c8] sm:$0xf]  ;;  %v11072_v32 = vld [vmem:[%s19835_s8 + $0x228] sm:$0xf0]  ;;  %v14817_v9 = vld [vmem:[%s19864_s4 + $0x18] sm:$0xff] }
 0x47d   :  { %3827 = vmatpush.bf16.msra.mxu1 %v11063_v41  ;;  %3892 = vmatpush.bf16.msrb.mxu2 %v10979_v24  ;;  %v10912_v41 = vld [vmem:[%s19835_s8 + $0xe8] sm:$0xf0]  ;;  %v11167_v10 = vor.u32 %v14081_v11, %v11166_v39  ;;  %v11070_v20 = vld [vmem:[%s19835_s8 + $0x208] sm:$0xf]  ;;  %v10815_v24 = vor.u32 %v13993_v17, %v10814_v16 }
 0x47e   :  { %3906 = vmatpush.bf16.msrb.mxu3 %v11235_v26  ;;  %v10915_v44 = vor.u32 %v14013_v40, %v10912_v41  ;;  %v10816_v26 = vld [vmem:[%s19835_s8 + $0x28] sm:$0xf0]  ;;  %v11071_v35 = vor.u32 %v14057_v25, %v11070_v20  ;;  %v14042_v25 = vld [vmem:[%s19835_s8 + $0x1ac] sm:$0xf0] }
 0x47f   :  { %v10819_v7 = vor.u32 %v13989_v30, %v10816_v26  ;;  %v14815_v59 = vld [vmem:[%s19864_s4 + $0x8] sm:$0xff] }
 0x480   :  { %3862 = vmatpush.bf16.msrb.mxu0 %v11039_v46 }
 0x481   :  { %3876 = vmatpush.bf16.msrb.mxu1 %v11295_v51  ;;  %3893 = vmatpush.bf16.msrb.mxu2 %v10947_v36  ;;  %v10879_v51 = vor.u32 %v14009_v29, %v10878_v28 }
 0x482   :  { %3907 = vmatpush.bf16.msrb.mxu3 %v11203_v12 }
 0x484   :  { %3863 = vmatpush.bf16.msrb.mxu0 %v11007_v62  ;;  %v11139_v62 = vor.u32 %v14069_v58, %v11136_v61 }
 0x485   :  { %3877 = vmatpush.bf16.msrb.mxu1 %v11263_v5  ;;  %3894 = vmatpush.bf16.msrb.mxu2 %v10915_v44  ;;  %v10847_v5 = vor.u32 %v14001_v3, %v10846_v2  ;;  %v14046_v2 = vld [vmem:[%s19835_s8 + $0x1d4] sm:$0xf]  ;;  %v14814_v3 = vld [vmem:[%s19864_s4] sm:$0xff] }
 0x486   :  { %3908 = vmatpush.bf16.msrb.mxu3 %v11171_v19  ;;  %v528_v19 = vld [vmem:[%s19834_s7] sm:$0x3] }
 0x487   :  { %v3152_v49 = vperm.slane %v528_v19, 0 }
 0x488   :  { %3864 = vmatpush.bf16.msrb.mxu0 %v10975_v15  ;;  %v11107_v15 = vor.u32 %v14061_v47, %v11104_v50  ;;  %v11048_v50 = vld [vmem:[%s19835_s8 + $0x1f0] sm:$0xf0] }
 0x489   :  { %3878 = vmatpush.bf16.msrb.mxu1 %v11231_v21  ;;  %3895 = vmatpush.bf16.msrb.mxu2 %v10883_v54  ;;  %v11051_v30 = vor.u32 %v14046_v2, %v11048_v50  ;;  %v11142_v50 = vld [vmem:[%s19835_s8 + $0x290] sm:$0xf] }
 0x48a   :  { %3909 = vmatpush.bf16.msrb.mxu3 %v11139_v62  ;;  %v11046_v62 = vld [vmem:[%s19835_s8 + $0x1d0] sm:$0xf] }
 0x48c   :  { %3865 = vmatpush.bf16.msrb.mxu0 %v10943_v31  ;;  %v14053_v31 = vld [vmem:[%s19835_s8 + $0x20c] sm:$0xf] }
 0x48d   :  { %3879 = vmatpush.bf16.msrb.mxu1 %v11199_v34  ;;  %3896 = vmatpush.bf16.msrb.mxu2 %v10851_v14  ;;  %v11075_v4 = vor.u32 %v14053_v31, %v11072_v32  ;;  %v14110_v14 = vld [vmem:[%s19835_s8 + $0x3d4] sm:$0xf] }
 0x48e   :  { %3910 = vmatpush.bf16.msrb.mxu3 %v11107_v15  ;;  %v11304_v15 = vld [vmem:[%s19835_s8 + $0x3f0] sm:$0xf0] }
 0x48f   :  { %v11307_v26 = vor.u32 %v14110_v14, %v11304_v15  ;;  %v11016_v31 = vld [vmem:[%s19835_s8 + $0x1b0] sm:$0xf0]  ;;  %v14074_v14 = vld [vmem:[%s19835_s8 + $0x2ac] sm:$0xf0] }
 0x490   :  { %3866 = vmatpush.bf16.msrb.mxu0 %v10911_v13  ;;  %v527_v13 = vld [vmem:[%s19868_s23] sm:$0x3]  ;;  %v14102_v32 = vld [vmem:[%s19835_s8 + $0x394] sm:$0xf] }
 0x491   :  { %3880 = vmatpush.bf16.msrb.mxu1 %v11167_v10  ;;  %3897 = vmatpush.bf16.msrb.mxu2 %v10819_v7  ;;  %v3143_v10 = vperm.slane %v527_v13, 0  ;;  %v3144_v44 = vperm.slane %v527_v13, 1  ;;  %v14038_v7 = vld [vmem:[%s19835_s8 + $0x194] sm:$0xf] }
 0x492   :  { %3911 = vmatpush.bf16.msrb.mxu3 %v11075_v4  ;;  %v11272_v4 = vld [vmem:[%s19835_s8 + $0x3b0] sm:$0xf0] }
 0x493   :  { %v10984_v13 = vld [vmem:[%s19835_s8 + $0x170] sm:$0xf0] }
 0x494   :  { %3867 = vmatpush.bf16.msrb.mxu0 %v10879_v51  ;;  %v14006_v15 = vld [vmem:[%s19835_s8 + $0x94] sm:$0xf] }
 0x495   :  { %3881 = vmatpush.bf16.msrb.mxu1 %v11135_v53 }
 0x498   :  { %3868 = vmatpush.bf16.msrb.mxu0 %v10847_v5 }
 0x499   :  { %3882 = vmatpush.bf16.msrb.mxu1 %v11103_v8 }
 0x49c   :  { %3869 = vmatpush.bf16.msrb.mxu0 %v10815_v24  ;;  %v11014_v24 = vld [vmem:[%s19835_s8 + $0x190] sm:$0xf] }
 0x49d   :  { %3883 = vmatpush.bf16.msrb.mxu1 %v11071_v35  ;;  %v14106_v35 = vld [vmem:[%s19835_s8 + $0x3ac] sm:$0xf0] }
 0x4e2   :  { %v3110_v46 = vpop.xlane.xlu0 %3109 }
 0x4e3   :  { %v3114_v57 = vmul.f32 %v3110_v46, %v15889_v48  ;;  %v3153_v46 = vperm.slane %v528_v19, 1 }
 0x4e5   :  { %v3116_v1 = vadd.f32 1e-05, %v3114_v57 }
 0x4e7   :  { %14766 = vrsqrt.f32 %v3116_v1  ;;  %vm3124_vm8 = vweird.f32 %v3116_v1 }
 0x4ea   :  { %v3113_v21 = vpop.xlane.xlu1 %3112 }
 0x4eb   :  { %v3115_v27 = vmul.f32 %v3113_v21, %v15889_v48 }
 0x4ed   :  { %v14767_v33 = vpop.eup %14766  ;;  %v3117_v34 = vadd.f32 1e-05, %v3115_v27  ;;  %v11270_v27 = vld [vmem:[%s19835_s8 + $0x390] sm:$0xf] }
 0x4ee   :  { %v3119_v36 = vmul.f32 %v14767_v33, %v3116_v1  ;;  %vm3125_vm7 = vweird.f32 %v14767_v33  ;;  %v14050_v1 = vld [vmem:[%s19835_s8 + $0x1ec] sm:$0xf0] }
 0x4ef   :  { %14768 = vrsqrt.f32 %v3117_v34  ;;  %vm3126_vm9 = vmor %vm3124_vm8, %vm3125_vm7  ;;  %vm3134_vm11 = vweird.f32 %v3117_v34  ;;  %v11047_v20 = vor.u32 %v14050_v1, %v11046_v62  ;;  %v10920_v62 = vld [vmem:[%s19835_s8 + $0xf0] sm:$0xf0] }
 0x4f0   :  { %v3120_v37 = vmul.f32 %v14767_v33, %v3119_v36  ;;  %v10982_v36 = vld [vmem:[%s19835_s8 + $0x150] sm:$0xf]  ;;  %v14078_v1 = vld [vmem:[%s19835_s8 + $0x2d4] sm:$0xf] }
 0x4f2   :  { %v3121_v22 = vmul.f32 0.5, %v3120_v37  ;;  %v14034_v37 = vld [vmem:[%s19835_s8 + $0x16c] sm:$0xf0] }
 0x4f4   :  { %v3122_v12 = vsub.f32 1.5, %v3121_v22  ;;  %v11019_v22 = vor.u32 %v14038_v7, %v11016_v31  ;;  %v11110_v31 = vld [vmem:[%s19835_s8 + $0x250] sm:$0xf] }
 0x4f5   :  { %v14769_v23 = vpop.eup %14768 }
 0x4f6   :  { %v3123_v38 = vmul.f32 %v14767_v33, %v3122_v12  ;;  %v3129_v39 = vmul.f32 %v14769_v23, %v3117_v34  ;;  %vm3135_vm10 = vweird.f32 %v14769_v23  ;;  %v11271_v34 = vor.u32 %v14106_v35, %v11270_v27  ;;  %v14002_v27 = vld [vmem:[%s19835_s8 + $0x6c] sm:$0xf0] }
 0x4f7   :  { %vm3136_vm12 = vmor %vm3134_vm11, %vm3135_vm10  ;;  %v11275_v12 = vor.u32 %v14102_v32, %v11272_v4  ;;  %v14066_v32 = vld [vmem:[%s19835_s8 + $0x26c] sm:$0xf0]  ;;  %v13998_v4 = vld [vmem:[%s19835_s8 + $0x54] sm:$0xf] }
 0x4f8   :  { %v3127_v11 = vsel %vm3126_vm9, %v14767_v33, %v3123_v38  ;;  %v3130_v40 = vmul.f32 %v14769_v23, %v3129_v39  ;;  %v11015_v33 = vor.u32 %v14042_v25, %v11014_v24  ;;  %v14098_v38 = vld [vmem:[%s19835_s8 + $0x36c] sm:$0xf0]  ;;  %v14030_v39 = vld [vmem:[%s19835_s8 + $0x154] sm:$0xf] }
 0x4f9   :  { %v3138_v45 = vmul.f32 %v3127_v11, %v15908_v63  ;;  %v3139_v18 = vmul.f32 %v3127_v11, %v15911_v0  ;;  %v14094_v11 = vld [vmem:[%s19835_s8 + $0x354] sm:$0xf] }
 0x4fa   :  { %v3131_v41 = vmul.f32 0.5, %v3130_v40  ;;  %v11240_v40 = vld [vmem:[%s19835_s8 + $0x370] sm:$0xf0] }
 0x4fb   :  { %v3147_v51 = vmul.f32 %v3143_v10, %v3138_v45  ;;  %v3148_v52 = vmul.f32 %v3144_v44, %v3139_v18  ;;  %v14026_v45 = vld [vmem:[%s19835_s8 + $0x12c] sm:$0xf0]  ;;  %v10987_v18 = vor.u32 %v14030_v39, %v10984_v13  ;;  %v11243_v19 = vor.u32 %v14094_v11, %v11240_v40  ;;  %v11144_v24 = vld [vmem:[%s19835_s8 + $0x2b0] sm:$0xf0] }
 0x4fc   :  { %v3132_v28 = vsub.f32 1.5, %v3131_v41  ;;  %v10983_v41 = vor.u32 %v14034_v37, %v10982_v36  ;;  %v11112_v36 = vld [vmem:[%s19835_s8 + $0x270] sm:$0xf0]  ;;  %v10822_v37 = vld [vmem:[%s19835_s8 + $0x10] sm:$0xf] }
 0x4fd   :  { %v3156_v57 = vadd.f32 %v3152_v49, %v3147_v51  ;;  %v3157_v0 = vadd.f32 %v3153_v46, %v3148_v52  ;;  %v14086_v51 = vld [vmem:[%s19835_s8 + $0x314] sm:$0xf]  ;;  %v14058_v39 = vld [vmem:[%s19835_s8 + $0x22c] sm:$0xf0] }
 0x4fe   :  { %v3133_v29 = vmul.f32 %v14769_v23, %v3132_v28  ;;  %v11206_v28 = vld [vmem:[%s19835_s8 + $0x310] sm:$0xf]  ;;  %v11208_v52 = vld [vmem:[%s19835_s8 + $0x330] sm:$0xf0] }
 0x4ff   :  { %v16222_v5 = vadd.f32 %v14814_v3, %v3156_v57  ;;  %v16227_v60 = vadd.f32 %v14815_v59, %v3157_v0  ;;  %v14018_v57 = vld [vmem:[%s19835_s8 + $0xec] sm:$0xf0]  ;;  %v13990_v40 = vld [vmem:[%s19835_s8 + $0x14] sm:$0xf] }
 0x500   :  { %v3137_v56 = vsel %vm3136_vm12, %v14769_v23, %v3133_v29  ;;  %v11238_v23 = vld [vmem:[%s19835_s8 + $0x350] sm:$0xf] }
 0x501   :  { %v3140_v55 = vmul.f32 %v3137_v56, %v15919_v42  ;;  %v3141_v63 = vmul.f32 %v3137_v56, %v15922_v43  ;;  %v11302_v42 = vld [vmem:[%s19835_s8 + $0x3d0] sm:$0xf] }
 0x502   :  { %v14114_v43 = vld [vmem:[%s19835_s8 + $0x3ec] sm:$0xf0] }
 0x503   :  { %v3149_v53 = vmul.f32 %v3143_v10, %v3140_v55  ;;  %v3150_v54 = vmul.f32 %v3144_v44, %v3141_v63  ;;  %v11303_v21 = vor.u32 %v14114_v43, %v11302_v42  ;;  %v11239_v10 = vor.u32 %v14098_v38, %v11238_v23  ;;  %v10950_v44 = vld [vmem:[%s19835_s8 + $0x110] sm:$0xf]  ;;  %v11176_v42 = vld [vmem:[%s19835_s8 + $0x2f0] sm:$0xf0] }
 0x504   :  { %v14090_v29 = vld [vmem:[%s19835_s8 + $0x32c] sm:$0xf0]  ;;  %v10951_v56 = vor.u32 %v14026_v45, %v10950_v44  ;;  %v11080_v44 = vld [vmem:[%s19835_s8 + $0x230] sm:$0xf0]  ;;  %v11054_v45 = vld [vmem:[%s19835_s8 + $0x1d8] sm:$0xf] }
 0x505   :  { %v3158_v58 = vadd.f32 %v3152_v49, %v3149_v53  ;;  %v3159_v61 = vadd.f32 %v3153_v46, %v3150_v54  ;;  %v14022_v49 = vld [vmem:[%s19835_s8 + $0x114] sm:$0xf]  ;;  %v11207_v55 = vor.u32 %v14090_v29, %v11206_v28  ;;  %v10918_v63 = vld [vmem:[%s19835_s8 + $0xd0] sm:$0xf]  ;;  %v11211_v53 = vor.u32 %v14086_v51, %v11208_v52  ;;  %v14115_v28 = vld [vmem:[%s19835_s8 + $0x3f4] sm:$0xf0] }
 0x506   :  { %v10952_v46 = vld [vmem:[%s19835_s8 + $0x130] sm:$0xf0]  ;;  %v11174_v54 = vld [vmem:[%s19835_s8 + $0x2d0] sm:$0xf]  ;;  %v10919_v43 = vor.u32 %v14018_v57, %v10918_v63  ;;  %v14047_v29 = vld [vmem:[%s19835_s8 + $0x1dc] sm:$0xf] }
 0x507   :  { %v16232_v8 = vadd.f32 %v14816_v6, %v3158_v58  ;;  %v16237_v47 = vadd.f32 %v14817_v9, %v3159_v61  ;;  %v10955_v0 = vor.u32 %v14022_v49, %v10952_v46  ;;  %v14082_v58 = vld [vmem:[%s19835_s8 + $0x2ec] sm:$0xf0]  ;;  %v14014_v61 = vld [vmem:[%s19835_s8 + $0xd4] sm:$0xf]  ;;  %v11179_v9 = vor.u32 %v14078_v1, %v11176_v42  ;;  %v11056_v51 = vld [vmem:[%s19835_s8 + $0x1f8] sm:$0xf0] }
 0x508   :  { %v11175_v2 = vor.u32 %v14082_v58, %v11174_v54  ;;  %v10886_v3 = vld [vmem:[%s19835_s8 + $0x90] sm:$0xf]  ;;  %v10923_v6 = vor.u32 %v14014_v61, %v10920_v62  ;;  %v14111_v52 = vld [vmem:[%s19835_s8 + $0x3dc] sm:$0xf]  ;;  %v14043_v54 = vld [vmem:[%s19835_s8 + $0x1b4] sm:$0xf0]  ;;  %v11059_v58 = vor.u32 %v14047_v29, %v11056_v51 }
 0x509   :  { %v16250_v16 = vpack.c.bf16 %v16232_v8, %v16222_v5  ;;  %v16254_v17 = vpack.c.bf16 %v16237_v47, %v16227_v60  ;;  %v14010_v59 = vld [vmem:[%s19835_s8 + $0xac] sm:$0xf0]  ;;  %v11278_v62 = vld [vmem:[%s19835_s8 + $0x398] sm:$0xf]  ;;  %v14039_v42 = vld [vmem:[%s19835_s8 + $0x19c] sm:$0xf] }
 0x50a   :  { %v10887_v25 = vor.u32 %v14010_v59, %v10886_v3  ;;  %v13994_v23 = vld [vmem:[%s19835_s8 + $0x2c] sm:$0xf0]  ;;  %v14107_v1 = vld [vmem:[%s19835_s8 + $0x3b4] sm:$0xf0]  ;;  %v11280_v3 = vld [vmem:[%s19835_s8 + $0x3b8] sm:$0xf0] }
 0x50b   :  { %3814 = vmatmul.bf16.vlgmr.msra.gmra.mxu0 %v16250_v16  ;;  %3828 = vmatmul.bf16.vlgmr.msra.gmra.mxu1 %v16254_v17  ;;  %v11078_v38 = vld [vmem:[%s19835_s8 + $0x210] sm:$0xf]  ;;  %v10823_v49 = vor.u32 %v13994_v23, %v10822_v37  ;;  %v10960_v37 = vld [vmem:[%s19835_s8 + $0x138] sm:$0xf0] }
 0x50c   :  { %3842 = vmatmul.bf16.vlgmr.msra.gmra.mxu2 %v16250_v16  ;;  %3856 = vmatmul.bf16.vlgmr.msra.gmra.mxu3 %v16254_v17  ;;  %v11079_v46 = vor.u32 %v14058_v39, %v11078_v38  ;;  %v10926_v39 = vld [vmem:[%s19835_s8 + $0xd8] sm:$0xf] }
 0x50d   :  { %3918 = vmatpush.bf16.msra.mxu0 %v11047_v20  ;;  %3932 = vmatpush.bf16.msra.mxu1 %v11303_v21  ;;  %v10888_v20 = vld [vmem:[%s19835_s8 + $0xb0] sm:$0xf0] }
 0x50e   :  { %3946 = vmatpush.bf16.msra.mxu2 %v11051_v30  ;;  %3960 = vmatpush.bf16.msra.mxu3 %v11307_v26  ;;  %v14070_v21 = vld [vmem:[%s19835_s8 + $0x294] sm:$0xf]  ;;  %v11143_v30 = vor.u32 %v14074_v14, %v11142_v50  ;;  %v10854_v26 = vld [vmem:[%s19835_s8 + $0x50] sm:$0xf]  ;;  %v10891_v35 = vor.u32 %v14006_v15, %v10888_v20  ;;  %v14035_v50 = vld [vmem:[%s19835_s8 + $0x174] sm:$0xf0] }
 0x50f   :  { %v11147_v7 = vor.u32 %v14070_v21, %v11144_v24  ;;  %v11246_v20 = vld [vmem:[%s19835_s8 + $0x358] sm:$0xf]  ;;  %v14031_v24 = vld [vmem:[%s19835_s8 + $0x15c] sm:$0xf] }
 0x510   :  { %v14099_v21 = vld [vmem:[%s19835_s8 + $0x374] sm:$0xf0] }
 0x511   :  { %3919 = vmatpush.bf16.msra.mxu0 %v11015_v33  ;;  %3933 = vmatpush.bf16.msra.mxu1 %v11271_v34  ;;  %v10856_v33 = vld [vmem:[%s19835_s8 + $0x70] sm:$0xf0] }
 0x512   :  { %3947 = vmatpush.bf16.msra.mxu2 %v11019_v22  ;;  %3961 = vmatpush.bf16.msra.mxu3 %v11275_v12  ;;  %v14062_v34 = vld [vmem:[%s19835_s8 + $0x254] sm:$0xf]  ;;  %v10855_v22 = vor.u32 %v14002_v27, %v10854_v26  ;;  %v11111_v12 = vor.u32 %v14066_v32, %v11110_v31  ;;  %v10859_v13 = vor.u32 %v13998_v4, %v10856_v33  ;;  %v11248_v26 = vld [vmem:[%s19835_s8 + $0x378] sm:$0xf0]  ;;  %v14027_v31 = vld [vmem:[%s19835_s8 + $0x134] sm:$0xf0] }
 0x513   :  { %v11115_v11 = vor.u32 %v14062_v34, %v11112_v36  ;;  %v11214_v33 = vld [vmem:[%s19835_s8 + $0x318] sm:$0xf]  ;;  %v14023_v36 = vld [vmem:[%s19835_s8 + $0x11c] sm:$0xf] }
 0x514   :  { %v14091_v34 = vld [vmem:[%s19835_s8 + $0x334] sm:$0xf0] }
 0x515   :  { %3920 = vmatpush.bf16.msra.mxu0 %v10983_v41  ;;  %3934 = vmatpush.bf16.msra.mxu1 %v11239_v10  ;;  %v10824_v41 = vld [vmem:[%s19835_s8 + $0x30] sm:$0xf0]  ;;  %v11215_v38 = vor.u32 %v14091_v34, %v11214_v33  ;;  %v14147_v33 = vld [vmem:[%s19836_s9 + $0xf4] sm:$0xf0] }
 0x516   :  { %3948 = vmatpush.bf16.msra.mxu2 %v10987_v18  ;;  %3962 = vmatpush.bf16.msra.mxu3 %v11243_v19  ;;  %v14054_v10 = vld [vmem:[%s19835_s8 + $0x214] sm:$0xf]  ;;  %v14051_v18 = vld [vmem:[%s19835_s8 + $0x1f4] sm:$0xf0] }
 0x517   :  { %v11310_v19 = vld [vmem:[%s19835_s8 + $0x3d8] sm:$0xf]  ;;  %v11083_v63 = vor.u32 %v14054_v10, %v11080_v44  ;;  %v11055_v57 = vor.u32 %v14051_v18, %v11054_v45  ;;  %v14015_v44 = vld [vmem:[%s19835_s8 + $0xdc] sm:$0xf] }
 0x518   :  { %v14083_v10 = vld [vmem:[%s19835_s8 + $0x2f4] sm:$0xf0]  ;;  %v10928_v45 = vld [vmem:[%s19835_s8 + $0xf8] sm:$0xf0] }
 0x519   :  { %3921 = vmatpush.bf16.msra.mxu0 %v10951_v56  ;;  %3935 = vmatpush.bf16.msra.mxu1 %v11207_v55  ;;  %v11312_v56 = vld [vmem:[%s19835_s8 + $0x3f8] sm:$0xf0]  ;;  %v10827_v55 = vor.u32 %v13990_v40, %v10824_v41  ;;  %v11182_v41 = vld [vmem:[%s19835_s8 + $0x2d8] sm:$0xf]  ;;  %v10931_v51 = vor.u32 %v14015_v44, %v10928_v45 }
 0x51a   :  { %3949 = vmatpush.bf16.msra.mxu2 %v10955_v0  ;;  %3963 = vmatpush.bf16.msra.mxu3 %v11211_v53  ;;  %v11311_v0 = vor.u32 %v14115_v28, %v11310_v19  ;;  %v11022_v53 = vld [vmem:[%s19835_s8 + $0x198] sm:$0xf]  ;;  %v11315_v61 = vor.u32 %v14111_v52, %v11312_v56  ;;  %v14079_v18 = vld [vmem:[%s19835_s8 + $0x2dc] sm:$0xf]  ;;  %v11183_v29 = vor.u32 %v14083_v10, %v11182_v41  ;;  %v14145_v41 = vld [vmem:[%s19836_s9 + $0xe4] sm:$0xf0] }
 0x51b   :  { %3870 = vmatmul.bf16.vlgmr.msrb.gmra.mxu0 %v16250_v16  ;;  %3884 = vmatmul.bf16.vlgmr.msrb.gmra.mxu1 %v16254_v17  ;;  %v11023_v59 = vor.u32 %v14043_v54, %v11022_v53  ;;  %v11184_v19 = vld [vmem:[%s19835_s8 + $0x2f8] sm:$0xf0]  ;;  %v11150_v56 = vld [vmem:[%s19835_s8 + $0x298] sm:$0xf]  ;;  %v11358_v10 = vld [vmem:[%s19836_s9 + $0x50] sm:$0xf] }
 0x51c   :  { %3898 = vmatmul.bf16.vlgmr.msrb.gmra.mxu2 %v16250_v16  ;;  %3912 = vmatmul.bf16.vlgmr.msrb.gmra.mxu3 %v16254_v17  ;;  %v11187_v52 = vor.u32 %v14079_v18, %v11184_v19  ;;  %v11152_v53 = vld [vmem:[%s19835_s8 + $0x2b8] sm:$0xf0]  ;;  %v14127_v18 = vld [vmem:[%s19836_s9 + $0x54] sm:$0xf0] }
 0x51d   :  { %3922 = vmatpush.bf16.msra.mxu0 %v10919_v43  ;;  %3936 = vmatpush.bf16.msra.mxu1 %v11175_v2  ;;  %v11024_v43 = vld [vmem:[%s19835_s8 + $0x1b8] sm:$0xf0] }
 0x51e   :  { %3950 = vmatpush.bf16.msra.mxu2 %v10923_v6  ;;  %3964 = vmatpush.bf16.msra.mxu3 %v11179_v9  ;;  %v14103_v2 = vld [vmem:[%s19835_s8 + $0x39c] sm:$0xf]  ;;  %v11279_v6 = vor.u32 %v14107_v1, %v11278_v62  ;;  %v10990_v9 = vld [vmem:[%s19835_s8 + $0x158] sm:$0xf]  ;;  %v11027_v14 = vor.u32 %v14039_v42, %v11024_v43 }
 0x51f   :  { %v11283_v15 = vor.u32 %v14103_v2, %v11280_v3  ;;  %v10991_v27 = vor.u32 %v14035_v50, %v10990_v9  ;;  %v14003_v62 = vld [vmem:[%s19835_s8 + $0x74] sm:$0xf0]  ;;  %v13999_v3 = vld [vmem:[%s19835_s8 + $0x5c] sm:$0xf] }
 0x520   :  { %v11118_v43 = vld [vmem:[%s19835_s8 + $0x258] sm:$0xf]  ;;  %v11120_v9 = vld [vmem:[%s19835_s8 + $0x278] sm:$0xf0] }
 0x521   :  { %3923 = vmatpush.bf16.msra.mxu0 %v10887_v25  ;;  %3937 = vmatpush.bf16.msra.mxu1 %v11143_v30  ;;  %v10992_v25 = vld [vmem:[%s19835_s8 + $0x178] sm:$0xf0]  ;;  %v14067_v2 = vld [vmem:[%s19835_s8 + $0x274] sm:$0xf0] }
 0x522   :  { %3951 = vmatpush.bf16.msra.mxu2 %v10891_v35  ;;  %3965 = vmatpush.bf16.msra.mxu3 %v11147_v7  ;;  %v14095_v30 = vld [vmem:[%s19835_s8 + $0x35c] sm:$0xf]  ;;  %v11247_v35 = vor.u32 %v14099_v21, %v11246_v20  ;;  %v10958_v7 = vld [vmem:[%s19835_s8 + $0x118] sm:$0xf]  ;;  %v10995_v32 = vor.u32 %v14031_v24, %v10992_v25 }
 0x523   :  { %v11251_v4 = vor.u32 %v14095_v30, %v11248_v26  ;;  %v10959_v23 = vor.u32 %v14027_v31, %v10958_v7  ;;  %v13995_v20 = vld [vmem:[%s19835_s8 + $0x34] sm:$0xf0]  ;;  %v13991_v26 = vld [vmem:[%s19835_s8 + $0x1c] sm:$0xf]  ;;  %v11374_v31 = vld [vmem:[%s19836_s9 + $0x70] sm:$0xf] }
 0x524   :  { %v11086_v21 = vld [vmem:[%s19835_s8 + $0x218] sm:$0xf]  ;;  %v11088_v7 = vld [vmem:[%s19835_s8 + $0x238] sm:$0xf0] }
 0x525   :  { %3924 = vmatpush.bf16.msra.mxu0 %v10855_v22  ;;  %3938 = vmatpush.bf16.msra.mxu1 %v11111_v12  ;;  %v14087_v22 = vld [vmem:[%s19835_s8 + $0x31c] sm:$0xf]  ;;  %v14059_v30 = vld [vmem:[%s19835_s8 + $0x234] sm:$0xf0] }
 0x526   :  { %3952 = vmatpush.bf16.msra.mxu2 %v10859_v13  ;;  %3966 = vmatpush.bf16.msra.mxu3 %v11115_v11  ;;  %v11216_v12 = vld [vmem:[%s19835_s8 + $0x338] sm:$0xf0]  ;;  %v14019_v13 = vld [vmem:[%s19835_s8 + $0xf4] sm:$0xf0]  ;;  %v10963_v11 = vor.u32 %v14023_v36, %v10960_v37  ;;  %v11087_v36 = vor.u32 %v14059_v30, %v11086_v21  ;;  %v11398_v21 = vld [vmem:[%s19836_s9 + $0xa0] sm:$0xf] }
 0x527   :  { %v11219_v40 = vor.u32 %v14087_v22, %v11216_v12  ;;  %v10927_v28 = vor.u32 %v14019_v13, %v10926_v39  ;;  %v11502_v39 = vld [vmem:[%s19836_s9 + $0x170] sm:$0xf]  ;;  %v14163_v13 = vld [vmem:[%s19836_s9 + $0x174] sm:$0xf0] }
 0x528   :  { %v11503_v44 = vor.u32 %v14163_v13, %v11502_v39  ;;  %v11326_v30 = vld [vmem:[%s19836_s9 + $0x10] sm:$0xf] }
 0x529   :  { %3925 = vmatpush.bf16.msra.mxu0 %v10823_v49  ;;  %3939 = vmatpush.bf16.msra.mxu1 %v11079_v46  ;;  %v10894_v49 = vld [vmem:[%s19835_s8 + $0x98] sm:$0xf] }
 0x52a   :  { %3953 = vmatpush.bf16.msra.mxu2 %v10827_v55  ;;  %3967 = vmatpush.bf16.msra.mxu3 %v11083_v63  ;;  %v14011_v46 = vld [vmem:[%s19835_s8 + $0xb4] sm:$0xf0]  ;;  %v14007_v63 = vld [vmem:[%s19835_s8 + $0x9c] sm:$0xf] }
 0x52b   :  { %v14075_v55 = vld [vmem:[%s19835_s8 + $0x2b4] sm:$0xf0]  ;;  %v10895_v54 = vor.u32 %v14011_v46, %v10894_v49  ;;  %v11422_v49 = vld [vmem:[%s19836_s9 + $0xd0] sm:$0xf] }
 0x52c   :  { %3926 = vmatmul.bf16.vlgmr.msra.gmra.mxu0 %v16250_v16  ;;  %3940 = vmatmul.bf16.vlgmr.msra.gmra.mxu1 %v16254_v17  ;;  %v14143_v46 = vld [vmem:[%s19836_s9 + $0xd4] sm:$0xf0] }
 0x52d   :  { %3974 = vmatpush.bf16.msrb.mxu0 %v11055_v57  ;;  %3988 = vmatpush.bf16.msrb.mxu1 %v11311_v0  ;;  %v10896_v57 = vld [vmem:[%s19835_s8 + $0xb8] sm:$0xf0] }
 0x52e   :  { %4002 = vmatpush.bf16.msrb.mxu2 %v11059_v58  ;;  %4016 = vmatpush.bf16.msrb.mxu3 %v11315_v61  ;;  %v14071_v0 = vld [vmem:[%s19835_s8 + $0x29c] sm:$0xf]  ;;  %v11151_v58 = vor.u32 %v14075_v55, %v11150_v56  ;;  %v10862_v61 = vld [vmem:[%s19835_s8 + $0x58] sm:$0xf]  ;;  %v10899_v1 = vor.u32 %v14007_v63, %v10896_v57  ;;  %v11350_v56 = vld [vmem:[%s19836_s9 + $0x40] sm:$0xf] }
 0x52f   :  { %3954 = vmatmul.bf16.vlgmr.msra.gmra.mxu2 %v16250_v16  ;;  %3968 = vmatmul.bf16.vlgmr.msra.gmra.mxu3 %v16254_v17  ;;  %v11155_v42 = vor.u32 %v14071_v0, %v11152_v53  ;;  %v10863_v50 = vor.u32 %v14003_v62, %v10862_v61  ;;  %v14125_v55 = vld [vmem:[%s19836_s9 + $0x44] sm:$0xf0]  ;;  %v11359_v0 = vor.u32 %v14127_v18, %v11358_v10  ;;  %v11486_v53 = vld [vmem:[%s19836_s9 + $0x150] sm:$0xf]  ;;  %v11558_v61 = vld [vmem:[%s19836_s9 + $0x1e0] sm:$0xf] }
 0x530   :  { %v14177_v62 = vld [vmem:[%s19836_s9 + $0x1e4] sm:$0xf0]  ;;  %v11686_v18 = vld [vmem:[%s19836_s9 + $0x2e0] sm:$0xf] }
 0x531   :  { %3975 = vmatpush.bf16.msrb.mxu0 %v11023_v59  ;;  %3989 = vmatpush.bf16.msrb.mxu1 %v11279_v6  ;;  %v10864_v59 = vld [vmem:[%s19835_s8 + $0x78] sm:$0xf0] }
 0x532   :  { %4003 = vmatpush.bf16.msrb.mxu2 %v11027_v14  ;;  %4017 = vmatpush.bf16.msrb.mxu3 %v11283_v15  ;;  %v14063_v6 = vld [vmem:[%s19835_s8 + $0x25c] sm:$0xf]  ;;  %v11119_v14 = vor.u32 %v14067_v2, %v11118_v43  ;;  %v10830_v15 = vld [vmem:[%s19835_s8 + $0x18] sm:$0xf]  ;;  %v10867_v24 = vor.u32 %v13999_v3, %v10864_v59  ;;  %v11351_v43 = vor.u32 %v14125_v55, %v11350_v56  ;;  %v11342_v2 = vld [vmem:[%s19836_s9 + $0x30] sm:$0xf] }
 0x533   :  { %v11123_v25 = vor.u32 %v14063_v6, %v11120_v9  ;;  %v10831_v34 = vor.u32 %v13995_v20, %v10830_v15  ;;  %v14123_v59 = vld [vmem:[%s19836_s9 + $0x34] sm:$0xf0]  ;;  %v11406_v6 = vld [vmem:[%s19836_s9 + $0xb0] sm:$0xf]  ;;  %v14121_v20 = vld [vmem:[%s19836_s9 + $0x24] sm:$0xf0] }
 0x534   :  { %v14139_v9 = vld [vmem:[%s19836_s9 + $0xb4] sm:$0xf0]  ;;  %v14189_v56 = vld [vmem:[%s19836_s9 + $0x244] sm:$0xf0]  ;;  %v11550_v55 = vld [vmem:[%s19836_s9 + $0x1d0] sm:$0xf] }
 0x535   :  { %3976 = vmatpush.bf16.msrb.mxu0 %v10991_v27  ;;  %3990 = vmatpush.bf16.msrb.mxu1 %v11247_v35  ;;  %v10832_v27 = vld [vmem:[%s19835_s8 + $0x38] sm:$0xf0]  ;;  %v11407_v15 = vor.u32 %v14139_v9, %v11406_v6 }
 0x536   :  { %4004 = vmatpush.bf16.msrb.mxu2 %v10995_v32  ;;  %4018 = vmatpush.bf16.msrb.mxu3 %v11251_v4  ;;  %v14055_v35 = vld [vmem:[%s19835_s8 + $0x21c] sm:$0xf]  ;;  %v14131_v32 = vld [vmem:[%s19836_s9 + $0x74] sm:$0xf0]  ;;  %v11438_v4 = vld [vmem:[%s19836_s9 + $0xf0] sm:$0xf]  ;;  %v10835_v37 = vor.u32 %v13991_v26, %v10832_v27 }
 0x537   :  { %v11091_v22 = vor.u32 %v14055_v35, %v11088_v7  ;;  %v11375_v12 = vor.u32 %v14131_v32, %v11374_v31  ;;  %v14119_v27 = vld [vmem:[%s19836_s9 + $0x14] sm:$0xf0]  ;;  %v11390_v35 = vld [vmem:[%s19836_s9 + $0x90] sm:$0xf]  ;;  %v11318_v32 = vld [vmem:[%s19836_s9] sm:$0xf] }
 0x538   :  { %v14135_v7 = vld [vmem:[%s19836_s9 + $0x94] sm:$0xf0]  ;;  %v11327_v31 = vor.u32 %v14119_v27, %v11326_v30 }
 0x539   :  { %3977 = vmatpush.bf16.msrb.mxu0 %v10959_v23  ;;  %3991 = vmatpush.bf16.msrb.mxu1 %v11215_v38  ;;  %v11366_v23 = vld [vmem:[%s19836_s9 + $0x60] sm:$0xf]  ;;  %v11439_v38 = vor.u32 %v14147_v33, %v11438_v4  ;;  %v14117_v4 = vld [vmem:[%s19836_s9 + $0x4] sm:$0xf0]  ;;  %v11391_v33 = vor.u32 %v14135_v7, %v11390_v35  ;;  %v14203_v27 = vld [vmem:[%s19836_s9 + $0x2b4] sm:$0xf0] }
 0x53a   :  { %4005 = vmatpush.bf16.msrb.mxu2 %v10963_v11  ;;  %4019 = vmatpush.bf16.msrb.mxu3 %v11219_v40  ;;  %v14129_v11 = vld [vmem:[%s19836_s9 + $0x64] sm:$0xf0]  ;;  %v11430_v40 = vld [vmem:[%s19836_s9 + $0xe0] sm:$0xf]  ;;  %v11454_v35 = vld [vmem:[%s19836_s9 + $0x110] sm:$0xf] }
 0x53b   :  { %v11367_v45 = vor.u32 %v14129_v11, %v11366_v23  ;;  %v11431_v19 = vor.u32 %v14145_v41, %v11430_v40  ;;  %v14211_v23 = vld [vmem:[%s19836_s9 + $0x2f4] sm:$0xf0]  ;;  %v11622_v40 = vld [vmem:[%s19836_s9 + $0x260] sm:$0xf]  ;;  %v14193_v41 = vld [vmem:[%s19836_s9 + $0x264] sm:$0xf0] }
 0x53c   :  { %v11623_v10 = vor.u32 %v14193_v41, %v11622_v40  ;;  %v11574_v41 = vld [vmem:[%s19836_s9 + $0x200] sm:$0xf] }
 0x53d   :  { %3978 = vmatpush.bf16.msrb.mxu0 %v10927_v28  ;;  %3992 = vmatpush.bf16.msrb.mxu1 %v11183_v29  ;;  %v11494_v28 = vld [vmem:[%s19836_s9 + $0x160] sm:$0xf]  ;;  %v14161_v29 = vld [vmem:[%s19836_s9 + $0x164] sm:$0xf0] }
 0x53e   :  { %4006 = vmatpush.bf16.msrb.mxu2 %v10931_v51  ;;  %4020 = vmatpush.bf16.msrb.mxu3 %v11187_v52  ;;  %v11566_v51 = vld [vmem:[%s19836_s9 + $0x1f0] sm:$0xf]  ;;  %v14179_v52 = vld [vmem:[%s19836_s9 + $0x1f4] sm:$0xf0]  ;;  %v11495_v63 = vor.u32 %v14161_v29, %v11494_v28 }
 0x53f   :  { %v11567_v57 = vor.u32 %v14179_v52, %v11566_v51  ;;  %v11606_v52 = vld [vmem:[%s19836_s9 + $0x240] sm:$0xf] }
 0x541   :  { %3979 = vmatpush.bf16.msrb.mxu0 %v10895_v54  ;;  %3993 = vmatpush.bf16.msrb.mxu1 %v11151_v58  ;;  %v14159_v54 = vld [vmem:[%s19836_s9 + $0x154] sm:$0xf0]  ;;  %v14141_v58 = vld [vmem:[%s19836_s9 + $0xc4] sm:$0xf0] }
 0x542   :  { %4007 = vmatpush.bf16.msrb.mxu2 %v10899_v1  ;;  %4021 = vmatpush.bf16.msrb.mxu3 %v11155_v42  ;;  %v11559_v1 = vor.u32 %v14177_v62, %v11558_v61  ;;  %v11487_v42 = vor.u32 %v14159_v54, %v11486_v53  ;;  %v11470_v53 = vld [vmem:[%s19836_s9 + $0x130] sm:$0xf]  ;;  %v14155_v54 = vld [vmem:[%s19836_s9 + $0x134] sm:$0xf0] }
 0x543   :  { %v11471_v61 = vor.u32 %v14155_v54, %v11470_v53  ;;  %v11598_v62 = vld [vmem:[%s19836_s9 + $0x230] sm:$0xf]  ;;  %v14197_v53 = vld [vmem:[%s19836_s9 + $0x284] sm:$0xf0] }
 0x545   :  { %3980 = vmatpush.bf16.msrb.mxu0 %v10863_v50  ;;  %3994 = vmatpush.bf16.msrb.mxu1 %v11119_v14  ;;  %v11343_v50 = vor.u32 %v14123_v59, %v11342_v2  ;;  %v11334_v14 = vld [vmem:[%s19836_s9 + $0x20] sm:$0xf]  ;;  %v14205_v59 = vld [vmem:[%s19836_s9 + $0x2c4] sm:$0xf0] }
 0x546   :  { %4008 = vmatpush.bf16.msrb.mxu2 %v10867_v24  ;;  %4022 = vmatpush.bf16.msrb.mxu3 %v11123_v25  ;;  %v14137_v24 = vld [vmem:[%s19836_s9 + $0xa4] sm:$0xf0]  ;;  %v11335_v25 = vor.u32 %v14121_v20, %v11334_v14  ;;  %v11590_v20 = vld [vmem:[%s19836_s9 + $0x220] sm:$0xf] }
 0x547   :  { %v11399_v26 = vor.u32 %v14137_v24, %v11398_v21  ;;  %v14153_v14 = vld [vmem:[%s19836_s9 + $0x124] sm:$0xf0]  ;;  %v11534_v24 = vld [vmem:[%s19836_s9 + $0x1b0] sm:$0xf] }
 0x548   :  { %v14185_v21 = vld [vmem:[%s19836_s9 + $0x224] sm:$0xf0] }
 0x549   :  { %3981 = vmatpush.bf16.msrb.mxu0 %v10831_v34  ;;  %3995 = vmatpush.bf16.msrb.mxu1 %v11087_v36  ;;  %v11630_v34 = vld [vmem:[%s19836_s9 + $0x270] sm:$0xf]  ;;  %v11382_v36 = vld [vmem:[%s19836_s9 + $0x80] sm:$0xf]  ;;  %v11591_v7 = vor.u32 %v14185_v21, %v11590_v20  ;;  %v14239_v21 = vld [vmem:[%s19836_s9 + $0x3d4] sm:$0xf0] }
 0x54a   :  { %4009 = vmatpush.bf16.msrb.mxu2 %v10835_v37  ;;  %4023 = vmatpush.bf16.msrb.mxu3 %v11091_v22  ;;  %v14133_v37 = vld [vmem:[%s19836_s9 + $0x84] sm:$0xf0]  ;;  %v14195_v22 = vld [vmem:[%s19836_s9 + $0x274] sm:$0xf0]  ;;  %v11806_v20 = vld [vmem:[%s19836_s9 + $0x3d0] sm:$0xf] }
 0x54b   :  { %v11383_v39 = vor.u32 %v14133_v37, %v11382_v36  ;;  %v11631_v13 = vor.u32 %v14195_v22, %v11630_v34  ;;  %v14183_v34 = vld [vmem:[%s19836_s9 + $0x214] sm:$0xf0]  ;;  %v11526_v36 = vld [vmem:[%s19836_s9 + $0x1a0] sm:$0xf]  ;;  %v14169_v37 = vld [vmem:[%s19836_s9 + $0x1a4] sm:$0xf0] }
 0x54c   :  { %3982 = vmatmul.bf16.vlgmr.msrb.gmra.mxu0 %v16250_v16  ;;  %3996 = vmatmul.bf16.vlgmr.msrb.gmra.mxu1 %v16254_v17  ;;  %v11527_v22 = vor.u32 %v14169_v37, %v11526_v36 }
 0x54d   :  { %4694 = vmatpush.bf16.msra.mxu0 %v11375_v12  ;;  %4708 = vmatpush.bf16.msra.mxu1 %v11439_v38  ;;  %v11694_v12 = vld [vmem:[%s19836_s9 + $0x2f0] sm:$0xf]  ;;  %v11319_v38 = vor.u32 %v14117_v4, %v11318_v32  ;;  %v14151_v32 = vld [vmem:[%s19836_s9 + $0x114] sm:$0xf0] }
 0x54e   :  { %4010 = vmatmul.bf16.vlgmr.msrb.gmra.mxu2 %v16250_v16  ;;  %4024 = vmatmul.bf16.vlgmr.msrb.gmra.mxu3 %v16254_v17  ;;  %v11423_v16 = vor.u32 %v14143_v46, %v11422_v49  ;;  %v11414_v17 = vld [vmem:[%s19836_s9 + $0xc0] sm:$0xf]  ;;  %v11695_v11 = vor.u32 %v14211_v23, %v11694_v12  ;;  %v14157_v46 = vld [vmem:[%s19836_s9 + $0x144] sm:$0xf0]  ;;  %v11455_v4 = vor.u32 %v14151_v32, %v11454_v35 }
 0x54f   :  { %4722 = vmatpush.bf16.msra.mxu2 %v11503_v44  ;;  %4736 = vmatpush.bf16.msra.mxu3 %v11567_v57  ;;  %v11415_v3 = vor.u32 %v14141_v58, %v11414_v17  ;;  %v11614_v44 = vld [vmem:[%s19836_s9 + $0x250] sm:$0xf]  ;;  %v11478_v49 = vld [vmem:[%s19836_s9 + $0x140] sm:$0xf]  ;;  %v11607_v58 = vor.u32 %v14189_v56, %v11606_v52  ;;  %v14201_v23 = vld [vmem:[%s19836_s9 + $0x2a4] sm:$0xf0] }
 0x550   :  { %v11479_v51 = vor.u32 %v14157_v46, %v11478_v49  ;;  %v11678_v57 = vld [vmem:[%s19836_s9 + $0x2d0] sm:$0xf]  ;;  %v11654_v12 = vld [vmem:[%s19836_s9 + $0x2a0] sm:$0xf]  ;;  %v14237_v35 = vld [vmem:[%s19836_s9 + $0x3c4] sm:$0xf0] }
 0x551   :  { %4695 = vmatpush.bf16.msra.mxu0 %v11367_v45  ;;  %4709 = vmatpush.bf16.msra.mxu1 %v11431_v19  ;;  %v14191_v45 = vld [vmem:[%s19836_s9 + $0x254] sm:$0xf0]  ;;  %v14209_v19 = vld [vmem:[%s19836_s9 + $0x2e4] sm:$0xf0]  ;;  %v11646_v49 = vld [vmem:[%s19836_s9 + $0x290] sm:$0xf] }
 0x552   :  { %v11615_v28 = vor.u32 %v14191_v45, %v11614_v44  ;;  %v11687_v29 = vor.u32 %v14209_v19, %v11686_v18  ;;  %v11758_v44 = vld [vmem:[%s19836_s9 + $0x370] sm:$0xf]  ;;  %v14227_v45 = vld [vmem:[%s19836_s9 + $0x374] sm:$0xf0]  ;;  %v11750_v56 = vld [vmem:[%s19836_s9 + $0x360] sm:$0xf] }
 0x553   :  { %4723 = vmatpush.bf16.msra.mxu2 %v11495_v63  ;;  %4737 = vmatpush.bf16.msra.mxu3 %v11559_v1  ;;  %v14175_v63 = vld [vmem:[%s19836_s9 + $0x1d4] sm:$0xf0]  ;;  %v11518_v18 = vld [vmem:[%s19836_s9 + $0x190] sm:$0xf] }
 0x554   :  { %v14187_v1 = vld [vmem:[%s19836_s9 + $0x234] sm:$0xf0] }
 0x555   :  { %4696 = vmatpush.bf16.msra.mxu0 %v11359_v0  ;;  %4710 = vmatpush.bf16.msra.mxu1 %v11423_v16  ;;  %v14207_v0 = vld [vmem:[%s19836_s9 + $0x2d4] sm:$0xf0]  ;;  %v11551_v16 = vor.u32 %v14175_v63, %v11550_v55  ;;  %v11599_v6 = vor.u32 %v14187_v1, %v11598_v62  ;;  %v14225_v55 = vld [vmem:[%s19836_s9 + $0x364] sm:$0xf0]  ;;  %v11742_v1 = vld [vmem:[%s19836_s9 + $0x350] sm:$0xf] }
 0x556   :  { %v11679_v17 = vor.u32 %v14207_v0, %v11678_v57  ;;  %v14167_v19 = vld [vmem:[%s19836_s9 + $0x194] sm:$0xf0]  ;;  %v11751_v63 = vor.u32 %v14225_v55, %v11750_v56  ;;  %v11510_v57 = vld [vmem:[%s19836_s9 + $0x180] sm:$0xf]  ;;  %v14165_v0 = vld [vmem:[%s19836_s9 + $0x184] sm:$0xf0] }
 0x557   :  { %4724 = vmatpush.bf16.msra.mxu2 %v11487_v42  ;;  %4738 = vmatpush.bf16.msra.mxu3 %v11551_v16  ;;  %v11542_v42 = vld [vmem:[%s19836_s9 + $0x1c0] sm:$0xf]  ;;  %v11511_v16 = vor.u32 %v14165_v0, %v11510_v57  ;;  %v14213_v57 = vld [vmem:[%s19836_s9 + $0x304] sm:$0xf0] }
 0x559   :  { %4697 = vmatpush.bf16.msra.mxu0 %v11351_v43  ;;  %4711 = vmatpush.bf16.msra.mxu1 %v11415_v3  ;;  %v14173_v43 = vld [vmem:[%s19836_s9 + $0x1c4] sm:$0xf0]  ;;  %v11670_v3 = vld [vmem:[%s19836_s9 + $0x2c0] sm:$0xf] }
 0x55a   :  { %v11543_v2 = vor.u32 %v14173_v43, %v11542_v42  ;;  %v11671_v9 = vor.u32 %v14205_v59, %v11670_v3  ;;  %v14223_v42 = vld [vmem:[%s19836_s9 + $0x354] sm:$0xf0]  ;;  %v14241_v3 = vld [vmem:[%s19836_s9 + $0x3e4] sm:$0xf0] }
 0x55b   :  { %4725 = vmatpush.bf16.msra.mxu2 %v11479_v51  ;;  %v14199_v51 = vld [vmem:[%s19836_s9 + $0x294] sm:$0xf0]  ;;  %v11743_v43 = vor.u32 %v14223_v42, %v11742_v1  ;;  %v11360_v1 = vld [vmem:[%s19836_s9 + $0x58] sm:$0xf0]  ;;  %v11774_v42 = vld [vmem:[%s19836_s9 + $0x390] sm:$0xf] }
 0x55c   :  { %4739 = vmatpush.bf16.msra.mxu3 %v11543_v2  ;;  %v11647_v52 = vor.u32 %v14199_v51, %v11646_v49  ;;  %v11814_v2 = vld [vmem:[%s19836_s9 + $0x3e0] sm:$0xf] }
 0x55d   :  { %4698 = vmatpush.bf16.msra.mxu0 %v11343_v50  ;;  %4712 = vmatpush.bf16.msra.mxu1 %v11407_v15  ;;  %v11462_v50 = vld [vmem:[%s19836_s9 + $0x120] sm:$0xf]  ;;  %v11815_v59 = vor.u32 %v14241_v3, %v11814_v2 }
 0x55e   :  { %v11463_v15 = vor.u32 %v14153_v14, %v11462_v50  ;;  %v11782_v49 = vld [vmem:[%s19836_s9 + $0x3a0] sm:$0xf] }
 0x55f   :  { %4726 = vmatpush.bf16.msra.mxu2 %v11471_v61  ;;  %v14243_v61 = vld [vmem:[%s19836_s9 + $0x3f4] sm:$0xf0] }
 0x561   :  { %4699 = vmatpush.bf16.msra.mxu0 %v11335_v25  ;;  %4713 = vmatpush.bf16.msra.mxu1 %v11399_v26  ;;  %v14171_v25 = vld [vmem:[%s19836_s9 + $0x1b4] sm:$0xf0]  ;;  %v11662_v26 = vld [vmem:[%s19836_s9 + $0x2b0] sm:$0xf] }
 0x562   :  { %v11535_v30 = vor.u32 %v14171_v25, %v11534_v24  ;;  %v11807_v24 = vor.u32 %v14239_v21, %v11806_v20  ;;  %v11726_v25 = vld [vmem:[%s19836_s9 + $0x330] sm:$0xf]  ;;  %v14124_v20 = vld [vmem:[%s19836_s9 + $0x44] sm:$0xf]  ;;  %v11352_v21 = vld [vmem:[%s19836_s9 + $0x48] sm:$0xf0] }
 0x563   :  { %4727 = vmatpush.bf16.msra.mxu2 %v11463_v15 }
 0x564   :  { %4740 = vmatpush.bf16.msra.mxu3 %v11535_v30  ;;  %v14219_v30 = vld [vmem:[%s19836_s9 + $0x334] sm:$0xf0] }
 0x565   :  { %4700 = vmatpush.bf16.msra.mxu0 %v11327_v31  ;;  %4714 = vmatpush.bf16.msra.mxu1 %v11391_v33  ;;  %v11663_v31 = vor.u32 %v14203_v27, %v11662_v26  ;;  %v11582_v33 = vld [vmem:[%s19836_s9 + $0x210] sm:$0xf]  ;;  %v11727_v26 = vor.u32 %v14219_v30, %v11726_v25  ;;  %v11798_v27 = vld [vmem:[%s19836_s9 + $0x3c0] sm:$0xf]  ;;  %v14229_v25 = vld [vmem:[%s19836_s9 + $0x384] sm:$0xf0] }
 0x567   :  { %4728 = vmatpush.bf16.msra.mxu2 %v11455_v4 }
 0x568   :  { %4741 = vmatpush.bf16.msra.mxu3 %v11527_v22  ;;  %v14130_v22 = vld [vmem:[%s19836_s9 + $0x74] sm:$0xf] }
 0x569   :  { %4701 = vmatpush.bf16.msra.mxu0 %v11319_v38  ;;  %4715 = vmatpush.bf16.msra.mxu1 %v11383_v39  ;;  %v11583_v38 = vor.u32 %v14183_v34, %v11582_v33  ;;  %v11655_v39 = vor.u32 %v14201_v23, %v11654_v12  ;;  %v11718_v33 = vld [vmem:[%s19836_s9 + $0x320] sm:$0xf]  ;;  %v14217_v34 = vld [vmem:[%s19836_s9 + $0x324] sm:$0xf0] }
 0x56a   :  { %v11719_v12 = vor.u32 %v14217_v34, %v11718_v33  ;;  %v14142_v33 = vld [vmem:[%s19836_s9 + $0xd4] sm:$0xf]  ;;  %v11424_v34 = vld [vmem:[%s19836_s9 + $0xd8] sm:$0xf0] }
 0x56d   :  { %4750 = vmatpush.bf16.msrb.mxu0 %v11631_v13  ;;  %4764 = vmatpush.bf16.msrb.mxu1 %v11695_v11  ;;  %v11446_v13 = vld [vmem:[%s19836_s9 + $0x100] sm:$0xf]  ;;  %v14149_v11 = vld [vmem:[%s19836_s9 + $0x104] sm:$0xf0] }
 0x56e   :  { %v11447_v40 = vor.u32 %v14149_v11, %v11446_v13  ;;  %v14235_v13 = vld [vmem:[%s19836_s9 + $0x3b4] sm:$0xf0] }
 0x570   :  { %4729 = vmatpush.bf16.msra.mxu2 %v11447_v40 }
 0x571   :  { %4751 = vmatpush.bf16.msrb.mxu0 %v11623_v10  ;;  %4765 = vmatpush.bf16.msrb.mxu1 %v11687_v29  ;;  %v14181_v10 = vld [vmem:[%s19836_s9 + $0x204] sm:$0xf0]  ;;  %v11519_v29 = vor.u32 %v14167_v19, %v11518_v18  ;;  %v14128_v18 = vld [vmem:[%s19836_s9 + $0x64] sm:$0xf] }
 0x572   :  { %v11575_v46 = vor.u32 %v14181_v10, %v11574_v41  ;;  %v11710_v10 = vld [vmem:[%s19836_s9 + $0x310] sm:$0xf] }
 0x573   :  { %4742 = vmatpush.bf16.msra.mxu3 %v11519_v29  ;;  %v11368_v29 = vld [vmem:[%s19836_s9 + $0x68] sm:$0xf0] }
 0x575   :  { %4752 = vmatpush.bf16.msrb.mxu0 %v11615_v28  ;;  %4766 = vmatpush.bf16.msrb.mxu1 %v11679_v17  ;;  %v11759_v28 = vor.u32 %v14227_v45, %v11758_v44  ;;  %v11638_v17 = vld [vmem:[%s19836_s9 + $0x280] sm:$0xf]  ;;  %v14215_v44 = vld [vmem:[%s19836_s9 + $0x314] sm:$0xf0] }
 0x576   :  { %v11639_v54 = vor.u32 %v14197_v53, %v11638_v17  ;;  %v11711_v19 = vor.u32 %v14215_v44, %v11710_v10  ;;  %v11371_v53 = vor.u32 %v14128_v18, %v11368_v29  ;;  %v14120_v10 = vld [vmem:[%s19836_s9 + $0x24] sm:$0xf]  ;;  %v11336_v18 = vld [vmem:[%s19836_s9 + $0x28] sm:$0xf0] }
 0x577   :  { %4778 = vmatpush.bf16.msrb.mxu2 %v11759_v28  ;;  %4743 = vmatpush.bf16.msra.mxu3 %v11511_v16  ;;  %v11496_v29 = vld [vmem:[%s19836_s9 + $0x168] sm:$0xf0] }
 0x579   :  { %4753 = vmatpush.bf16.msrb.mxu0 %v11607_v58  ;;  %4767 = vmatpush.bf16.msrb.mxu1 %v11671_v9  ;;  %v11822_v58 = vld [vmem:[%s19836_s9 + $0x3f0] sm:$0xf]  ;;  %v14221_v9 = vld [vmem:[%s19836_s9 + $0x344] sm:$0xf0] }
 0x57a   :  { %v11823_v62 = vor.u32 %v14243_v61, %v11822_v58  ;;  %v11440_v58 = vld [vmem:[%s19836_s9 + $0xf8] sm:$0xf0]  ;;  %v14126_v61 = vld [vmem:[%s19836_s9 + $0x54] sm:$0xf] }
 0x57b   :  { %4779 = vmatpush.bf16.msrb.mxu2 %v11751_v63  ;;  %v11702_v63 = vld [vmem:[%s19836_s9 + $0x300] sm:$0xf] }
 0x57c   :  { %4792 = vmatpush.bf16.msrb.mxu3 %v11823_v62  ;;  %v11703_v62 = vor.u32 %v14213_v57, %v11702_v63  ;;  %v11339_v57 = vor.u32 %v14120_v10, %v11336_v18  ;;  %v14132_v10 = vld [vmem:[%s19836_s9 + $0x84] sm:$0xf]  ;;  %v11384_v18 = vld [vmem:[%s19836_s9 + $0x88] sm:$0xf0] }
 0x57d   :  { %4754 = vmatpush.bf16.msrb.mxu0 %v11599_v6  ;;  %4768 = vmatpush.bf16.msrb.mxu1 %v11663_v31  ;;  %v11734_v6 = vld [vmem:[%s19836_s9 + $0x340] sm:$0xf] }
 0x57e   :  { %v11735_v15 = vor.u32 %v14221_v9, %v11734_v6 }
 0x57f   :  { %4780 = vmatpush.bf16.msrb.mxu2 %v11743_v43  ;;  %v14231_v43 = vld [vmem:[%s19836_s9 + $0x394] sm:$0xf0] }
 0x580   :  { %4793 = vmatpush.bf16.msrb.mxu3 %v11815_v59  ;;  %v11775_v59 = vor.u32 %v14231_v43, %v11774_v42 }
 0x581   :  { %4755 = vmatpush.bf16.msrb.mxu0 %v11591_v7  ;;  %4769 = vmatpush.bf16.msrb.mxu1 %v11655_v39  ;;  %v11799_v7 = vor.u32 %v14237_v35, %v11798_v27  ;;  %v11790_v39 = vld [vmem:[%s19836_s9 + $0x3b0] sm:$0xf] }
 0x582   :  { %v11791_v11 = vor.u32 %v14235_v13, %v11790_v39  ;;  %v11427_v13 = vor.u32 %v14142_v33, %v11424_v34  ;;  %v14174_v33 = vld [vmem:[%s19836_s9 + $0x1d4] sm:$0xf]  ;;  %v11552_v34 = vld [vmem:[%s19836_s9 + $0x1d8] sm:$0xf0] }
 0x583   :  { %4781 = vmatpush.bf16.msrb.mxu2 %v11735_v15  ;;  %v11432_v15 = vld [vmem:[%s19836_s9 + $0xe8] sm:$0xf0] }
 0x584   :  { %4794 = vmatpush.bf16.msrb.mxu3 %v11807_v24  ;;  %v11766_v24 = vld [vmem:[%s19836_s9 + $0x380] sm:$0xf] }
 0x585   :  { %4756 = vmatpush.bf16.msrb.mxu0 %v11583_v38  ;;  %4770 = vmatpush.bf16.msrb.mxu1 %v11647_v52  ;;  %v11376_v38 = vld [vmem:[%s19836_s9 + $0x78] sm:$0xf0]  ;;  %v11767_v30 = vor.u32 %v14229_v25, %v11766_v24  ;;  %v11560_v24 = vld [vmem:[%s19836_s9 + $0x1e8] sm:$0xf0] }
 0x586   :  { %v11379_v45 = vor.u32 %v14130_v22, %v11376_v38  ;;  %v11344_v22 = vld [vmem:[%s19836_s9 + $0x38] sm:$0xf0]  ;;  %v11320_v25 = vld [vmem:[%s19836_s9 + $0x8] sm:$0xf0] }
 0x587   :  { %4782 = vmatpush.bf16.msrb.mxu2 %v11727_v26 }
 0x588   :  { %v3815_v50 = vpop.f32.mrf.mxu0  ;;  %v3829_v14 = vpop.f32.mrf.mxu1  ;;  %4795 = vmatpush.bf16.msrb.mxu3 %v11799_v7 }
 0x589   :  { %4757 = vmatpush.bf16.msrb.mxu0 %v11575_v46  ;;  %4771 = vmatpush.bf16.msrb.mxu1 %v11639_v54  ;;  %v3830_v31 = vadd.f32 %v3829_v14, %v3815_v50  ;;  %v14233_v46 = vld [vmem:[%s19836_s9 + $0x3a4] sm:$0xf0]  ;;  %v14146_v54 = vld [vmem:[%s19836_s9 + $0xf4] sm:$0xf]  ;;  %v11363_v50 = vor.u32 %v14126_v61, %v11360_v1  ;;  %v14144_v14 = vld [vmem:[%s19836_s9 + $0xe4] sm:$0xf] }
 0x58a   :  { %v11783_v52 = vor.u32 %v14233_v46, %v11782_v49  ;;  %v11443_v6 = vor.u32 %v14146_v54, %v11440_v58  ;;  %v11435_v7 = vor.u32 %v14144_v14, %v11432_v15  ;;  %v11328_v54 = vld [vmem:[%s19836_s9 + $0x18] sm:$0xf0]  ;;  %v14158_v58 = vld [vmem:[%s19836_s9 + $0x154] sm:$0xf]  ;;  %v14116_v15 = vld [vmem:[%s19836_s9 + $0x4] sm:$0xf] }
 0x58b   :  { %v4030_v40 = vmax.f32 %v3830_v31, 0.0  ;;  %4783 = vmatpush.bf16.msrb.mxu2 %v11719_v12  ;;  %v14162_v12 = vld [vmem:[%s19836_s9 + $0x174] sm:$0xf]  ;;  %v11488_v61 = vld [vmem:[%s19836_s9 + $0x158] sm:$0xf0] }
 0x58c   :  { %4796 = vmatpush.bf16.msrb.mxu3 %v11791_v11 }
 0x58f   :  { %v3843_v32 = vpop.f32.mrf.mxu2  ;;  %v3857_v4 = vpop.f32.mrf.mxu3  ;;  %4784 = vmatpush.bf16.msrb.mxu2 %v11711_v19  ;;  %v14160_v19 = vld [vmem:[%s19836_s9 + $0x164] sm:$0xf] }
 0x590   :  { %v3817_v36 = vpop.f32.mrf.mxu0  ;;  %v3831_v37 = vpop.f32.mrf.mxu1  ;;  %v3858_v51 = vadd.f32 %v3857_v4, %v3843_v32  ;;  %4797 = vmatpush.bf16.msrb.mxu3 %v11783_v52  ;;  %v11355_v4 = vor.u32 %v14124_v20, %v11352_v21  ;;  %v11491_v20 = vor.u32 %v14158_v58, %v11488_v61  ;;  %v14176_v21 = vld [vmem:[%s19836_s9 + $0x1e4] sm:$0xf]  ;;  %v14170_v58 = vld [vmem:[%s19836_s9 + $0x1b4] sm:$0xf]  ;;  %v11536_v61 = vld [vmem:[%s19836_s9 + $0x1b8] sm:$0xf0] }
 0x591   :  { %v3832_v23 = vadd.f32 %v3831_v37, %v3817_v36  ;;  %v14122_v36 = vld [vmem:[%s19836_s9 + $0x34] sm:$0xf] }
 0x592   :  { %v4031_v2 = vmax.f32 %v3858_v51, 0.0  ;;  %v11347_v11 = vor.u32 %v14122_v36, %v11344_v22 }
 0x593   :  { %v4038_v41 = vmax.f32 %v3832_v23, 0.0  ;;  %4785 = vmatpush.bf16.msrb.mxu2 %v11703_v62  ;;  %v11504_v23 = vld [vmem:[%s19836_s9 + $0x178] sm:$0xf0] }
 0x594   :  { %4798 = vmatpush.bf16.msrb.mxu3 %v11775_v59  ;;  %v11507_v44 = vor.u32 %v14162_v12, %v11504_v23  ;;  %v11400_v59 = vld [vmem:[%s19836_s9 + $0xa8] sm:$0xf0]  ;;  %v14154_v12 = vld [vmem:[%s19836_s9 + $0x134] sm:$0xf]  ;;  %v11472_v23 = vld [vmem:[%s19836_s9 + $0x138] sm:$0xf0] }
 0x595   :  { %v17001_v28 = vpack.c.bf16 %v4038_v41, %v4030_v40  ;;  %v14140_v40 = vld [vmem:[%s19836_s9 + $0xc4] sm:$0xf]  ;;  %v11416_v41 = vld [vmem:[%s19836_s9 + $0xc8] sm:$0xf0] }
 0x596   :  { %v11419_v52 = vor.u32 %v14140_v40, %v11416_v41  ;;  %v11632_v40 = vld [vmem:[%s19836_s9 + $0x278] sm:$0xf0] }
 0x597   :  { %v3845_v56 = vpop.f32.mrf.mxu2  ;;  %v3859_v55 = vpop.f32.mrf.mxu3  ;;  %4702 = vmatmul.bf16.vlgmr.msra.gmra.mxu0 %v17001_v28 }
 0x598   :  { %v3860_v0 = vadd.f32 %v3859_v55, %v3845_v56  ;;  %v3871_v16 = vpop.f32.mrf.mxu0  ;;  %v3885_v17 = vpop.f32.mrf.mxu1  ;;  %4806 = vmatpush.bf16.msra.mxu0 %v11379_v45  ;;  %4799 = vmatpush.bf16.msrb.mxu3 %v11767_v30  ;;  %v14138_v56 = vld [vmem:[%s19836_s9 + $0xb4] sm:$0xf]  ;;  %v11408_v55 = vld [vmem:[%s19836_s9 + $0xb8] sm:$0xf0]  ;;  %v14156_v30 = vld [vmem:[%s19836_s9 + $0x144] sm:$0xf] }
 0x599   :  { %v3886_v26 = vadd.f32 %v3885_v17, %v3871_v16  ;;  %v11499_v16 = vor.u32 %v14160_v19, %v11496_v29  ;;  %v14178_v17 = vld [vmem:[%s19836_s9 + $0x1f4] sm:$0xf]  ;;  %v11475_v19 = vor.u32 %v14154_v12, %v11472_v23  ;;  %v14172_v29 = vld [vmem:[%s19836_s9 + $0x1c4] sm:$0xf]  ;;  %v11520_v23 = vld [vmem:[%s19836_s9 + $0x198] sm:$0xf0] }
 0x59a   :  { %v4039_v3 = vmax.f32 %v3860_v0, 0.0  ;;  %v14118_v0 = vld [vmem:[%s19836_s9 + $0x14] sm:$0xf] }
 0x59b   :  { %v4032_v38 = vmax.f32 %v3886_v26, 0.0  ;;  %v11331_v14 = vor.u32 %v14118_v0, %v11328_v54  ;;  %v11480_v26 = vld [vmem:[%s19836_s9 + $0x148] sm:$0xf0]  ;;  %v14166_v12 = vld [vmem:[%s19836_s9 + $0x194] sm:$0xf] }
 0x59c   :  { %v17037_v9 = vpack.c.bf16 %v4039_v3, %v4031_v2  ;;  %4807 = vmatpush.bf16.msra.mxu0 %v11371_v53  ;;  %v11568_v53 = vld [vmem:[%s19836_s9 + $0x1f8] sm:$0xf0]  ;;  %v11411_v2 = vor.u32 %v14138_v56, %v11408_v55  ;;  %v14136_v3 = vld [vmem:[%s19836_s9 + $0xa4] sm:$0xf]  ;;  %v11464_v56 = vld [vmem:[%s19836_s9 + $0x128] sm:$0xf0] }
 0x59d   :  { %v11624_v0 = vld [vmem:[%s19836_s9 + $0x268] sm:$0xf0] }
 0x59e   :  { %4716 = vmatmul.bf16.vlgmr.msra.gmra.mxu1 %v17037_v9 }
 0x59f   :  { %v3899_v27 = vpop.f32.mrf.mxu2  ;;  %v3913_v35 = vpop.f32.mrf.mxu3  ;;  %4820 = vmatpush.bf16.msra.mxu1 %v11443_v6  ;;  %v11571_v6 = vor.u32 %v14178_v17, %v11568_v53 }
 0x5a0   :  { %v3873_v31 = vpop.f32.mrf.mxu0  ;;  %v3887_v32 = vpop.f32.mrf.mxu1  ;;  %4808 = vmatpush.bf16.msra.mxu0 %v11363_v50  ;;  %v3914_v49 = vadd.f32 %v3913_v35, %v3899_v27  ;;  %v11403_v27 = vor.u32 %v14136_v3, %v11400_v59  ;;  %v14134_v35 = vld [vmem:[%s19836_s9 + $0x94] sm:$0xf] }
 0x5a1   :  { %v3888_v37 = vadd.f32 %v3887_v32, %v3873_v31  ;;  %v11323_v31 = vor.u32 %v14116_v15, %v11320_v25  ;;  %v11392_v32 = vld [vmem:[%s19836_s9 + $0x98] sm:$0xf0]  ;;  %v14210_v59 = vld [vmem:[%s19836_s9 + $0x2f4] sm:$0xf] }
 0x5a2   :  { %v4033_v62 = vmax.f32 %v3914_v49, 0.0  ;;  %v11395_v41 = vor.u32 %v14134_v35, %v11392_v32  ;;  %v11544_v49 = vld [vmem:[%s19836_s9 + $0x1c8] sm:$0xf0]  ;;  %v11616_v15 = vld [vmem:[%s19836_s9 + $0x258] sm:$0xf0] }
 0x5a3   :  { %v4040_v39 = vmax.f32 %v3888_v37, 0.0  ;;  %4821 = vmatpush.bf16.msra.mxu1 %v11435_v7  ;;  %v11563_v7 = vor.u32 %v14176_v21, %v11560_v24  ;;  %v11547_v17 = vor.u32 %v14172_v29, %v11544_v49  ;;  %v14148_v35 = vld [vmem:[%s19836_s9 + $0x104] sm:$0xf] }
 0x5a4   :  { %4809 = vmatpush.bf16.msra.mxu0 %v11355_v4  ;;  %v11483_v4 = vor.u32 %v14156_v30, %v11480_v26  ;;  %v14168_v30 = vld [vmem:[%s19836_s9 + $0x1a4] sm:$0xf]  ;;  %v11528_v26 = vld [vmem:[%s19836_s9 + $0x1a8] sm:$0xf0] }
 0x5a5   :  { %v17085_v45 = vpack.c.bf16 %v4040_v39, %v4032_v38  ;;  %v14204_v49 = vld [vmem:[%s19836_s9 + $0x2c4] sm:$0xf] }
 0x5a7   :  { %v3901_v46 = vpop.f32.mrf.mxu2  ;;  %v3915_v51 = vpop.f32.mrf.mxu3  ;;  %4730 = vmatmul.bf16.vlgmr.msra.gmra.mxu2 %v17085_v45  ;;  %4822 = vmatpush.bf16.msra.mxu1 %v11427_v13 }
 0x5a8   :  { %v3916_v63 = vadd.f32 %v3915_v51, %v3901_v46  ;;  %4810 = vmatpush.bf16.msra.mxu0 %v11347_v11  ;;  %4834 = vmatpush.bf16.msra.mxu2 %v11507_v44  ;;  %v14194_v11 = vld [vmem:[%s19836_s9 + $0x274] sm:$0xf]  ;;  %v11555_v44 = vor.u32 %v14174_v33, %v11552_v34  ;;  %v11688_v33 = vld [vmem:[%s19836_s9 + $0x2e8] sm:$0xf0]  ;;  %v14188_v34 = vld [vmem:[%s19836_s9 + $0x244] sm:$0xf] }
 0x5a9   :  { %v3927_v42 = vpop.f32.mrf.mxu0  ;;  %v3941_v43 = vpop.f32.mrf.mxu1  ;;  %v11635_v55 = vor.u32 %v14194_v11, %v11632_v40  ;;  %v11680_v11 = vld [vmem:[%s19836_s9 + $0x2d8] sm:$0xf0]  ;;  %v14186_v40 = vld [vmem:[%s19836_s9 + $0x234] sm:$0xf] }
 0x5aa   :  { %v4041_v1 = vmax.f32 %v3916_v63, 0.0  ;;  %v3942_v36 = vadd.f32 %v3941_v43, %v3927_v42  ;;  %v14150_v42 = vld [vmem:[%s19836_s9 + $0x114] sm:$0xf]  ;;  %v11456_v43 = vld [vmem:[%s19836_s9 + $0x118] sm:$0xf0] }
 0x5ab   :  { %4823 = vmatpush.bf16.msra.mxu1 %v11419_v52  ;;  %v14152_v52 = vld [vmem:[%s19836_s9 + $0x124] sm:$0xf]  ;;  %v11459_v25 = vor.u32 %v14150_v42, %v11456_v43 }
 0x5ac   :  { %v17127_v50 = vpack.c.bf16 %v4041_v1, %v4033_v62  ;;  %4811 = vmatpush.bf16.msra.mxu0 %v11339_v57  ;;  %4835 = vmatpush.bf16.msra.mxu2 %v11499_v16  ;;  %v4034_v46 = vmax.f32 %v3942_v36, 0.0  ;;  %v14192_v57 = vld [vmem:[%s19836_s9 + $0x264] sm:$0xf]  ;;  %v11387_v16 = vor.u32 %v14132_v10, %v11384_v18  ;;  %v11467_v54 = vor.u32 %v14152_v52, %v11464_v56  ;;  %v11608_v36 = vld [vmem:[%s19836_s9 + $0x248] sm:$0xf0] }
 0x5ad   :  { %v11627_v3 = vor.u32 %v14192_v57, %v11624_v0  ;;  %v11523_v10 = vor.u32 %v14166_v12, %v11520_v23  ;;  %v11512_v18 = vld [vmem:[%s19836_s9 + $0x188] sm:$0xf0]  ;;  %v14184_v56 = vld [vmem:[%s19836_s9 + $0x224] sm:$0xf] }
 0x5ae   :  { %4744 = vmatmul.bf16.vlgmr.msra.gmra.mxu3 %v17127_v50  ;;  %v14200_v43 = vld [vmem:[%s19836_s9 + $0x2a4] sm:$0xf]  ;;  %v11640_v12 = vld [vmem:[%s19836_s9 + $0x288] sm:$0xf0] }
 0x5af   :  { %4824 = vmatpush.bf16.msra.mxu1 %v11411_v2  ;;  %4848 = vmatpush.bf16.msra.mxu3 %v11571_v6  ;;  %v11696_v6 = vld [vmem:[%s19836_s9 + $0x2f8] sm:$0xf0] }
 0x5b0   :  { %4812 = vmatpush.bf16.msra.mxu0 %v11331_v14  ;;  %4836 = vmatpush.bf16.msra.mxu2 %v11491_v20  ;;  %v14190_v14 = vld [vmem:[%s19836_s9 + $0x254] sm:$0xf]  ;;  %v11539_v20 = vor.u32 %v14170_v58, %v11536_v61  ;;  %v11584_v58 = vld [vmem:[%s19836_s9 + $0x218] sm:$0xf0] }
 0x5b1   :  { %v3929_v38 = vpop.f32.mrf.mxu0  ;;  %v3943_v39 = vpop.f32.mrf.mxu1  ;;  %v11619_v32 = vor.u32 %v14190_v14, %v11616_v15  ;;  %v11576_v14 = vld [vmem:[%s19836_s9 + $0x208] sm:$0xf0] }
 0x5b2   :  { %v3955_v37 = vpop.f32.mrf.mxu2  ;;  %v3969_v22 = vpop.f32.mrf.mxu3  ;;  %v3944_v13 = vadd.f32 %v3943_v39, %v3929_v38  ;;  %v11611_v39 = vor.u32 %v14188_v34, %v11608_v36 }
 0x5b3   :  { %4825 = vmatpush.bf16.msra.mxu1 %v11403_v27  ;;  %4849 = vmatpush.bf16.msra.mxu3 %v11563_v7  ;;  %v3970_v53 = vadd.f32 %v3969_v22, %v3955_v37  ;;  %v11699_v27 = vor.u32 %v14210_v59, %v11696_v6  ;;  %v11448_v7 = vld [vmem:[%s19836_s9 + $0x108] sm:$0xf0]  ;;  %v11531_v37 = vor.u32 %v14168_v30, %v11528_v26  ;;  %v14180_v6 = vld [vmem:[%s19836_s9 + $0x204] sm:$0xf] }
 0x5b4   :  { %4813 = vmatpush.bf16.msra.mxu0 %v11323_v31  ;;  %4837 = vmatpush.bf16.msra.mxu2 %v11483_v4  ;;  %v4042_v51 = vmax.f32 %v3944_v13, 0.0  ;;  %v14208_v4 = vld [vmem:[%s19836_s9 + $0x2e4] sm:$0xf]  ;;  %v11451_v22 = vor.u32 %v14148_v35, %v11448_v7  ;;  %v14206_v13 = vld [vmem:[%s19836_s9 + $0x2d4] sm:$0xf]  ;;  %v11579_v26 = vor.u32 %v14180_v6, %v11576_v14 }
 0x5b5   :  { %v4035_v21 = vmax.f32 %v3970_v53, 0.0  ;;  %v11691_v38 = vor.u32 %v14208_v4, %v11688_v33  ;;  %v11664_v53 = vld [vmem:[%s19836_s9 + $0x2b8] sm:$0xf0]  ;;  %v11752_v4 = vld [vmem:[%s19836_s9 + $0x368] sm:$0xf0] }
 0x5b6   :  { %v17190_v63 = vpack.c.bf16 %v4042_v51, %v4034_v46  ;;  %v11672_v46 = vld [vmem:[%s19836_s9 + $0x2c8] sm:$0xf0]  ;;  %v14212_v14 = vld [vmem:[%s19836_s9 + $0x304] sm:$0xf] }
 0x5b7   :  { %4826 = vmatpush.bf16.msra.mxu1 %v11395_v41  ;;  %4850 = vmatpush.bf16.msra.mxu3 %v11555_v44  ;;  %v11600_v41 = vld [vmem:[%s19836_s9 + $0x238] sm:$0xf0]  ;;  %v14164_v44 = vld [vmem:[%s19836_s9 + $0x184] sm:$0xf]  ;;  %v11675_v0 = vor.u32 %v14204_v49, %v11672_v46  ;;  %v11816_v46 = vld [vmem:[%s19836_s9 + $0x3e8] sm:$0xf0] }
 0x5b8   :  { %4838 = vmatpush.bf16.msra.mxu2 %v11475_v19  ;;  %4758 = vmatmul.bf16.vlgmr.msrb.gmra.mxu0 %v17190_v63  ;;  %v11683_v19 = vor.u32 %v14206_v13, %v11680_v11  ;;  %v11603_v29 = vor.u32 %v14186_v40, %v11600_v41  ;;  %v11515_v57 = vor.u32 %v14164_v44, %v11512_v18  ;;  %v11824_v13 = vld [vmem:[%s19836_s9 + $0x3f8] sm:$0xf0]  ;;  %v14222_v11 = vld [vmem:[%s19836_s9 + $0x354] sm:$0xf]  ;;  %v14240_v49 = vld [vmem:[%s19836_s9 + $0x3e4] sm:$0xf] }
 0x5b9   :  { %4862 = vmatpush.bf16.msrb.mxu0 %v11635_v55  ;;  %v11592_v55 = vld [vmem:[%s19836_s9 + $0x228] sm:$0xf0]  ;;  %v11744_v40 = vld [vmem:[%s19836_s9 + $0x358] sm:$0xf0] }
 0x5ba   :  { %v3957_v62 = vpop.f32.mrf.mxu2  ;;  %v3971_v1 = vpop.f32.mrf.mxu3  ;;  %v11784_v6 = vld [vmem:[%s19836_s9 + $0x3a8] sm:$0xf0] }
 0x5bb   :  { %v3972_v2 = vadd.f32 %v3971_v1, %v3957_v62  ;;  %4827 = vmatpush.bf16.msra.mxu1 %v11387_v16  ;;  %4851 = vmatpush.bf16.msra.mxu3 %v11547_v17  ;;  %v11595_v16 = vor.u32 %v14184_v56, %v11592_v55  ;;  %v14202_v17 = vld [vmem:[%s19836_s9 + $0x2b4] sm:$0xf] }
 0x5bc   :  { %4839 = vmatpush.bf16.msra.mxu2 %v11467_v54  ;;  %v14182_v54 = vld [vmem:[%s19836_s9 + $0x214] sm:$0xf] }
 0x5bd   :  { %v4043_v24 = vmax.f32 %v3972_v2, 0.0  ;;  %4863 = vmatpush.bf16.msrb.mxu0 %v11627_v3  ;;  %v11587_v42 = vor.u32 %v14182_v54, %v11584_v58  ;;  %v11656_v2 = vld [vmem:[%s19836_s9 + $0x2a8] sm:$0xf0]  ;;  %v14238_v55 = vld [vmem:[%s19836_s9 + $0x3d4] sm:$0xf] }
 0x5be   :  { %v14236_v54 = vld [vmem:[%s19836_s9 + $0x3c4] sm:$0xf] }
 0x5bf   :  { %v17235_v31 = vpack.c.bf16 %v4043_v24, %v4035_v21  ;;  %4852 = vmatpush.bf16.msra.mxu3 %v11539_v20  ;;  %v14226_v20 = vld [vmem:[%s19836_s9 + $0x374] sm:$0xf]  ;;  %v11760_v21 = vld [vmem:[%s19836_s9 + $0x378] sm:$0xf0]  ;;  %v11659_v24 = vor.u32 %v14200_v43, %v11656_v2  ;;  %v14216_v58 = vld [vmem:[%s19836_s9 + $0x324] sm:$0xf] }
 0x5c0   :  { %4840 = vmatpush.bf16.msra.mxu2 %v11459_v25  ;;  %v11763_v35 = vor.u32 %v14226_v20, %v11760_v21  ;;  %v14214_v43 = vld [vmem:[%s19836_s9 + $0x314] sm:$0xf]  ;;  %v11712_v2 = vld [vmem:[%s19836_s9 + $0x318] sm:$0xf0] }
 0x5c1   :  { %4772 = vmatmul.bf16.vlgmr.msrb.gmra.mxu1 %v17235_v31  ;;  %4864 = vmatpush.bf16.msrb.mxu0 %v11619_v32  ;;  %v14224_v32 = vld [vmem:[%s19836_s9 + $0x364] sm:$0xf] }
 0x5c2   :  { %4876 = vmatpush.bf16.msrb.mxu1 %v11699_v27  ;;  %v14198_v27 = vld [vmem:[%s19836_s9 + $0x294] sm:$0xf] }
 0x5c3   :  { %4853 = vmatpush.bf16.msra.mxu3 %v11531_v37 }
 0x5c4   :  { %4841 = vmatpush.bf16.msra.mxu2 %v11451_v22  ;;  %v14196_v22 = vld [vmem:[%s19836_s9 + $0x284] sm:$0xf] }
 0x5c5   :  { %4865 = vmatpush.bf16.msrb.mxu0 %v11611_v39  ;;  %v14242_v39 = vld [vmem:[%s19836_s9 + $0x3f4] sm:$0xf]  ;;  %v11643_v44 = vor.u32 %v14196_v22, %v11640_v12 }
 0x5c6   :  { %4877 = vmatpush.bf16.msrb.mxu1 %v11691_v38  ;;  %v11755_v38 = vor.u32 %v14224_v32, %v11752_v4  ;;  %v11827_v18 = vor.u32 %v14242_v39, %v11824_v13 }
 0x5c7   :  { %4854 = vmatpush.bf16.msra.mxu3 %v11523_v10 }
 0x5c8   :  { %4814 = vmatmul.bf16.vlgmr.msra.gmra.mxu0 %v17001_v28  ;;  %v11667_v28 = vor.u32 %v14202_v17, %v11664_v53 }
 0x5c9   :  { %v3983_v51 = vpop.f32.mrf.mxu0  ;;  %v3997_v52 = vpop.f32.mrf.mxu1  ;;  %4866 = vmatpush.bf16.msrb.mxu0 %v11603_v29  ;;  %v11747_v29 = vor.u32 %v14222_v11, %v11744_v40 }
 0x5ca   :  { %4878 = vmatpush.bf16.msrb.mxu1 %v11683_v19  ;;  %v3998_v61 = vadd.f32 %v3997_v52, %v3983_v51  ;;  %v14220_v51 = vld [vmem:[%s19836_s9 + $0x344] sm:$0xf]  ;;  %v11819_v52 = vor.u32 %v14240_v49, %v11816_v46 }
 0x5cb   :  { %4855 = vmatpush.bf16.msra.mxu3 %v11515_v57  ;;  %v11808_v57 = vld [vmem:[%s19836_s9 + $0x3d8] sm:$0xf0] }
 0x5cc   :  { %v4036_v25 = vmax.f32 %v3998_v61, 0.0  ;;  %v11811_v17 = vor.u32 %v14238_v55, %v11808_v57 }
 0x5cd   :  { %4867 = vmatpush.bf16.msrb.mxu0 %v11595_v16  ;;  %v11728_v16 = vld [vmem:[%s19836_s9 + $0x338] sm:$0xf0] }
 0x5ce   :  { %4879 = vmatpush.bf16.msrb.mxu1 %v11675_v0  ;;  %v14218_v0 = vld [vmem:[%s19836_s9 + $0x334] sm:$0xf] }
 0x5cf   :  { %v11731_v53 = vor.u32 %v14218_v0, %v11728_v16 }
 0x5d1   :  { %v4011_v62 = vpop.f32.mrf.mxu2  ;;  %v4025_v1 = vpop.f32.mrf.mxu3  ;;  %4828 = vmatmul.bf16.vlgmr.msra.gmra.mxu1 %v17037_v9  ;;  %4868 = vmatpush.bf16.msrb.mxu0 %v11587_v42  ;;  %v11648_v9 = vld [vmem:[%s19836_s9 + $0x298] sm:$0xf0] }
 0x5d2   :  { %v3985_v3 = vpop.f32.mrf.mxu0  ;;  %v3999_v59 = vpop.f32.mrf.mxu1  ;;  %4880 = vmatpush.bf16.msrb.mxu1 %v11667_v28  ;;  %v4026_v33 = vadd.f32 %v4025_v1, %v4011_v62  ;;  %v11651_v34 = vor.u32 %v14198_v27, %v11648_v9  ;;  %v11720_v28 = vld [vmem:[%s19836_s9 + $0x328] sm:$0xf0]  ;;  %v14234_v1 = vld [vmem:[%s19836_s9 + $0x3b4] sm:$0xf]  ;;  %v11792_v42 = vld [vmem:[%s19836_s9 + $0x3b8] sm:$0xf0] }
 0x5d3   :  { %v4000_v15 = vadd.f32 %v3999_v59, %v3985_v3  ;;  %v11723_v62 = vor.u32 %v14216_v58, %v11720_v28  ;;  %v11715_v3 = vor.u32 %v14214_v43, %v11712_v2  ;;  %v14232_v59 = vld [vmem:[%s19836_s9 + $0x3a4] sm:$0xf] }
 0x5d4   :  { %v4037_v41 = vmax.f32 %v4026_v33, 0.0  ;;  %v11787_v20 = vor.u32 %v14232_v59, %v11784_v6 }
 0x5d5   :  { %v4044_v30 = vmax.f32 %v4000_v15, 0.0  ;;  %4869 = vmatpush.bf16.msrb.mxu0 %v11579_v26  ;;  %v11704_v15 = vld [vmem:[%s19836_s9 + $0x308] sm:$0xf0]  ;;  %v14228_v26 = vld [vmem:[%s19836_s9 + $0x384] sm:$0xf] }
 0x5d6   :  { %4881 = vmatpush.bf16.msrb.mxu1 %v11659_v24  ;;  %v11707_v21 = vor.u32 %v14212_v14, %v11704_v15  ;;  %v14230_v24 = vld [vmem:[%s19836_s9 + $0x394] sm:$0xf] }
 0x5d7   :  { %v17324_v7 = vpack.c.bf16 %v4044_v30, %v4036_v25  ;;  %v11776_v25 = vld [vmem:[%s19836_s9 + $0x398] sm:$0xf0] }
 0x5d8   :  { %4870 = vmatmul.bf16.vlgmr.msrb.gmra.mxu0 %v17190_v63  ;;  %v11736_v63 = vld [vmem:[%s19836_s9 + $0x348] sm:$0xf0]  ;;  %v11779_v30 = vor.u32 %v14230_v24, %v11776_v25 }
 0x5d9   :  { %v4013_v36 = vpop.f32.mrf.mxu2  ;;  %v4027_v37 = vpop.f32.mrf.mxu3  ;;  %4786 = vmatmul.bf16.vlgmr.msrb.gmra.mxu2 %v17324_v7  ;;  %v11739_v56 = vor.u32 %v14220_v51, %v11736_v63 }
 0x5da   :  { %v4028_v23 = vadd.f32 %v4027_v37, %v4013_v36  ;;  %4890 = vmatpush.bf16.msrb.mxu2 %v11763_v35  ;;  %4882 = vmatpush.bf16.msrb.mxu1 %v11651_v34 }
 0x5dc   :  { %v4045_v10 = vmax.f32 %v4028_v23, 0.0 }
 0x5de   :  { %v4053_v19 = vpack.c.bf16 %v4045_v10, %v4037_v41  ;;  %4891 = vmatpush.bf16.msrb.mxu2 %v11755_v38  ;;  %4883 = vmatpush.bf16.msrb.mxu1 %v11643_v44 }
 0x5e0   :  { %4800 = vmatmul.bf16.vlgmr.msrb.gmra.mxu3 %v4053_v19 }
 0x5e1   :  { %4904 = vmatpush.bf16.msrb.mxu3 %v11827_v18  ;;  %4884 = vmatmul.bf16.vlgmr.msrb.gmra.mxu1 %v17235_v31  ;;  %v11800_v31 = vld [vmem:[%s19836_s9 + $0x3c8] sm:$0xf0] }
 0x5e2   :  { %4892 = vmatpush.bf16.msrb.mxu2 %v11747_v29  ;;  %v11803_v61 = vor.u32 %v14236_v54, %v11800_v31 }
 0x5e5   :  { %4905 = vmatpush.bf16.msrb.mxu3 %v11819_v52 }
 0x5e6   :  { %4893 = vmatpush.bf16.msrb.mxu2 %v11739_v56 }
 0x5e9   :  { %4906 = vmatpush.bf16.msrb.mxu3 %v11811_v17  ;;  %4842 = vmatmul.bf16.vlgmr.msra.gmra.mxu2 %v17085_v45  ;;  %v11795_v45 = vor.u32 %v14234_v1, %v11792_v42 }
 0x5ea   :  { %4894 = vmatpush.bf16.msrb.mxu2 %v11731_v53 }
 0x5ed   :  { %4907 = vmatpush.bf16.msrb.mxu3 %v11803_v61 }
 0x5ee   :  { %4895 = vmatpush.bf16.msrb.mxu2 %v11723_v62 }
 0x5f0   :  { %4856 = vmatmul.bf16.vlgmr.msra.gmra.mxu3 %v17127_v50  ;;  %v11768_v50 = vld [vmem:[%s19836_s9 + $0x388] sm:$0xf0] }
 0x5f1   :  { %4908 = vmatpush.bf16.msrb.mxu3 %v11795_v45  ;;  %v11771_v27 = vor.u32 %v14228_v26, %v11768_v50 }
 0x5f2   :  { %4896 = vmatpush.bf16.msrb.mxu2 %v11715_v3 }
 0x5f5   :  { %4909 = vmatpush.bf16.msrb.mxu3 %v11787_v20 }
 0x5f6   :  { %4897 = vmatpush.bf16.msrb.mxu2 %v11707_v21 }
 0x5f9   :  { %4910 = vmatpush.bf16.msrb.mxu3 %v11779_v30  ;;  %4898 = vmatmul.bf16.vlgmr.msrb.gmra.mxu2 %v17324_v7 }
 0x5fd   :  { %4911 = vmatpush.bf16.msrb.mxu3 %v11771_v27 }
 0x600   :  { %4912 = vmatmul.bf16.vlgmr.msrb.gmra.mxu3 %v4053_v19 }
 0x614   :  { %v4703_v9 = vpop.f32.mrf.mxu0 }
 0x61b   :  { %v4717_v35 = vpop.f32.mrf.mxu1 }
 0x61c   :  { %v4705_v32 = vpop.f32.mrf.mxu0  ;;  %v4718_v46 = vadd.f32 %v4717_v35, %v4703_v9 }
 0x623   :  { %v4719_v33 = vpop.f32.mrf.mxu1 }
 0x624   :  { %v4720_v31 = vadd.f32 %v4719_v33, %v4705_v32 }
 0x62a   :  { %v4731_v4 = vpop.f32.mrf.mxu2 }
 0x62b   :  { %v4732_v63 = vadd.f32 %v4731_v4, %v4718_v46 }
 0x631   :  { %v4745_v34 = vpop.f32.mrf.mxu3 }
 0x632   :  { %v4733_v37 = vpop.f32.mrf.mxu2  ;;  %v4746_v55 = vadd.f32 %v4745_v34, %v4732_v63 }
 0x633   :  { %v4734_v61 = vadd.f32 %v4733_v37, %v4720_v31  ;;  %v14251_v37 = vld [vmem:[%s19839_s12 + $0x38] sm:$0xff] }
 0x634   :  { %5778 = vmatpush.bf16.msra.mxu0 %v14251_v37  ;;  %v14288_v37 = vld [vmem:[%s19839_s12 + $0x160] sm:$0xff] }
 0x635   :  { %v4759_v36 = vpop.f32.mrf.mxu0 }
 0x636   :  { %v4760_v0 = vadd.f32 %v4759_v36, %v4746_v55 }
 0x639   :  { %v4747_v12 = vpop.f32.mrf.mxu3 }
 0x63a   :  { %v4748_v43 = vadd.f32 %v4747_v12, %v4734_v61  ;;  %v14267_v12 = vld [vmem:[%s19839_s12 + $0xb8] sm:$0xff] }
 0x63b   :  { %5902 = vmatpush.bf16.msra.mxu2 %v14267_v12  ;;  %v14263_v61 = vld [vmem:[%s19839_s12 + $0x98] sm:$0xff]  ;;  %v14304_v12 = vld [vmem:[%s19839_s12 + $0x1e0] sm:$0xff] }
 0x63d   :  { %v4761_v23 = vpop.f32.mrf.mxu0 }
 0x63e   :  { %v4773_v22 = vpop.f32.mrf.mxu1  ;;  %v4762_v6 = vadd.f32 %v4761_v23, %v4748_v43  ;;  %v14275_v23 = vld [vmem:[%s19839_s12 + $0xf8] sm:$0xff]  ;;  %v14262_v43 = vld [vmem:[%s19839_s12 + $0x90] sm:$0xff] }
 0x63f   :  { %v4774_v58 = vadd.f32 %v4773_v22, %v4760_v0  ;;  %v14259_v22 = vld [vmem:[%s19839_s12 + $0x78] sm:$0xff]  ;;  %5916 = vmatpush.bf16.msra.mxu3 %v14275_v23 }
 0x640   :  { %5792 = vmatpush.bf16.msra.mxu1 %v14259_v22  ;;  %v14296_v22 = vld [vmem:[%s19839_s12 + $0x1a0] sm:$0xff]  ;;  %v14279_v23 = vld [vmem:[%s19839_s12 + $0x118] sm:$0xff] }
 0x645   :  { %v4815_v40 = vpop.f32.mrf.mxu0 }
 0x646   :  { %v4775_v39 = vpop.f32.mrf.mxu1 }
 0x647   :  { %v4776_v20 = vadd.f32 %v4775_v39, %v4762_v6  ;;  %v14258_v39 = vld [vmem:[%s19839_s12 + $0x70] sm:$0xff]  ;;  %v14269_v6 = vld [vmem:[%s19839_s12 + $0xc8] sm:$0xff] }
 0x648   :  { %5793 = vmatpush.bf16.msra.mxu1 %v14258_v39  ;;  %v14295_v39 = vld [vmem:[%s19839_s12 + $0x198] sm:$0xff] }
 0x64d   :  { %v4817_v44 = vpop.f32.mrf.mxu0 }
 0x64e   :  { %v4829_v7 = vpop.f32.mrf.mxu1 }
 0x64f   :  { %v4830_v29 = vadd.f32 %v4829_v7, %v4815_v40  ;;  %v14249_v40 = vld [vmem:[%s19839_s12 + $0x28] sm:$0xff] }
 0x650   :  { %v14257_v7 = vld [vmem:[%s19839_s12 + $0x68] sm:$0xff] }
 0x651   :  { %5794 = vmatpush.bf16.msra.mxu1 %v14257_v7  ;;  %v14278_v7 = vld [vmem:[%s19839_s12 + $0x110] sm:$0xff] }
 0x655   :  { %v4871_v56 = vpop.f32.mrf.mxu0 }
 0x656   :  { %v4831_v18 = vpop.f32.mrf.mxu1 }
 0x657   :  { %v4832_v16 = vadd.f32 %v4831_v18, %v4817_v44  ;;  %v14248_v44 = vld [vmem:[%s19839_s12 + $0x20] sm:$0xff] }
 0x658   :  { %v14256_v18 = vld [vmem:[%s19839_s12 + $0x60] sm:$0xff] }
 0x659   :  { %5795 = vmatpush.bf16.msra.mxu1 %v14256_v18  ;;  %v14302_v18 = vld [vmem:[%s19839_s12 + $0x1d0] sm:$0xff] }
 0x65c   :  { %v4787_v38 = vpop.f32.mrf.mxu2 }
 0x65d   :  { %v4788_v62 = vadd.f32 %v4787_v38, %v4774_v58  ;;  %v4873_v3 = vpop.f32.mrf.mxu0  ;;  %v14250_v38 = vld [vmem:[%s19839_s12 + $0x30] sm:$0xff]  ;;  %v14247_v58 = vld [vmem:[%s19839_s12 + $0x18] sm:$0xff] }
 0x65e   :  { %v4885_v53 = vpop.f32.mrf.mxu1  ;;  %5779 = vmatpush.bf16.msra.mxu0 %v14250_v38  ;;  %v14287_v38 = vld [vmem:[%s19839_s12 + $0x158] sm:$0xff] }
 0x662   :  { %5780 = vmatpush.bf16.msra.mxu0 %v14249_v40 }
 0x663   :  { %v4801_v13 = vpop.f32.mrf.mxu3 }
 0x664   :  { %v4789_v11 = vpop.f32.mrf.mxu2  ;;  %v4802_v2 = vadd.f32 %v4801_v13, %v4788_v62  ;;  %v14266_v13 = vld [vmem:[%s19839_s12 + $0xb0] sm:$0xff]  ;;  %v14271_v62 = vld [vmem:[%s19839_s12 + $0xd8] sm:$0xff] }
 0x665   :  { %v4790_v26 = vadd.f32 %v4789_v11, %v4776_v20  ;;  %v14274_v11 = vld [vmem:[%s19839_s12 + $0xf0] sm:$0xff]  ;;  %5903 = vmatpush.bf16.msra.mxu2 %v14266_v13  ;;  %v14260_v20 = vld [vmem:[%s19839_s12 + $0x80] sm:$0xff]  ;;  %v14303_v13 = vld [vmem:[%s19839_s12 + $0x1d8] sm:$0xff] }
 0x666   :  { %v4918_v21 = vmax.f32 %v4802_v2, 0.0  ;;  %v4887_v25 = vpop.f32.mrf.mxu1  ;;  %5917 = vmatpush.bf16.msra.mxu3 %v14274_v11  ;;  %5781 = vmatpush.bf16.msra.mxu0 %v14248_v44  ;;  %v14270_v2 = vld [vmem:[%s19839_s12 + $0xd0] sm:$0xff] }
 0x66a   :  { %5782 = vmatpush.bf16.msra.mxu0 %v14247_v58 }
 0x66b   :  { %v4803_v41 = vpop.f32.mrf.mxu3 }
 0x66c   :  { %v4843_v10 = vpop.f32.mrf.mxu2  ;;  %v4804_v9 = vadd.f32 %v4803_v41, %v4790_v26  ;;  %v14265_v41 = vld [vmem:[%s19839_s12 + $0xa8] sm:$0xff]  ;;  %v14307_v26 = vld [vmem:[%s19839_s12 + $0x1f8] sm:$0xff] }
 0x66d   :  { %v4844_v51 = vadd.f32 %v4843_v10, %v4830_v29  ;;  %v14273_v10 = vld [vmem:[%s19839_s12 + $0xe8] sm:$0xff]  ;;  %5904 = vmatpush.bf16.msra.mxu2 %v14265_v41  ;;  %v14272_v29 = vld [vmem:[%s19839_s12 + $0xe0] sm:$0xff]  ;;  %v14286_v41 = vld [vmem:[%s19839_s12 + $0x150] sm:$0xff] }
 0x66e   :  { %v4920_v33 = vmax.f32 %v4804_v9, 0.0  ;;  %5918 = vmatpush.bf16.msra.mxu3 %v14273_v10  ;;  %v14298_v9 = vld [vmem:[%s19839_s12 + $0x1b0] sm:$0xff] }
 0x66f   :  { %v14294_v10 = vld [vmem:[%s19839_s12 + $0x190] sm:$0xff] }
 0x672   :  { %5919 = vmatpush.bf16.msra.mxu3 %v14272_v29  ;;  %v14285_v29 = vld [vmem:[%s19839_s12 + $0x148] sm:$0xff] }
 0x673   :  { %v4857_v19 = vpop.f32.mrf.mxu3 }
 0x674   :  { %v4845_v49 = vpop.f32.mrf.mxu2  ;;  %v4858_v52 = vadd.f32 %v4857_v19, %v4844_v51  ;;  %v14264_v19 = vld [vmem:[%s19839_s12 + $0xa0] sm:$0xff] }
 0x675   :  { %v4846_v28 = vadd.f32 %v4845_v49, %v4832_v16  ;;  %5905 = vmatpush.bf16.msra.mxu2 %v14264_v19  ;;  %v14277_v19 = vld [vmem:[%s19839_s12 + $0x108] sm:$0xff] }
 0x676   :  { %v4872_v17 = vadd.f32 %v4871_v56, %v4858_v52  ;;  %5920 = vmatpush.bf16.msra.mxu3 %v14271_v62  ;;  %v785_v62 = vld [vmem:[%s19837_s10] sm:$0x3] }
 0x678   :  { %v4886_v42 = vadd.f32 %v4885_v53, %v4872_v17 }
 0x679   :  { %5906 = vmatpush.bf16.msra.mxu2 %v14263_v61 }
 0x67a   :  { %5921 = vmatpush.bf16.msra.mxu3 %v14270_v2 }
 0x67b   :  { %v4859_v57 = vpop.f32.mrf.mxu3 }
 0x67c   :  { %v4899_v54 = vpop.f32.mrf.mxu2  ;;  %v4860_v1 = vadd.f32 %v4859_v57, %v4846_v28  ;;  %v14255_v28 = vld [vmem:[%s19839_s12 + $0x58] sm:$0xff] }
 0x67d   :  { %v4900_v45 = vadd.f32 %v4899_v54, %v4886_v42  ;;  %5796 = vmatpush.bf16.msra.mxu1 %v14255_v28  ;;  %v14254_v42 = vld [vmem:[%s19839_s12 + $0x50] sm:$0xff]  ;;  %5907 = vmatpush.bf16.msra.mxu2 %v14262_v43 }
 0x67e   :  { %v4874_v14 = vadd.f32 %v4873_v3, %v4860_v1  ;;  %v14246_v1 = vld [vmem:[%s19839_s12 + $0x10] sm:$0xff]  ;;  %v14253_v3 = vld [vmem:[%s19839_s12 + $0x48] sm:$0xff]  ;;  %5922 = vmatpush.bf16.msra.mxu3 %v14269_v6 }
 0x67f   :  { %5783 = vmatpush.bf16.msra.mxu0 %v14246_v1 }
 0x680   :  { %v4888_v50 = vadd.f32 %v4887_v25, %v4874_v14  ;;  %v14244_v14 = vld [vmem:[%s19839_s12] sm:$0xff]  ;;  %v14291_v25 = vld [vmem:[%s19839_s12 + $0x178] sm:$0xff] }
 0x681   :  { %5797 = vmatpush.bf16.msra.mxu1 %v14254_v42 }
 0x683   :  { %v4913_v59 = vpop.f32.mrf.mxu3 }
 0x684   :  { %v4914_v15 = vadd.f32 %v4913_v59, %v4900_v45  ;;  %v4901_v30 = vpop.f32.mrf.mxu2  ;;  %v14245_v45 = vld [vmem:[%s19839_s12 + $0x8] sm:$0xff] }
 0x685   :  { %v4902_v35 = vadd.f32 %v4901_v30, %v4888_v50  ;;  %v14261_v59 = vld [vmem:[%s19839_s12 + $0x88] sm:$0xff]  ;;  %5784 = vmatpush.bf16.msra.mxu0 %v14245_v45  ;;  %5798 = vmatpush.bf16.msra.mxu1 %v14253_v3  ;;  %v14299_v30 = vld [vmem:[%s19839_s12 + $0x1b8] sm:$0xff]  ;;  %v14282_v50 = vld [vmem:[%s19839_s12 + $0x130] sm:$0xff]  ;;  %v4973_v45 = vperm.slane %v785_v62, 0  ;;  %v4974_v3 = vperm.slane %v785_v62, 1 }
 0x686   :  { %v4919_v24 = vmax.f32 %v4914_v15, 0.0  ;;  %5908 = vmatpush.bf16.msra.mxu2 %v14261_v59  ;;  %v14252_v15 = vld [vmem:[%s19839_s12 + $0x40] sm:$0xff]  ;;  %v14334_v62 = vld [vmem:[%s19840_s13 + $0xd0] sm:$0xff] }
 0x687   :  { %v786_v59 = vld [vmem:[%s19838_s11] sm:$0x3] }
 0x688   :  { %v4922_v27 = vadd.f32 %v4919_v24, %v4918_v21 }
 0x689   :  { %5785 = vmatpush.bf16.msra.mxu0 %v14244_v14  ;;  %5799 = vmatpush.bf16.msra.mxu1 %v14252_v15 }
 0x68a   :  { %4923 = vadd.xlane.f32.xlu2 %v4922_v27  ;;  %5909 = vmatpush.bf16.msra.mxu2 %v14260_v20  ;;  %v14290_v27 = vld [vmem:[%s19839_s12 + $0x170] sm:$0xff] }
 0x68b   :  { %v4915_v32 = vpop.f32.mrf.mxu3 }
 0x68c   :  { %v4916_v4 = vadd.f32 %v4915_v32, %v4902_v35  ;;  %v14306_v35 = vld [vmem:[%s19839_s12 + $0x1f0] sm:$0xff]  ;;  %v14281_v32 = vld [vmem:[%s19839_s12 + $0x128] sm:$0xff] }
 0x68d   :  { %6040 = vmatpush.bf16.msrb.mxu1 %v14291_v25  ;;  %v4983_v25 = vperm.slane %v786_v59, 1 }
 0x68e   :  { %v4921_v34 = vmax.f32 %v4916_v4, 0.0  ;;  %6150 = vmatpush.bf16.msrb.mxu2 %v14299_v30  ;;  %v14289_v4 = vld [vmem:[%s19839_s12 + $0x168] sm:$0xff] }
 0x690   :  { %v4925_v36 = vadd.f32 %v4921_v34, %v4920_v33 }
 0x691   :  { %6041 = vmatpush.bf16.msrb.mxu1 %v14290_v27 }
 0x692   :  { %4926 = vadd.xlane.f32.xlu0 %v4925_v36  ;;  %6151 = vmatpush.bf16.msrb.mxu2 %v14298_v9  ;;  %v14280_v36 = vld [vmem:[%s19839_s12 + $0x120] sm:$0xff] }
 0x695   :  { %6042 = vmatpush.bf16.msrb.mxu1 %v14289_v4 }
 0x699   :  { %6043 = vmatpush.bf16.msrb.mxu1 %v14288_v37 }
 0x69d   :  { %6044 = vmatpush.bf16.msrb.mxu1 %v14287_v38 }
 0x6a1   :  { %6045 = vmatpush.bf16.msrb.mxu1 %v14286_v41  ;;  %v14314_v41 = vld [vmem:[%s19840_s13 + $0x30] sm:$0xff] }
 0x6a5   :  { %6046 = vmatpush.bf16.msrb.mxu1 %v14285_v29  ;;  %v14321_v29 = vld [vmem:[%s19840_s13 + $0x68] sm:$0xff] }
 0x6fd   :  { %v4924_v49 = vpop.xlane.xlu2 %4923 }
 0x6fe   :  { %v4928_v46 = vmul.f32 %v4924_v49, %v15889_v48  ;;  %v14293_v49 = vld [vmem:[%s19839_s12 + $0x188] sm:$0xff] }
 0x700   :  { %v17477_v51 = vsub.f32 %v4918_v21, %v4928_v46  ;;  %v17479_v63 = vsub.f32 %v4919_v24, %v4928_v46  ;;  %v14268_v21 = vld [vmem:[%s19839_s12 + $0xc0] sm:$0xff]  ;;  %v14283_v24 = vld [vmem:[%s19839_s12 + $0x138] sm:$0xff]  ;;  %v14301_v46 = vld [vmem:[%s19839_s12 + $0x1c8] sm:$0xff] }
 0x701   :  { %5923 = vmatpush.bf16.msra.mxu3 %v14268_v21  ;;  %6026 = vmatpush.bf16.msrb.mxu0 %v14283_v24  ;;  %v4982_v24 = vperm.slane %v786_v59, 0  ;;  %v14324_v59 = vld [vmem:[%s19840_s13 + $0x80] sm:$0xff] }
 0x702   :  { %v4934_v52 = vmul.f32 %v17477_v51, %v17477_v51  ;;  %v4935_v56 = vmul.f32 %v17479_v63, %v17479_v63 }
 0x704   :  { %v4938_v55 = vadd.f32 %v4935_v56, %v4934_v52 }
 0x705   :  { %v4927_v57 = vpop.xlane.xlu0 %4926  ;;  %6164 = vmatpush.bf16.msrb.mxu3 %v14307_v26  ;;  %6027 = vmatpush.bf16.msrb.mxu0 %v14282_v50 }
 0x706   :  { %v4929_v0 = vmul.f32 %v4927_v57, %v15889_v48  ;;  %4939 = vadd.xlane.f32.xlu1 %v4938_v55  ;;  %v14276_v55 = vld [vmem:[%s19839_s12 + $0x100] sm:$0xff] }
 0x707   :  { %v14284_v57 = vld [vmem:[%s19839_s12 + $0x140] sm:$0xff] }
 0x708   :  { %v17486_v16 = vsub.f32 %v4920_v33, %v4929_v0  ;;  %v17488_v17 = vsub.f32 %v4921_v34, %v4929_v0  ;;  %v14297_v33 = vld [vmem:[%s19839_s12 + $0x1a8] sm:$0xff]  ;;  %v14292_v0 = vld [vmem:[%s19839_s12 + $0x180] sm:$0xff]  ;;  %6047 = vmatpush.bf16.msrb.mxu1 %v14284_v57 }
 0x709   :  { %6165 = vmatpush.bf16.msrb.mxu3 %v14306_v35  ;;  %v14305_v34 = vld [vmem:[%s19839_s12 + $0x1e8] sm:$0xff]  ;;  %6028 = vmatpush.bf16.msrb.mxu0 %v14281_v32  ;;  %v14336_v57 = vld [vmem:[%s19840_s13 + $0xe0] sm:$0xff] }
 0x70a   :  { %v4936_v53 = vmul.f32 %v17486_v16, %v17486_v16  ;;  %v4937_v54 = vmul.f32 %v17488_v17, %v17488_v17  ;;  %6152 = vmatpush.bf16.msrb.mxu2 %v14297_v33 }
 0x70c   :  { %v4941_v31 = vadd.f32 %v4937_v54, %v4936_v53 }
 0x70d   :  { %6166 = vmatpush.bf16.msrb.mxu3 %v14305_v34  ;;  %6029 = vmatpush.bf16.msrb.mxu0 %v14280_v36 }
 0x70e   :  { %4942 = vadd.xlane.f32.xlu2 %v4941_v31  ;;  %6153 = vmatpush.bf16.msrb.mxu2 %v14296_v22  ;;  %v14300_v31 = vld [vmem:[%s19839_s12 + $0x1c0] sm:$0xff] }
 0x711   :  { %6167 = vmatpush.bf16.msrb.mxu3 %v14304_v12  ;;  %6030 = vmatpush.bf16.msrb.mxu0 %v14279_v23 }
 0x712   :  { %6154 = vmatpush.bf16.msrb.mxu2 %v14295_v39 }
 0x715   :  { %6168 = vmatpush.bf16.msrb.mxu3 %v14303_v13  ;;  %6031 = vmatpush.bf16.msrb.mxu0 %v14278_v7  ;;  %v14339_v7 = vld [vmem:[%s19840_s13 + $0xf8] sm:$0xff] }
 0x716   :  { %6155 = vmatpush.bf16.msrb.mxu2 %v14294_v10  ;;  %v14322_v10 = vld [vmem:[%s19840_s13 + $0x70] sm:$0xff] }
 0x719   :  { %6169 = vmatpush.bf16.msrb.mxu3 %v14302_v18  ;;  %6032 = vmatpush.bf16.msrb.mxu0 %v14277_v19  ;;  %v14338_v18 = vld [vmem:[%s19840_s13 + $0xf0] sm:$0xff]  ;;  %v14313_v19 = vld [vmem:[%s19840_s13 + $0x28] sm:$0xff] }
 0x71a   :  { %6156 = vmatpush.bf16.msrb.mxu2 %v14293_v49  ;;  %v14329_v49 = vld [vmem:[%s19840_s13 + $0xa8] sm:$0xff] }
 0x71d   :  { %6170 = vmatpush.bf16.msrb.mxu3 %v14301_v46  ;;  %6033 = vmatpush.bf16.msrb.mxu0 %v14276_v55  ;;  %v14337_v46 = vld [vmem:[%s19840_s13 + $0xe8] sm:$0xff]  ;;  %v14328_v55 = vld [vmem:[%s19840_s13 + $0xa0] sm:$0xff] }
 0x71e   :  { %6157 = vmatpush.bf16.msrb.mxu2 %v14292_v0  ;;  %v14311_v0 = vld [vmem:[%s19840_s13 + $0x18] sm:$0xff] }
 0x721   :  { %6171 = vmatpush.bf16.msrb.mxu3 %v14300_v31  ;;  %v14335_v31 = vld [vmem:[%s19840_s13 + $0xd8] sm:$0xff] }
 0x779   :  { %v4940_v11 = vpop.xlane.xlu1 %4939 }
 0x77a   :  { %v4944_v40 = vmul.f32 %v4940_v11, %v15889_v48 }
 0x77c   :  { %v4946_v44 = vadd.f32 1e-05, %v4944_v40  ;;  %v14315_v40 = vld [vmem:[%s19840_s13 + $0x38] sm:$0xff] }
 0x77e   :  { %14770 = vrsqrt.f32 %v4946_v44  ;;  %vm4954_vm14 = vweird.f32 %v4946_v44 }
 0x781   :  { %v4943_v52 = vpop.xlane.xlu2 %4942 }
 0x782   :  { %v4945_v56 = vmul.f32 %v4943_v52, %v15889_v48  ;;  %v14312_v52 = vld [vmem:[%s19840_s13 + $0x20] sm:$0xff] }
 0x784   :  { %v14771_v53 = vpop.eup %14770  ;;  %v4947_v54 = vadd.f32 1e-05, %v4945_v56  ;;  %v14320_v56 = vld [vmem:[%s19840_s13 + $0x60] sm:$0xff] }
 0x785   :  { %v4949_v58 = vmul.f32 %v14771_v53, %v4946_v44  ;;  %vm4955_vm13 = vweird.f32 %v14771_v53  ;;  %v14330_v44 = vld [vmem:[%s19840_s13 + $0xb0] sm:$0xff] }
 0x786   :  { %14772 = vrsqrt.f32 %v4947_v54  ;;  %vm4956_vm15 = vmor %vm4954_vm14, %vm4955_vm13  ;;  %vm4964_vm3 = vweird.f32 %v4947_v54 }
 0x787   :  { %v4950_v28 = vmul.f32 %v14771_v53, %v4949_v58  ;;  %v14310_v58 = vld [vmem:[%s19840_s13 + $0x10] sm:$0xff] }
 0x789   :  { %v4951_v61 = vmul.f32 0.5, %v4950_v28  ;;  %v14318_v28 = vld [vmem:[%s19840_s13 + $0x50] sm:$0xff] }
 0x78b   :  { %v4952_v1 = vsub.f32 1.5, %v4951_v61  ;;  %v14326_v61 = vld [vmem:[%s19840_s13 + $0x90] sm:$0xff] }
 0x78c   :  { %v14773_v42 = vpop.eup %14772 }
 0x78d   :  { %v4953_v43 = vmul.f32 %v14771_v53, %v4952_v1  ;;  %v4959_v2 = vmul.f32 %v14773_v42, %v4947_v54  ;;  %vm4965_vm2 = vweird.f32 %v14773_v42  ;;  %v14327_v54 = vld [vmem:[%s19840_s13 + $0x98] sm:$0xff]  ;;  %v14309_v1 = vld [vmem:[%s19840_s13 + $0x8] sm:$0xff] }
 0x78e   :  { %vm4966_vm4 = vmor %vm4964_vm3, %vm4965_vm2 }
 0x78f   :  { %v4957_v6 = vsel %vm4956_vm15, %v14771_v53, %v4953_v43  ;;  %v4960_v14 = vmul.f32 %v14773_v42, %v4959_v2  ;;  %v14319_v53 = vld [vmem:[%s19840_s13 + $0x58] sm:$0xff]  ;;  %v14325_v43 = vld [vmem:[%s19840_s13 + $0x88] sm:$0xff] }
 0x790   :  { %v4968_v15 = vmul.f32 %v4957_v6, %v17477_v51  ;;  %v4969_v20 = vmul.f32 %v4957_v6, %v17479_v63  ;;  %v14333_v2 = vld [vmem:[%s19840_s13 + $0xc8] sm:$0xff]  ;;  %v14332_v6 = vld [vmem:[%s19840_s13 + $0xc0] sm:$0xff] }
 0x791   :  { %v4961_v21 = vmul.f32 0.5, %v4960_v14  ;;  %v14347_v14 = vld [vmem:[%s19840_s13 + $0x138] sm:$0xff] }
 0x792   :  { %v4977_v30 = vmul.f32 %v4973_v45, %v4968_v15  ;;  %v4978_v26 = vmul.f32 %v4974_v3, %v4969_v20  ;;  %v14355_v15 = vld [vmem:[%s19840_s13 + $0x178] sm:$0xff] }
 0x793   :  { %v4962_v50 = vsub.f32 1.5, %v4961_v21  ;;  %v14363_v20 = vld [vmem:[%s19840_s13 + $0x1b8] sm:$0xff] }
 0x794   :  { %v4986_v9 = vadd.f32 %v4982_v24, %v4977_v30  ;;  %v4987_v35 = vadd.f32 %v4983_v25, %v4978_v26  ;;  %v14371_v21 = vld [vmem:[%s19840_s13 + $0x1f8] sm:$0xff]  ;;  %v14362_v30 = vld [vmem:[%s19840_s13 + $0x1b0] sm:$0xff] }
 0x795   :  { %v4963_v27 = vmul.f32 %v14773_v42, %v4962_v50  ;;  %v14370_v26 = vld [vmem:[%s19840_s13 + $0x1f0] sm:$0xff]  ;;  %v14345_v50 = vld [vmem:[%s19840_s13 + $0x128] sm:$0xff] }
 0x796   :  { %v17651_v51 = vadd.f32 %v4986_v9, %v16222_v5  ;;  %v17654_v63 = vadd.f32 %v4987_v35, %v16227_v60  ;;  %v14361_v9 = vld [vmem:[%s19840_s13 + $0x1a8] sm:$0xff] }
 0x797   :  { %v4967_v32 = vsel %vm4966_vm4, %v14773_v42, %v4963_v27  ;;  %v14317_v42 = vld [vmem:[%s19840_s13 + $0x48] sm:$0xff] }
 0x798   :  { %v4970_v4 = vmul.f32 %v4967_v32, %v17486_v16  ;;  %v4971_v33 = vmul.f32 %v4967_v32, %v17488_v17  ;;  %v5670_v12 = vpack.c.bf16 %v17654_v63, %v17651_v51  ;;  %v14353_v27 = vld [vmem:[%s19840_s13 + $0x168] sm:$0xff]  ;;  %v14344_v32 = vld [vmem:[%s19840_s13 + $0x120] sm:$0xff] }
 0x799   :  { %v14369_v35 = vld [vmem:[%s19840_s13 + $0x1e8] sm:$0xff] }
 0x79a   :  { %v4979_v34 = vmul.f32 %v4973_v45, %v4970_v4  ;;  %v4980_v36 = vmul.f32 %v4974_v3, %v4971_v33  ;;  %v5674_v17 = vunpack.c.l.b16 %v5670_v12  ;;  %v5675_v38 = vunpack.c.h.b16 %v5670_v12  ;;  %v14308_v45 = vld [vmem:[%s19840_s13] sm:$0xff]  ;;  %v14367_v12 = vld [vmem:[%s19840_s13 + $0x1d8] sm:$0xff] }
 0x79b   :  { %v14316_v3 = vld [vmem:[%s19840_s13 + $0x40] sm:$0xff] }
 0x79c   :  { %v4988_v37 = vadd.f32 %v4982_v24, %v4979_v34  ;;  %v4989_v22 = vadd.f32 %v4983_v25, %v4980_v36  ;;  %v14346_v24 = vld [vmem:[%s19840_s13 + $0x130] sm:$0xff]  ;;  %v14352_v4 = vld [vmem:[%s19840_s13 + $0x160] sm:$0xff]  ;;  %v14343_v36 = vld [vmem:[%s19840_s13 + $0x118] sm:$0xff] }
 0x79d   :  { %v14354_v25 = vld [vmem:[%s19840_s13 + $0x170] sm:$0xff]  ;;  %v14360_v33 = vld [vmem:[%s19840_s13 + $0x1a0] sm:$0xff] }
 0x79e   :  { %v17659_v23 = vadd.f32 %v4988_v37, %v16232_v8  ;;  %v17662_v16 = vadd.f32 %v4989_v22, %v16237_v47  ;;  %v14323_v8 = vld [vmem:[%s19840_s13 + $0x78] sm:$0xff]  ;;  %v14368_v34 = vld [vmem:[%s19840_s13 + $0x1e0] sm:$0xff] }
 0x79f   :  { %v14331_v47 = vld [vmem:[%s19840_s13 + $0xb8] sm:$0xff] }
 0x7a0   :  { %v5671_v5 = vpack.c.bf16 %v17662_v16, %v17659_v23  ;;  %v14351_v37 = vld [vmem:[%s19840_s13 + $0x158] sm:$0xff] }
 0x7a1   :  { %v14359_v22 = vld [vmem:[%s19840_s13 + $0x198] sm:$0xff] }
 0x7a2   :  { %v5676_v60 = vunpack.c.l.b16 %v5671_v5  ;;  %v5677_v39 = vunpack.c.h.b16 %v5671_v5  ;;  %v14342_v5 = vld [vmem:[%s19840_s13 + $0x110] sm:$0xff] }
 0x7a4   :  { %v17666_v13 = vpack.c.b16 %v5676_v60, %v5674_v17  ;;  %v17668_v11 = vpack.c.b16 %v5677_v39, %v5675_v38  ;;  %v14350_v17 = vld [vmem:[%s19840_s13 + $0x150] sm:$0xff]  ;;  %v14341_v39 = vld [vmem:[%s19840_s13 + $0x108] sm:$0xff] }
 0x7a5   :  { %v14358_v38 = vld [vmem:[%s19840_s13 + $0x190] sm:$0xff] }
 0x7a6   :  { %5786 = vmatmul.bf16.vlgmr.msra.gmra.mxu0 %v17666_v13  ;;  %5800 = vmatmul.bf16.vlgmr.msra.gmra.mxu1 %v17668_v11  ;;  %v14366_v60 = vld [vmem:[%s19840_s13 + $0x1d0] sm:$0xff] }
 0x7a7   :  { %5910 = vmatmul.bf16.vlgmr.msra.gmra.mxu2 %v17666_v13  ;;  %5924 = vmatmul.bf16.vlgmr.msra.gmra.mxu3 %v17668_v11 }
 0x7a8   :  { %6274 = vmatpush.bf16.msra.mxu0 %v14315_v40  ;;  %6288 = vmatpush.bf16.msra.mxu1 %v14323_v8  ;;  %v14349_v40 = vld [vmem:[%s19840_s13 + $0x148] sm:$0xff] }
 0x7a9   :  { %6398 = vmatpush.bf16.msra.mxu2 %v14331_v47  ;;  %6412 = vmatpush.bf16.msra.mxu3 %v14339_v7  ;;  %v14357_v8 = vld [vmem:[%s19840_s13 + $0x188] sm:$0xff]  ;;  %v14340_v7 = vld [vmem:[%s19840_s13 + $0x100] sm:$0xff] }
 0x7aa   :  { %v14365_v47 = vld [vmem:[%s19840_s13 + $0x1c8] sm:$0xff] }
 0x7ac   :  { %6275 = vmatpush.bf16.msra.mxu0 %v14314_v41  ;;  %6289 = vmatpush.bf16.msra.mxu1 %v14322_v10  ;;  %v14348_v41 = vld [vmem:[%s19840_s13 + $0x140] sm:$0xff] }
 0x7ad   :  { %6399 = vmatpush.bf16.msra.mxu2 %v14330_v44  ;;  %6413 = vmatpush.bf16.msra.mxu3 %v14338_v18  ;;  %v14356_v10 = vld [vmem:[%s19840_s13 + $0x180] sm:$0xff]  ;;  %v14379_v18 = vld [vmem:[%s19841_s14 + $0x38] sm:$0xff] }
 0x7ae   :  { %v14364_v44 = vld [vmem:[%s19840_s13 + $0x1c0] sm:$0xff] }
 0x7b0   :  { %6276 = vmatpush.bf16.msra.mxu0 %v14313_v19  ;;  %6290 = vmatpush.bf16.msra.mxu1 %v14321_v29  ;;  %v14387_v19 = vld [vmem:[%s19841_s14 + $0x78] sm:$0xff] }
 0x7b1   :  { %6400 = vmatpush.bf16.msra.mxu2 %v14329_v49  ;;  %6414 = vmatpush.bf16.msra.mxu3 %v14337_v46  ;;  %v14395_v29 = vld [vmem:[%s19841_s14 + $0xb8] sm:$0xff]  ;;  %v14378_v46 = vld [vmem:[%s19841_s14 + $0x30] sm:$0xff] }
 0x7b2   :  { %v14403_v49 = vld [vmem:[%s19841_s14 + $0xf8] sm:$0xff] }
 0x7b4   :  { %6277 = vmatpush.bf16.msra.mxu0 %v14312_v52  ;;  %6291 = vmatpush.bf16.msra.mxu1 %v14320_v56  ;;  %v14386_v52 = vld [vmem:[%s19841_s14 + $0x70] sm:$0xff] }
 0x7b5   :  { %6401 = vmatpush.bf16.msra.mxu2 %v14328_v55  ;;  %6415 = vmatpush.bf16.msra.mxu3 %v14336_v57  ;;  %v14394_v56 = vld [vmem:[%s19841_s14 + $0xb0] sm:$0xff]  ;;  %v14377_v57 = vld [vmem:[%s19841_s14 + $0x28] sm:$0xff] }
 0x7b6   :  { %6034 = vmatmul.bf16.vlgmr.msrb.gmra.mxu0 %v17666_v13  ;;  %6048 = vmatmul.bf16.vlgmr.msrb.gmra.mxu1 %v17668_v11  ;;  %v14402_v55 = vld [vmem:[%s19841_s14 + $0xf0] sm:$0xff] }
 0x7b7   :  { %6158 = vmatmul.bf16.vlgmr.msrb.gmra.mxu2 %v17666_v13  ;;  %6172 = vmatmul.bf16.vlgmr.msrb.gmra.mxu3 %v17668_v11 }
 0x7b8   :  { %6278 = vmatpush.bf16.msra.mxu0 %v14311_v0  ;;  %6292 = vmatpush.bf16.msra.mxu1 %v14319_v53  ;;  %v14385_v0 = vld [vmem:[%s19841_s14 + $0x68] sm:$0xff] }
 0x7b9   :  { %6402 = vmatpush.bf16.msra.mxu2 %v14327_v54  ;;  %6416 = vmatpush.bf16.msra.mxu3 %v14335_v31  ;;  %v14393_v53 = vld [vmem:[%s19841_s14 + $0xa8] sm:$0xff]  ;;  %v14376_v31 = vld [vmem:[%s19841_s14 + $0x20] sm:$0xff] }
 0x7ba   :  { %v14401_v54 = vld [vmem:[%s19841_s14 + $0xe8] sm:$0xff] }
 0x7bc   :  { %6279 = vmatpush.bf16.msra.mxu0 %v14310_v58  ;;  %6293 = vmatpush.bf16.msra.mxu1 %v14318_v28  ;;  %v14384_v58 = vld [vmem:[%s19841_s14 + $0x60] sm:$0xff] }
 0x7bd   :  { %6403 = vmatpush.bf16.msra.mxu2 %v14326_v61  ;;  %6417 = vmatpush.bf16.msra.mxu3 %v14334_v62  ;;  %v14392_v28 = vld [vmem:[%s19841_s14 + $0xa0] sm:$0xff]  ;;  %v14375_v62 = vld [vmem:[%s19841_s14 + $0x18] sm:$0xff] }
 0x7be   :  { %v14400_v61 = vld [vmem:[%s19841_s14 + $0xe0] sm:$0xff] }
 0x7c0   :  { %6280 = vmatpush.bf16.msra.mxu0 %v14309_v1  ;;  %6294 = vmatpush.bf16.msra.mxu1 %v14317_v42  ;;  %v14383_v1 = vld [vmem:[%s19841_s14 + $0x58] sm:$0xff] }
 0x7c1   :  { %6404 = vmatpush.bf16.msra.mxu2 %v14325_v43  ;;  %6418 = vmatpush.bf16.msra.mxu3 %v14333_v2  ;;  %v14391_v42 = vld [vmem:[%s19841_s14 + $0x98] sm:$0xff]  ;;  %v14374_v2 = vld [vmem:[%s19841_s14 + $0x10] sm:$0xff] }
 0x7c2   :  { %v14399_v43 = vld [vmem:[%s19841_s14 + $0xd8] sm:$0xff] }
 0x7c4   :  { %6281 = vmatpush.bf16.msra.mxu0 %v14308_v45  ;;  %6295 = vmatpush.bf16.msra.mxu1 %v14316_v3  ;;  %v14382_v45 = vld [vmem:[%s19841_s14 + $0x50] sm:$0xff] }
 0x7c5   :  { %6405 = vmatpush.bf16.msra.mxu2 %v14324_v59  ;;  %6419 = vmatpush.bf16.msra.mxu3 %v14332_v6  ;;  %v14390_v3 = vld [vmem:[%s19841_s14 + $0x90] sm:$0xff]  ;;  %v14373_v6 = vld [vmem:[%s19841_s14 + $0x8] sm:$0xff] }
 0x7c6   :  { %v14398_v59 = vld [vmem:[%s19841_s14 + $0xd0] sm:$0xff] }
 0x7c7   :  { %6282 = vmatmul.bf16.vlgmr.msra.gmra.mxu0 %v17666_v13  ;;  %6296 = vmatmul.bf16.vlgmr.msra.gmra.mxu1 %v17668_v11 }
 0x7c8   :  { %6522 = vmatpush.bf16.msrb.mxu0 %v14347_v14  ;;  %6536 = vmatpush.bf16.msrb.mxu1 %v14355_v15  ;;  %v14381_v14 = vld [vmem:[%s19841_s14 + $0x48] sm:$0xff] }
 0x7c9   :  { %6646 = vmatpush.bf16.msrb.mxu2 %v14363_v20  ;;  %6660 = vmatpush.bf16.msrb.mxu3 %v14371_v21  ;;  %v14389_v15 = vld [vmem:[%s19841_s14 + $0x88] sm:$0xff]  ;;  %v14372_v21 = vld [vmem:[%s19841_s14] sm:$0xff] }
 0x7ca   :  { %6406 = vmatmul.bf16.vlgmr.msra.gmra.mxu2 %v17666_v13  ;;  %6420 = vmatmul.bf16.vlgmr.msra.gmra.mxu3 %v17668_v11  ;;  %v14397_v20 = vld [vmem:[%s19841_s14 + $0xc8] sm:$0xff] }
 0x7cc   :  { %6523 = vmatpush.bf16.msrb.mxu0 %v14346_v24  ;;  %6537 = vmatpush.bf16.msrb.mxu1 %v14354_v25  ;;  %v14380_v24 = vld [vmem:[%s19841_s14 + $0x40] sm:$0xff] }
 0x7cd   :  { %6647 = vmatpush.bf16.msrb.mxu2 %v14362_v30  ;;  %6661 = vmatpush.bf16.msrb.mxu3 %v14370_v26  ;;  %v14388_v25 = vld [vmem:[%s19841_s14 + $0x80] sm:$0xff]  ;;  %v14411_v26 = vld [vmem:[%s19841_s14 + $0x138] sm:$0xff] }
 0x7ce   :  { %v14396_v30 = vld [vmem:[%s19841_s14 + $0xc0] sm:$0xff] }
 0x7d0   :  { %6524 = vmatpush.bf16.msrb.mxu0 %v14345_v50  ;;  %6538 = vmatpush.bf16.msrb.mxu1 %v14353_v27  ;;  %v14419_v50 = vld [vmem:[%s19841_s14 + $0x178] sm:$0xff] }
 0x7d1   :  { %6648 = vmatpush.bf16.msrb.mxu2 %v14361_v9  ;;  %6662 = vmatpush.bf16.msrb.mxu3 %v14369_v35  ;;  %v14427_v27 = vld [vmem:[%s19841_s14 + $0x1b8] sm:$0xff]  ;;  %v14410_v35 = vld [vmem:[%s19841_s14 + $0x130] sm:$0xff] }
 0x7d2   :  { %v14435_v9 = vld [vmem:[%s19841_s14 + $0x1f8] sm:$0xff] }
 0x7d4   :  { %6525 = vmatpush.bf16.msrb.mxu0 %v14344_v32  ;;  %6539 = vmatpush.bf16.msrb.mxu1 %v14352_v4  ;;  %v14418_v32 = vld [vmem:[%s19841_s14 + $0x170] sm:$0xff] }
 0x7d5   :  { %6649 = vmatpush.bf16.msrb.mxu2 %v14360_v33  ;;  %6663 = vmatpush.bf16.msrb.mxu3 %v14368_v34  ;;  %v14426_v4 = vld [vmem:[%s19841_s14 + $0x1b0] sm:$0xff]  ;;  %v14409_v34 = vld [vmem:[%s19841_s14 + $0x128] sm:$0xff] }
 0x7d6   :  { %v14434_v33 = vld [vmem:[%s19841_s14 + $0x1f0] sm:$0xff] }
 0x7d8   :  { %6526 = vmatpush.bf16.msrb.mxu0 %v14343_v36  ;;  %6540 = vmatpush.bf16.msrb.mxu1 %v14351_v37  ;;  %v14417_v36 = vld [vmem:[%s19841_s14 + $0x168] sm:$0xff] }
 0x7d9   :  { %6650 = vmatpush.bf16.msrb.mxu2 %v14359_v22  ;;  %6664 = vmatpush.bf16.msrb.mxu3 %v14367_v12  ;;  %v14425_v37 = vld [vmem:[%s19841_s14 + $0x1a8] sm:$0xff]  ;;  %v14408_v12 = vld [vmem:[%s19841_s14 + $0x120] sm:$0xff] }
 0x7da   :  { %v14433_v22 = vld [vmem:[%s19841_s14 + $0x1e8] sm:$0xff] }
 0x7dc   :  { %6527 = vmatpush.bf16.msrb.mxu0 %v14342_v5  ;;  %6541 = vmatpush.bf16.msrb.mxu1 %v14350_v17  ;;  %v14416_v5 = vld [vmem:[%s19841_s14 + $0x160] sm:$0xff] }
 0x7dd   :  { %6651 = vmatpush.bf16.msrb.mxu2 %v14358_v38  ;;  %6665 = vmatpush.bf16.msrb.mxu3 %v14366_v60  ;;  %v14424_v17 = vld [vmem:[%s19841_s14 + $0x1a0] sm:$0xff]  ;;  %v14407_v60 = vld [vmem:[%s19841_s14 + $0x118] sm:$0xff] }
 0x7de   :  { %v14432_v38 = vld [vmem:[%s19841_s14 + $0x1e0] sm:$0xff] }
 0x7e0   :  { %6528 = vmatpush.bf16.msrb.mxu0 %v14341_v39  ;;  %6542 = vmatpush.bf16.msrb.mxu1 %v14349_v40  ;;  %v14415_v39 = vld [vmem:[%s19841_s14 + $0x158] sm:$0xff] }
 0x7e1   :  { %6652 = vmatpush.bf16.msrb.mxu2 %v14357_v8  ;;  %6666 = vmatpush.bf16.msrb.mxu3 %v14365_v47  ;;  %v14423_v40 = vld [vmem:[%s19841_s14 + $0x198] sm:$0xff]  ;;  %v14406_v47 = vld [vmem:[%s19841_s14 + $0x110] sm:$0xff] }
 0x7e2   :  { %v14431_v8 = vld [vmem:[%s19841_s14 + $0x1d8] sm:$0xff] }
 0x7e4   :  { %6529 = vmatpush.bf16.msrb.mxu0 %v14340_v7  ;;  %6543 = vmatpush.bf16.msrb.mxu1 %v14348_v41  ;;  %v14414_v7 = vld [vmem:[%s19841_s14 + $0x150] sm:$0xff] }
 0x7e5   :  { %6653 = vmatpush.bf16.msrb.mxu2 %v14356_v10  ;;  %6667 = vmatpush.bf16.msrb.mxu3 %v14364_v44  ;;  %v14422_v41 = vld [vmem:[%s19841_s14 + $0x190] sm:$0xff]  ;;  %v14405_v44 = vld [vmem:[%s19841_s14 + $0x108] sm:$0xff] }
 0x7e6   :  { %v14430_v10 = vld [vmem:[%s19841_s14 + $0x1d0] sm:$0xff] }
 0x7e7   :  { %6530 = vmatmul.bf16.vlgmr.msrb.gmra.mxu0 %v17666_v13  ;;  %6544 = vmatmul.bf16.vlgmr.msrb.gmra.mxu1 %v17668_v11 }
 0x7e8   :  { %6770 = vmatpush.bf16.msra.mxu0 %v14379_v18  ;;  %6784 = vmatpush.bf16.msra.mxu1 %v14387_v19  ;;  %v14413_v18 = vld [vmem:[%s19841_s14 + $0x148] sm:$0xff] }
 0x7e9   :  { %6894 = vmatpush.bf16.msra.mxu2 %v14395_v29  ;;  %6908 = vmatpush.bf16.msra.mxu3 %v14403_v49  ;;  %v14421_v19 = vld [vmem:[%s19841_s14 + $0x188] sm:$0xff]  ;;  %v14404_v49 = vld [vmem:[%s19841_s14 + $0x100] sm:$0xff] }
 0x7ea   :  { %6654 = vmatmul.bf16.vlgmr.msrb.gmra.mxu2 %v17666_v13  ;;  %6668 = vmatmul.bf16.vlgmr.msrb.gmra.mxu3 %v17668_v11  ;;  %v14429_v29 = vld [vmem:[%s19841_s14 + $0x1c8] sm:$0xff] }
 0x7ec   :  { %6771 = vmatpush.bf16.msra.mxu0 %v14378_v46  ;;  %6785 = vmatpush.bf16.msra.mxu1 %v14386_v52  ;;  %v14412_v46 = vld [vmem:[%s19841_s14 + $0x140] sm:$0xff] }
 0x7ed   :  { %6895 = vmatpush.bf16.msra.mxu2 %v14394_v56  ;;  %6909 = vmatpush.bf16.msra.mxu3 %v14402_v55  ;;  %v14420_v52 = vld [vmem:[%s19841_s14 + $0x180] sm:$0xff] }
 0x7ee   :  { %v14428_v56 = vld [vmem:[%s19841_s14 + $0x1c0] sm:$0xff]  ;;  %s14905_s14 = smov 16  }
 0x7f0   :  { %6772 = vmatpush.bf16.msra.mxu0 %v14377_v57  ;;  %6786 = vmatpush.bf16.msra.mxu1 %v14385_v0 }
 0x7f1   :  { %6896 = vmatpush.bf16.msra.mxu2 %v14393_v53  ;;  %6910 = vmatpush.bf16.msra.mxu3 %v14401_v54 }
 0x7f4   :  { %6773 = vmatpush.bf16.msra.mxu0 %v14376_v31  ;;  %6787 = vmatpush.bf16.msra.mxu1 %v14384_v58 }
 0x7f5   :  { %6897 = vmatpush.bf16.msra.mxu2 %v14392_v28  ;;  %6911 = vmatpush.bf16.msra.mxu3 %v14400_v61 }
 0x7f8   :  { %6774 = vmatpush.bf16.msra.mxu0 %v14375_v62  ;;  %6788 = vmatpush.bf16.msra.mxu1 %v14383_v1 }
 0x7f9   :  { %6898 = vmatpush.bf16.msra.mxu2 %v14391_v42  ;;  %6912 = vmatpush.bf16.msra.mxu3 %v14399_v43 }
 0x7fc   :  { %6775 = vmatpush.bf16.msra.mxu0 %v14374_v2  ;;  %6789 = vmatpush.bf16.msra.mxu1 %v14382_v45 }
 0x7fd   :  { %6899 = vmatpush.bf16.msra.mxu2 %v14390_v3  ;;  %6913 = vmatpush.bf16.msra.mxu3 %v14398_v59 }
 0x800   :  { %6776 = vmatpush.bf16.msra.mxu0 %v14373_v6  ;;  %6790 = vmatpush.bf16.msra.mxu1 %v14381_v14 }
 0x801   :  { %6900 = vmatpush.bf16.msra.mxu2 %v14389_v15  ;;  %6914 = vmatpush.bf16.msra.mxu3 %v14397_v20 }
 0x804   :  { %6777 = vmatpush.bf16.msra.mxu0 %v14372_v21  ;;  %6791 = vmatpush.bf16.msra.mxu1 %v14380_v24 }
 0x805   :  { %6901 = vmatpush.bf16.msra.mxu2 %v14388_v25  ;;  %6915 = vmatpush.bf16.msra.mxu3 %v14396_v30 }
 0x807   :  { %6778 = vmatmul.bf16.vlgmr.msra.gmra.mxu0 %v17666_v13  ;;  %6792 = vmatmul.bf16.vlgmr.msra.gmra.mxu1 %v17668_v11 }
 0x808   :  { %7018 = vmatpush.bf16.msrb.mxu0 %v14411_v26  ;;  %7032 = vmatpush.bf16.msrb.mxu1 %v14419_v50 }
 0x809   :  { %7142 = vmatpush.bf16.msrb.mxu2 %v14427_v27  ;;  %7156 = vmatpush.bf16.msrb.mxu3 %v14435_v9 }
 0x80a   :  { %6902 = vmatmul.bf16.vlgmr.msra.gmra.mxu2 %v17666_v13  ;;  %6916 = vmatmul.bf16.vlgmr.msra.gmra.mxu3 %v17668_v11 }
 0x80c   :  { %7019 = vmatpush.bf16.msrb.mxu0 %v14410_v35  ;;  %7033 = vmatpush.bf16.msrb.mxu1 %v14418_v32 }
 0x80d   :  { %7143 = vmatpush.bf16.msrb.mxu2 %v14426_v4  ;;  %7157 = vmatpush.bf16.msrb.mxu3 %v14434_v33 }
 0x810   :  { %7020 = vmatpush.bf16.msrb.mxu0 %v14409_v34  ;;  %7034 = vmatpush.bf16.msrb.mxu1 %v14417_v36 }
 0x811   :  { %7144 = vmatpush.bf16.msrb.mxu2 %v14425_v37  ;;  %7158 = vmatpush.bf16.msrb.mxu3 %v14433_v22 }
 0x814   :  { %7021 = vmatpush.bf16.msrb.mxu0 %v14408_v12  ;;  %7035 = vmatpush.bf16.msrb.mxu1 %v14416_v5 }
 0x815   :  { %7145 = vmatpush.bf16.msrb.mxu2 %v14424_v17  ;;  %7159 = vmatpush.bf16.msrb.mxu3 %v14432_v38 }
 0x818   :  { %7022 = vmatpush.bf16.msrb.mxu0 %v14407_v60  ;;  %7036 = vmatpush.bf16.msrb.mxu1 %v14415_v39 }
 0x819   :  { %7146 = vmatpush.bf16.msrb.mxu2 %v14423_v40  ;;  %7160 = vmatpush.bf16.msrb.mxu3 %v14431_v8 }
 0x81c   :  { %7023 = vmatpush.bf16.msrb.mxu0 %v14406_v47  ;;  %7037 = vmatpush.bf16.msrb.mxu1 %v14414_v7 }
 0x81d   :  { %7147 = vmatpush.bf16.msrb.mxu2 %v14422_v41  ;;  %7161 = vmatpush.bf16.msrb.mxu3 %v14430_v10 }
 0x820   :  { %7024 = vmatpush.bf16.msrb.mxu0 %v14405_v44  ;;  %7038 = vmatpush.bf16.msrb.mxu1 %v14413_v18 }
 0x821   :  { %7148 = vmatpush.bf16.msrb.mxu2 %v14421_v19  ;;  %7162 = vmatpush.bf16.msrb.mxu3 %v14429_v29 }
 0x823   :  { %v5787_v55 = vpop.f32.mrf.mxu0  ;;  %v5801_v57 = vpop.f32.mrf.mxu1 }
 0x824   :  { %7025 = vmatpush.bf16.msrb.mxu0 %v14404_v49  ;;  %7039 = vmatpush.bf16.msrb.mxu1 %v14412_v46  ;;  %v5802_v50 = vadd.f32 %v5801_v57, %v5787_v55 }
 0x825   :  { %7149 = vmatpush.bf16.msrb.mxu2 %v14420_v52  ;;  %7163 = vmatpush.bf16.msrb.mxu3 %v14428_v56 }
 0x826   :  { %v7170_v37 = vpack.c.bf16 %v5802_v50, %v5802_v50 }
 0x827   :  { %7026 = vmatmul.bf16.vlgmr.msrb.gmra.mxu0 %v17666_v13  ;;  %7040 = vmatmul.bf16.vlgmr.msrb.gmra.mxu1 %v17668_v11 }
 0x828   :  { %7150 = vmatmul.bf16.vlgmr.msrb.gmra.mxu2 %v17666_v13  ;;  %7164 = vmatmul.bf16.vlgmr.msrb.gmra.mxu3 %v17668_v11  ;;  %v7188_v40 = vunpack.c.l.b16 %v7170_v37 }
 0x82a   :  { %v5911_v0 = vpop.f32.mrf.mxu2  ;;  %v5925_v53 = vpop.f32.mrf.mxu3 }
 0x82b   :  { %v5789_v54 = vpop.f32.mrf.mxu0  ;;  %v5803_v31 = vpop.f32.mrf.mxu1  ;;  %v5926_v38 = vadd.f32 %v5925_v53, %v5911_v0 }
 0x82c   :  { %v5804_v25 = vadd.f32 %v5803_v31, %v5789_v54 }
 0x82d   :  { %v7172_v41 = vpack.c.bf16 %v5926_v38, %v5926_v38 }
 0x82e   :  { %v7171_v35 = vpack.c.bf16 %v5804_v25, %v5804_v25 }
 0x82f   :  { %v7218_v18 = vunpack.c.l.b16 %v7172_v41 }
 0x830   :  { %v7189_v17 = vunpack.c.l.b16 %v7171_v35 }
 0x832   :  { %v5913_v58 = vpop.f32.mrf.mxu2  ;;  %v5927_v28 = vpop.f32.mrf.mxu3  ;;  %v7190_v7 = vpack.c.b16 %v7189_v17, %v7188_v40 }
 0x833   :  { %v6035_v61 = vpop.f32.mrf.mxu0  ;;  %v6049_v62 = vpop.f32.mrf.mxu1  ;;  %v5928_v12 = vadd.f32 %v5927_v28, %v5913_v58 }
 0x834   :  { %v6050_v28 = vadd.f32 %v6049_v62, %v6035_v61 }
 0x835   :  { %v7173_v8 = vpack.c.bf16 %v5928_v12, %v5928_v12 }
 0x837   :  { %v7219_v44 = vunpack.c.l.b16 %v7173_v8 }
 0x839   :  { %v7220_v19 = vpack.c.b16 %v7219_v44, %v7218_v18 }
 0x83a   :  { %v18078_v1 = vpop.f32.mrf.mxu2  ;;  %v18080_v42 = vpop.f32.mrf.mxu3 }
 0x83b   :  { %v6037_v43 = vpop.f32.mrf.mxu0  ;;  %v6051_v2 = vpop.f32.mrf.mxu1  ;;  %v6174_v61 = vadd.f32 %v18080_v42, %v18078_v1 }
 0x83c   :  { %v6052_v54 = vadd.f32 %v6051_v2, %v6037_v43 }
 0x842   :  { %v18082_v45 = vpop.f32.mrf.mxu2  ;;  %v18084_v13 = vpop.f32.mrf.mxu3 }
 0x844   :  { %v6283_v11 = vpop.f32.mrf.mxu0  ;;  %v6297_v3 = vpop.f32.mrf.mxu1 }
 0x845   :  { %v6298_v59 = vadd.f32 %v6297_v3, %v6283_v11 }
 0x847   :  { %v7178_v21 = vpack.c.bf16 %v6298_v59, %v6298_v59  ;;  %v7175_v59 = vpack.c.bf16 %v6052_v54, %v6052_v54 }
 0x849   :  { %v7193_v27 = vunpack.c.l.b16 %v7178_v21  ;;  %v7249_v43 = vunpack.c.l.b16 %v7175_v59 }
 0x84c   :  { %v6285_v15 = vpop.f32.mrf.mxu0  ;;  %v6299_v20 = vpop.f32.mrf.mxu1 }
 0x84d   :  { %v6407_v6 = vpop.f32.mrf.mxu2  ;;  %v6421_v14 = vpop.f32.mrf.mxu3  ;;  %v6300_v24 = vadd.f32 %v6299_v20, %v6285_v15 }
 0x84e   :  { %v6422_v26 = vadd.f32 %v6421_v14, %v6407_v6 }
 0x84f   :  { %v7179_v30 = vpack.c.bf16 %v6300_v24, %v6300_v24  ;;  %v7174_v24 = vpack.c.bf16 %v6050_v28, %v6050_v28 }
 0x850   :  { %v7180_v34 = vpack.c.bf16 %v6422_v26, %v6422_v26 }
 0x851   :  { %v7194_v9 = vunpack.c.l.b16 %v7179_v30  ;;  %v6176_v30 = vadd.f32 %v18084_v13, %v18082_v45  ;;  %v7248_v50 = vunpack.c.l.b16 %v7174_v24 }
 0x852   :  { %v7223_v60 = vunpack.c.l.b16 %v7180_v34 }
 0x853   :  { %v7195_v32 = vpack.c.b16 %v7194_v9, %v7193_v27  ;;  %v7177_v27 = vpack.c.bf16 %v6176_v30, %v6176_v30  ;;  %v7250_v35 = vpack.c.b16 %v7249_v43, %v7248_v50  ;;  %v14818_v43 = vld [vmem:[%s19867_s2] sm:$0xff] }
 0x855   :  { %v6409_v4 = vpop.f32.mrf.mxu2  ;;  %v6423_v33 = vpop.f32.mrf.mxu3  ;;  %v7200_v22 = vsel %vm2313_vm0, %v7195_v32, 0  ;;  %v7176_v32 = vpack.c.bf16 %v6174_v61, %v6174_v61 }
 0x856   :  { %v6424_v36 = vadd.f32 %v6423_v33, %v6409_v4  ;;  %7209 = vmatpush.bf16.xpose.msra.mxu0 %v7200_v22  ;;  %v7279_v33 = vunpack.c.l.b16 %v7177_v27 }
 0x857   :  { %v7278_v45 = vunpack.c.l.b16 %v7176_v32 }
 0x858   :  { %v7181_v5 = vpack.c.bf16 %v6424_v36, %v6424_v36 }
 0x859   :  { %v7280_v13 = vpack.c.b16 %v7279_v33, %v7278_v45  ;;  %v14819_v45 = vld [vmem:[%s19867_s2 + $0x8] sm:$0xff] }
 0x85a   :  { %v7224_v39 = vunpack.c.l.b16 %v7181_v5 }
 0x85c   :  { %v7225_v47 = vpack.c.b16 %v7224_v39, %v7223_v60 }
 0x85d   :  { %12596 = vmatmul.msk.bf16.vlgmr.msra.gmra.mxu0 %vm2313_vm0, %v7190_v7 }
 0x85e   :  { %v7230_v10 = vsel %vm2313_vm0, %v7225_v47, 0 }
 0x85f   :  { %7239 = vmatpush.bf16.xpose.msra.mxu1 %v7230_v10 }
 0x864   :  { %v6531_v29 = vpop.f32.mrf.mxu0  ;;  %v6545_v49 = vpop.f32.mrf.mxu1 }
 0x865   :  { %v6546_v46 = vadd.f32 %v6545_v49, %v6531_v29 }
 0x866   :  { %12597 = vmatmul.msk.bf16.vlgmr.msra.gmra.mxu1 %vm2313_vm0, %v7220_v19 }
 0x867   :  { %v7182_v0 = vpack.c.bf16 %v6546_v46, %v6546_v46 }
 0x869   :  { %v7253_v11 = vunpack.c.l.b16 %v7182_v0 }
 0x86c   :  { %v6533_v55 = vpop.f32.mrf.mxu0  ;;  %v6547_v57 = vpop.f32.mrf.mxu1 }
 0x86d   :  { %v6655_v52 = vpop.f32.mrf.mxu2  ;;  %v6669_v56 = vpop.f32.mrf.mxu3  ;;  %v6548_v53 = vadd.f32 %v6547_v57, %v6533_v55 }
 0x86e   :  { %v6670_v58 = vadd.f32 %v6669_v56, %v6655_v52 }
 0x86f   :  { %v7183_v31 = vpack.c.bf16 %v6548_v53, %v6548_v53 }
 0x870   :  { %v7184_v20 = vpack.c.bf16 %v6670_v58, %v6670_v58 }
 0x871   :  { %v7254_v3 = vunpack.c.l.b16 %v7183_v31 }
 0x872   :  { %v7283_v62 = vunpack.c.l.b16 %v7184_v20 }
 0x873   :  { %v7255_v6 = vpack.c.b16 %v7254_v3, %v7253_v11 }
 0x875   :  { %v6657_v14 = vpop.f32.mrf.mxu2  ;;  %v6671_v15 = vpop.f32.mrf.mxu3  ;;  %v7260_v25 = vsel %vm2313_vm0, %v7255_v6, 0 }
 0x876   :  { %v6672_v21 = vadd.f32 %v6671_v15, %v6657_v14  ;;  %7269 = vmatpush.bf16.xpose.msra.mxu2 %v7260_v25 }
 0x878   :  { %v7185_v26 = vpack.c.bf16 %v6672_v21, %v6672_v21 }
 0x87a   :  { %v7284_v2 = vunpack.c.l.b16 %v7185_v26 }
 0x87c   :  { %v7285_v9 = vpack.c.b16 %v7284_v2, %v7283_v62 }
 0x87d   :  { %12598 = vmatmul.msk.bf16.vlgmr.msra.gmra.mxu2 %vm2313_vm0, %v7250_v35 }
 0x87e   :  { %v7290_v4 = vsel %vm2313_vm0, %v7285_v9, 0 }
 0x87f   :  { %7299 = vmatpush.bf16.xpose.msra.mxu3 %v7290_v4 }
 0x884   :  { %v6779_v34 = vpop.f32.mrf.mxu0  ;;  %v6793_v36 = vpop.f32.mrf.mxu1 }
 0x885   :  { %v6794_v1 = vadd.f32 %v6793_v36, %v6779_v34 }
 0x886   :  { %12599 = vmatmul.msk.bf16.vlgmr.msra.gmra.mxu3 %vm2313_vm0, %v7280_v13 }
 0x887   :  { %v7522_v5 = vpack.c.bf16 %v6794_v1, %v6794_v1 }
 0x889   :  { %v7537_v39 = vunpack.c.l.b16 %v7522_v5 }
 0x88c   :  { %v6781_v22 = vpop.f32.mrf.mxu0  ;;  %v6795_v12 = vpop.f32.mrf.mxu1 }
 0x88d   :  { %v6903_v42 = vpop.f32.mrf.mxu2  ;;  %v6917_v37 = vpop.f32.mrf.mxu3  ;;  %v6796_v17 = vadd.f32 %v6795_v12, %v6781_v22 }
 0x88e   :  { %v6918_v60 = vadd.f32 %v6917_v37, %v6903_v42 }
 0x88f   :  { %v7523_v38 = vpack.c.bf16 %v6796_v17, %v6796_v17 }
 0x890   :  { %v7524_v41 = vpack.c.bf16 %v6918_v60, %v6918_v60 }
 0x891   :  { %v7538_v40 = vunpack.c.l.b16 %v7523_v38 }
 0x892   :  { %v7565_v18 = vunpack.c.l.b16 %v7524_v41 }
 0x893   :  { %v7539_v8 = vpack.c.b16 %v7538_v40, %v7537_v39 }
 0x895   :  { %v6905_v47 = vpop.f32.mrf.mxu2  ;;  %v6919_v7 = vpop.f32.mrf.mxu3  ;;  %7551 = vmatpush.bf16.msrb.mxu0 %v7539_v8 }
 0x896   :  { %v6920_v10 = vadd.f32 %v6919_v7, %v6905_v47 }
 0x898   :  { %v7525_v44 = vpack.c.bf16 %v6920_v10, %v6920_v10 }
 0x89a   :  { %v7566_v19 = vunpack.c.l.b16 %v7525_v44 }
 0x89c   :  { %v7567_v29 = vpack.c.b16 %v7566_v19, %v7565_v18 }
 0x89e   :  { %7579 = vmatpush.bf16.msrb.mxu1 %v7567_v29 }
 0x8a4   :  { %v7027_v49 = vpop.f32.mrf.mxu0  ;;  %v7041_v46 = vpop.f32.mrf.mxu1 }
 0x8a5   :  { %v7042_v52 = vadd.f32 %v7041_v46, %v7027_v49 }
 0x8a7   :  { %v7526_v53 = vpack.c.bf16 %v7042_v52, %v7042_v52 }
 0x8a9   :  { %v7593_v28 = vunpack.c.l.b16 %v7526_v53 }
 0x8ab   :  { %v7151_v56 = vpop.f32.mrf.mxu2  ;;  %v7165_v55 = vpop.f32.mrf.mxu3 }
 0x8ac   :  { %v7029_v57 = vpop.f32.mrf.mxu0  ;;  %v7043_v0 = vpop.f32.mrf.mxu1  ;;  %v7166_v58 = vadd.f32 %v7165_v55, %v7151_v56 }
 0x8ad   :  { %v7044_v54 = vadd.f32 %v7043_v0, %v7029_v57 }
 0x8ae   :  { %v7528_v14 = vpack.c.bf16 %v7166_v58, %v7166_v58 }
 0x8af   :  { %v7527_v31 = vpack.c.bf16 %v7044_v54, %v7044_v54 }
 0x8b0   :  { %v7621_v21 = vunpack.c.l.b16 %v7528_v14 }
 0x8b1   :  { %v7594_v11 = vunpack.c.l.b16 %v7527_v31 }
 0x8b3   :  { %v7595_v3 = vpack.c.b16 %v7594_v11, %v7593_v28  ;;  %v7153_v59 = vpop.f32.mrf.mxu2  ;;  %v7167_v6 = vpop.f32.mrf.mxu3 }
 0x8b4   :  { %v7168_v15 = vadd.f32 %v7167_v6, %v7153_v59 }
 0x8b5   :  { %7607 = vmatpush.bf16.msrb.mxu2 %v7595_v3 }
 0x8b6   :  { %v7529_v20 = vpack.c.bf16 %v7168_v15, %v7168_v15 }
 0x8b8   :  { %v7622_v24 = vunpack.c.l.b16 %v7529_v20 }
 0x8ba   :  { %v7623_v25 = vpack.c.b16 %v7622_v24, %v7621_v21 }
 0x8bc   :  { %7635 = vmatpush.bf16.msrb.mxu3 %v7623_v25 }
 0x8da   :  { %v7211_v30 = vpop.f32.mrf.mxu0 }
 0x8db   :  { %v7306_v26 = vmul.f32 0.125, %v7211_v30 }
 0x8dd   :  { %v7314_v61 = vadd.f32 %v14818_v43, %v7306_v26 }
 0x8df   :  { %v7322_v62 = vsel %vm2440_vm1, %v7314_v61, -inf }
 0x8e0   :  { %7323 = vmax.xlane.f32.xlu2 %v7322_v62 }
 0x8e2   :  { %v7213_v27 = vpop.f32.mrf.mxu0 }
 0x8e3   :  { %v7241_v2 = vpop.f32.mrf.mxu1  ;;  %v7307_v35 = vmul.f32 0.125, %v7213_v27 }
 0x8e4   :  { %v7308_v50 = vmul.f32 0.125, %v7241_v2 }
 0x8e5   :  { %v7315_v13 = vadd.f32 %v14819_v45, %v7307_v35 }
 0x8e6   :  { %v7316_v9 = vadd.f32 %v14818_v43, %v7308_v50 }
 0x8e7   :  { %v7325_v1 = vsel %vm2440_vm1, %v7315_v13, -inf }
 0x8e8   :  { %v7328_v32 = vsel %vm2440_vm1, %v7316_v9, -inf }
 0x8e9   :  { %7329 = vmax.xlane.f32.xlu0 %v7328_v32 }
 0x8eb   :  { %v7243_v4 = vpop.f32.mrf.mxu1 }
 0x8ec   :  { %v7309_v33 = vmul.f32 0.125, %v7243_v4 }
 0x8ee   :  { %v7317_v34 = vadd.f32 %v14819_v45, %v7309_v33 }
 0x8f0   :  { %v7331_v36 = vsel %vm2440_vm1, %v7317_v34, -inf }
 0x8f1   :  { %7332 = vmax.xlane.f32.xlu1 %v7331_v36  ;;  %7326 = vmax.xlane.f32.xlu0 %v7325_v1 }
 0x900   :  { %v7271_v42 = vpop.f32.mrf.mxu2 }
 0x901   :  { %v7310_v37 = vmul.f32 0.125, %v7271_v42 }
 0x903   :  { %v7318_v22 = vadd.f32 %v14818_v43, %v7310_v37 }
 0x905   :  { %v7334_v12 = vsel %vm2440_vm1, %v7318_v22, -inf }
 0x906   :  { %7335 = vmax.xlane.f32.xlu0 %v7334_v12 }
 0x908   :  { %v7273_v38 = vpop.f32.mrf.mxu2 }
 0x909   :  { %v7301_v5 = vpop.f32.mrf.mxu3  ;;  %v7311_v39 = vmul.f32 0.125, %v7273_v38 }
 0x90a   :  { %v7312_v17 = vmul.f32 0.125, %v7301_v5 }
 0x90b   :  { %v7319_v7 = vadd.f32 %v14819_v45, %v7311_v39 }
 0x90c   :  { %v7320_v60 = vadd.f32 %v14818_v43, %v7312_v17 }
 0x90d   :  { %v7337_v10 = vsel %vm2440_vm1, %v7319_v7, -inf }
 0x90e   :  { %v7340_v40 = vsel %vm2440_vm1, %v7320_v60, -inf }
 0x90f   :  { %7341 = vmax.xlane.f32.xlu1 %v7340_v40 }
 0x911   :  { %v7303_v8 = vpop.f32.mrf.mxu3 }
 0x912   :  { %v7313_v47 = vmul.f32 0.125, %v7303_v8 }
 0x914   :  { %v7321_v41 = vadd.f32 %v14819_v45, %v7313_v47 }
 0x916   :  { %v7343_v44 = vsel %vm2440_vm1, %v7321_v41, -inf }
 0x917   :  { %7338 = vmax.xlane.f32.xlu1 %v7337_v10  ;;  %7344 = vmax.xlane.f32.xlu2 %v7343_v44 }
 0x953   :  { %v7324_v18 = vpop.xlane.xlu2 %7323 }
 0x954   :  { %v7346_v19 = vsub.f32 %v7314_v61, %v7324_v18 }
 0x956   :  { %v7354_v29 = vmul.f32 1.442695, %v7346_v19 }
 0x958   :  { %14774 = vpow2.f32 %v7354_v29 }
 0x95c   :  { %v7330_v49 = vpop.xlane.xlu0 %7329 }
 0x95d   :  { %v7348_v46 = vsub.f32 %v7316_v9, %v7330_v49 }
 0x95e   :  { %v18112_v56 = vpop.eup %14774 }
 0x95f   :  { %v7358_v52 = vmul.f32 1.442695, %v7348_v46  ;;  %v7370_v55 = vsel %vm2440_vm1, %v18112_v56, 0.0 }
 0x960   :  { %7371 = vadd.xlane.f32.xlu1 %v7370_v55 }
 0x961   :  { %14776 = vpow2.f32 %v7358_v52 }
 0x964   :  { %v7333_v57 = vpop.xlane.xlu1 %7332  ;;  %v7327_v0 = vpop.xlane.xlu0 %7326 }
 0x965   :  { %v7349_v53 = vsub.f32 %v7317_v34, %v7333_v57  ;;  %v7347_v54 = vsub.f32 %v7315_v13, %v7327_v0 }
 0x967   :  { %v18116_v31 = vpop.eup %14776  ;;  %v7360_v58 = vmul.f32 1.442695, %v7349_v53  ;;  %v7356_v28 = vmul.f32 1.442695, %v7347_v54 }
 0x968   :  { %v7376_v11 = vsel %vm2440_vm1, %v18116_v31, 0.0 }
 0x969   :  { %14778 = vpow2.f32 %v7360_v58  ;;  %7377 = vadd.xlane.f32.xlu2 %v7376_v11 }
 0x96a   :  { %14780 = vpow2.f32 %v7356_v28 }
 0x96f   :  { %v18120_v3 = vpop.eup %14778 }
 0x970   :  { %v18122_v59 = vpop.eup %14780  ;;  %v7379_v6 = vsel %vm2440_vm1, %v18120_v3, 0.0 }
 0x971   :  { %7380 = vadd.xlane.f32.xlu0 %v7379_v6  ;;  %v7373_v14 = vsel %vm2440_vm1, %v18122_v59, 0.0 }
 0x972   :  { %7374 = vadd.xlane.f32.xlu2 %v7373_v14 }
 0x979   :  { %v7336_v15 = vpop.xlane.xlu0 %7335 }
 0x97a   :  { %v7350_v20 = vsub.f32 %v7318_v22, %v7336_v15 }
 0x97c   :  { %v7362_v21 = vmul.f32 1.442695, %v7350_v20 }
 0x97e   :  { %14782 = vpow2.f32 %v7362_v21 }
 0x982   :  { %v7342_v24 = vpop.xlane.xlu1 %7341 }
 0x983   :  { %v7352_v25 = vsub.f32 %v7320_v60, %v7342_v24 }
 0x984   :  { %v18128_v26 = vpop.eup %14782 }
 0x985   :  { %v7366_v30 = vmul.f32 1.442695, %v7352_v25  ;;  %v7382_v43 = vsel %vm2440_vm1, %v18128_v26, 0.0 }
 0x986   :  { %7383 = vadd.xlane.f32.xlu2 %v7382_v43 }
 0x987   :  { %14784 = vpow2.f32 %v7366_v30 }
 0x98a   :  { %v7339_v61 = vpop.xlane.xlu1 %7338  ;;  %v7345_v62 = vpop.xlane.xlu2 %7344 }
 0x98b   :  { %v7351_v2 = vsub.f32 %v7319_v7, %v7339_v61  ;;  %v7353_v50 = vsub.f32 %v7321_v41, %v7345_v62 }
 0x98d   :  { %v18132_v27 = vpop.eup %14784  ;;  %v7364_v9 = vmul.f32 1.442695, %v7351_v2  ;;  %v7368_v35 = vmul.f32 1.442695, %v7353_v50 }
 0x98e   :  { %v7388_v32 = vsel %vm2440_vm1, %v18132_v27, 0.0 }
 0x98f   :  { %14786 = vpow2.f32 %v7364_v9  ;;  %7389 = vadd.xlane.f32.xlu0 %v7388_v32 }
 0x990   :  { %14788 = vpow2.f32 %v7368_v35 }
 0x995   :  { %v18136_v4 = vpop.eup %14786 }
 0x996   :  { %v18138_v33 = vpop.eup %14788  ;;  %v7385_v45 = vsel %vm2440_vm1, %v18136_v4, 0.0 }
 0x997   :  { %v7391_v13 = vsel %vm2440_vm1, %v18138_v33, 0.0  ;;  %7386 = vadd.xlane.f32.xlu0 %v7385_v45 }
 0x998   :  { %7392 = vadd.xlane.f32.xlu1 %v7391_v13 }
 0x9d3   :  { %v7372_v34 = vpop.xlane.xlu1 %7371 }
 0x9d4   :  { %14790 = vrcp.f32 %v7372_v34  ;;  %v7403_v8 = vand.u32 2147483647, %v7372_v34  ;;  %v7405_v7 = vand.u32 2147483648, %v7372_v34  ;;  %vm7399_vm8 = vweird.f32 %v7372_v34 }
 0x9d6   :  { %vm7404_vm11 = vcmp.eq.f32.partialorder %v7403_v8, 8.507059e+37  ;;  %v7406_v55 = vor.u32 1.1754944e-38, %v7405_v7 }
 0x9da   :  { %v14791_v36 = vpop.eup %14790 }
 0x9db   :  { %v7395_v42 = vmul.f32 %v14791_v36, %v7372_v34  ;;  %vm7400_vm6 = vweird.f32 %v14791_v36 }
 0x9dc   :  { %v7378_v1 = vpop.xlane.xlu2 %7377  ;;  %vm7401_vm10 = vmor %vm7399_vm8, %vm7400_vm6 }
 0x9dd   :  { %14792 = vrcp.f32 %v7378_v1  ;;  %v7396_v37 = vsub.f32 1.0, %v7395_v42  ;;  %v7435_v47 = vand.u32 2147483648, %v7378_v1  ;;  %vm7429_vm7 = vweird.f32 %v7378_v1 }
 0x9de   :  { %v7433_v10 = vand.u32 2147483647, %v7378_v1 }
 0x9df   :  { %v7397_v17 = vmul.f32 %v14791_v36, %v7396_v37  ;;  %v7436_v46 = vor.u32 1.1754944e-38, %v7435_v47 }
 0x9e0   :  { %vm7434_vm12 = vcmp.eq.f32.partialorder %v7433_v10, 8.507059e+37 }
 0x9e1   :  { %v7398_v40 = vadd.f32 %v14791_v36, %v7397_v17 }
 0x9e3   :  { %v14793_v22 = vpop.eup %14792  ;;  %v7402_v49 = vsel %vm7401_vm10, %v14791_v36, %v7398_v40 }
 0x9e4   :  { %v7425_v12 = vmul.f32 %v14793_v22, %v7378_v1  ;;  %v7381_v5 = vpop.xlane.xlu0 %7380  ;;  %vm7430_vm5 = vweird.f32 %v14793_v22  ;;  %v7407_v28 = vsel %vm7404_vm11, %v7406_v55, %v7402_v49 }
 0x9e5   :  { %v7375_v38 = vpop.xlane.xlu2 %7374  ;;  %14794 = vrcp.f32 %v7381_v5  ;;  %vm7431_vm9 = vmor %vm7429_vm7, %vm7430_vm5  ;;  %v7448_v54 = vand.u32 2147483647, %v7381_v5  ;;  %v7450_v58 = vand.u32 2147483648, %v7381_v5  ;;  %vm7444_vm15 = vweird.f32 %v7381_v5 }
 0x9e6   :  { %v7426_v60 = vsub.f32 1.0, %v7425_v12  ;;  %14796 = vrcp.f32 %v7375_v38  ;;  %v7420_v11 = vand.u32 2147483648, %v7375_v38  ;;  %v7418_v15 = vand.u32 2147483647, %v7375_v38 }
 0x9e7   :  { %v7408_v24 = vmul.f32 %v18112_v56, %v7407_v28  ;;  %vm7414_vm2 = vweird.f32 %v7375_v38  ;;  %v7451_v30 = vor.u32 1.1754944e-38, %v7450_v58  ;;  %vm7449_vm5 = vcmp.eq.f32.partialorder %v7448_v54, 8.507059e+37 }
 0x9e8   :  { %v7427_v39 = vmul.f32 %v14793_v22, %v7426_v60  ;;  %v7421_v43 = vor.u32 1.1754944e-38, %v7420_v11  ;;  %vm7419_vm6 = vcmp.eq.f32.partialorder %v7418_v15, 8.507059e+37 }
 0x9ea   :  { %v7428_v41 = vadd.f32 %v14793_v22, %v7427_v39 }
 0x9eb   :  { %v14795_v44 = vpop.eup %14794 }
 0x9ec   :  { %v14797_v18 = vpop.eup %14796  ;;  %v7432_v19 = vsel %vm7431_vm9, %v14793_v22, %v7428_v41  ;;  %v7440_v29 = vmul.f32 %v14795_v44, %v7381_v5  ;;  %vm7445_vm13 = vweird.f32 %v14795_v44 }
 0x9ed   :  { %v7410_v52 = vmul.f32 %v14797_v18, %v7375_v38  ;;  %v7437_v0 = vsel %vm7434_vm12, %v7436_v46, %v7432_v19  ;;  %vm7415_vm14 = vweird.f32 %v14797_v18  ;;  %vm7446_vm3 = vmor %vm7444_vm15, %vm7445_vm13 }
 0x9ee   :  { %v7441_v57 = vsub.f32 1.0, %v7440_v29  ;;  %v7438_v20 = vmul.f32 %v18116_v31, %v7437_v0  ;;  %vm7416_vm4 = vmor %vm7414_vm2, %vm7415_vm14  ;;  %v7514_v31 = vpack.c.bf16 %v7408_v24, %v7408_v24 }
 0x9ef   :  { %v7411_v53 = vsub.f32 1.0, %v7410_v52 }
 0x9f0   :  { %v7442_v6 = vmul.f32 %v14795_v44, %v7441_v57  ;;  %v7516_v50 = vpack.c.bf16 %v7438_v20, %v7438_v20  ;;  %v7532_v1 = vunpack.c.l.b16 %v7514_v31 }
 0x9f1   :  { %v7412_v14 = vmul.f32 %v14797_v18, %v7411_v53 }
 0x9f2   :  { %v7443_v21 = vadd.f32 %v14795_v44, %v7442_v6  ;;  %v7560_v34 = vunpack.c.l.b16 %v7516_v50 }
 0x9f3   :  { %v7413_v25 = vadd.f32 %v14797_v18, %v7412_v14 }
 0x9f4   :  { %v7447_v61 = vsel %vm7446_vm3, %v14795_v44, %v7443_v21 }
 0x9f5   :  { %v7417_v62 = vsel %vm7416_vm4, %v14797_v18, %v7413_v25  ;;  %v7452_v2 = vsel %vm7449_vm5, %v7451_v30, %v7447_v61 }
 0x9f6   :  { %v7422_v9 = vsel %vm7419_vm6, %v7421_v43, %v7417_v62  ;;  %v7453_v35 = vmul.f32 %v18120_v3, %v7452_v2 }
 0x9f7   :  { %v7423_v32 = vmul.f32 %v18122_v59, %v7422_v9 }
 0x9f8   :  { %v7517_v45 = vpack.c.bf16 %v7453_v35, %v7453_v35 }
 0x9f9   :  { %v7515_v56 = vpack.c.bf16 %v7423_v32, %v7423_v32  ;;  %v7384_v13 = vpop.xlane.xlu2 %7383 }
 0x9fa   :  { %v7561_v36 = vunpack.c.l.b16 %v7517_v45  ;;  %14798 = vrcp.f32 %v7384_v13  ;;  %vm7459_vm8 = vweird.f32 %v7384_v13  ;;  %v7465_v41 = vand.u32 2147483648, %v7384_v13 }
 0x9fb   :  { %v7533_v42 = vunpack.c.l.b16 %v7515_v56  ;;  %v7463_v10 = vand.u32 2147483647, %v7384_v13 }
 0x9fc   :  { %v7562_v37 = vpack.c.b16 %v7561_v36, %v7560_v34  ;;  %v7466_v55 = vor.u32 1.1754944e-38, %v7465_v41  ;;  %v14440_v41 = vld [vmem:[#allocation5 + $0x24] sm:$0xf] }
 0x9fd   :  { %v7534_v22 = vpack.c.b16 %v7533_v42, %v7532_v1  ;;  %vm7464_vm13 = vcmp.eq.f32.partialorder %v7463_v10, 8.507059e+37  ;;  %v12624_v10 = vld [vmem:[#allocation5 + $0x28] sm:$0xf0] }
 0x9fe   :  { %12601 = vmatmul.msk.bf16.vlgmr.msrb.gmra.mxu1 %vm2440_vm1, %v7562_v37 }
 0x9ff   :  { %12600 = vmatmul.msk.bf16.vlgmr.msrb.gmra.mxu0 %vm2440_vm1, %v7534_v22 }
 0xa00   :  { %v14799_v12 = vpop.eup %14798 }
 0xa01   :  { %v7455_v3 = vmul.f32 %v14799_v12, %v7384_v13  ;;  %vm7460_vm7 = vweird.f32 %v14799_v12 }
 0xa02   :  { %v7390_v5 = vpop.xlane.xlu0 %7389  ;;  %vm7461_vm10 = vmor %vm7459_vm8, %vm7460_vm7 }
 0xa03   :  { %14800 = vrcp.f32 %v7390_v5  ;;  %v7456_v17 = vsub.f32 1.0, %v7455_v3  ;;  %v7493_v18 = vand.u32 2147483647, %v7390_v5  ;;  %v7495_v19 = vand.u32 2147483648, %v7390_v5  ;;  %v14442_v3 = vld [vmem:[#allocation5 + $0x34] sm:$0xf] }
 0xa04   :  { %vm7489_vm11 = vweird.f32 %v7390_v5 }
 0xa05   :  { %v7457_v38 = vmul.f32 %v14799_v12, %v7456_v17  ;;  %vm7494_vm14 = vcmp.eq.f32.partialorder %v7493_v18, 8.507059e+37  ;;  %v7496_v53 = vor.u32 1.1754944e-38, %v7495_v19  ;;  %v12627_v18 = vor.u32 %v14440_v41, %v12624_v10  ;;  %v12656_v19 = vld [vmem:[#allocation5 + $0x60] sm:$0xf] }
 0xa06   :  { %v12690_v10 = vld [vmem:[#allocation5 + $0xa0] sm:$0xf] }
 0xa07   :  { %v7458_v47 = vadd.f32 %v14799_v12, %v7457_v38  ;;  %v14451_v38 = vld [vmem:[#allocation5 + $0x74] sm:$0xf0] }
 0xa09   :  { %v14801_v59 = vpop.eup %14800  ;;  %v7462_v46 = vsel %vm7461_vm10, %v14799_v12, %v7458_v47  ;;  %v12630_v12 = vld [vmem:[#allocation5 + $0x30] sm:$0xf] }
 0xa0a   :  { %v7485_v60 = vmul.f32 %v14801_v59, %v7390_v5  ;;  %v7387_v39 = vpop.xlane.xlu0 %7386  ;;  %vm7490_vm9 = vweird.f32 %v14801_v59  ;;  %v7467_v58 = vsel %vm7464_vm13, %v7466_v55, %v7462_v46  ;;  %v14443_v5 = vld [vmem:[#allocation5 + $0x34] sm:$0xf0] }
 0xa0b   :  { %v7393_v40 = vpop.xlane.xlu1 %7392  ;;  %14802 = vrcp.f32 %v7387_v39  ;;  %vm7491_vm12 = vmor %vm7489_vm11, %vm7490_vm9  ;;  %v7478_v11 = vand.u32 2147483647, %v7387_v39  ;;  %v7480_v6 = vand.u32 2147483648, %v7387_v39  ;;  %v7468_v25 = vmul.f32 %v18128_v26, %v7467_v58  ;;  %v12616_v58 = vld [vmem:[#allocation5 + $0x18] sm:$0xf0] }
 0xa0c   :  { %v7486_v8 = vsub.f32 1.0, %v7485_v60  ;;  %14804 = vrcp.f32 %v7393_v40  ;;  %v7510_v15 = vand.u32 2147483648, %v7393_v40  ;;  %v7508_v24 = vand.u32 2147483647, %v7393_v40 }
 0xa0d   :  { %vm7474_vm3 = vweird.f32 %v7387_v39  ;;  %vm7504_vm4 = vweird.f32 %v7393_v40  ;;  %v7481_v62 = vor.u32 1.1754944e-38, %v7480_v6  ;;  %vm7479_vm7 = vcmp.eq.f32.partialorder %v7478_v11, 8.507059e+37  ;;  %v14447_v11 = vld [vmem:[#allocation5 + $0x54] sm:$0xf0] }
 0xa0e   :  { %v7487_v7 = vmul.f32 %v14801_v59, %v7486_v8  ;;  %v7511_v2 = vor.u32 1.1754944e-38, %v7510_v15  ;;  %vm7509_vm8 = vcmp.eq.f32.partialorder %v7508_v24, 8.507059e+37  ;;  %v7518_v31 = vpack.c.bf16 %v7468_v25, %v7468_v25  ;;  %v12622_v8 = vld [vmem:[#allocation5 + $0x20] sm:$0xf]  ;;  %v14446_v15 = vld [vmem:[#allocation5 + $0x54] sm:$0xf] }
 0xa0f   :  { %v12631_v17 = vor.u32 %v14443_v5, %v12630_v12  ;;  %v12606_v24 = vld [vmem:[#allocation5] sm:$0xf]  ;;  %v14437_v25 = vld [vmem:[#allocation5 + $0x4] sm:$0xf0] }
 0xa10   :  { %v7488_v44 = vadd.f32 %v14801_v59, %v7487_v7  ;;  %v7588_v34 = vunpack.c.l.b16 %v7518_v31  ;;  %v14441_v7 = vld [vmem:[#allocation5 + $0x24] sm:$0xf0]  ;;  %v12642_v31 = vld [vmem:[#allocation5 + $0x48] sm:$0xf0] }
 0xa11   :  { %v14803_v29 = vpop.eup %14802  ;;  %7702 = vmatpush.bf16.msra.mxu0 %v12631_v17  ;;  %v12700_v17 = vld [vmem:[#allocation5 + $0xb8] sm:$0xf0] }
 0xa12   :  { %v14805_v49 = vpop.eup %14804  ;;  %v7470_v52 = vmul.f32 %v14803_v29, %v7387_v39  ;;  %v7492_v57 = vsel %vm7491_vm12, %v14801_v59, %v7488_v44  ;;  %vm7475_vm15 = vweird.f32 %v14803_v29  ;;  %v12664_v59 = vld [vmem:[#allocation5 + $0x70] sm:$0xf]  ;;  %v14450_v39 = vld [vmem:[#allocation5 + $0x74] sm:$0xf]  ;;  %v12623_v44 = vor.u32 %v14441_v7, %v12622_v8  ;;  %v12734_v8 = vld [vmem:[#allocation5 + $0xf8] sm:$0xf0] }
 0xa13   :  { %v7500_v0 = vmul.f32 %v14805_v49, %v7393_v40  ;;  %v7497_v14 = vsel %vm7494_vm14, %v7496_v53, %v7492_v57  ;;  %vm7505_vm2 = vweird.f32 %v14805_v49  ;;  %vm7476_vm5 = vmor %vm7474_vm3, %vm7475_vm15  ;;  %v12665_v60 = vor.u32 %v14451_v38, %v12664_v59  ;;  %v12666_v40 = vld [vmem:[#allocation5 + $0x78] sm:$0xf0]  ;;  %v12614_v57 = vld [vmem:[#allocation5 + $0x10] sm:$0xf] }
 0xa14   :  { %v7471_v54 = vsub.f32 1.0, %v7470_v52  ;;  %v7498_v43 = vmul.f32 %v18132_v27, %v7497_v14  ;;  %vm7506_vm6 = vmor %vm7504_vm4, %vm7505_vm2  ;;  %v12669_v47 = vor.u32 %v14450_v39, %v12666_v40  ;;  %v12658_v52 = vld [vmem:[#allocation5 + $0x68] sm:$0xf0]  ;;  %v14438_v53 = vld [vmem:[#allocation5 + $0x14] sm:$0xf] }
 0xa15   :  { %v7501_v28 = vsub.f32 1.0, %v7500_v0  ;;  %7778 = vmatpush.bf16.msra.mxu2 %v12665_v60  ;;  %7703 = vmatpush.bf16.msra.mxu0 %v12623_v44  ;;  %v14439_v0 = vld [vmem:[#allocation5 + $0x14] sm:$0xf0]  ;;  %v12619_v6 = vor.u32 %v14438_v53, %v12616_v58  ;;  %v14466_v40 = vld [vmem:[#allocation5 + $0xf4] sm:$0xf] }
 0xa16   :  { %v7472_v20 = vmul.f32 %v14803_v29, %v7471_v54  ;;  %v7520_v26 = vpack.c.bf16 %v7498_v43, %v7498_v43  ;;  %7792 = vmatpush.bf16.msra.mxu3 %v12669_v47  ;;  %v12615_v54 = vor.u32 %v14439_v0, %v12614_v57  ;;  %v12607_v43 = vor.u32 %v14437_v25, %v12606_v24  ;;  %v14467_v59 = vld [vmem:[#allocation5 + $0xf4] sm:$0xf0]  ;;  %v14457_v44 = vld [vmem:[#allocation5 + $0xa4] sm:$0xf0]  ;;  %v14464_v57 = vld [vmem:[#allocation5 + $0xe4] sm:$0xf] }
 0xa17   :  { %v7502_v21 = vmul.f32 %v14805_v49, %v7501_v28  ;;  %v12648_v28 = vld [vmem:[#allocation5 + $0x50] sm:$0xf]  ;;  %v12737_v7 = vor.u32 %v14466_v40, %v12734_v8  ;;  %v12726_v0 = vld [vmem:[#allocation5 + $0xe8] sm:$0xf0]  ;;  %v14455_v58 = vld [vmem:[#allocation5 + $0x94] sm:$0xf0] }
 0xa18   :  { %v7473_v30 = vadd.f32 %v14803_v29, %v7472_v20  ;;  %v7616_v1 = vunpack.c.l.b16 %v7520_v26  ;;  %v12649_v14 = vor.u32 %v14447_v11, %v12648_v28  ;;  %v12650_v20 = vld [vmem:[#allocation5 + $0x58] sm:$0xf0]  ;;  %v12729_v53 = vor.u32 %v14464_v57, %v12726_v0  ;;  %v14454_v28 = vld [vmem:[#allocation5 + $0x94] sm:$0xf] }
 0xa19   :  { %v7503_v61 = vadd.f32 %v14805_v49, %v7502_v21  ;;  %7704 = vmatpush.bf16.msra.mxu0 %v12615_v54  ;;  %v12653_v21 = vor.u32 %v14446_v15, %v12650_v20  ;;  %v12682_v54 = vld [vmem:[#allocation5 + $0x90] sm:$0xf]  ;;  %v14463_v15 = vld [vmem:[#allocation5 + $0xd4] sm:$0xf0]  ;;  %v14462_v24 = vld [vmem:[#allocation5 + $0xd4] sm:$0xf] }
 0xa1a   :  { %v7477_v50 = vsel %vm7476_vm5, %v14803_v29, %v7473_v30  ;;  %v14449_v29 = vld [vmem:[#allocation5 + $0x64] sm:$0xf0]  ;;  %v14436_v30 = vld [vmem:[#allocation5 + $0x4] sm:$0xf]  ;;  %v12683_v11 = vor.u32 %v14455_v58, %v12682_v54  ;;  %v12718_v25 = vld [vmem:[#allocation5 + $0xd8] sm:$0xf0] }
 0xa1b   :  { %v7507_v9 = vsel %vm7506_vm6, %v14805_v49, %v7503_v61  ;;  %v7482_v35 = vsel %vm7479_vm7, %v7481_v62, %v7477_v50  ;;  %v14448_v49 = vld [vmem:[#allocation5 + $0x64] sm:$0xf]  ;;  %v12657_v46 = vor.u32 %v14449_v29, %v12656_v19  ;;  %v12608_v61 = vld [vmem:[#allocation5 + $0x8] sm:$0xf0]  ;;  %v12640_v62 = vld [vmem:[#allocation5 + $0x40] sm:$0xf]  ;;  %v12691_v19 = vor.u32 %v14457_v44, %v12690_v10 }
 0xa1c   :  { %v7512_v32 = vsel %vm7509_vm8, %v7511_v2, %v7507_v9  ;;  %v7483_v45 = vmul.f32 %v18136_v4, %v7482_v35  ;;  %v12632_v4 = vld [vmem:[#allocation5 + $0x38] sm:$0xf0]  ;;  %v12661_v55 = vor.u32 %v14448_v49, %v12658_v52  ;;  %v14445_v2 = vld [vmem:[#allocation5 + $0x44] sm:$0xf0]  ;;  %v12611_v50 = vor.u32 %v14436_v30, %v12608_v61  ;;  %v14444_v35 = vld [vmem:[#allocation5 + $0x44] sm:$0xf] }
 0xa1d   :  { %v7513_v56 = vmul.f32 %v18138_v33, %v7512_v32  ;;  %v12635_v33 = vor.u32 %v14442_v3, %v12632_v4  ;;  %7779 = vmatpush.bf16.msra.mxu2 %v12657_v46  ;;  %v12641_v9 = vor.u32 %v14445_v2, %v12640_v62  ;;  %7705 = vmatpush.bf16.msra.mxu0 %v12607_v43  ;;  %v12732_v4 = vld [vmem:[#allocation5 + $0xf0] sm:$0xf]  ;;  %v12692_v29 = vld [vmem:[#allocation5 + $0xa8] sm:$0xf0]  ;;  %v12724_v49 = vld [vmem:[#allocation5 + $0xe0] sm:$0xf] }
 0xa1e   :  { %v7519_v13 = vpack.c.bf16 %v7483_v45, %v7483_v45  ;;  %7793 = vmatpush.bf16.msra.mxu3 %v12661_v55  ;;  %v12645_v32 = vor.u32 %v14444_v35, %v12642_v31  ;;  %v12733_v39 = vor.u32 %v14467_v59, %v12732_v4  ;;  %v14465_v46 = vld [vmem:[#allocation5 + $0xe4] sm:$0xf0]  ;;  %v12721_v30 = vor.u32 %v14462_v24, %v12718_v25  ;;  %v12674_v43 = vld [vmem:[#allocation5 + $0x80] sm:$0xf]  ;;  %v14452_v62 = vld [vmem:[#allocation5 + $0x84] sm:$0xf] }
 0xa1f   :  { %v7521_v27 = vpack.c.bf16 %v7513_v56, %v7513_v56  ;;  %7716 = vmatpush.bf16.msra.mxu1 %v12635_v33  ;;  %v12725_v55 = vor.u32 %v14465_v46, %v12724_v49  ;;  %v14453_v61 = vld [vmem:[#allocation5 + $0x84] sm:$0xf0]  ;;  %v12966_v24 = vld [vmem:[%s19845_s18 + $0x1c0] sm:$0xf] }
 0xa20   :  { %v7589_v36 = vunpack.c.l.b16 %v7519_v13  ;;  %v12675_v2 = vor.u32 %v14453_v61, %v12674_v43  ;;  %v14461_v35 = vld [vmem:[#allocation5 + $0xc4] sm:$0xf0]  ;;  %v14528_v25 = vld [vmem:[%s19845_s18 + $0x1dc] sm:$0xf0] }
 0xa21   :  { %v7617_v42 = vunpack.c.l.b16 %v7521_v27  ;;  %7780 = vmatpush.bf16.msra.mxu2 %v12649_v14  ;;  %v12716_v14 = vld [vmem:[#allocation5 + $0xd0] sm:$0xf]  ;;  %v12967_v43 = vor.u32 %v14528_v25, %v12966_v24  ;;  %v14592_v61 = vld [vmem:[%s19845_s18 + $0x3dc] sm:$0xf0]  ;;  %v13096_v24 = vld [vmem:[%s19845_s18 + $0x2e0] sm:$0xf0] }
 0xa22   :  { %v7590_v37 = vpack.c.b16 %v7589_v36, %v7588_v34  ;;  %7794 = vmatpush.bf16.msra.mxu3 %v12653_v21  ;;  %v12717_v21 = vor.u32 %v14463_v15, %v12716_v14 }
 0xa23   :  { %v7618_v22 = vpack.c.b16 %v7617_v42, %v7616_v1  ;;  %7717 = vmatpush.bf16.msra.mxu1 %v12627_v18  ;;  %v12698_v42 = vld [vmem:[#allocation5 + $0xb0] sm:$0xf]  ;;  %v14456_v18 = vld [vmem:[#allocation5 + $0xa4] sm:$0xf] }
 0xa24   :  { %12602 = vmatmul.msk.bf16.vlgmr.msrb.gmra.mxu2 %vm2440_vm1, %v7590_v37  ;;  %v14459_v37 = vld [vmem:[#allocation5 + $0xb4] sm:$0xf0]  ;;  %v12695_v52 = vor.u32 %v14456_v18, %v12692_v29 }
 0xa25   :  { %12603 = vmatmul.msk.bf16.vlgmr.msrb.gmra.mxu3 %vm2440_vm1, %v7618_v22  ;;  %7781 = vmatpush.bf16.msra.mxu2 %v12641_v9  ;;  %v14458_v22 = vld [vmem:[#allocation5 + $0xb4] sm:$0xf]  ;;  %v12699_v3 = vor.u32 %v14459_v37, %v12698_v42  ;;  %v12708_v9 = vld [vmem:[#allocation5 + $0xc0] sm:$0xf] }
 0xa26   :  { %7795 = vmatpush.bf16.msra.mxu3 %v12645_v32  ;;  %v12703_v60 = vor.u32 %v14458_v22, %v12700_v17  ;;  %v12709_v32 = vor.u32 %v14461_v35, %v12708_v9  ;;  %v14588_v35 = vld [vmem:[%s19845_s18 + $0x3c4] sm:$0xf] }
 0xa27   :  { %7718 = vmatpush.bf16.msra.mxu1 %v12619_v6  ;;  %7854 = vmatpush.bf16.msrb.mxu0 %v12699_v3  ;;  %v12684_v6 = vld [vmem:[#allocation5 + $0x98] sm:$0xf0] }
 0xa28   :  { %v12687_v20 = vor.u32 %v14454_v28, %v12684_v6 }
 0xa29   :  { %7930 = vmatpush.bf16.msrb.mxu2 %v12733_v39 }
 0xa2a   :  { %7944 = vmatpush.bf16.msrb.mxu3 %v12737_v7 }
 0xa2b   :  { %7719 = vmatpush.bf16.msra.mxu1 %v12611_v50  ;;  %7855 = vmatpush.bf16.msrb.mxu0 %v12691_v19  ;;  %v12676_v50 = vld [vmem:[#allocation5 + $0x88] sm:$0xf0] }
 0xa2c   :  { %v12679_v31 = vor.u32 %v14452_v62, %v12676_v50  ;;  %v14524_v62 = vld [vmem:[%s19845_s18 + $0x1c4] sm:$0xf] }
 0xa2d   :  { %7931 = vmatpush.bf16.msrb.mxu2 %v12725_v55 }
 0xa2e   :  { %7945 = vmatpush.bf16.msrb.mxu3 %v12729_v53 }
 0xa2f   :  { %7868 = vmatpush.bf16.msrb.mxu1 %v12703_v60  ;;  %7856 = vmatpush.bf16.msrb.mxu0 %v12683_v11 }
 0xa31   :  { %7932 = vmatpush.bf16.msrb.mxu2 %v12717_v21 }
 0xa32   :  { %7946 = vmatpush.bf16.msrb.mxu3 %v12721_v30  ;;  %v13222_v30 = vld [vmem:[%s19845_s18 + $0x3c0] sm:$0xf] }
 0xa33   :  { %7869 = vmatpush.bf16.msrb.mxu1 %v12695_v52  ;;  %7857 = vmatpush.bf16.msrb.mxu0 %v12675_v2  ;;  %v12968_v2 = vld [vmem:[%s19845_s18 + $0x1e0] sm:$0xf0]  ;;  %v13223_v50 = vor.u32 %v14592_v61, %v13222_v30 }
 0xa34   :  { %v12971_v9 = vor.u32 %v14524_v62, %v12968_v2 }
 0xa35   :  { %7933 = vmatpush.bf16.msrb.mxu2 %v12709_v32  ;;  %v12934_v32 = vld [vmem:[%s19845_s18 + $0x180] sm:$0xf] }
 0xa37   :  { %7870 = vmatpush.bf16.msrb.mxu1 %v12687_v20 }
 0xa3b   :  { %7871 = vmatpush.bf16.msrb.mxu1 %v12679_v31  ;;  %v13224_v31 = vld [vmem:[%s19845_s18 + $0x3e0] sm:$0xf0] }
 0xa7b   :  { %v7581_v45 = vpop.f32.mrf.mxu1 }
 0xa7c   :  { %v7553_v26 = vpop.f32.mrf.mxu0  ;;  %v7644_v56 = vpack.c.bf16 %v7581_v45, %v7581_v45  ;;  %v14460_v45 = vld [vmem:[#allocation5 + $0xc4] sm:$0xf] }
 0xa7d   :  { %v7642_v13 = vpack.c.bf16 %v7553_v26, %v7553_v26  ;;  %v12710_v26 = vld [vmem:[#allocation5 + $0xc8] sm:$0xf0] }
 0xa7e   :  { %v7728_v12 = vunpack.c.l.b16 %v7644_v56  ;;  %v12713_v56 = vor.u32 %v14460_v45, %v12710_v26  ;;  %v13227_v45 = vor.u32 %v14588_v35, %v13224_v31  ;;  %v14520_v26 = vld [vmem:[%s19845_s18 + $0x19c] sm:$0xf0] }
 0xa7f   :  { %v7652_v38 = vunpack.c.l.b16 %v7642_v13 }
 0xa80   :  { %7947 = vmatpush.bf16.msrb.mxu3 %v12713_v56  ;;  %v13190_v56 = vld [vmem:[%s19845_s18 + $0x380] sm:$0xf] }
 0xa83   :  { %v7583_v27 = vpop.f32.mrf.mxu1 }
 0xa84   :  { %v7555_v34 = vpop.f32.mrf.mxu0  ;;  %v7645_v36 = vpack.c.bf16 %v7583_v27, %v7583_v27 }
 0xa85   :  { %v7643_v1 = vpack.c.bf16 %v7555_v34, %v7555_v34 }
 0xa86   :  { %v7729_v5 = vunpack.c.l.b16 %v7645_v36 }
 0xa87   :  { %v7653_v33 = vunpack.c.l.b16 %v7643_v1 }
 0xa88   :  { %v7730_v47 = vpack.c.b16 %v7729_v5, %v7728_v12 }
 0xa89   :  { %v7654_v41 = vpack.c.b16 %v7653_v33, %v7652_v38 }
 0xa8a   :  { %12670 = vmatmul.msk.bf16.vlgmr.msra.gmra.mxu2 %vm2313_vm0, %v7730_v47  ;;  %12671 = vmatmul.msk.bf16.vlgmr.msra.gmra.mxu3 %vm2313_vm0, %v7730_v47 }
 0xa8b   :  { %12636 = vmatmul.msk.bf16.vlgmr.msra.gmra.mxu0 %vm2313_vm0, %v7654_v41  ;;  %12637 = vmatmul.msk.bf16.vlgmr.msra.gmra.mxu1 %vm2313_vm0, %v7654_v41 }
 0xa8c   :  { %8680 = vmatpush.bf16.msra.mxu0 %v12967_v43  ;;  %8694 = vmatpush.bf16.msra.mxu1 %v13223_v50 }
 0xa8d   :  { %8708 = vmatpush.bf16.msra.mxu2 %v12971_v9  ;;  %8722 = vmatpush.bf16.msra.mxu3 %v13227_v45 }
 0xaa7   :  { %v7609_v13 = vpop.f32.mrf.mxu2 }
 0xaa8   :  { %v7637_v27 = vpop.f32.mrf.mxu3  ;;  %v7646_v34 = vpack.c.bf16 %v7609_v13, %v7609_v13  ;;  %v14584_v13 = vld [vmem:[%s19845_s18 + $0x39c] sm:$0xf0] }
 0xaa9   :  { %v7648_v36 = vpack.c.bf16 %v7637_v27, %v7637_v27  ;;  %v12935_v27 = vor.u32 %v14520_v26, %v12934_v32 }
 0xaaa   :  { %v7804_v12 = vunpack.c.l.b16 %v7646_v34  ;;  %v13191_v34 = vor.u32 %v14584_v13, %v13190_v56 }
 0xaab   :  { %v7880_v3 = vunpack.c.l.b16 %v7648_v36  ;;  %v14516_v36 = vld [vmem:[%s19845_s18 + $0x184] sm:$0xf]  ;;  %8681 = vmatpush.bf16.msra.mxu0 %v12935_v27 }
 0xaac   :  { %8695 = vmatpush.bf16.msra.mxu1 %v13191_v34  ;;  %v12806_v34 = vld [vmem:[%s19845_s18 + $0x80] sm:$0xf] }
 0xaaf   :  { %v7611_v1 = vpop.f32.mrf.mxu2 }
 0xab0   :  { %v7647_v42 = vpack.c.bf16 %v7611_v1, %v7611_v1  ;;  %v7639_v37 = vpop.f32.mrf.mxu3  ;;  %v12936_v1 = vld [vmem:[%s19845_s18 + $0x1a0] sm:$0xf0] }
 0xab1   :  { %v7649_v22 = vpack.c.bf16 %v7639_v37, %v7639_v37  ;;  %v12939_v37 = vor.u32 %v14516_v36, %v12936_v1  ;;  %v14552_v1 = vld [vmem:[%s19845_s18 + $0x29c] sm:$0xf0] }
 0xab2   :  { %v7805_v5 = vunpack.c.l.b16 %v7647_v42  ;;  %v14580_v42 = vld [vmem:[%s19845_s18 + $0x384] sm:$0xf] }
 0xab3   :  { %v7881_v17 = vunpack.c.l.b16 %v7649_v22  ;;  %v13192_v22 = vld [vmem:[%s19845_s18 + $0x3a0] sm:$0xf0]  ;;  %8709 = vmatpush.bf16.msra.mxu2 %v12939_v37 }
 0xab4   :  { %v7806_v4 = vpack.c.b16 %v7805_v5, %v7804_v12  ;;  %v12902_v12 = vld [vmem:[%s19845_s18 + $0x140] sm:$0xf]  ;;  %v12808_v37 = vld [vmem:[%s19845_s18 + $0xa0] sm:$0xf0] }
 0xab5   :  { %v7882_v59 = vpack.c.b16 %v7881_v17, %v7880_v3  ;;  %v14512_v5 = vld [vmem:[%s19845_s18 + $0x15c] sm:$0xf0]  ;;  %v13195_v3 = vor.u32 %v14580_v42, %v13192_v22  ;;  %v14484_v42 = vld [vmem:[%s19845_s18 + $0x84] sm:$0xf] }
 0xab6   :  { %12704 = vmatmul.msk.bf16.vlgmr.msrb.gmra.mxu0 %vm2313_vm0, %v7806_v4  ;;  %12705 = vmatmul.msk.bf16.vlgmr.msrb.gmra.mxu1 %vm2313_vm0, %v7806_v4  ;;  %v13158_v17 = vld [vmem:[%s19845_s18 + $0x340] sm:$0xf] }
 0xab7   :  { %12738 = vmatmul.msk.bf16.vlgmr.msrb.gmra.mxu2 %vm2313_vm0, %v7882_v59  ;;  %12739 = vmatmul.msk.bf16.vlgmr.msrb.gmra.mxu3 %vm2313_vm0, %v7882_v59  ;;  %v14576_v4 = vld [vmem:[%s19845_s18 + $0x35c] sm:$0xf0]  ;;  %v14508_v59 = vld [vmem:[%s19845_s18 + $0x144] sm:$0xf] }
 0xab8   :  { %8723 = vmatpush.bf16.msra.mxu3 %v13195_v3  ;;  %v13064_v3 = vld [vmem:[%s19845_s18 + $0x2a0] sm:$0xf0] }
 0xb08   :  { %v7707_v38 = vpop.f32.mrf.mxu0  ;;  %v7721_v33 = vpop.f32.mrf.mxu1 }
 0xb0d   :  { %v7783_v60 = vpop.f32.mrf.mxu2  ;;  %v7797_v39 = vpop.f32.mrf.mxu3 }
 0xb0e   :  { %v7954_v44 = vadd.f32 %v7783_v60, %v7707_v38  ;;  %v7955_v18 = vadd.f32 %v7797_v39, %v7721_v33  ;;  %v12903_v38 = vor.u32 %v14512_v5, %v12902_v12  ;;  %v12904_v33 = vld [vmem:[%s19845_s18 + $0x160] sm:$0xf0]  ;;  %v12811_v12 = vor.u32 %v14484_v42, %v12808_v37  ;;  %v12910_v42 = vld [vmem:[%s19845_s18 + $0x148] sm:$0xf] }
 0xb0f   :  { %v14572_v60 = vld [vmem:[%s19845_s18 + $0x344] sm:$0xf]  ;;  %v14513_v37 = vld [vmem:[%s19845_s18 + $0x164] sm:$0xf0] }
 0xb10   :  { %v7709_v40 = vpop.f32.mrf.mxu0  ;;  %v7723_v8 = vpop.f32.mrf.mxu1  ;;  %v13160_v39 = vld [vmem:[%s19845_s18 + $0x360] sm:$0xf0]  ;;  %8682 = vmatpush.bf16.msra.mxu0 %v12903_v38  ;;  %v13030_v38 = vld [vmem:[%s19845_s18 + $0x240] sm:$0xf] }
 0xb11   :  { %v14548_v5 = vld [vmem:[%s19845_s18 + $0x284] sm:$0xf] }
 0xb15   :  { %v7785_v47 = vpop.f32.mrf.mxu2  ;;  %v7799_v7 = vpop.f32.mrf.mxu3 }
 0xb16   :  { %v7956_v54 = vadd.f32 %v7785_v47, %v7709_v40  ;;  %v7957_v58 = vadd.f32 %v7799_v7, %v7723_v8  ;;  %v13159_v40 = vor.u32 %v14576_v4, %v13158_v17  ;;  %v12907_v8 = vor.u32 %v14508_v59, %v12904_v33  ;;  %v12870_v47 = vld [vmem:[%s19845_s18 + $0x100] sm:$0xf] }
 0xb17   :  { %v14504_v7 = vld [vmem:[%s19845_s18 + $0x11c] sm:$0xf0]  ;;  %v13067_v17 = vor.u32 %v14548_v5, %v13064_v3  ;;  %v14577_v5 = vld [vmem:[%s19845_s18 + $0x364] sm:$0xf0]  ;;  %v14509_v3 = vld [vmem:[%s19845_s18 + $0x14c] sm:$0xf] }
 0xb18   :  { %8696 = vmatpush.bf16.msra.mxu1 %v13159_v40  ;;  %8710 = vmatpush.bf16.msra.mxu2 %v12907_v8  ;;  %v12774_v4 = vld [vmem:[%s19845_s18 + $0x40] sm:$0xf]  ;;  %v12776_v40 = vld [vmem:[%s19845_s18 + $0x60] sm:$0xf0] }
 0xb19   :  { %v14480_v59 = vld [vmem:[%s19845_s18 + $0x5c] sm:$0xf0] }
 0xb1a   :  { %v12775_v33 = vor.u32 %v14480_v59, %v12774_v4 }
 0xb33   :  { %v7859_v41 = vpop.f32.mrf.mxu0  ;;  %v7873_v10 = vpop.f32.mrf.mxu1 }
 0xb34   :  { %v7958_v19 = vadd.f32 %v7954_v44, %v7859_v41  ;;  %v7959_v29 = vadd.f32 %v7955_v18, %v7873_v10  ;;  %v13126_v41 = vld [vmem:[%s19845_s18 + $0x300] sm:$0xf]  ;;  %v13163_v10 = vor.u32 %v14572_v60, %v13160_v39  ;;  %v14500_v18 = vld [vmem:[%s19845_s18 + $0x104] sm:$0xf] }
 0xb35   :  { %v14568_v44 = vld [vmem:[%s19845_s18 + $0x31c] sm:$0xf0]  ;;  %v14476_v39 = vld [vmem:[%s19845_s18 + $0x44] sm:$0xf] }
 0xb36   :  { %8724 = vmatpush.bf16.msra.mxu3 %v13163_v10  ;;  %v14544_v60 = vld [vmem:[%s19845_s18 + $0x25c] sm:$0xf0] }
 0xb37   :  { %v13031_v8 = vor.u32 %v14544_v60, %v13030_v38  ;;  %v14573_v38 = vld [vmem:[%s19845_s18 + $0x34c] sm:$0xf] }
 0xb3a   :  { %v7935_v49 = vpop.f32.mrf.mxu2  ;;  %v7949_v46 = vpop.f32.mrf.mxu3 }
 0xb3b   :  { %v18164_v52 = vadd.f32 %v7958_v19, %v7935_v49  ;;  %v18166_v55 = vadd.f32 %v7959_v29, %v7949_v46  ;;  %v7861_v0 = vpop.f32.mrf.mxu0  ;;  %v7875_v53 = vpop.f32.mrf.mxu1  ;;  %v12872_v19 = vld [vmem:[%s19845_s18 + $0x120] sm:$0xf0]  ;;  %v12871_v46 = vor.u32 %v14504_v7, %v12870_v47  ;;  %v12779_v47 = vor.u32 %v14476_v39, %v12776_v40  ;;  %v12878_v39 = vld [vmem:[%s19845_s18 + $0x108] sm:$0xf] }
 0xb3c   :  { %v7960_v28 = vadd.f32 %v7956_v54, %v7861_v0  ;;  %v7961_v11 = vadd.f32 %v7957_v58, %v7875_v53  ;;  %v14564_v29 = vld [vmem:[%s19845_s18 + $0x304] sm:$0xf]  ;;  %v12875_v0 = vor.u32 %v14500_v18, %v12872_v19  ;;  %v12838_v53 = vld [vmem:[%s19845_s18 + $0xc0] sm:$0xf]  ;;  %v14505_v40 = vld [vmem:[%s19845_s18 + $0x124] sm:$0xf0] }
 0xb3d   :  { %v7966_v57 = vadd.f32 %v18166_v55, %v18164_v52  ;;  %v13128_v49 = vld [vmem:[%s19845_s18 + $0x320] sm:$0xf0]  ;;  %v14496_v54 = vld [vmem:[%s19845_s18 + $0xdc] sm:$0xf0]  ;;  %8683 = vmatpush.bf16.msra.mxu0 %v12871_v46 }
 0xb3e   :  { %v13094_v58 = vld [vmem:[%s19845_s18 + $0x2c0] sm:$0xf]  ;;  %v12839_v30 = vor.u32 %v14496_v54, %v12838_v53  ;;  %8711 = vmatpush.bf16.msra.mxu2 %v12875_v0  ;;  %v14540_v7 = vld [vmem:[%s19845_s18 + $0x244] sm:$0xf] }
 0xb3f   :  { %7967 = vadd.xlane.f32.xlu1 %v7966_v57  ;;  %v13127_v57 = vor.u32 %v14568_v44, %v13126_v41  ;;  %v13032_v41 = vld [vmem:[%s19845_s18 + $0x260] sm:$0xf0]  ;;  %v12742_v44 = vld [vmem:[%s19845_s18] sm:$0xf] }
 0xb40   :  { %v13035_v10 = vor.u32 %v14540_v7, %v13032_v41  ;;  %v14472_v18 = vld [vmem:[%s19845_s18 + $0x1c] sm:$0xf0]  ;;  %v14468_v46 = vld [vmem:[%s19845_s18 + $0x4] sm:$0xf]  ;;  %v14569_v7 = vld [vmem:[%s19845_s18 + $0x324] sm:$0xf0] }
 0xb41   :  { %8697 = vmatpush.bf16.msra.mxu1 %v13127_v57  ;;  %8684 = vmatpush.bf16.msra.mxu0 %v12839_v30  ;;  %v12998_v19 = vld [vmem:[%s19845_s18 + $0x200] sm:$0xf]  ;;  %v12744_v57 = vld [vmem:[%s19845_s18 + $0x20] sm:$0xf0]  ;;  %v14525_v30 = vld [vmem:[%s19845_s18 + $0x1cc] sm:$0xf] }
 0xb42   :  { %v7937_v6 = vpop.f32.mrf.mxu2  ;;  %v7951_v14 = vpop.f32.mrf.mxu3  ;;  %v12747_v53 = vor.u32 %v14468_v46, %v12744_v57  ;;  %v14532_v54 = vld [vmem:[%s19845_s18 + $0x204] sm:$0xf]  ;;  %v14501_v41 = vld [vmem:[%s19845_s18 + $0x10c] sm:$0xf]  ;;  %v12846_v46 = vld [vmem:[%s19845_s18 + $0xc8] sm:$0xf] }
 0xb43   :  { %v18170_v15 = vadd.f32 %v7960_v28, %v7937_v6  ;;  %v18172_v20 = vadd.f32 %v7961_v11, %v7951_v14  ;;  %v13131_v28 = vor.u32 %v14564_v29, %v13128_v49  ;;  %v14560_v11 = vld [vmem:[%s19845_s18 + $0x2dc] sm:$0xf0]  ;;  %v14492_v6 = vld [vmem:[%s19845_s18 + $0xc4] sm:$0xf]  ;;  %v12743_v29 = vor.u32 %v14472_v18, %v12742_v44  ;;  %v14497_v57 = vld [vmem:[%s19845_s18 + $0xe4] sm:$0xf0] }
 0xb44   :  { %v12840_v14 = vld [vmem:[%s19845_s18 + $0xe0] sm:$0xf0]  ;;  %v13095_v61 = vor.u32 %v14560_v11, %v13094_v58  ;;  %v14536_v49 = vld [vmem:[%s19845_s18 + $0x21c] sm:$0xf0] }
 0xb45   :  { %v7969_v21 = vadd.f32 %v18172_v20, %v18170_v15  ;;  %v12843_v62 = vor.u32 %v14492_v6, %v12840_v14  ;;  %8725 = vmatpush.bf16.msra.mxu3 %v13131_v28  ;;  %v12999_v0 = vor.u32 %v14536_v49, %v12998_v19  ;;  %v13000_v58 = vld [vmem:[%s19845_s18 + $0x220] sm:$0xf0]  ;;  %v12974_v28 = vld [vmem:[%s19845_s18 + $0x1c8] sm:$0xf]  ;;  %v14565_v19 = vld [vmem:[%s19845_s18 + $0x30c] sm:$0xf] }
 0xb46   :  { %8698 = vmatpush.bf16.msra.mxu1 %v13095_v61  ;;  %v13003_v11 = vor.u32 %v14532_v54, %v13000_v58  ;;  %v14529_v6 = vld [vmem:[%s19845_s18 + $0x1e4] sm:$0xf0]  ;;  %v14589_v61 = vld [vmem:[%s19845_s18 + $0x3cc] sm:$0xf] }
 0xb47   :  { %7970 = vadd.xlane.f32.xlu2 %v7969_v21  ;;  %v14556_v21 = vld [vmem:[%s19845_s18 + $0x2c4] sm:$0xf]  ;;  %8712 = vmatpush.bf16.msra.mxu2 %v12843_v62  ;;  %v13230_v14 = vld [vmem:[%s19845_s18 + $0x3c8] sm:$0xf]  ;;  %v14493_v58 = vld [vmem:[%s19845_s18 + $0xcc] sm:$0xf] }
 0xb48   :  { %v13099_v2 = vor.u32 %v14556_v21, %v13096_v24  ;;  %v14593_v21 = vld [vmem:[%s19845_s18 + $0x3e4] sm:$0xf0]  ;;  %v12975_v24 = vor.u32 %v14529_v6, %v12974_v28  ;;  %v12848_v28 = vld [vmem:[%s19845_s18 + $0xe8] sm:$0xf0] }
 0xb49   :  { %v14561_v54 = vld [vmem:[%s19845_s18 + $0x2e4] sm:$0xf0]  ;;  %v12851_v6 = vor.u32 %v14493_v58, %v12848_v28 }
 0xb4a   :  { %8726 = vmatpush.bf16.msra.mxu3 %v13099_v2  ;;  %v13232_v2 = vld [vmem:[%s19845_s18 + $0x3e8] sm:$0xf0] }
 0xb4b   :  { %8713 = vmatpush.bf16.msra.mxu2 %v12811_v12  ;;  %v12911_v12 = vor.u32 %v14513_v37, %v12910_v42  ;;  %v14545_v42 = vld [vmem:[%s19845_s18 + $0x264] sm:$0xf0]  ;;  %v14477_v37 = vld [vmem:[%s19845_s18 + $0x4c] sm:$0xf] }
 0xb4e   :  { %8727 = vmatpush.bf16.msra.mxu3 %v13067_v17  ;;  %v12912_v17 = vld [vmem:[%s19845_s18 + $0x168] sm:$0xf0] }
 0xb4f   :  { %8714 = vmatpush.bf16.msra.mxu2 %v12779_v47  ;;  %v12915_v59 = vor.u32 %v14509_v3, %v12912_v17  ;;  %v12879_v47 = vor.u32 %v14505_v40, %v12878_v39  ;;  %v13040_v3 = vld [vmem:[%s19845_s18 + $0x268] sm:$0xf0]  ;;  %v14537_v40 = vld [vmem:[%s19845_s18 + $0x224] sm:$0xf0] }
 0xb52   :  { %8728 = vmatpush.bf16.msra.mxu3 %v13035_v10  ;;  %v12880_v10 = vld [vmem:[%s19845_s18 + $0x128] sm:$0xf0] }
 0xb53   :  { %8715 = vmatpush.bf16.msra.mxu2 %v12747_v53  ;;  %v12883_v18 = vor.u32 %v14501_v41, %v12880_v10  ;;  %v12847_v53 = vor.u32 %v14497_v57, %v12846_v46 }
 0xb56   :  { %8729 = vmatpush.bf16.msra.mxu3 %v13003_v11 }
 0xbb2   :  { %v7968_v25 = vpop.xlane.xlu1 %7967 }
 0xbb3   :  { %v7972_v43 = vmul.f32 %v7968_v25, %v15889_v48  ;;  %v13231_v25 = vor.u32 %v14593_v21, %v13230_v14  ;;  %v14557_v14 = vld [vmem:[%s19845_s18 + $0x2cc] sm:$0xf] }
 0xbb4   :  { %v13104_v21 = vld [vmem:[%s19845_s18 + $0x2e8] sm:$0xf0] }
 0xbb5   :  { %v18298_v50 = vsub.f32 %v18164_v52, %v7972_v43  ;;  %v18301_v9 = vsub.f32 %v18166_v55, %v7972_v43  ;;  %v12976_v43 = vld [vmem:[%s19845_s18 + $0x1e8] sm:$0xf0] }
 0xbb6   :  { %v12979_v62 = vor.u32 %v14525_v30, %v12976_v43  ;;  %v14489_v30 = vld [vmem:[%s19845_s18 + $0xa4] sm:$0xf0] }
 0xbb7   :  { %v7978_v35 = vmul.f32 %v18298_v50, %v18298_v50  ;;  %v7979_v31 = vmul.f32 %v18301_v9, %v18301_v9  ;;  %v13070_v43 = vld [vmem:[%s19845_s18 + $0x288] sm:$0xf] }
 0xbb8   :  { %8764 = vmatpush.bf16.msrb.mxu2 %v12979_v62 }
 0xbb9   :  { %v7982_v32 = vadd.f32 %v7979_v31, %v7978_v35  ;;  %v12942_v35 = vld [vmem:[%s19845_s18 + $0x188] sm:$0xf] }
 0xbba   :  { %v7971_v45 = vpop.xlane.xlu2 %7970  ;;  %v14521_v31 = vld [vmem:[%s19845_s18 + $0x1a4] sm:$0xf0] }
 0xbbb   :  { %v7973_v26 = vmul.f32 %v7971_v45, %v15889_v48  ;;  %7983 = vadd.xlane.f32.xlu0 %v7982_v32  ;;  %v13235_v32 = vor.u32 %v14589_v61, %v13232_v2  ;;  %v12943_v45 = vor.u32 %v14521_v31, %v12942_v35  ;;  %v14553_v2 = vld [vmem:[%s19845_s18 + $0x2a4] sm:$0xf0]  ;;  %v14485_v35 = vld [vmem:[%s19845_s18 + $0x8c] sm:$0xf] }
 0xbbc   :  { %v12816_v31 = vld [vmem:[%s19845_s18 + $0xa8] sm:$0xf0] }
 0xbbd   :  { %v18309_v52 = vsub.f32 %v18170_v15, %v7973_v26  ;;  %v18312_v55 = vsub.f32 %v18172_v20, %v7973_v26  ;;  %v14488_v15 = vld [vmem:[%s19845_s18 + $0x9c] sm:$0xf0]  ;;  %v13198_v26 = vld [vmem:[%s19845_s18 + $0x388] sm:$0xf]  ;;  %8778 = vmatpush.bf16.msrb.mxu3 %v13235_v32 }
 0xbbe   :  { %v13062_v20 = vld [vmem:[%s19845_s18 + $0x280] sm:$0xf]  ;;  %v12807_v36 = vor.u32 %v14488_v15, %v12806_v34  ;;  %v12944_v34 = vld [vmem:[%s19845_s18 + $0x1a8] sm:$0xf0] }
 0xbbf   :  { %v7980_v56 = vmul.f32 %v18309_v52, %v18309_v52  ;;  %v7981_v13 = vmul.f32 %v18312_v55, %v18312_v55  ;;  %v13063_v22 = vor.u32 %v14552_v1, %v13062_v20  ;;  %v14581_v15 = vld [vmem:[%s19845_s18 + $0x38c] sm:$0xf] }
 0xbc0   :  { %8685 = vmatpush.bf16.msra.mxu0 %v12807_v36  ;;  %v13200_v20 = vld [vmem:[%s19845_s18 + $0x3a8] sm:$0xf0] }
 0xbc1   :  { %v7985_v27 = vadd.f32 %v7981_v13, %v7980_v56  ;;  %8699 = vmatpush.bf16.msra.mxu1 %v13063_v22  ;;  %v14585_v56 = vld [vmem:[%s19845_s18 + $0x3a4] sm:$0xf0]  ;;  %v14517_v13 = vld [vmem:[%s19845_s18 + $0x18c] sm:$0xf]  ;;  %v13203_v1 = vor.u32 %v14581_v15, %v13200_v20 }
 0xbc2   :  { %v12947_v36 = vor.u32 %v14517_v13, %v12944_v34  ;;  %v13166_v22 = vld [vmem:[%s19845_s18 + $0x348] sm:$0xf]  ;;  %v13072_v13 = vld [vmem:[%s19845_s18 + $0x2a8] sm:$0xf0] }
 0xbc3   :  { %7986 = vadd.xlane.f32.xlu1 %v7985_v27  ;;  %v13199_v27 = vor.u32 %v14585_v56, %v13198_v26  ;;  %v13167_v4 = vor.u32 %v14577_v5, %v13166_v22  ;;  %8779 = vmatpush.bf16.msrb.mxu3 %v13203_v1  ;;  %v12819_v26 = vor.u32 %v14485_v35, %v12816_v31  ;;  %v14549_v56 = vld [vmem:[%s19845_s18 + $0x28c] sm:$0xf]  ;;  %v12782_v15 = vld [vmem:[%s19845_s18 + $0x48] sm:$0xf] }
 0xbc4   :  { %8686 = vmatpush.bf16.msra.mxu0 %v12775_v33  ;;  %8765 = vmatpush.bf16.msrb.mxu2 %v12947_v36  ;;  %v13168_v33 = vld [vmem:[%s19845_s18 + $0x368] sm:$0xf0]  ;;  %v14481_v20 = vld [vmem:[%s19845_s18 + $0x64] sm:$0xf0] }
 0xbc5   :  { %8700 = vmatpush.bf16.msra.mxu1 %v13031_v8  ;;  %v13171_v60 = vor.u32 %v14573_v38, %v13168_v33  ;;  %v13134_v8 = vld [vmem:[%s19845_s18 + $0x308] sm:$0xf]  ;;  %v12783_v36 = vor.u32 %v14481_v20, %v12782_v15  ;;  %v14541_v5 = vld [vmem:[%s19845_s18 + $0x24c] sm:$0xf] }
 0xbc6   :  { %v13135_v44 = vor.u32 %v14569_v7, %v13134_v8  ;;  %v13038_v1 = vld [vmem:[%s19845_s18 + $0x248] sm:$0xf]  ;;  %v14469_v8 = vld [vmem:[%s19845_s18 + $0xc] sm:$0xf] }
 0xbc7   :  { %8780 = vmatpush.bf16.msrb.mxu3 %v13171_v60  ;;  %v13039_v22 = vor.u32 %v14545_v42, %v13038_v1  ;;  %v14473_v38 = vld [vmem:[%s19845_s18 + $0x24] sm:$0xf0]  ;;  %v14530_v1 = vld [vmem:[%s19845_s18 + $0x1ec] sm:$0xf0]  ;;  %v14526_v42 = vld [vmem:[%s19845_s18 + $0x1d4] sm:$0xf] }
 0xbc8   :  { %8687 = vmatpush.bf16.msra.mxu0 %v12743_v29  ;;  %8766 = vmatpush.bf16.msrb.mxu2 %v12915_v59  ;;  %v13136_v29 = vld [vmem:[%s19845_s18 + $0x328] sm:$0xf0]  ;;  %v12750_v59 = vld [vmem:[%s19845_s18 + $0x8] sm:$0xf] }
 0xbc9   :  { %8701 = vmatpush.bf16.msra.mxu1 %v12999_v0  ;;  %v13139_v49 = vor.u32 %v14565_v19, %v13136_v29  ;;  %v13102_v0 = vld [vmem:[%s19845_s18 + $0x2c8] sm:$0xf]  ;;  %v12751_v39 = vor.u32 %v14473_v38, %v12750_v59  ;;  %v12950_v59 = vld [vmem:[%s19845_s18 + $0x190] sm:$0xf] }
 0xbca   :  { %v13103_v11 = vor.u32 %v14561_v54, %v13102_v0  ;;  %v13006_v33 = vld [vmem:[%s19845_s18 + $0x208] sm:$0xf]  ;;  %v14522_v38 = vld [vmem:[%s19845_s18 + $0x1ac] sm:$0xf0] }
 0xbcb   :  { %8781 = vmatpush.bf16.msrb.mxu3 %v13139_v49  ;;  %v13007_v41 = vor.u32 %v14537_v40, %v13006_v33  ;;  %v14586_v40 = vld [vmem:[%s19845_s18 + $0x3ac] sm:$0xf0] }
 0xbcc   :  { %8736 = vmatpush.bf16.msrb.mxu0 %v12975_v24  ;;  %8767 = vmatpush.bf16.msrb.mxu2 %v12883_v18  ;;  %v13107_v24 = vor.u32 %v14557_v14, %v13104_v21  ;;  %v13008_v18 = vld [vmem:[%s19845_s18 + $0x228] sm:$0xf0] }
 0xbcd   :  { %8750 = vmatpush.bf16.msrb.mxu1 %v13231_v25  ;;  %v12814_v25 = vld [vmem:[%s19845_s18 + $0x88] sm:$0xf] }
 0xbce   :  { %v12815_v62 = vor.u32 %v14489_v30, %v12814_v25 }
 0xbcf   :  { %8782 = vmatpush.bf16.msrb.mxu3 %v13107_v24 }
 0xbd0   :  { %8737 = vmatpush.bf16.msrb.mxu0 %v12943_v45  ;;  %8768 = vmatpush.bf16.msrb.mxu2 %v12851_v6  ;;  %v13071_v45 = vor.u32 %v14553_v2, %v13070_v43 }
 0xbd1   :  { %8751 = vmatpush.bf16.msrb.mxu1 %v13199_v27  ;;  %v13075_v27 = vor.u32 %v14549_v56, %v13072_v13 }
 0xbd3   :  { %8783 = vmatpush.bf16.msrb.mxu3 %v13075_v27 }
 0xbd4   :  { %8738 = vmatpush.bf16.msrb.mxu0 %v12911_v12  ;;  %8769 = vmatpush.bf16.msrb.mxu2 %v12819_v26  ;;  %v12784_v12 = vld [vmem:[%s19845_s18 + $0x68] sm:$0xf0] }
 0xbd5   :  { %8752 = vmatpush.bf16.msrb.mxu1 %v13167_v4  ;;  %v12787_v17 = vor.u32 %v14477_v37, %v12784_v12  ;;  %v13043_v4 = vor.u32 %v14541_v5, %v13040_v3  ;;  %v12984_v3 = vld [vmem:[%s19845_s18 + $0x1f0] sm:$0xf0] }
 0xbd6   :  { %v12987_v33 = vor.u32 %v14526_v42, %v12984_v3  ;;  %v13078_v3 = vld [vmem:[%s19845_s18 + $0x290] sm:$0xf] }
 0xbd7   :  { %8784 = vmatpush.bf16.msrb.mxu3 %v13043_v4 }
 0xbd8   :  { %8739 = vmatpush.bf16.msrb.mxu0 %v12879_v47  ;;  %v12752_v47 = vld [vmem:[%s19845_s18 + $0x28] sm:$0xf0]  ;;  %8770 = vmatpush.bf16.msrb.mxu2 %v12787_v17  ;;  %v14590_v17 = vld [vmem:[%s19845_s18 + $0x3d4] sm:$0xf] }
 0xbd9   :  { %8753 = vmatpush.bf16.msrb.mxu1 %v13135_v44  ;;  %v12755_v10 = vor.u32 %v14469_v8, %v12752_v47  ;;  %v14533_v44 = vld [vmem:[%s19845_s18 + $0x20c] sm:$0xf]  ;;  %v14518_v8 = vld [vmem:[%s19845_s18 + $0x194] sm:$0xf] }
 0xbda   :  { %v13011_v19 = vor.u32 %v14533_v44, %v13008_v18  ;;  %v12952_v47 = vld [vmem:[%s19845_s18 + $0x1b0] sm:$0xf0]  ;;  %v12918_v18 = vld [vmem:[%s19845_s18 + $0x150] sm:$0xf] }
 0xbdc   :  { %8740 = vmatpush.bf16.msrb.mxu0 %v12847_v53  ;;  %8771 = vmatpush.bf16.msrb.mxu2 %v12755_v10  ;;  %v12951_v10 = vor.u32 %v14522_v38, %v12950_v59  ;;  %v13080_v59 = vld [vmem:[%s19845_s18 + $0x2b0] sm:$0xf0] }
 0xbdd   :  { %8754 = vmatpush.bf16.msrb.mxu1 %v13103_v11  ;;  %8785 = vmatpush.bf16.msrb.mxu3 %v13011_v19  ;;  %v5410_v11 = vld [vmem:[%s19843_s16] sm:$0x3]  ;;  %v14514_v19 = vld [vmem:[%s19845_s18 + $0x16c] sm:$0xf0]  ;;  %s9878_s16 = sshll.u32 %s19849_s22, 4  ;;  %s9879_s16 = int_to_ptr.hbm [resolvable:$true] %s9878_s16 }
 0xbde   :  { %v8017_v24 = vperm.slane %v5410_v11, 0  ;;  %v8018_v25 = vperm.slane %v5410_v11, 1 }
 0xbe0   :  { %8741 = vmatpush.bf16.msrb.mxu0 %v12815_v62 }
 0xbe1   :  { %8755 = vmatpush.bf16.msrb.mxu1 %v13071_v45 }
 0xbe4   :  { %8742 = vmatpush.bf16.msrb.mxu0 %v12783_v36  ;;  %v12982_v36 = vld [vmem:[%s19845_s18 + $0x1d0] sm:$0xf] }
 0xbe5   :  { %8756 = vmatpush.bf16.msrb.mxu1 %v13039_v22 }
 0xbe8   :  { %8743 = vmatpush.bf16.msrb.mxu0 %v12751_v39  ;;  %v13206_v39 = vld [vmem:[%s19845_s18 + $0x390] sm:$0xf] }
 0xbe9   :  { %8757 = vmatpush.bf16.msrb.mxu1 %v13007_v41  ;;  %v13208_v41 = vld [vmem:[%s19845_s18 + $0x3b0] sm:$0xf0]  ;;  %v13207_v44 = vor.u32 %v14586_v40, %v13206_v39  ;;  %v14482_v39 = vld [vmem:[%s19845_s18 + $0x6c] sm:$0xf0] }
 0xc2e   :  { %v7984_v61 = vpop.xlane.xlu0 %7983 }
 0xc2f   :  { %v7988_v32 = vmul.f32 %v7984_v61, %v15889_v48  ;;  %v5411_v61 = vld [vmem:[%s19844_s17] sm:$0x3]  ;;  %s14904_s17 = smov 256  }
 0xc30   :  { %v8026_v35 = vperm.slane %v5411_v61, 0  ;;  %v8027_v31 = vperm.slane %v5411_v61, 1  ;;  %v12888_v61 = vld [vmem:[%s19845_s18 + $0x130] sm:$0xf0] }
 0xc31   :  { %v7990_v34 = vadd.f32 1e-05, %v7988_v32 }
 0xc33   :  { %14806 = vrsqrt.f32 %v7990_v34  ;;  %vm7998_vm1 = vweird.f32 %v7990_v34 }
 0xc36   :  { %v7987_v60 = vpop.xlane.xlu1 %7986 }
 0xc37   :  { %v7989_v7 = vmul.f32 %v7987_v60, %v15889_v48 }
 0xc39   :  { %v14807_v29 = vpop.eup %14806  ;;  %v7991_v49 = vadd.f32 1e-05, %v7989_v7  ;;  %v14582_v7 = vld [vmem:[%s19845_s18 + $0x394] sm:$0xf] }
 0xc3a   :  { %v7993_v46 = vmul.f32 %v14807_v29, %v7990_v34  ;;  %vm7999_vm0 = vweird.f32 %v14807_v29 }
 0xc3b   :  { %14808 = vrsqrt.f32 %v7991_v49  ;;  %vm8000_vm9 = vmor %vm7998_vm1, %vm7999_vm0  ;;  %vm8008_vm11 = vweird.f32 %v7991_v49 }
 0xc3c   :  { %v7994_v57 = vmul.f32 %v14807_v29, %v7993_v46  ;;  %v13174_v46 = vld [vmem:[%s19845_s18 + $0x350] sm:$0xf] }
 0xc3e   :  { %v7995_v0 = vmul.f32 0.5, %v7994_v57  ;;  %v14578_v57 = vld [vmem:[%s19845_s18 + $0x36c] sm:$0xf0] }
 0xc3f   :  { %v13175_v11 = vor.u32 %v14578_v57, %v13174_v46  ;;  %v14474_v46 = vld [vmem:[%s19845_s18 + $0x2c] sm:$0xf0] }
 0xc40   :  { %v7996_v53 = vsub.f32 1.5, %v7995_v0  ;;  %v14510_v0 = vld [vmem:[%s19845_s18 + $0x154] sm:$0xf]  ;;  %v13014_v57 = vld [vmem:[%s19845_s18 + $0x210] sm:$0xf] }
 0xc41   :  { %v14809_v54 = vpop.eup %14808 }
 0xc42   :  { %v7997_v58 = vmul.f32 %v14807_v29, %v7996_v53  ;;  %v8003_v28 = vmul.f32 %v14809_v54, %v7991_v49  ;;  %vm8009_vm10 = vweird.f32 %v14809_v54  ;;  %v13211_v49 = vor.u32 %v14582_v7, %v13208_v41  ;;  %v12920_v53 = vld [vmem:[%s19845_s18 + $0x170] sm:$0xf0]  ;;  %v14546_v7 = vld [vmem:[%s19845_s18 + $0x26c] sm:$0xf0] }
 0xc43   :  { %vm8010_vm12 = vmor %vm8008_vm11, %vm8009_vm10  ;;  %v14478_v41 = vld [vmem:[%s19845_s18 + $0x54] sm:$0xf] }
 0xc44   :  { %v8001_v6 = vsel %vm8000_vm9, %v14807_v29, %v7997_v58  ;;  %v8004_v14 = vmul.f32 %v14809_v54, %v8003_v28  ;;  %v12955_v29 = vor.u32 %v14518_v8, %v12952_v47  ;;  %v13176_v58 = vld [vmem:[%s19845_s18 + $0x370] sm:$0xf0]  ;;  %v12919_v28 = vor.u32 %v14514_v19, %v12918_v18  ;;  %v13046_v47 = vld [vmem:[%s19845_s18 + $0x250] sm:$0xf] }
 0xc45   :  { %v8012_v30 = vmul.f32 %v8001_v6, %v18298_v50  ;;  %v8013_v43 = vmul.f32 %v8001_v6, %v18301_v9  ;;  %v12886_v6 = vld [vmem:[%s19845_s18 + $0x110] sm:$0xf]  ;;  %v13048_v18 = vld [vmem:[%s19845_s18 + $0x270] sm:$0xf0] }
 0xc46   :  { %v8005_v21 = vmul.f32 0.5, %v8004_v14  ;;  %v14506_v14 = vld [vmem:[%s19845_s18 + $0x12c] sm:$0xf0] }
 0xc47   :  { %v8021_v32 = vmul.f32 %v8017_v24, %v8012_v30  ;;  %v8022_v45 = vmul.f32 %v8018_v25, %v8013_v43  ;;  %v14570_v30 = vld [vmem:[%s19845_s18 + $0x32c] sm:$0xf0]  ;;  %v14502_v43 = vld [vmem:[%s19845_s18 + $0x114] sm:$0xf] }
 0xc48   :  { %v8006_v62 = vsub.f32 1.5, %v8005_v21  ;;  %v12923_v21 = vor.u32 %v14510_v0, %v12920_v53  ;;  %v12758_v19 = vld [vmem:[%s19845_s18 + $0x10] sm:$0xf] }
 0xc49   :  { %v8030_v13 = vadd.f32 %v8026_v35, %v8021_v32  ;;  %v8031_v9 = vadd.f32 %v8027_v31, %v8022_v45  ;;  %v12854_v32 = vld [vmem:[%s19845_s18 + $0xd0] sm:$0xf] }
 0xc4a   :  { %v8007_v2 = vmul.f32 %v14809_v54, %v8006_v62  ;;  %v14566_v62 = vld [vmem:[%s19845_s18 + $0x314] sm:$0xf]  ;;  %v14498_v45 = vld [vmem:[%s19845_s18 + $0xec] sm:$0xf0] }
 0xc4b   :  { %v18610_v37 = vadd.f32 %v8030_v13, %v17651_v51  ;;  %v18613_v22 = vadd.f32 %v8031_v9, %v17654_v63  ;;  %v13240_v51 = vld [vmem:[%s19845_s18 + $0x3f0] sm:$0xf0]  ;;  %v14562_v13 = vld [vmem:[%s19845_s18 + $0x2ec] sm:$0xf0] }
 0xc4c   :  { %v8011_v26 = vsel %vm8010_vm12, %v14809_v54, %v8007_v2  ;;  %v13243_v60 = vor.u32 %v14590_v17, %v13240_v51  ;;  %v14574_v54 = vld [vmem:[%s19845_s18 + $0x354] sm:$0xf]  ;;  %v14554_v17 = vld [vmem:[%s19845_s18 + $0x2ac] sm:$0xf0] }
 0xc4d   :  { %v8014_v56 = vmul.f32 %v8011_v26, %v18309_v52  ;;  %v8015_v50 = vmul.f32 %v8011_v26, %v18312_v55  ;;  %v13238_v52 = vld [vmem:[%s19845_s18 + $0x3d0] sm:$0xf]  ;;  %v13144_v2 = vld [vmem:[%s19845_s18 + $0x330] sm:$0xf0]  ;;  %v12891_v26 = vor.u32 %v14502_v43, %v12888_v61  ;;  %v12759_v43 = vor.u32 %v14474_v46, %v12758_v19  ;;  %v12896_v19 = vld [vmem:[%s19845_s18 + $0x138] sm:$0xf0] }
 0xc4e   :  { %v14594_v55 = vld [vmem:[%s19845_s18 + $0x3ec] sm:$0xf0]  ;;  %v14494_v9 = vld [vmem:[%s19845_s18 + $0xd4] sm:$0xf] }
 0xc4f   :  { %v8023_v27 = vmul.f32 %v8017_v24, %v8014_v56  ;;  %v8024_v34 = vmul.f32 %v8018_v25, %v8015_v50  ;;  %v13239_v4 = vor.u32 %v14594_v55, %v13238_v52  ;;  %v13179_v24 = vor.u32 %v14574_v54, %v13176_v58  ;;  %v13142_v25 = vld [vmem:[%s19845_s18 + $0x310] sm:$0xf]  ;;  %v14486_v51 = vld [vmem:[%s19845_s18 + $0x94] sm:$0xf] }
 0xc50   :  { %v13147_v56 = vor.u32 %v14566_v62, %v13144_v2  ;;  %v13110_v50 = vld [vmem:[%s19845_s18 + $0x2d0] sm:$0xf]  ;;  %v14470_v58 = vld [vmem:[%s19845_s18 + $0x14] sm:$0xf]  ;;  %v12992_v62 = vld [vmem:[%s19845_s18 + $0x1f8] sm:$0xf0] }
 0xc51   :  { %v8032_v15 = vadd.f32 %v8026_v35, %v8023_v27  ;;  %v8033_v20 = vadd.f32 %v8027_v31, %v8024_v34  ;;  %v12887_v35 = vor.u32 %v14506_v14, %v12886_v6  ;;  %v13143_v31 = vor.u32 %v14570_v30, %v13142_v25  ;;  %v12856_v27 = vld [vmem:[%s19845_s18 + $0xf0] sm:$0xf0]  ;;  %v14490_v52 = vld [vmem:[%s19845_s18 + $0xac] sm:$0xf0]  ;;  %v12990_v14 = vld [vmem:[%s19845_s18 + $0x1d8] sm:$0xf] }
 0xc52   :  { %v14558_v34 = vld [vmem:[%s19845_s18 + $0x2d4] sm:$0xf]  ;;  %v12859_v55 = vor.u32 %v14494_v9, %v12856_v27  ;;  %v14538_v0 = vld [vmem:[%s19845_s18 + $0x22c] sm:$0xf0]  ;;  %v14595_v25 = vld [vmem:[%s19845_s18 + $0x3f4] sm:$0xf0] }
 0xc53   :  { %v18616_v12 = vadd.f32 %v8032_v15, %v17659_v23  ;;  %v18619_v5 = vadd.f32 %v8033_v20, %v17662_v16  ;;  %v12983_v16 = vor.u32 %v14530_v1, %v12982_v36  ;;  %v13112_v15 = vld [vmem:[%s19845_s18 + $0x2f0] sm:$0xf0]  ;;  %v12855_v20 = vor.u32 %v14498_v45, %v12854_v32  ;;  %v12822_v1 = vld [vmem:[%s19845_s18 + $0x90] sm:$0xf]  ;;  %v14527_v30 = vld [vmem:[%s19845_s18 + $0x1dc] sm:$0xf] }
 0xc54   :  { %v13111_v36 = vor.u32 %v14562_v13, %v13110_v50  ;;  %v13115_v42 = vor.u32 %v14558_v34, %v13112_v15  ;;  %v12823_v38 = vor.u32 %v14490_v52, %v12822_v1  ;;  %v13016_v6 = vld [vmem:[%s19845_s18 + $0x230] sm:$0xf0]  ;;  %v13015_v61 = vor.u32 %v14538_v0, %v13014_v57  ;;  %v14591_v2 = vld [vmem:[%s19845_s18 + $0x3dc] sm:$0xf]  ;;  %v14523_v50 = vld [vmem:[%s19845_s18 + $0x1b4] sm:$0xf0] }
 0xc55   :  { %v18632_v63 = vpack.c.bf16 %v18616_v12, %v18610_v37  ;;  %v18636_v23 = vpack.c.bf16 %v18619_v5, %v18613_v22  ;;  %v12995_v13 = vor.u32 %v14527_v30, %v12992_v62  ;;  %v13214_v27 = vld [vmem:[%s19845_s18 + $0x398] sm:$0xf]  ;;  %v14519_v15 = vld [vmem:[%s19845_s18 + $0x19c] sm:$0xf] }
 0xc56   :  { %v14587_v34 = vld [vmem:[%s19845_s18 + $0x3b4] sm:$0xf0]  ;;  %v13216_v1 = vld [vmem:[%s19845_s18 + $0x3b8] sm:$0xf0] }
 0xc57   :  { %8688 = vmatmul.bf16.vlgmr.msra.gmra.mxu0 %v18632_v63  ;;  %8702 = vmatmul.bf16.vlgmr.msra.gmra.mxu1 %v18636_v23  ;;  %v12862_v0 = vld [vmem:[%s19845_s18 + $0xd8] sm:$0xf] }
 0xc58   :  { %8716 = vmatmul.bf16.vlgmr.msra.gmra.mxu2 %v18632_v63  ;;  %8730 = vmatmul.bf16.vlgmr.msra.gmra.mxu3 %v18636_v23 }
 0xc59   :  { %8792 = vmatpush.bf16.msra.mxu0 %v12983_v16  ;;  %8806 = vmatpush.bf16.msra.mxu1 %v13239_v4  ;;  %v12824_v16 = vld [vmem:[%s19845_s18 + $0xb0] sm:$0xf0] }
 0xc5a   :  { %8820 = vmatpush.bf16.msra.mxu2 %v12987_v33  ;;  %8834 = vmatpush.bf16.msra.mxu3 %v13243_v60  ;;  %v14550_v4 = vld [vmem:[%s19845_s18 + $0x294] sm:$0xf]  ;;  %v13079_v33 = vor.u32 %v14554_v17, %v13078_v3  ;;  %v12790_v60 = vld [vmem:[%s19845_s18 + $0x50] sm:$0xf]  ;;  %v12827_v40 = vor.u32 %v14486_v51, %v12824_v16  ;;  %v14515_v3 = vld [vmem:[%s19845_s18 + $0x174] sm:$0xf0] }
 0xc5b   :  { %v13083_v8 = vor.u32 %v14550_v4, %v13080_v59  ;;  %v13182_v16 = vld [vmem:[%s19845_s18 + $0x358] sm:$0xf]  ;;  %v14511_v59 = vld [vmem:[%s19845_s18 + $0x15c] sm:$0xf] }
 0xc5c   :  { %v14579_v4 = vld [vmem:[%s19845_s18 + $0x374] sm:$0xf0] }
 0xc5d   :  { %8793 = vmatpush.bf16.msra.mxu0 %v12951_v10  ;;  %8807 = vmatpush.bf16.msra.mxu1 %v13207_v44  ;;  %v12792_v10 = vld [vmem:[%s19845_s18 + $0x70] sm:$0xf0] }
 0xc5e   :  { %8821 = vmatpush.bf16.msra.mxu2 %v12955_v29  ;;  %8835 = vmatpush.bf16.msra.mxu3 %v13211_v49  ;;  %v14542_v44 = vld [vmem:[%s19845_s18 + $0x254] sm:$0xf]  ;;  %v12791_v29 = vor.u32 %v14482_v39, %v12790_v60  ;;  %v13047_v49 = vor.u32 %v14546_v7, %v13046_v47  ;;  %v12795_v53 = vor.u32 %v14478_v41, %v12792_v10  ;;  %v13184_v60 = vld [vmem:[%s19845_s18 + $0x378] sm:$0xf0]  ;;  %v14507_v47 = vld [vmem:[%s19845_s18 + $0x134] sm:$0xf0] }
 0xc5f   :  { %v13051_v54 = vor.u32 %v14542_v44, %v13048_v18  ;;  %v13150_v10 = vld [vmem:[%s19845_s18 + $0x318] sm:$0xf]  ;;  %v14503_v18 = vld [vmem:[%s19845_s18 + $0x11c] sm:$0xf] }
 0xc60   :  { %v14571_v44 = vld [vmem:[%s19845_s18 + $0x334] sm:$0xf0] }
 0xc61   :  { %8794 = vmatpush.bf16.msra.mxu0 %v12919_v28  ;;  %8808 = vmatpush.bf16.msra.mxu1 %v13175_v11  ;;  %v12760_v28 = vld [vmem:[%s19845_s18 + $0x30] sm:$0xf0]  ;;  %v13151_v57 = vor.u32 %v14571_v44, %v13150_v10  ;;  %v14627_v10 = vld [vmem:[%s19846_s19 + $0xf4] sm:$0xf0] }
 0xc62   :  { %8822 = vmatpush.bf16.msra.mxu2 %v12923_v21  ;;  %8836 = vmatpush.bf16.msra.mxu3 %v13179_v24  ;;  %v14534_v11 = vld [vmem:[%s19845_s18 + $0x214] sm:$0xf]  ;;  %v14531_v21 = vld [vmem:[%s19845_s18 + $0x1f4] sm:$0xf0] }
 0xc63   :  { %v13246_v24 = vld [vmem:[%s19845_s18 + $0x3d8] sm:$0xf]  ;;  %v13019_v32 = vor.u32 %v14534_v11, %v13016_v6  ;;  %v12991_v45 = vor.u32 %v14531_v21, %v12990_v14  ;;  %v14495_v6 = vld [vmem:[%s19845_s18 + $0xdc] sm:$0xf] }
 0xc64   :  { %v14563_v11 = vld [vmem:[%s19845_s18 + $0x2f4] sm:$0xf0]  ;;  %v12864_v14 = vld [vmem:[%s19845_s18 + $0xf8] sm:$0xf0] }
 0xc65   :  { %8795 = vmatpush.bf16.msra.mxu0 %v12887_v35  ;;  %8809 = vmatpush.bf16.msra.mxu1 %v13143_v31  ;;  %v13248_v35 = vld [vmem:[%s19845_s18 + $0x3f8] sm:$0xf0]  ;;  %v12763_v31 = vor.u32 %v14470_v58, %v12760_v28  ;;  %v13118_v28 = vld [vmem:[%s19845_s18 + $0x2d8] sm:$0xf]  ;;  %v12867_v62 = vor.u32 %v14495_v6, %v12864_v14 }
 0xc66   :  { %8823 = vmatpush.bf16.msra.mxu2 %v12891_v26  ;;  %8837 = vmatpush.bf16.msra.mxu3 %v13147_v56  ;;  %v13247_v26 = vor.u32 %v14595_v25, %v13246_v24  ;;  %v12958_v56 = vld [vmem:[%s19845_s18 + $0x198] sm:$0xf]  ;;  %v13251_v9 = vor.u32 %v14591_v2, %v13248_v35  ;;  %v14559_v21 = vld [vmem:[%s19845_s18 + $0x2dc] sm:$0xf]  ;;  %v13119_v30 = vor.u32 %v14563_v11, %v13118_v28  ;;  %v14625_v28 = vld [vmem:[%s19846_s19 + $0xe4] sm:$0xf0] }
 0xc67   :  { %8744 = vmatmul.bf16.vlgmr.msrb.gmra.mxu0 %v18632_v63  ;;  %8758 = vmatmul.bf16.vlgmr.msrb.gmra.mxu1 %v18636_v23  ;;  %v12959_v52 = vor.u32 %v14523_v50, %v12958_v56  ;;  %v13120_v24 = vld [vmem:[%s19845_s18 + $0x2f8] sm:$0xf0]  ;;  %v13086_v35 = vld [vmem:[%s19845_s18 + $0x298] sm:$0xf]  ;;  %v13294_v11 = vld [vmem:[%s19846_s19 + $0x50] sm:$0xf] }
 0xc68   :  { %8772 = vmatmul.bf16.vlgmr.msrb.gmra.mxu2 %v18632_v63  ;;  %8786 = vmatmul.bf16.vlgmr.msrb.gmra.mxu3 %v18636_v23  ;;  %v13123_v2 = vor.u32 %v14559_v21, %v13120_v24  ;;  %v13088_v56 = vld [vmem:[%s19845_s18 + $0x2b8] sm:$0xf0]  ;;  %v14607_v21 = vld [vmem:[%s19846_s19 + $0x54] sm:$0xf0] }
 0xc69   :  { %8796 = vmatpush.bf16.msra.mxu0 %v12855_v20  ;;  %8810 = vmatpush.bf16.msra.mxu1 %v13111_v36  ;;  %v12960_v20 = vld [vmem:[%s19845_s18 + $0x1b8] sm:$0xf0] }
 0xc6a   :  { %8824 = vmatpush.bf16.msra.mxu2 %v12859_v55  ;;  %8838 = vmatpush.bf16.msra.mxu3 %v13115_v42  ;;  %v14583_v36 = vld [vmem:[%s19845_s18 + $0x39c] sm:$0xf]  ;;  %v13215_v55 = vor.u32 %v14587_v34, %v13214_v27  ;;  %v12926_v42 = vld [vmem:[%s19845_s18 + $0x158] sm:$0xf]  ;;  %v12963_v17 = vor.u32 %v14519_v15, %v12960_v20 }
 0xc6b   :  { %v13219_v51 = vor.u32 %v14583_v36, %v13216_v1  ;;  %v12927_v39 = vor.u32 %v14515_v3, %v12926_v42  ;;  %v14483_v27 = vld [vmem:[%s19845_s18 + $0x74] sm:$0xf0]  ;;  %v14479_v1 = vld [vmem:[%s19845_s18 + $0x5c] sm:$0xf] }
 0xc6c   :  { %v13054_v20 = vld [vmem:[%s19845_s18 + $0x258] sm:$0xf]  ;;  %v13056_v42 = vld [vmem:[%s19845_s18 + $0x278] sm:$0xf0] }
 0xc6d   :  { %8797 = vmatpush.bf16.msra.mxu0 %v12823_v38  ;;  %8811 = vmatpush.bf16.msra.mxu1 %v13079_v33  ;;  %v12928_v38 = vld [vmem:[%s19845_s18 + $0x178] sm:$0xf0]  ;;  %v14547_v36 = vld [vmem:[%s19845_s18 + $0x274] sm:$0xf0] }
 0xc6e   :  { %8825 = vmatpush.bf16.msra.mxu2 %v12827_v40  ;;  %8839 = vmatpush.bf16.msra.mxu3 %v13083_v8  ;;  %v14575_v33 = vld [vmem:[%s19845_s18 + $0x35c] sm:$0xf]  ;;  %v13183_v40 = vor.u32 %v14579_v4, %v13182_v16  ;;  %v12894_v8 = vld [vmem:[%s19845_s18 + $0x118] sm:$0xf]  ;;  %v12931_v7 = vor.u32 %v14511_v59, %v12928_v38 }
 0xc6f   :  { %v13187_v41 = vor.u32 %v14575_v33, %v13184_v60  ;;  %v12895_v46 = vor.u32 %v14507_v47, %v12894_v8  ;;  %v14475_v16 = vld [vmem:[%s19845_s18 + $0x34] sm:$0xf0]  ;;  %v14471_v60 = vld [vmem:[%s19845_s18 + $0x1c] sm:$0xf]  ;;  %v13310_v47 = vld [vmem:[%s19846_s19 + $0x70] sm:$0xf] }
 0xc70   :  { %v13022_v4 = vld [vmem:[%s19845_s18 + $0x218] sm:$0xf]  ;;  %v13024_v8 = vld [vmem:[%s19845_s18 + $0x238] sm:$0xf0] }
 0xc71   :  { %8798 = vmatpush.bf16.msra.mxu0 %v12791_v29  ;;  %8812 = vmatpush.bf16.msra.mxu1 %v13047_v49  ;;  %v14567_v29 = vld [vmem:[%s19845_s18 + $0x31c] sm:$0xf]  ;;  %v14539_v33 = vld [vmem:[%s19845_s18 + $0x234] sm:$0xf0] }
 0xc72   :  { %8826 = vmatpush.bf16.msra.mxu2 %v12795_v53  ;;  %8840 = vmatpush.bf16.msra.mxu3 %v13051_v54  ;;  %v13152_v49 = vld [vmem:[%s19845_s18 + $0x338] sm:$0xf0]  ;;  %v14499_v53 = vld [vmem:[%s19845_s18 + $0xf4] sm:$0xf0]  ;;  %v12899_v54 = vor.u32 %v14503_v18, %v12896_v19  ;;  %v13023_v18 = vor.u32 %v14539_v33, %v13022_v4  ;;  %v13334_v4 = vld [vmem:[%s19846_s19 + $0xa0] sm:$0xf] }
 0xc73   :  { %v13155_v58 = vor.u32 %v14567_v29, %v13152_v49  ;;  %v12863_v25 = vor.u32 %v14499_v53, %v12862_v0  ;;  %v13438_v0 = vld [vmem:[%s19846_s19 + $0x170] sm:$0xf]  ;;  %v14643_v53 = vld [vmem:[%s19846_s19 + $0x174] sm:$0xf0] }
 0xc74   :  { %v13439_v6 = vor.u32 %v14643_v53, %v13438_v0  ;;  %v13262_v33 = vld [vmem:[%s19846_s19 + $0x10] sm:$0xf] }
 0xc75   :  { %8799 = vmatpush.bf16.msra.mxu0 %v12759_v43  ;;  %8813 = vmatpush.bf16.msra.mxu1 %v13015_v61  ;;  %v12830_v43 = vld [vmem:[%s19845_s18 + $0x98] sm:$0xf] }
 0xc76   :  { %8827 = vmatpush.bf16.msra.mxu2 %v12763_v31  ;;  %8841 = vmatpush.bf16.msra.mxu3 %v13019_v32  ;;  %v14491_v61 = vld [vmem:[%s19845_s18 + $0xb4] sm:$0xf0]  ;;  %v14487_v32 = vld [vmem:[%s19845_s18 + $0x9c] sm:$0xf] }
 0xc77   :  { %v14555_v31 = vld [vmem:[%s19845_s18 + $0x2b4] sm:$0xf0]  ;;  %v12831_v50 = vor.u32 %v14491_v61, %v12830_v43  ;;  %v13358_v43 = vld [vmem:[%s19846_s19 + $0xd0] sm:$0xf] }
 0xc78   :  { %8800 = vmatmul.bf16.vlgmr.msra.gmra.mxu0 %v18632_v63  ;;  %8814 = vmatmul.bf16.vlgmr.msra.gmra.mxu1 %v18636_v23  ;;  %v14623_v61 = vld [vmem:[%s19846_s19 + $0xd4] sm:$0xf0] }
 0xc79   :  { %8848 = vmatpush.bf16.msrb.mxu0 %v12991_v45  ;;  %8862 = vmatpush.bf16.msrb.mxu1 %v13247_v26  ;;  %v12832_v45 = vld [vmem:[%s19845_s18 + $0xb8] sm:$0xf0] }
 0xc7a   :  { %8876 = vmatpush.bf16.msrb.mxu2 %v12995_v13  ;;  %8890 = vmatpush.bf16.msrb.mxu3 %v13251_v9  ;;  %v14551_v26 = vld [vmem:[%s19845_s18 + $0x29c] sm:$0xf]  ;;  %v13087_v13 = vor.u32 %v14555_v31, %v13086_v35  ;;  %v12798_v9 = vld [vmem:[%s19845_s18 + $0x58] sm:$0xf]  ;;  %v12835_v34 = vor.u32 %v14487_v32, %v12832_v45  ;;  %v13286_v35 = vld [vmem:[%s19846_s19 + $0x40] sm:$0xf] }
 0xc7b   :  { %8828 = vmatmul.bf16.vlgmr.msra.gmra.mxu2 %v18632_v63  ;;  %8842 = vmatmul.bf16.vlgmr.msra.gmra.mxu3 %v18636_v23  ;;  %v13091_v15 = vor.u32 %v14551_v26, %v13088_v56  ;;  %v12799_v3 = vor.u32 %v14483_v27, %v12798_v9  ;;  %v14605_v31 = vld [vmem:[%s19846_s19 + $0x44] sm:$0xf0]  ;;  %v13295_v26 = vor.u32 %v14607_v21, %v13294_v11  ;;  %v13422_v56 = vld [vmem:[%s19846_s19 + $0x150] sm:$0xf]  ;;  %v13494_v9 = vld [vmem:[%s19846_s19 + $0x1e0] sm:$0xf] }
 0xc7c   :  { %v14657_v27 = vld [vmem:[%s19846_s19 + $0x1e4] sm:$0xf0]  ;;  %v13622_v21 = vld [vmem:[%s19846_s19 + $0x2e0] sm:$0xf] }
 0xc7d   :  { %8849 = vmatpush.bf16.msrb.mxu0 %v12959_v52  ;;  %8863 = vmatpush.bf16.msrb.mxu1 %v13215_v55  ;;  %v12800_v52 = vld [vmem:[%s19845_s18 + $0x78] sm:$0xf0] }
 0xc7e   :  { %8877 = vmatpush.bf16.msrb.mxu2 %v12963_v17  ;;  %8891 = vmatpush.bf16.msrb.mxu3 %v13219_v51  ;;  %v14543_v55 = vld [vmem:[%s19845_s18 + $0x25c] sm:$0xf]  ;;  %v13055_v17 = vor.u32 %v14547_v36, %v13054_v20  ;;  %v12766_v51 = vld [vmem:[%s19845_s18 + $0x18] sm:$0xf]  ;;  %v12803_v59 = vor.u32 %v14479_v1, %v12800_v52  ;;  %v13287_v20 = vor.u32 %v14605_v31, %v13286_v35  ;;  %v13278_v36 = vld [vmem:[%s19846_s19 + $0x30] sm:$0xf] }
 0xc7f   :  { %v13059_v38 = vor.u32 %v14543_v55, %v13056_v42  ;;  %v12767_v44 = vor.u32 %v14475_v16, %v12766_v51  ;;  %v14603_v52 = vld [vmem:[%s19846_s19 + $0x34] sm:$0xf0]  ;;  %v13342_v55 = vld [vmem:[%s19846_s19 + $0xb0] sm:$0xf]  ;;  %v14601_v16 = vld [vmem:[%s19846_s19 + $0x24] sm:$0xf0] }
 0xc80   :  { %v14619_v42 = vld [vmem:[%s19846_s19 + $0xb4] sm:$0xf0]  ;;  %v14669_v35 = vld [vmem:[%s19846_s19 + $0x244] sm:$0xf0]  ;;  %v13486_v31 = vld [vmem:[%s19846_s19 + $0x1d0] sm:$0xf] }
 0xc81   :  { %8850 = vmatpush.bf16.msrb.mxu0 %v12927_v39  ;;  %8864 = vmatpush.bf16.msrb.mxu1 %v13183_v40  ;;  %v12768_v39 = vld [vmem:[%s19845_s18 + $0x38] sm:$0xf0]  ;;  %v13343_v51 = vor.u32 %v14619_v42, %v13342_v55 }
 0xc82   :  { %8878 = vmatpush.bf16.msrb.mxu2 %v12931_v7  ;;  %8892 = vmatpush.bf16.msrb.mxu3 %v13187_v41  ;;  %v14535_v40 = vld [vmem:[%s19845_s18 + $0x21c] sm:$0xf]  ;;  %v14611_v7 = vld [vmem:[%s19846_s19 + $0x74] sm:$0xf0]  ;;  %v13374_v41 = vld [vmem:[%s19846_s19 + $0xf0] sm:$0xf]  ;;  %v12771_v19 = vor.u32 %v14471_v60, %v12768_v39 }
 0xc83   :  { %v13027_v29 = vor.u32 %v14535_v40, %v13024_v8  ;;  %v13311_v49 = vor.u32 %v14611_v7, %v13310_v47  ;;  %v14599_v39 = vld [vmem:[%s19846_s19 + $0x14] sm:$0xf0]  ;;  %v13326_v40 = vld [vmem:[%s19846_s19 + $0x90] sm:$0xf]  ;;  %v13254_v7 = vld [vmem:[%s19846_s19] sm:$0xf] }
 0xc84   :  { %v14615_v8 = vld [vmem:[%s19846_s19 + $0x94] sm:$0xf0]  ;;  %v13263_v47 = vor.u32 %v14599_v39, %v13262_v33 }
 0xc85   :  { %8851 = vmatpush.bf16.msrb.mxu0 %v12895_v46  ;;  %8865 = vmatpush.bf16.msrb.mxu1 %v13151_v57  ;;  %v13302_v46 = vld [vmem:[%s19846_s19 + $0x60] sm:$0xf]  ;;  %v13375_v57 = vor.u32 %v14627_v10, %v13374_v41  ;;  %v14597_v41 = vld [vmem:[%s19846_s19 + $0x4] sm:$0xf0]  ;;  %v13327_v10 = vor.u32 %v14615_v8, %v13326_v40  ;;  %v14683_v39 = vld [vmem:[%s19846_s19 + $0x2b4] sm:$0xf0] }
 0xc86   :  { %8879 = vmatpush.bf16.msrb.mxu2 %v12899_v54  ;;  %8893 = vmatpush.bf16.msrb.mxu3 %v13155_v58  ;;  %v14609_v54 = vld [vmem:[%s19846_s19 + $0x64] sm:$0xf0]  ;;  %v13366_v58 = vld [vmem:[%s19846_s19 + $0xe0] sm:$0xf]  ;;  %v13390_v40 = vld [vmem:[%s19846_s19 + $0x110] sm:$0xf] }
 0xc87   :  { %v13303_v14 = vor.u32 %v14609_v54, %v13302_v46  ;;  %v13367_v24 = vor.u32 %v14625_v28, %v13366_v58  ;;  %v14691_v46 = vld [vmem:[%s19846_s19 + $0x2f4] sm:$0xf0]  ;;  %v13558_v58 = vld [vmem:[%s19846_s19 + $0x260] sm:$0xf]  ;;  %v14673_v28 = vld [vmem:[%s19846_s19 + $0x264] sm:$0xf0] }
 0xc88   :  { %v13559_v11 = vor.u32 %v14673_v28, %v13558_v58  ;;  %v13510_v28 = vld [vmem:[%s19846_s19 + $0x200] sm:$0xf] }
 0xc89   :  { %8852 = vmatpush.bf16.msrb.mxu0 %v12863_v25  ;;  %8866 = vmatpush.bf16.msrb.mxu1 %v13119_v30  ;;  %v13430_v25 = vld [vmem:[%s19846_s19 + $0x160] sm:$0xf]  ;;  %v14641_v30 = vld [vmem:[%s19846_s19 + $0x164] sm:$0xf0] }
 0xc8a   :  { %8880 = vmatpush.bf16.msrb.mxu2 %v12867_v62  ;;  %8894 = vmatpush.bf16.msrb.mxu3 %v13123_v2  ;;  %v13502_v62 = vld [vmem:[%s19846_s19 + $0x1f0] sm:$0xf]  ;;  %v14659_v2 = vld [vmem:[%s19846_s19 + $0x1f4] sm:$0xf0]  ;;  %v13431_v32 = vor.u32 %v14641_v30, %v13430_v25 }
 0xc8b   :  { %v13503_v45 = vor.u32 %v14659_v2, %v13502_v62  ;;  %v13542_v2 = vld [vmem:[%s19846_s19 + $0x240] sm:$0xf] }
 0xc8d   :  { %8853 = vmatpush.bf16.msrb.mxu0 %v12831_v50  ;;  %8867 = vmatpush.bf16.msrb.mxu1 %v13087_v13  ;;  %v14639_v50 = vld [vmem:[%s19846_s19 + $0x154] sm:$0xf0]  ;;  %v14621_v13 = vld [vmem:[%s19846_s19 + $0xc4] sm:$0xf0] }
 0xc8e   :  { %8881 = vmatpush.bf16.msrb.mxu2 %v12835_v34  ;;  %8895 = vmatpush.bf16.msrb.mxu3 %v13091_v15  ;;  %v13495_v34 = vor.u32 %v14657_v27, %v13494_v9  ;;  %v13423_v15 = vor.u32 %v14639_v50, %v13422_v56  ;;  %v13406_v56 = vld [vmem:[%s19846_s19 + $0x130] sm:$0xf]  ;;  %v14635_v50 = vld [vmem:[%s19846_s19 + $0x134] sm:$0xf0] }
 0xc8f   :  { %v13407_v9 = vor.u32 %v14635_v50, %v13406_v56  ;;  %v13534_v27 = vld [vmem:[%s19846_s19 + $0x230] sm:$0xf]  ;;  %v14677_v56 = vld [vmem:[%s19846_s19 + $0x284] sm:$0xf0] }
 0xc91   :  { %8854 = vmatpush.bf16.msrb.mxu0 %v12799_v3  ;;  %8868 = vmatpush.bf16.msrb.mxu1 %v13055_v17  ;;  %v13279_v3 = vor.u32 %v14603_v52, %v13278_v36  ;;  %v13270_v17 = vld [vmem:[%s19846_s19 + $0x20] sm:$0xf]  ;;  %v14685_v52 = vld [vmem:[%s19846_s19 + $0x2c4] sm:$0xf0] }
 0xc92   :  { %8882 = vmatpush.bf16.msrb.mxu2 %v12803_v59  ;;  %8896 = vmatpush.bf16.msrb.mxu3 %v13059_v38  ;;  %v14617_v59 = vld [vmem:[%s19846_s19 + $0xa4] sm:$0xf0]  ;;  %v13271_v38 = vor.u32 %v14601_v16, %v13270_v17  ;;  %v13526_v16 = vld [vmem:[%s19846_s19 + $0x220] sm:$0xf] }
 0xc93   :  { %v13335_v60 = vor.u32 %v14617_v59, %v13334_v4  ;;  %v14633_v17 = vld [vmem:[%s19846_s19 + $0x124] sm:$0xf0]  ;;  %v13470_v59 = vld [vmem:[%s19846_s19 + $0x1b0] sm:$0xf] }
 0xc94   :  { %v14665_v4 = vld [vmem:[%s19846_s19 + $0x224] sm:$0xf0] }
 0xc95   :  { %8855 = vmatpush.bf16.msrb.mxu0 %v12767_v44  ;;  %8869 = vmatpush.bf16.msrb.mxu1 %v13023_v18  ;;  %v13566_v44 = vld [vmem:[%s19846_s19 + $0x270] sm:$0xf]  ;;  %v13318_v18 = vld [vmem:[%s19846_s19 + $0x80] sm:$0xf]  ;;  %v13527_v8 = vor.u32 %v14665_v4, %v13526_v16  ;;  %v14719_v4 = vld [vmem:[%s19846_s19 + $0x3d4] sm:$0xf0] }
 0xc96   :  { %8883 = vmatpush.bf16.msrb.mxu2 %v12771_v19  ;;  %8897 = vmatpush.bf16.msrb.mxu3 %v13027_v29  ;;  %v14613_v19 = vld [vmem:[%s19846_s19 + $0x84] sm:$0xf0]  ;;  %v14675_v29 = vld [vmem:[%s19846_s19 + $0x274] sm:$0xf0]  ;;  %v13742_v16 = vld [vmem:[%s19846_s19 + $0x3d0] sm:$0xf] }
 0xc97   :  { %v13319_v0 = vor.u32 %v14613_v19, %v13318_v18  ;;  %v13567_v53 = vor.u32 %v14675_v29, %v13566_v44  ;;  %v14663_v44 = vld [vmem:[%s19846_s19 + $0x214] sm:$0xf0]  ;;  %v13462_v18 = vld [vmem:[%s19846_s19 + $0x1a0] sm:$0xf]  ;;  %v14649_v19 = vld [vmem:[%s19846_s19 + $0x1a4] sm:$0xf0] }
 0xc98   :  { %8856 = vmatmul.bf16.vlgmr.msrb.gmra.mxu0 %v18632_v63  ;;  %8870 = vmatmul.bf16.vlgmr.msrb.gmra.mxu1 %v18636_v23  ;;  %v13463_v29 = vor.u32 %v14649_v19, %v13462_v18 }
 0xc99   :  { %9568 = vmatpush.bf16.msra.mxu0 %v13311_v49  ;;  %9582 = vmatpush.bf16.msra.mxu1 %v13375_v57  ;;  %v13630_v49 = vld [vmem:[%s19846_s19 + $0x2f0] sm:$0xf]  ;;  %v13255_v57 = vor.u32 %v14597_v41, %v13254_v7  ;;  %v14631_v7 = vld [vmem:[%s19846_s19 + $0x114] sm:$0xf0] }
 0xc9a   :  { %8884 = vmatmul.bf16.vlgmr.msrb.gmra.mxu2 %v18632_v63  ;;  %8898 = vmatmul.bf16.vlgmr.msrb.gmra.mxu3 %v18636_v23  ;;  %v13359_v63 = vor.u32 %v14623_v61, %v13358_v43  ;;  %v13350_v23 = vld [vmem:[%s19846_s19 + $0xc0] sm:$0xf]  ;;  %v13631_v54 = vor.u32 %v14691_v46, %v13630_v49  ;;  %v14637_v61 = vld [vmem:[%s19846_s19 + $0x144] sm:$0xf0]  ;;  %v13391_v41 = vor.u32 %v14631_v7, %v13390_v40 }
 0xc9b   :  { %9596 = vmatpush.bf16.msra.mxu2 %v13439_v6  ;;  %9610 = vmatpush.bf16.msra.mxu3 %v13503_v45  ;;  %v13351_v1 = vor.u32 %v14621_v13, %v13350_v23  ;;  %v13550_v6 = vld [vmem:[%s19846_s19 + $0x250] sm:$0xf]  ;;  %v13414_v43 = vld [vmem:[%s19846_s19 + $0x140] sm:$0xf]  ;;  %v13543_v13 = vor.u32 %v14669_v35, %v13542_v2  ;;  %v14681_v46 = vld [vmem:[%s19846_s19 + $0x2a4] sm:$0xf0] }
 0xc9c   :  { %v13415_v62 = vor.u32 %v14637_v61, %v13414_v43  ;;  %v13614_v45 = vld [vmem:[%s19846_s19 + $0x2d0] sm:$0xf]  ;;  %v13590_v49 = vld [vmem:[%s19846_s19 + $0x2a0] sm:$0xf]  ;;  %v14717_v40 = vld [vmem:[%s19846_s19 + $0x3c4] sm:$0xf0] }
 0xc9d   :  { %9569 = vmatpush.bf16.msra.mxu0 %v13303_v14  ;;  %9583 = vmatpush.bf16.msra.mxu1 %v13367_v24  ;;  %v14671_v14 = vld [vmem:[%s19846_s19 + $0x254] sm:$0xf0]  ;;  %v14689_v24 = vld [vmem:[%s19846_s19 + $0x2e4] sm:$0xf0]  ;;  %v13582_v43 = vld [vmem:[%s19846_s19 + $0x290] sm:$0xf] }
 0xc9e   :  { %v13551_v25 = vor.u32 %v14671_v14, %v13550_v6  ;;  %v13623_v30 = vor.u32 %v14689_v24, %v13622_v21  ;;  %v13694_v6 = vld [vmem:[%s19846_s19 + $0x370] sm:$0xf]  ;;  %v14707_v14 = vld [vmem:[%s19846_s19 + $0x374] sm:$0xf0]  ;;  %v13686_v35 = vld [vmem:[%s19846_s19 + $0x360] sm:$0xf] }
 0xc9f   :  { %9597 = vmatpush.bf16.msra.mxu2 %v13431_v32  ;;  %9611 = vmatpush.bf16.msra.mxu3 %v13495_v34  ;;  %v14655_v32 = vld [vmem:[%s19846_s19 + $0x1d4] sm:$0xf0]  ;;  %v13454_v21 = vld [vmem:[%s19846_s19 + $0x190] sm:$0xf] }
 0xca0   :  { %v14667_v34 = vld [vmem:[%s19846_s19 + $0x234] sm:$0xf0] }
 0xca1   :  { %9570 = vmatpush.bf16.msra.mxu0 %v13295_v26  ;;  %9584 = vmatpush.bf16.msra.mxu1 %v13359_v63  ;;  %v14687_v26 = vld [vmem:[%s19846_s19 + $0x2d4] sm:$0xf0]  ;;  %v13487_v63 = vor.u32 %v14655_v32, %v13486_v31  ;;  %v13535_v55 = vor.u32 %v14667_v34, %v13534_v27  ;;  %v14705_v31 = vld [vmem:[%s19846_s19 + $0x364] sm:$0xf0]  ;;  %v13678_v34 = vld [vmem:[%s19846_s19 + $0x350] sm:$0xf] }
 0xca2   :  { %v13615_v23 = vor.u32 %v14687_v26, %v13614_v45  ;;  %v14647_v24 = vld [vmem:[%s19846_s19 + $0x194] sm:$0xf0]  ;;  %v13687_v32 = vor.u32 %v14705_v31, %v13686_v35  ;;  %v13446_v45 = vld [vmem:[%s19846_s19 + $0x180] sm:$0xf]  ;;  %v14645_v26 = vld [vmem:[%s19846_s19 + $0x184] sm:$0xf0] }
 0xca3   :  { %9598 = vmatpush.bf16.msra.mxu2 %v13423_v15  ;;  %9612 = vmatpush.bf16.msra.mxu3 %v13487_v63  ;;  %v13478_v15 = vld [vmem:[%s19846_s19 + $0x1c0] sm:$0xf]  ;;  %v13447_v63 = vor.u32 %v14645_v26, %v13446_v45  ;;  %v14693_v45 = vld [vmem:[%s19846_s19 + $0x304] sm:$0xf0] }
 0xca5   :  { %9571 = vmatpush.bf16.msra.mxu0 %v13287_v20  ;;  %9585 = vmatpush.bf16.msra.mxu1 %v13351_v1  ;;  %v14653_v20 = vld [vmem:[%s19846_s19 + $0x1c4] sm:$0xf0]  ;;  %v13606_v1 = vld [vmem:[%s19846_s19 + $0x2c0] sm:$0xf] }
 0xca6   :  { %v13479_v36 = vor.u32 %v14653_v20, %v13478_v15  ;;  %v13607_v42 = vor.u32 %v14685_v52, %v13606_v1  ;;  %v14703_v15 = vld [vmem:[%s19846_s19 + $0x354] sm:$0xf0]  ;;  %v14721_v1 = vld [vmem:[%s19846_s19 + $0x3e4] sm:$0xf0] }
 0xca7   :  { %9599 = vmatpush.bf16.msra.mxu2 %v13415_v62  ;;  %v14679_v62 = vld [vmem:[%s19846_s19 + $0x294] sm:$0xf0]  ;;  %v13679_v20 = vor.u32 %v14703_v15, %v13678_v34  ;;  %v13296_v34 = vld [vmem:[%s19846_s19 + $0x58] sm:$0xf0]  ;;  %v13710_v15 = vld [vmem:[%s19846_s19 + $0x390] sm:$0xf] }
 0xca8   :  { %9613 = vmatpush.bf16.msra.mxu3 %v13479_v36  ;;  %v13583_v2 = vor.u32 %v14679_v62, %v13582_v43  ;;  %v13750_v36 = vld [vmem:[%s19846_s19 + $0x3e0] sm:$0xf] }
 0xca9   :  { %9572 = vmatpush.bf16.msra.mxu0 %v13279_v3  ;;  %9586 = vmatpush.bf16.msra.mxu1 %v13343_v51  ;;  %v13398_v3 = vld [vmem:[%s19846_s19 + $0x120] sm:$0xf]  ;;  %v13751_v52 = vor.u32 %v14721_v1, %v13750_v36 }
 0xcaa   :  { %v13399_v51 = vor.u32 %v14633_v17, %v13398_v3  ;;  %v13718_v43 = vld [vmem:[%s19846_s19 + $0x3a0] sm:$0xf] }
 0xcab   :  { %9600 = vmatpush.bf16.msra.mxu2 %v13407_v9  ;;  %v14723_v9 = vld [vmem:[%s19846_s19 + $0x3f4] sm:$0xf0] }
 0xcad   :  { %9573 = vmatpush.bf16.msra.mxu0 %v13271_v38  ;;  %9587 = vmatpush.bf16.msra.mxu1 %v13335_v60  ;;  %v14651_v38 = vld [vmem:[%s19846_s19 + $0x1b4] sm:$0xf0]  ;;  %v13598_v60 = vld [vmem:[%s19846_s19 + $0x2b0] sm:$0xf] }
 0xcae   :  { %v13471_v33 = vor.u32 %v14651_v38, %v13470_v59  ;;  %v13743_v59 = vor.u32 %v14719_v4, %v13742_v16  ;;  %v13662_v38 = vld [vmem:[%s19846_s19 + $0x330] sm:$0xf]  ;;  %v14604_v16 = vld [vmem:[%s19846_s19 + $0x44] sm:$0xf]  ;;  %v13288_v4 = vld [vmem:[%s19846_s19 + $0x48] sm:$0xf0] }
 0xcaf   :  { %9601 = vmatpush.bf16.msra.mxu2 %v13399_v51 }
 0xcb0   :  { %9614 = vmatpush.bf16.msra.mxu3 %v13471_v33  ;;  %v14699_v33 = vld [vmem:[%s19846_s19 + $0x334] sm:$0xf0] }
 0xcb1   :  { %9574 = vmatpush.bf16.msra.mxu0 %v13263_v47  ;;  %9588 = vmatpush.bf16.msra.mxu1 %v13327_v10  ;;  %v13599_v47 = vor.u32 %v14683_v39, %v13598_v60  ;;  %v13518_v10 = vld [vmem:[%s19846_s19 + $0x210] sm:$0xf]  ;;  %v13663_v60 = vor.u32 %v14699_v33, %v13662_v38  ;;  %v13734_v39 = vld [vmem:[%s19846_s19 + $0x3c0] sm:$0xf]  ;;  %v14709_v38 = vld [vmem:[%s19846_s19 + $0x384] sm:$0xf0] }
 0xcb3   :  { %9602 = vmatpush.bf16.msra.mxu2 %v13391_v41 }
 0xcb4   :  { %9615 = vmatpush.bf16.msra.mxu3 %v13463_v29  ;;  %v14610_v29 = vld [vmem:[%s19846_s19 + $0x74] sm:$0xf] }
 0xcb5   :  { %9575 = vmatpush.bf16.msra.mxu0 %v13255_v57  ;;  %9589 = vmatpush.bf16.msra.mxu1 %v13319_v0  ;;  %v13519_v57 = vor.u32 %v14663_v44, %v13518_v10  ;;  %v13591_v0 = vor.u32 %v14681_v46, %v13590_v49  ;;  %v13654_v10 = vld [vmem:[%s19846_s19 + $0x320] sm:$0xf]  ;;  %v14697_v44 = vld [vmem:[%s19846_s19 + $0x324] sm:$0xf0] }
 0xcb6   :  { %v13655_v49 = vor.u32 %v14697_v44, %v13654_v10  ;;  %v14622_v10 = vld [vmem:[%s19846_s19 + $0xd4] sm:$0xf]  ;;  %v13360_v44 = vld [vmem:[%s19846_s19 + $0xd8] sm:$0xf0] }
 0xcb9   :  { %9624 = vmatpush.bf16.msrb.mxu0 %v13567_v53  ;;  %9638 = vmatpush.bf16.msrb.mxu1 %v13631_v54  ;;  %v13382_v53 = vld [vmem:[%s19846_s19 + $0x100] sm:$0xf]  ;;  %v14629_v54 = vld [vmem:[%s19846_s19 + $0x104] sm:$0xf0] }
 0xcba   :  { %v13383_v58 = vor.u32 %v14629_v54, %v13382_v53  ;;  %v14715_v53 = vld [vmem:[%s19846_s19 + $0x3b4] sm:$0xf0] }
 0xcbc   :  { %9603 = vmatpush.bf16.msra.mxu2 %v13383_v58 }
 0xcbd   :  { %9625 = vmatpush.bf16.msrb.mxu0 %v13559_v11  ;;  %9639 = vmatpush.bf16.msrb.mxu1 %v13623_v30  ;;  %v14661_v11 = vld [vmem:[%s19846_s19 + $0x204] sm:$0xf0]  ;;  %v13455_v30 = vor.u32 %v14647_v24, %v13454_v21  ;;  %v14608_v21 = vld [vmem:[%s19846_s19 + $0x64] sm:$0xf] }
 0xcbe   :  { %v13511_v61 = vor.u32 %v14661_v11, %v13510_v28  ;;  %v13646_v11 = vld [vmem:[%s19846_s19 + $0x310] sm:$0xf] }
 0xcbf   :  { %9616 = vmatpush.bf16.msra.mxu3 %v13455_v30  ;;  %v13304_v30 = vld [vmem:[%s19846_s19 + $0x68] sm:$0xf0] }
 0xcc1   :  { %9626 = vmatpush.bf16.msrb.mxu0 %v13551_v25  ;;  %9640 = vmatpush.bf16.msrb.mxu1 %v13615_v23  ;;  %v13695_v25 = vor.u32 %v14707_v14, %v13694_v6  ;;  %v13574_v23 = vld [vmem:[%s19846_s19 + $0x280] sm:$0xf]  ;;  %v14695_v6 = vld [vmem:[%s19846_s19 + $0x314] sm:$0xf0] }
 0xcc2   :  { %v13575_v50 = vor.u32 %v14677_v56, %v13574_v23  ;;  %v13647_v24 = vor.u32 %v14695_v6, %v13646_v11  ;;  %v13307_v56 = vor.u32 %v14608_v21, %v13304_v30  ;;  %v14600_v11 = vld [vmem:[%s19846_s19 + $0x24] sm:$0xf]  ;;  %v13272_v21 = vld [vmem:[%s19846_s19 + $0x28] sm:$0xf0] }
 0xcc3   :  { %9652 = vmatpush.bf16.msrb.mxu2 %v13695_v25  ;;  %9617 = vmatpush.bf16.msra.mxu3 %v13447_v63  ;;  %v13432_v30 = vld [vmem:[%s19846_s19 + $0x168] sm:$0xf0] }
 0xcc5   :  { %9627 = vmatpush.bf16.msrb.mxu0 %v13543_v13  ;;  %9641 = vmatpush.bf16.msrb.mxu1 %v13607_v42  ;;  %v13758_v13 = vld [vmem:[%s19846_s19 + $0x3f0] sm:$0xf]  ;;  %v14701_v42 = vld [vmem:[%s19846_s19 + $0x344] sm:$0xf0] }
 0xcc6   :  { %v13759_v27 = vor.u32 %v14723_v9, %v13758_v13  ;;  %v13376_v13 = vld [vmem:[%s19846_s19 + $0xf8] sm:$0xf0]  ;;  %v14606_v9 = vld [vmem:[%s19846_s19 + $0x54] sm:$0xf] }
 0xcc7   :  { %9653 = vmatpush.bf16.msrb.mxu2 %v13687_v32  ;;  %v13638_v32 = vld [vmem:[%s19846_s19 + $0x300] sm:$0xf] }
 0xcc8   :  { %9666 = vmatpush.bf16.msrb.mxu3 %v13759_v27  ;;  %v13639_v27 = vor.u32 %v14693_v45, %v13638_v32  ;;  %v13275_v45 = vor.u32 %v14600_v11, %v13272_v21  ;;  %v14612_v11 = vld [vmem:[%s19846_s19 + $0x84] sm:$0xf]  ;;  %v13320_v21 = vld [vmem:[%s19846_s19 + $0x88] sm:$0xf0] }
 0xcc9   :  { %9628 = vmatpush.bf16.msrb.mxu0 %v13535_v55  ;;  %9642 = vmatpush.bf16.msrb.mxu1 %v13599_v47  ;;  %v13670_v55 = vld [vmem:[%s19846_s19 + $0x340] sm:$0xf] }
 0xcca   :  { %v13671_v51 = vor.u32 %v14701_v42, %v13670_v55 }
 0xccb   :  { %9654 = vmatpush.bf16.msrb.mxu2 %v13679_v20  ;;  %v14711_v20 = vld [vmem:[%s19846_s19 + $0x394] sm:$0xf0] }
 0xccc   :  { %9667 = vmatpush.bf16.msrb.mxu3 %v13751_v52  ;;  %v13711_v52 = vor.u32 %v14711_v20, %v13710_v15 }
 0xccd   :  { %9629 = vmatpush.bf16.msrb.mxu0 %v13527_v8  ;;  %9643 = vmatpush.bf16.msrb.mxu1 %v13591_v0  ;;  %v13735_v8 = vor.u32 %v14717_v40, %v13734_v39  ;;  %v13726_v0 = vld [vmem:[%s19846_s19 + $0x3b0] sm:$0xf] }
 0xcce   :  { %v13727_v54 = vor.u32 %v14715_v53, %v13726_v0  ;;  %v13363_v53 = vor.u32 %v14622_v10, %v13360_v44  ;;  %v14654_v10 = vld [vmem:[%s19846_s19 + $0x1d4] sm:$0xf]  ;;  %v13488_v44 = vld [vmem:[%s19846_s19 + $0x1d8] sm:$0xf0] }
 0xccf   :  { %9655 = vmatpush.bf16.msrb.mxu2 %v13671_v51  ;;  %v13368_v51 = vld [vmem:[%s19846_s19 + $0xe8] sm:$0xf0] }
 0xcd0   :  { %9668 = vmatpush.bf16.msrb.mxu3 %v13743_v59  ;;  %v13702_v59 = vld [vmem:[%s19846_s19 + $0x380] sm:$0xf] }
 0xcd1   :  { %9630 = vmatpush.bf16.msrb.mxu0 %v13519_v57  ;;  %9644 = vmatpush.bf16.msrb.mxu1 %v13583_v2  ;;  %v13312_v57 = vld [vmem:[%s19846_s19 + $0x78] sm:$0xf0]  ;;  %v13703_v33 = vor.u32 %v14709_v38, %v13702_v59  ;;  %v13496_v59 = vld [vmem:[%s19846_s19 + $0x1e8] sm:$0xf0] }
 0xcd2   :  { %v13315_v14 = vor.u32 %v14610_v29, %v13312_v57  ;;  %v13280_v29 = vld [vmem:[%s19846_s19 + $0x38] sm:$0xf0]  ;;  %v13256_v38 = vld [vmem:[%s19846_s19 + $0x8] sm:$0xf0] }
 0xcd3   :  { %9656 = vmatpush.bf16.msrb.mxu2 %v13663_v60 }
 0xcd4   :  { %v8689_v3 = vpop.f32.mrf.mxu0  ;;  %v8703_v17 = vpop.f32.mrf.mxu1  ;;  %9669 = vmatpush.bf16.msrb.mxu3 %v13735_v8 }
 0xcd5   :  { %9631 = vmatpush.bf16.msrb.mxu0 %v13511_v61  ;;  %9645 = vmatpush.bf16.msrb.mxu1 %v13575_v50  ;;  %v8704_v47 = vadd.f32 %v8703_v17, %v8689_v3  ;;  %v14713_v61 = vld [vmem:[%s19846_s19 + $0x3a4] sm:$0xf0]  ;;  %v14626_v50 = vld [vmem:[%s19846_s19 + $0xf4] sm:$0xf]  ;;  %v13299_v3 = vor.u32 %v14606_v9, %v13296_v34  ;;  %v14624_v17 = vld [vmem:[%s19846_s19 + $0xe4] sm:$0xf] }
 0xcd6   :  { %v13719_v2 = vor.u32 %v14713_v61, %v13718_v43  ;;  %v13379_v55 = vor.u32 %v14626_v50, %v13376_v13  ;;  %v13371_v8 = vor.u32 %v14624_v17, %v13368_v51  ;;  %v13264_v50 = vld [vmem:[%s19846_s19 + $0x18] sm:$0xf0]  ;;  %v14638_v13 = vld [vmem:[%s19846_s19 + $0x154] sm:$0xf]  ;;  %v14596_v51 = vld [vmem:[%s19846_s19 + $0x4] sm:$0xf] }
 0xcd7   :  { %v8904_v58 = vmax.f32 %v8704_v47, 0.0  ;;  %9657 = vmatpush.bf16.msrb.mxu2 %v13655_v49  ;;  %v14642_v49 = vld [vmem:[%s19846_s19 + $0x174] sm:$0xf]  ;;  %v13424_v9 = vld [vmem:[%s19846_s19 + $0x158] sm:$0xf0] }
 0xcd8   :  { %9670 = vmatpush.bf16.msrb.mxu3 %v13727_v54 }
 0xcdb   :  { %v8717_v7 = vpop.f32.mrf.mxu2  ;;  %v8731_v41 = vpop.f32.mrf.mxu3  ;;  %9658 = vmatpush.bf16.msrb.mxu2 %v13647_v24  ;;  %v14640_v24 = vld [vmem:[%s19846_s19 + $0x164] sm:$0xf] }
 0xcdc   :  { %v8691_v18 = vpop.f32.mrf.mxu0  ;;  %v8705_v19 = vpop.f32.mrf.mxu1  ;;  %v8732_v62 = vadd.f32 %v8731_v41, %v8717_v7  ;;  %9671 = vmatpush.bf16.msrb.mxu3 %v13719_v2  ;;  %v13291_v41 = vor.u32 %v14604_v16, %v13288_v4  ;;  %v13427_v16 = vor.u32 %v14638_v13, %v13424_v9  ;;  %v14656_v4 = vld [vmem:[%s19846_s19 + $0x1e4] sm:$0xf]  ;;  %v14650_v13 = vld [vmem:[%s19846_s19 + $0x1b4] sm:$0xf]  ;;  %v13472_v9 = vld [vmem:[%s19846_s19 + $0x1b8] sm:$0xf0] }
 0xcdd   :  { %v8706_v46 = vadd.f32 %v8705_v19, %v8691_v18  ;;  %v14602_v18 = vld [vmem:[%s19846_s19 + $0x34] sm:$0xf] }
 0xcde   :  { %v8905_v36 = vmax.f32 %v8732_v62, 0.0  ;;  %v13283_v54 = vor.u32 %v14602_v18, %v13280_v29 }
 0xcdf   :  { %v8912_v28 = vmax.f32 %v8706_v46, 0.0  ;;  %9659 = vmatpush.bf16.msrb.mxu2 %v13639_v27  ;;  %v13440_v46 = vld [vmem:[%s19846_s19 + $0x178] sm:$0xf0] }
 0xce0   :  { %9672 = vmatpush.bf16.msrb.mxu3 %v13711_v52  ;;  %v13443_v6 = vor.u32 %v14642_v49, %v13440_v46  ;;  %v13336_v52 = vld [vmem:[%s19846_s19 + $0xa8] sm:$0xf0]  ;;  %v14634_v49 = vld [vmem:[%s19846_s19 + $0x134] sm:$0xf]  ;;  %v13408_v46 = vld [vmem:[%s19846_s19 + $0x138] sm:$0xf0] }
 0xce1   :  { %v19383_v25 = vpack.c.bf16 %v8912_v28, %v8904_v58  ;;  %v14620_v58 = vld [vmem:[%s19846_s19 + $0xc4] sm:$0xf]  ;;  %v13352_v28 = vld [vmem:[%s19846_s19 + $0xc8] sm:$0xf0] }
 0xce2   :  { %v13355_v2 = vor.u32 %v14620_v58, %v13352_v28  ;;  %v13568_v58 = vld [vmem:[%s19846_s19 + $0x278] sm:$0xf0] }
 0xce3   :  { %v8719_v35 = vpop.f32.mrf.mxu2  ;;  %v8733_v31 = vpop.f32.mrf.mxu3  ;;  %9576 = vmatmul.bf16.vlgmr.msra.gmra.mxu0 %v19383_v25 }
 0xce4   :  { %v8734_v26 = vadd.f32 %v8733_v31, %v8719_v35  ;;  %v8745_v63 = vpop.f32.mrf.mxu0  ;;  %v8759_v23 = vpop.f32.mrf.mxu1  ;;  %9680 = vmatpush.bf16.msra.mxu0 %v13315_v14  ;;  %9673 = vmatpush.bf16.msrb.mxu3 %v13703_v33  ;;  %v14618_v35 = vld [vmem:[%s19846_s19 + $0xb4] sm:$0xf]  ;;  %v13344_v31 = vld [vmem:[%s19846_s19 + $0xb8] sm:$0xf0]  ;;  %v14636_v33 = vld [vmem:[%s19846_s19 + $0x144] sm:$0xf] }
 0xce5   :  { %v8760_v60 = vadd.f32 %v8759_v23, %v8745_v63  ;;  %v13435_v63 = vor.u32 %v14640_v24, %v13432_v30  ;;  %v14658_v23 = vld [vmem:[%s19846_s19 + $0x1f4] sm:$0xf]  ;;  %v13411_v24 = vor.u32 %v14634_v49, %v13408_v46  ;;  %v14652_v30 = vld [vmem:[%s19846_s19 + $0x1c4] sm:$0xf]  ;;  %v13456_v46 = vld [vmem:[%s19846_s19 + $0x198] sm:$0xf0] }
 0xce6   :  { %v8913_v1 = vmax.f32 %v8734_v26, 0.0  ;;  %v14598_v26 = vld [vmem:[%s19846_s19 + $0x14] sm:$0xf] }
 0xce7   :  { %v8906_v57 = vmax.f32 %v8760_v60, 0.0  ;;  %v13267_v17 = vor.u32 %v14598_v26, %v13264_v50  ;;  %v13416_v60 = vld [vmem:[%s19846_s19 + $0x148] sm:$0xf0]  ;;  %v14646_v49 = vld [vmem:[%s19846_s19 + $0x194] sm:$0xf] }
 0xce8   :  { %v19419_v42 = vpack.c.bf16 %v8913_v1, %v8905_v36  ;;  %9681 = vmatpush.bf16.msra.mxu0 %v13307_v56  ;;  %v13504_v56 = vld [vmem:[%s19846_s19 + $0x1f8] sm:$0xf0]  ;;  %v13347_v36 = vor.u32 %v14618_v35, %v13344_v31  ;;  %v14616_v1 = vld [vmem:[%s19846_s19 + $0xa4] sm:$0xf]  ;;  %v13400_v35 = vld [vmem:[%s19846_s19 + $0x128] sm:$0xf0] }
 0xce9   :  { %v13560_v26 = vld [vmem:[%s19846_s19 + $0x268] sm:$0xf0] }
 0xcea   :  { %9590 = vmatmul.bf16.vlgmr.msra.gmra.mxu1 %v19419_v42 }
 0xceb   :  { %v8773_v39 = vpop.f32.mrf.mxu2  ;;  %v8787_v40 = vpop.f32.mrf.mxu3  ;;  %9694 = vmatpush.bf16.msra.mxu1 %v13379_v55  ;;  %v13507_v55 = vor.u32 %v14658_v23, %v13504_v56 }
 0xcec   :  { %v8747_v47 = vpop.f32.mrf.mxu0  ;;  %v8761_v7 = vpop.f32.mrf.mxu1  ;;  %9682 = vmatpush.bf16.msra.mxu0 %v13299_v3  ;;  %v8788_v43 = vadd.f32 %v8787_v40, %v8773_v39  ;;  %v13339_v39 = vor.u32 %v14616_v1, %v13336_v52  ;;  %v14614_v40 = vld [vmem:[%s19846_s19 + $0x94] sm:$0xf] }
 0xced   :  { %v8762_v19 = vadd.f32 %v8761_v7, %v8747_v47  ;;  %v13259_v47 = vor.u32 %v14596_v51, %v13256_v38  ;;  %v13328_v7 = vld [vmem:[%s19846_s19 + $0x98] sm:$0xf0]  ;;  %v14690_v52 = vld [vmem:[%s19846_s19 + $0x2f4] sm:$0xf] }
 0xcee   :  { %v8907_v27 = vmax.f32 %v8788_v43, 0.0  ;;  %v13331_v28 = vor.u32 %v14614_v40, %v13328_v7  ;;  %v13480_v43 = vld [vmem:[%s19846_s19 + $0x1c8] sm:$0xf0]  ;;  %v13552_v51 = vld [vmem:[%s19846_s19 + $0x258] sm:$0xf0] }
 0xcef   :  { %v8914_v0 = vmax.f32 %v8762_v19, 0.0  ;;  %9695 = vmatpush.bf16.msra.mxu1 %v13371_v8  ;;  %v13499_v8 = vor.u32 %v14656_v4, %v13496_v59  ;;  %v13483_v23 = vor.u32 %v14652_v30, %v13480_v43  ;;  %v14628_v40 = vld [vmem:[%s19846_s19 + $0x104] sm:$0xf] }
 0xcf0   :  { %9683 = vmatpush.bf16.msra.mxu0 %v13291_v41  ;;  %v13419_v41 = vor.u32 %v14636_v33, %v13416_v60  ;;  %v14648_v33 = vld [vmem:[%s19846_s19 + $0x1a4] sm:$0xf]  ;;  %v13464_v60 = vld [vmem:[%s19846_s19 + $0x1a8] sm:$0xf0] }
 0xcf1   :  { %v19467_v14 = vpack.c.bf16 %v8914_v0, %v8906_v57  ;;  %v14684_v43 = vld [vmem:[%s19846_s19 + $0x2c4] sm:$0xf] }
 0xcf3   :  { %v8775_v61 = vpop.f32.mrf.mxu2  ;;  %v8789_v62 = vpop.f32.mrf.mxu3  ;;  %9604 = vmatmul.bf16.vlgmr.msra.gmra.mxu2 %v19467_v14  ;;  %9696 = vmatpush.bf16.msra.mxu1 %v13363_v53 }
 0xcf4   :  { %v8790_v32 = vadd.f32 %v8789_v62, %v8775_v61  ;;  %9684 = vmatpush.bf16.msra.mxu0 %v13283_v54  ;;  %9708 = vmatpush.bf16.msra.mxu2 %v13443_v6  ;;  %v14674_v54 = vld [vmem:[%s19846_s19 + $0x274] sm:$0xf]  ;;  %v13491_v6 = vor.u32 %v14654_v10, %v13488_v44  ;;  %v13624_v10 = vld [vmem:[%s19846_s19 + $0x2e8] sm:$0xf0]  ;;  %v14668_v44 = vld [vmem:[%s19846_s19 + $0x244] sm:$0xf] }
 0xcf5   :  { %v8801_v15 = vpop.f32.mrf.mxu0  ;;  %v8815_v20 = vpop.f32.mrf.mxu1  ;;  %v13571_v31 = vor.u32 %v14674_v54, %v13568_v58  ;;  %v13616_v54 = vld [vmem:[%s19846_s19 + $0x2d8] sm:$0xf0]  ;;  %v14666_v58 = vld [vmem:[%s19846_s19 + $0x234] sm:$0xf] }
 0xcf6   :  { %v8915_v34 = vmax.f32 %v8790_v32, 0.0  ;;  %v8816_v18 = vadd.f32 %v8815_v20, %v8801_v15  ;;  %v14630_v15 = vld [vmem:[%s19846_s19 + $0x114] sm:$0xf]  ;;  %v13392_v20 = vld [vmem:[%s19846_s19 + $0x118] sm:$0xf0] }
 0xcf7   :  { %9697 = vmatpush.bf16.msra.mxu1 %v13355_v2  ;;  %v14632_v2 = vld [vmem:[%s19846_s19 + $0x124] sm:$0xf]  ;;  %v13395_v38 = vor.u32 %v14630_v15, %v13392_v20 }
 0xcf8   :  { %v19509_v3 = vpack.c.bf16 %v8915_v34, %v8907_v27  ;;  %9685 = vmatpush.bf16.msra.mxu0 %v13275_v45  ;;  %9709 = vmatpush.bf16.msra.mxu2 %v13435_v63  ;;  %v8908_v61 = vmax.f32 %v8816_v18, 0.0  ;;  %v14672_v45 = vld [vmem:[%s19846_s19 + $0x264] sm:$0xf]  ;;  %v13323_v63 = vor.u32 %v14612_v11, %v13320_v21  ;;  %v13403_v50 = vor.u32 %v14632_v2, %v13400_v35  ;;  %v13544_v18 = vld [vmem:[%s19846_s19 + $0x248] sm:$0xf0] }
 0xcf9   :  { %v13563_v1 = vor.u32 %v14672_v45, %v13560_v26  ;;  %v13459_v11 = vor.u32 %v14646_v49, %v13456_v46  ;;  %v13448_v21 = vld [vmem:[%s19846_s19 + $0x188] sm:$0xf0]  ;;  %v14664_v35 = vld [vmem:[%s19846_s19 + $0x224] sm:$0xf] }
 0xcfa   :  { %9618 = vmatmul.bf16.vlgmr.msra.gmra.mxu3 %v19509_v3  ;;  %v14680_v20 = vld [vmem:[%s19846_s19 + $0x2a4] sm:$0xf]  ;;  %v13576_v49 = vld [vmem:[%s19846_s19 + $0x288] sm:$0xf0] }
 0xcfb   :  { %9698 = vmatpush.bf16.msra.mxu1 %v13347_v36  ;;  %9722 = vmatpush.bf16.msra.mxu3 %v13507_v55  ;;  %v13632_v55 = vld [vmem:[%s19846_s19 + $0x2f8] sm:$0xf0] }
 0xcfc   :  { %9686 = vmatpush.bf16.msra.mxu0 %v13267_v17  ;;  %9710 = vmatpush.bf16.msra.mxu2 %v13427_v16  ;;  %v14670_v17 = vld [vmem:[%s19846_s19 + $0x254] sm:$0xf]  ;;  %v13475_v16 = vor.u32 %v14650_v13, %v13472_v9  ;;  %v13520_v13 = vld [vmem:[%s19846_s19 + $0x218] sm:$0xf0] }
 0xcfd   :  { %v8803_v57 = vpop.f32.mrf.mxu0  ;;  %v8817_v0 = vpop.f32.mrf.mxu1  ;;  %v13555_v7 = vor.u32 %v14670_v17, %v13552_v51  ;;  %v13512_v17 = vld [vmem:[%s19846_s19 + $0x208] sm:$0xf0] }
 0xcfe   :  { %v8829_v19 = vpop.f32.mrf.mxu2  ;;  %v8843_v29 = vpop.f32.mrf.mxu3  ;;  %v8818_v53 = vadd.f32 %v8817_v0, %v8803_v57  ;;  %v13547_v0 = vor.u32 %v14668_v44, %v13544_v18 }
 0xcff   :  { %9699 = vmatpush.bf16.msra.mxu1 %v13339_v39  ;;  %9723 = vmatpush.bf16.msra.mxu3 %v13499_v8  ;;  %v8844_v56 = vadd.f32 %v8843_v29, %v8829_v19  ;;  %v13635_v39 = vor.u32 %v14690_v52, %v13632_v55  ;;  %v13384_v8 = vld [vmem:[%s19846_s19 + $0x108] sm:$0xf0]  ;;  %v13467_v19 = vor.u32 %v14648_v33, %v13464_v60  ;;  %v14660_v55 = vld [vmem:[%s19846_s19 + $0x204] sm:$0xf] }
 0xd00   :  { %9687 = vmatpush.bf16.msra.mxu0 %v13259_v47  ;;  %9711 = vmatpush.bf16.msra.mxu2 %v13419_v41  ;;  %v8916_v62 = vmax.f32 %v8818_v53, 0.0  ;;  %v14688_v41 = vld [vmem:[%s19846_s19 + $0x2e4] sm:$0xf]  ;;  %v13387_v29 = vor.u32 %v14628_v40, %v13384_v8  ;;  %v14686_v53 = vld [vmem:[%s19846_s19 + $0x2d4] sm:$0xf]  ;;  %v13515_v60 = vor.u32 %v14660_v55, %v13512_v17 }
 0xd01   :  { %v8909_v4 = vmax.f32 %v8844_v56, 0.0  ;;  %v13627_v57 = vor.u32 %v14688_v41, %v13624_v10  ;;  %v13600_v56 = vld [vmem:[%s19846_s19 + $0x2b8] sm:$0xf0]  ;;  %v13688_v41 = vld [vmem:[%s19846_s19 + $0x368] sm:$0xf0] }
 0xd02   :  { %v19572_v32 = vpack.c.bf16 %v8916_v62, %v8908_v61  ;;  %v13608_v61 = vld [vmem:[%s19846_s19 + $0x2c8] sm:$0xf0]  ;;  %v14692_v17 = vld [vmem:[%s19846_s19 + $0x304] sm:$0xf] }
 0xd03   :  { %9700 = vmatpush.bf16.msra.mxu1 %v13331_v28  ;;  %9724 = vmatpush.bf16.msra.mxu3 %v13491_v6  ;;  %v13536_v28 = vld [vmem:[%s19846_s19 + $0x238] sm:$0xf0]  ;;  %v14644_v6 = vld [vmem:[%s19846_s19 + $0x184] sm:$0xf]  ;;  %v13611_v26 = vor.u32 %v14684_v43, %v13608_v61  ;;  %v13752_v61 = vld [vmem:[%s19846_s19 + $0x3e8] sm:$0xf0] }
 0xd04   :  { %9712 = vmatpush.bf16.msra.mxu2 %v13411_v24  ;;  %9632 = vmatmul.bf16.vlgmr.msrb.gmra.mxu0 %v19572_v32  ;;  %v13619_v24 = vor.u32 %v14686_v53, %v13616_v54  ;;  %v13539_v30 = vor.u32 %v14666_v58, %v13536_v28  ;;  %v13451_v45 = vor.u32 %v14644_v6, %v13448_v21  ;;  %v13760_v53 = vld [vmem:[%s19846_s19 + $0x3f8] sm:$0xf0]  ;;  %v14702_v54 = vld [vmem:[%s19846_s19 + $0x354] sm:$0xf]  ;;  %v14720_v43 = vld [vmem:[%s19846_s19 + $0x3e4] sm:$0xf] }
 0xd05   :  { %9736 = vmatpush.bf16.msrb.mxu0 %v13571_v31  ;;  %v13528_v31 = vld [vmem:[%s19846_s19 + $0x228] sm:$0xf0]  ;;  %v13680_v58 = vld [vmem:[%s19846_s19 + $0x358] sm:$0xf0] }
 0xd06   :  { %v8831_v27 = vpop.f32.mrf.mxu2  ;;  %v8845_v34 = vpop.f32.mrf.mxu3  ;;  %v13720_v55 = vld [vmem:[%s19846_s19 + $0x3a8] sm:$0xf0] }
 0xd07   :  { %v8846_v36 = vadd.f32 %v8845_v34, %v8831_v27  ;;  %9701 = vmatpush.bf16.msra.mxu1 %v13323_v63  ;;  %9725 = vmatpush.bf16.msra.mxu3 %v13483_v23  ;;  %v13531_v63 = vor.u32 %v14664_v35, %v13528_v31  ;;  %v14682_v23 = vld [vmem:[%s19846_s19 + $0x2b4] sm:$0xf] }
 0xd08   :  { %9713 = vmatpush.bf16.msra.mxu2 %v13403_v50  ;;  %v14662_v50 = vld [vmem:[%s19846_s19 + $0x214] sm:$0xf] }
 0xd09   :  { %v8917_v59 = vmax.f32 %v8846_v36, 0.0  ;;  %9737 = vmatpush.bf16.msrb.mxu0 %v13563_v1  ;;  %v13523_v15 = vor.u32 %v14662_v50, %v13520_v13  ;;  %v13592_v36 = vld [vmem:[%s19846_s19 + $0x2a8] sm:$0xf0]  ;;  %v14718_v31 = vld [vmem:[%s19846_s19 + $0x3d4] sm:$0xf] }
 0xd0a   :  { %v14716_v50 = vld [vmem:[%s19846_s19 + $0x3c4] sm:$0xf] }
 0xd0b   :  { %v19617_v47 = vpack.c.bf16 %v8917_v59, %v8909_v4  ;;  %9726 = vmatpush.bf16.msra.mxu3 %v13475_v16  ;;  %v14706_v16 = vld [vmem:[%s19846_s19 + $0x374] sm:$0xf]  ;;  %v13696_v4 = vld [vmem:[%s19846_s19 + $0x378] sm:$0xf0]  ;;  %v13595_v59 = vor.u32 %v14680_v20, %v13592_v36  ;;  %v14696_v13 = vld [vmem:[%s19846_s19 + $0x324] sm:$0xf] }
 0xd0c   :  { %9714 = vmatpush.bf16.msra.mxu2 %v13395_v38  ;;  %v13699_v40 = vor.u32 %v14706_v16, %v13696_v4  ;;  %v14694_v20 = vld [vmem:[%s19846_s19 + $0x314] sm:$0xf]  ;;  %v13648_v36 = vld [vmem:[%s19846_s19 + $0x318] sm:$0xf0] }
 0xd0d   :  { %9646 = vmatmul.bf16.vlgmr.msrb.gmra.mxu1 %v19617_v47  ;;  %9738 = vmatpush.bf16.msrb.mxu0 %v13555_v7  ;;  %v14704_v7 = vld [vmem:[%s19846_s19 + $0x364] sm:$0xf] }
 0xd0e   :  { %9750 = vmatpush.bf16.msrb.mxu1 %v13635_v39  ;;  %v14678_v39 = vld [vmem:[%s19846_s19 + $0x294] sm:$0xf] }
 0xd0f   :  { %9727 = vmatpush.bf16.msra.mxu3 %v13467_v19 }
 0xd10   :  { %9715 = vmatpush.bf16.msra.mxu2 %v13387_v29  ;;  %v14676_v29 = vld [vmem:[%s19846_s19 + $0x284] sm:$0xf] }
 0xd11   :  { %9739 = vmatpush.bf16.msrb.mxu0 %v13547_v0  ;;  %v14722_v0 = vld [vmem:[%s19846_s19 + $0x3f4] sm:$0xf]  ;;  %v13579_v6 = vor.u32 %v14676_v29, %v13576_v49 }
 0xd12   :  { %9751 = vmatpush.bf16.msrb.mxu1 %v13627_v57  ;;  %v13691_v57 = vor.u32 %v14704_v7, %v13688_v41  ;;  %v13763_v21 = vor.u32 %v14722_v0, %v13760_v53 }
 0xd13   :  { %9728 = vmatpush.bf16.msra.mxu3 %v13459_v11 }
 0xd14   :  { %9688 = vmatmul.bf16.vlgmr.msra.gmra.mxu0 %v19383_v25  ;;  %v13603_v25 = vor.u32 %v14682_v23, %v13600_v56 }
 0xd15   :  { %v8857_v62 = vpop.f32.mrf.mxu0  ;;  %v8871_v2 = vpop.f32.mrf.mxu1  ;;  %9740 = vmatpush.bf16.msrb.mxu0 %v13539_v30  ;;  %v13683_v30 = vor.u32 %v14702_v54, %v13680_v58 }
 0xd16   :  { %9752 = vmatpush.bf16.msrb.mxu1 %v13619_v24  ;;  %v8872_v9 = vadd.f32 %v8871_v2, %v8857_v62  ;;  %v14700_v62 = vld [vmem:[%s19846_s19 + $0x344] sm:$0xf]  ;;  %v13755_v2 = vor.u32 %v14720_v43, %v13752_v61 }
 0xd17   :  { %9729 = vmatpush.bf16.msra.mxu3 %v13451_v45  ;;  %v13744_v45 = vld [vmem:[%s19846_s19 + $0x3d8] sm:$0xf0] }
 0xd18   :  { %v8910_v38 = vmax.f32 %v8872_v9, 0.0  ;;  %v13747_v23 = vor.u32 %v14718_v31, %v13744_v45 }
 0xd19   :  { %9741 = vmatpush.bf16.msrb.mxu0 %v13531_v63  ;;  %v13664_v63 = vld [vmem:[%s19846_s19 + $0x338] sm:$0xf0] }
 0xd1a   :  { %9753 = vmatpush.bf16.msrb.mxu1 %v13611_v26  ;;  %v14698_v26 = vld [vmem:[%s19846_s19 + $0x334] sm:$0xf] }
 0xd1b   :  { %v13667_v56 = vor.u32 %v14698_v26, %v13664_v63 }
 0xd1d   :  { %v8885_v27 = vpop.f32.mrf.mxu2  ;;  %v8899_v34 = vpop.f32.mrf.mxu3  ;;  %9702 = vmatmul.bf16.vlgmr.msra.gmra.mxu1 %v19419_v42  ;;  %9742 = vmatpush.bf16.msrb.mxu0 %v13523_v15  ;;  %v13584_v42 = vld [vmem:[%s19846_s19 + $0x298] sm:$0xf0] }
 0xd1e   :  { %v8859_v1 = vpop.f32.mrf.mxu0  ;;  %v8873_v52 = vpop.f32.mrf.mxu1  ;;  %9754 = vmatpush.bf16.msrb.mxu1 %v13603_v25  ;;  %v8900_v10 = vadd.f32 %v8899_v34, %v8885_v27  ;;  %v13587_v44 = vor.u32 %v14678_v39, %v13584_v42  ;;  %v13656_v25 = vld [vmem:[%s19846_s19 + $0x328] sm:$0xf0]  ;;  %v14714_v34 = vld [vmem:[%s19846_s19 + $0x3b4] sm:$0xf]  ;;  %v13728_v15 = vld [vmem:[%s19846_s19 + $0x3b8] sm:$0xf0] }
 0xd1f   :  { %v8874_v51 = vadd.f32 %v8873_v52, %v8859_v1  ;;  %v13659_v27 = vor.u32 %v14696_v13, %v13656_v25  ;;  %v13651_v1 = vor.u32 %v14694_v20, %v13648_v36  ;;  %v14712_v52 = vld [vmem:[%s19846_s19 + $0x3a4] sm:$0xf] }
 0xd20   :  { %v8911_v28 = vmax.f32 %v8900_v10, 0.0  ;;  %v13723_v16 = vor.u32 %v14712_v52, %v13720_v55 }
 0xd21   :  { %v8918_v33 = vmax.f32 %v8874_v51, 0.0  ;;  %9743 = vmatpush.bf16.msrb.mxu0 %v13515_v60  ;;  %v13640_v51 = vld [vmem:[%s19846_s19 + $0x308] sm:$0xf0]  ;;  %v14708_v60 = vld [vmem:[%s19846_s19 + $0x384] sm:$0xf] }
 0xd22   :  { %9755 = vmatpush.bf16.msrb.mxu1 %v13595_v59  ;;  %v13643_v4 = vor.u32 %v14692_v17, %v13640_v51  ;;  %v14710_v59 = vld [vmem:[%s19846_s19 + $0x394] sm:$0xf] }
 0xd23   :  { %v19706_v8 = vpack.c.bf16 %v8918_v33, %v8910_v38  ;;  %v13712_v38 = vld [vmem:[%s19846_s19 + $0x398] sm:$0xf0] }
 0xd24   :  { %9744 = vmatmul.bf16.vlgmr.msrb.gmra.mxu0 %v19572_v32  ;;  %v13672_v32 = vld [vmem:[%s19846_s19 + $0x348] sm:$0xf0]  ;;  %v13715_v33 = vor.u32 %v14710_v59, %v13712_v38 }
 0xd25   :  { %v8887_v18 = vpop.f32.mrf.mxu2  ;;  %v8901_v19 = vpop.f32.mrf.mxu3  ;;  %9660 = vmatmul.bf16.vlgmr.msrb.gmra.mxu2 %v19706_v8  ;;  %v13675_v35 = vor.u32 %v14700_v62, %v13672_v32 }
 0xd26   :  { %v8902_v46 = vadd.f32 %v8901_v19, %v8887_v18  ;;  %9764 = vmatpush.bf16.msrb.mxu2 %v13699_v40  ;;  %9756 = vmatpush.bf16.msrb.mxu1 %v13587_v44 }
 0xd28   :  { %v8919_v11 = vmax.f32 %v8902_v46, 0.0 }
 0xd2a   :  { %v8927_v24 = vpack.c.bf16 %v8919_v11, %v8911_v28  ;;  %9765 = vmatpush.bf16.msrb.mxu2 %v13691_v57  ;;  %9757 = vmatpush.bf16.msrb.mxu1 %v13579_v6 }
 0xd2c   :  { %9674 = vmatmul.bf16.vlgmr.msrb.gmra.mxu3 %v8927_v24 }
 0xd2d   :  { %9778 = vmatpush.bf16.msrb.mxu3 %v13763_v21  ;;  %9758 = vmatmul.bf16.vlgmr.msrb.gmra.mxu1 %v19617_v47  ;;  %v13736_v47 = vld [vmem:[%s19846_s19 + $0x3c8] sm:$0xf0] }
 0xd2e   :  { %9766 = vmatpush.bf16.msrb.mxu2 %v13683_v30  ;;  %v13739_v9 = vor.u32 %v14716_v50, %v13736_v47 }
 0xd31   :  { %9779 = vmatpush.bf16.msrb.mxu3 %v13755_v2 }
 0xd32   :  { %9767 = vmatpush.bf16.msrb.mxu2 %v13675_v35 }
 0xd35   :  { %9780 = vmatpush.bf16.msrb.mxu3 %v13747_v23  ;;  %9716 = vmatmul.bf16.vlgmr.msra.gmra.mxu2 %v19467_v14  ;;  %v13731_v14 = vor.u32 %v14714_v34, %v13728_v15 }
 0xd36   :  { %9768 = vmatpush.bf16.msrb.mxu2 %v13667_v56 }
 0xd39   :  { %9781 = vmatpush.bf16.msrb.mxu3 %v13739_v9 }
 0xd3a   :  { %9769 = vmatpush.bf16.msrb.mxu2 %v13659_v27 }
 0xd3c   :  { %9730 = vmatmul.bf16.vlgmr.msra.gmra.mxu3 %v19509_v3  ;;  %v13704_v3 = vld [vmem:[%s19846_s19 + $0x388] sm:$0xf0] }
 0xd3d   :  { %9782 = vmatpush.bf16.msrb.mxu3 %v13731_v14  ;;  %v13707_v39 = vor.u32 %v14708_v60, %v13704_v3 }
 0xd3e   :  { %9770 = vmatpush.bf16.msrb.mxu2 %v13651_v1 }
 0xd41   :  { %9783 = vmatpush.bf16.msrb.mxu3 %v13723_v16 }
 0xd42   :  { %9771 = vmatpush.bf16.msrb.mxu2 %v13643_v4 }
 0xd45   :  { %9784 = vmatpush.bf16.msrb.mxu3 %v13715_v33  ;;  %9772 = vmatmul.bf16.vlgmr.msrb.gmra.mxu2 %v19706_v8 }
 0xd49   :  { %9785 = vmatpush.bf16.msrb.mxu3 %v13707_v39 }
 0xd4c   :  { %9786 = vmatmul.bf16.vlgmr.msrb.gmra.mxu3 %v8927_v24 }
 0xd60   :  { %v9577_v42 = vpop.f32.mrf.mxu0 }
 0xd67   :  { %v9591_v40 = vpop.f32.mrf.mxu1 }
 0xd68   :  { %v9579_v7 = vpop.f32.mrf.mxu0  ;;  %v9592_v61 = vadd.f32 %v9591_v40, %v9577_v42 }
 0xd6f   :  { %v9593_v10 = vpop.f32.mrf.mxu1 }
 0xd70   :  { %v9594_v47 = vadd.f32 %v9593_v10, %v9579_v7 }
 0xd76   :  { %v9605_v41 = vpop.f32.mrf.mxu2 }
 0xd77   :  { %v9606_v32 = vadd.f32 %v9605_v41, %v9592_v61 }
 0xd7d   :  { %v9619_v44 = vpop.f32.mrf.mxu3 }
 0xd7e   :  { %v9607_v19 = vpop.f32.mrf.mxu2  ;;  %v9620_v31 = vadd.f32 %v9619_v44, %v9606_v32 }
 0xd7f   :  { %v9608_v9 = vadd.f32 %v9607_v19, %v9594_v47 }
 0xd81   :  { %v9633_v18 = vpop.f32.mrf.mxu0 }
 0xd82   :  { %v9634_v26 = vadd.f32 %v9633_v18, %v9620_v31 }
 0xd85   :  { %v9621_v49 = vpop.f32.mrf.mxu3 }
 0xd86   :  { %v9622_v20 = vadd.f32 %v9621_v49, %v9608_v9 }
 0xd89   :  { %v9635_v46 = vpop.f32.mrf.mxu0 }
 0xd8a   :  { %v9647_v29 = vpop.f32.mrf.mxu1  ;;  %v9636_v55 = vadd.f32 %v9635_v46, %v9622_v20 }
 0xd8b   :  { %v9648_v13 = vadd.f32 %v9647_v29, %v9634_v26  ;;  %v5668_v26 = vld [vmem:[%s19847_s20] sm:$0x3]  ;;  %s14903_s20 = smov [#allocation7]  }
 0xd8c   :  { %v9847_v47 = vperm.slane %v5668_v26, 0 }
 0xd91   :  { %v9689_v58 = vpop.f32.mrf.mxu0 }
 0xd92   :  { %v9649_v0 = vpop.f32.mrf.mxu1 }
 0xd93   :  { %v9650_v16 = vadd.f32 %v9649_v0, %v9636_v55 }
 0xd99   :  { %v9691_v6 = vpop.f32.mrf.mxu0 }
 0xd9a   :  { %v9703_v8 = vpop.f32.mrf.mxu1 }
 0xd9b   :  { %v9704_v30 = vadd.f32 %v9703_v8, %v9689_v58 }
 0xda1   :  { %v9745_v35 = vpop.f32.mrf.mxu0 }
 0xda2   :  { %v9705_v21 = vpop.f32.mrf.mxu1 }
 0xda3   :  { %v9706_v63 = vadd.f32 %v9705_v21, %v9691_v6 }
 0xda8   :  { %v9661_v57 = vpop.f32.mrf.mxu2 }
 0xda9   :  { %v9662_v27 = vadd.f32 %v9661_v57, %v9648_v13  ;;  %v9747_v1 = vpop.f32.mrf.mxu0  ;;  %v9848_v13 = vperm.slane %v5668_v26, 1 }
 0xdaa   :  { %v9759_v56 = vpop.f32.mrf.mxu1 }
 0xdaf   :  { %v9675_v53 = vpop.f32.mrf.mxu3 }
 0xdb0   :  { %v9663_v54 = vpop.f32.mrf.mxu2  ;;  %v9676_v36 = vadd.f32 %v9675_v53, %v9662_v27 }
 0xdb1   :  { %v9664_v60 = vadd.f32 %v9663_v54, %v9650_v16 }
 0xdb2   :  { %v9792_v4 = vmax.f32 %v9676_v36, 0.0  ;;  %v9761_v38 = vpop.f32.mrf.mxu1 }
 0xdb7   :  { %v9677_v28 = vpop.f32.mrf.mxu3 }
 0xdb8   :  { %v9717_v11 = vpop.f32.mrf.mxu2  ;;  %v9678_v42 = vadd.f32 %v9677_v28, %v9664_v60 }
 0xdb9   :  { %v9718_v62 = vadd.f32 %v9717_v11, %v9704_v30 }
 0xdba   :  { %v9794_v10 = vmax.f32 %v9678_v42, 0.0 }
 0xdbf   :  { %v9731_v24 = vpop.f32.mrf.mxu3 }
 0xdc0   :  { %v9719_v43 = vpop.f32.mrf.mxu2  ;;  %v9732_v2 = vadd.f32 %v9731_v24, %v9718_v62 }
 0xdc1   :  { %v9720_v25 = vadd.f32 %v9719_v43, %v9706_v63 }
 0xdc2   :  { %v9746_v23 = vadd.f32 %v9745_v35, %v9732_v2 }
 0xdc4   :  { %v9760_v15 = vadd.f32 %v9759_v56, %v9746_v23  ;;  %v5669_v56 = vld [vmem:[%s19848_s21] sm:$0x3]  ;;  %s9876_s21 = sshll.u32 %s14903_s20, 4  ;;  %s9877_s21 = int_to_ptr.vmem [resolvable:$true] %s9876_s21 }
 0xdc5   :  { %v9856_v27 = vperm.slane %v5669_v56, 0 }
 0xdc7   :  { %v9733_v45 = vpop.f32.mrf.mxu3 }
 0xdc8   :  { %v9773_v50 = vpop.f32.mrf.mxu2  ;;  %v9734_v34 = vadd.f32 %v9733_v45, %v9720_v25 }
 0xdc9   :  { %v9774_v14 = vadd.f32 %v9773_v50, %v9760_v15 }
 0xdca   :  { %v9748_v17 = vadd.f32 %v9747_v1, %v9734_v34  ;;  %v9857_v34 = vperm.slane %v5669_v56, 1 }
 0xdcc   :  { %v9762_v3 = vadd.f32 %v9761_v38, %v9748_v17 }
 0xdcf   :  { %v9787_v52 = vpop.f32.mrf.mxu3 }
 0xdd0   :  { %v9788_v51 = vadd.f32 %v9787_v52, %v9774_v14  ;;  %v9775_v33 = vpop.f32.mrf.mxu2 }
 0xdd1   :  { %v9776_v40 = vadd.f32 %v9775_v33, %v9762_v3 }
 0xdd2   :  { %v9793_v59 = vmax.f32 %v9788_v51, 0.0 }
 0xdd4   :  { %v9796_v39 = vadd.f32 %v9793_v59, %v9792_v4 }
 0xdd6   :  { %9797 = vadd.xlane.f32.xlu2 %v9796_v39 }
 0xdd7   :  { %v9789_v7 = vpop.f32.mrf.mxu3 }
 0xdd8   :  { %v9790_v41 = vadd.f32 %v9789_v7, %v9776_v40 }
 0xdda   :  { %v9795_v44 = vmax.f32 %v9790_v41, 0.0 }
 0xddc   :  { %v9799_v18 = vadd.f32 %v9795_v44, %v9794_v10 }
 0xdde   :  { %9800 = vadd.xlane.f32.xlu0 %v9799_v18 }
 0xe49   :  { %v9798_v19 = vpop.xlane.xlu2 %9797 }
 0xe4a   :  { %v9802_v29 = vmul.f32 %v9798_v19, %v15889_v48 }
 0xe4c   :  { %v9804_v49 = vsub.f32 %v9792_v4, %v9802_v29  ;;  %v9805_v46 = vsub.f32 %v9793_v59, %v9802_v29 }
 0xe4e   :  { %v9808_v57 = vmul.f32 %v9804_v49, %v9804_v49  ;;  %v9809_v0 = vmul.f32 %v9805_v46, %v9805_v46 }
 0xe50   :  { %v9812_v53 = vadd.f32 %v9809_v0, %v9808_v57 }
 0xe51   :  { %v9801_v54 = vpop.xlane.xlu0 %9800 }
 0xe52   :  { %v9803_v58 = vmul.f32 %v9801_v54, %v15889_v48  ;;  %9813 = vadd.xlane.f32.xlu1 %v9812_v53 }
 0xe54   :  { %v9806_v8 = vsub.f32 %v9794_v10, %v9803_v58  ;;  %v9807_v28 = vsub.f32 %v9795_v44, %v9803_v58 }
 0xe56   :  { %v9810_v11 = vmul.f32 %v9806_v8, %v9806_v8  ;;  %v9811_v6 = vmul.f32 %v9807_v28, %v9807_v28 }
 0xe58   :  { %v9815_v21 = vadd.f32 %v9811_v6, %v9810_v11 }
 0xe5a   :  { %9816 = vadd.xlane.f32.xlu2 %v9815_v21 }
 0xec5   :  { %v9814_v24 = vpop.xlane.xlu1 %9813 }
 0xec6   :  { %v9818_v30 = vmul.f32 %v9814_v24, %v15889_v48 }
 0xec8   :  { %v9820_v43 = vadd.f32 1e-05, %v9818_v30 }
 0xeca   :  { %14810 = vrsqrt.f32 %v9820_v43  ;;  %vm9828_vm14 = vweird.f32 %v9820_v43 }
 0xecd   :  { %v9817_v61 = vpop.xlane.xlu2 %9816 }
 0xece   :  { %v9819_v62 = vmul.f32 %v9817_v61, %v15889_v48 }
 0xed0   :  { %v14811_v32 = vpop.eup %14810  ;;  %v9821_v2 = vadd.f32 1e-05, %v9819_v62 }
 0xed1   :  { %v9823_v35 = vmul.f32 %v14811_v32, %v9820_v43  ;;  %vm9829_vm13 = vweird.f32 %v14811_v32 }
 0xed2   :  { %14812 = vrsqrt.f32 %v9821_v2  ;;  %vm9830_vm15 = vmor %vm9828_vm14, %vm9829_vm13  ;;  %vm9838_vm3 = vweird.f32 %v9821_v2 }
 0xed3   :  { %v9824_v31 = vmul.f32 %v14811_v32, %v9823_v35 }
 0xed5   :  { %v9825_v45 = vmul.f32 0.5, %v9824_v31 }
 0xed7   :  { %v9826_v63 = vsub.f32 1.5, %v9825_v45 }
 0xed8   :  { %v14813_v23 = vpop.eup %14812 }
 0xed9   :  { %v9827_v50 = vmul.f32 %v14811_v32, %v9826_v63  ;;  %v9833_v48 = vmul.f32 %v14813_v23, %v9821_v2  ;;  %vm9839_vm2 = vweird.f32 %v14813_v23 }
 0xeda   :  { %vm9840_vm4 = vmor %vm9838_vm3, %vm9839_vm2 }
 0xedb   :  { %v9831_v25 = vsel %vm9830_vm15, %v14811_v32, %v9827_v50  ;;  %v9834_v9 = vmul.f32 %v14813_v23, %v9833_v48 }
 0xedc   :  { %v9842_v15 = vmul.f32 %v9831_v25, %v9804_v49  ;;  %v9843_v20 = vmul.f32 %v9831_v25, %v9805_v46 }
 0xedd   :  { %v9835_v36 = vmul.f32 0.5, %v9834_v9 }
 0xede   :  { %v9851_v14 = vmul.f32 %v9847_v47, %v9842_v15  ;;  %v9852_v1 = vmul.f32 %v9848_v13, %v9843_v20 }
 0xedf   :  { %v9836_v52 = vsub.f32 1.5, %v9835_v36 }
 0xee0   :  { %v9860_v55 = vadd.f32 %v9856_v27, %v9851_v14  ;;  %v9861_v17 = vadd.f32 %v9857_v34, %v9852_v1 }
 0xee1   :  { %v9837_v51 = vmul.f32 %v14813_v23, %v9836_v52 }
 0xee2   :  { %v9864_v16 = vadd.f32 %v9860_v55, %v18610_v37  ;;  %v9865_v4 = vadd.f32 %v9861_v17, %v18613_v22 }
 0xee3   :  { %v9841_v59 = vsel %vm9840_vm4, %v14813_v23, %v9837_v51 }
 0xee4   :  { %9868 = vst [vmem:[#allocation7] sm:$0xff] %v9864_v16  ;;  %v9844_v38 = vmul.f32 %v9841_v59, %v9806_v8  ;;  %v9845_v33 = vmul.f32 %v9841_v59, %v9807_v28 }
 0xee5   :  { %9869 = vst [vmem:[#allocation7 + $0x8] sm:$0xff] %v9865_v4 }
 0xee6   :  { %v9853_v60 = vmul.f32 %v9847_v47, %v9844_v38  ;;  %v9854_v3 = vmul.f32 %v9848_v13, %v9845_v33 }
 0xee8   :  { %v9862_v39 = vadd.f32 %v9856_v27, %v9853_v60  ;;  %v9863_v42 = vadd.f32 %v9857_v34, %v9854_v3 }
 0xeea   :  { %v9866_v37 = vadd.f32 %v9862_v39, %v18616_v12  ;;  %v9867_v22 = vadd.f32 %v9863_v42, %v18619_v5 }
 0xeec   :  { %9870 = vst [vmem:[#allocation7 + $0x10] sm:$0xff] %v9866_v37 }
 0xeed   :  { %9871 = vst [vmem:[#allocation7 + $0x18] sm:$0xff] %v9867_v22 }
 0xeee   :  { %9884 = dma.vmem_to_hbm [thread:$0]  %s9877_s21, 512, %s9879_s16, [#allocation4], %s14904_s17, %s14904_s17, %s14905_s14  }
 0xeef   :  { %14896 = dma.done.wait [#allocation4], 512  }
 0xef0   :  { %14897 = vsyncadd [#allocation4], 4294966784 }
 0xef1   :  { %9889 = vsyncpa [#allocation3], 1 }
 0xef2   :  { %9890 = vsyncpa [#allocation6], 1 }
 0xef3   :  { %9891 = vsyncpa [#allocation4], 1 }

</bundles_post_ra>
